<compile_context>
chip_gen: v7x
topology: tpu7x:2x2x1
jax: 0.10.0
libtpu: 0.0.40
codegen_flags: <defaults>
</compile_context>

<pallas_src>
import math
import functools

import jax
import jax.numpy as jnp
from jax import lax
from jax.experimental import pallas as pl
from jax.experimental.pallas import tpu as pltpu


_VMEM_LIMIT = 32 * 1024 * 1024  # explicit scoped-VMEM limit (v5e default is only 16 MiB)

# dimension_numbers helpers (2-D matmuls, no transposes)
_C_LAST_LAST = (((1,), (1,)), ((), ()))   # (M,K) x (N,K) -> (M,N)   i.e. x @ W.T
_C_LAST_FIRST = (((1,), (0,)), ((), ()))  # (M,K) x (K,N) -> (M,N)


def _quick_gelu(x):
    # x * sigmoid(1.702 x) written with exp so it lowers cleanly in Mosaic (EUP).
    return x / (1.0 + jnp.exp(-1.702 * x))


def _gelu_tanh(x):
    # TODO(synk): torch.nn.functional.gelu defaults to the exact erf form; tanh approx here.
    c = math.sqrt(2.0 / math.pi)
    return 0.5 * x * (1.0 + jnp.tanh(c * (x + 0.044715 * x * x * x)))


_ACTIVATIONS = {"quick_gelu": _quick_gelu, "gelu": _gelu_tanh}


def _layer_norm(x, gamma, beta, eps=1e-5):
    """LayerNorm over the last axis in f32 (PyTorch semantics)."""
    x = x.astype(jnp.float32)
    mu = jnp.mean(x, axis=-1, keepdims=True)
    xc = x - mu
    var = jnp.mean(xc * xc, axis=-1, keepdims=True)
    return xc * lax.rsqrt(var + eps) * gamma + beta


# --------------------------------------------------------------------------------------
# Fused CLIP layer kernel: LN1 -> multi-head causal attention -> +res -> LN2 -> MLP -> +res
# --------------------------------------------------------------------------------------
def _clip_layer_kernel(x_ref,
                       ln1_g_ref, ln1_b_ref,
                       wq_ref, bq_ref, wk_ref, bk_ref, wv_ref, bv_ref,
                       wo_ref, bo_ref,
                       ln2_g_ref, ln2_b_ref,
                       w1_ref, b1_ref, w2_ref, b2_ref,
                       o_ref,
                       *, heads: int, act: str, compute_dtype, causal: bool):
    Bt, S, E = x_ref.shape
    dh = E // heads
    scale = 1.0 / math.sqrt(dh)
    cd = compute_dtype
    act_fn = _ACTIVATIONS[act]

    # Parameters: constant index_map -> DMA'd only once across the grid.
    ln1_g = ln1_g_ref[...]
    ln1_b = ln1_b_ref[...]
    ln2_g = ln2_g_ref[...]
    ln2_b = ln2_b_ref[...]
    wq = wq_ref[...].astype(cd)          # (heads, E, dh)   head-major, MXU-ready
    wk = wk_ref[...].astype(cd)
    wv = wv_ref[...].astype(cd)
    wo = wo_ref[...].astype(cd)          # (heads, dh, E)
    bq = bq_ref[...]                     # (heads, 1, dh)   f32
    bk = bk_ref[...]
    bv = bv_ref[...]
    bo = bo_ref[...]                     # (1, E)           f32
    w1 = w1_ref[...].astype(cd)          # (I, E)
    b1 = b1_ref[...]                     # (1, I)
    w2 = w2_ref[...].astype(cd)          # (E, I)
    b2 = b2_ref[...]                     # (1, E)

    if causal:
        row = lax.broadcasted_iota(jnp.int32, (S, S), 0)
        col = lax.broadcasted_iota(jnp.int32, (S, S), 1)
        allow = col <= row               # causal mask of CLIPTextModel_

    for b in range(Bt):                  # Bt sequences per grid step
        xb = x_ref[b].astype(jnp.float32)        # (S, E) residual stream in f32
        h1 = _layer_norm(xb, ln1_g, ln1_b)
        h1c = h1.astype(cd)

        # ---- self-attention: head-major weights, per-head out-projection accumulation ----
        attn = jnp.zeros((S, E), jnp.float32)
        for h in range(heads):
            q = lax.dot_general(h1c, wq[h], _C_LAST_FIRST,
                                preferred_element_type=jnp.float32) + bq[h]
            q = q * scale                                  # scale folded into q
            k = lax.dot_general(h1c, wk[h], _C_LAST_FIRST,
                                preferred_element_type=jnp.float32) + bk[h]
            v = lax.dot_general(h1c, wv[h], _C_LAST_FIRST,
                                preferred_element_type=jnp.float32) + bv[h]
            # scores: contract dh on both operands ('qd,kd->qk'), no K transpose
            s = lax.dot_general(q.astype(cd), k.astype(cd), _C_LAST_LAST,
                                preferred_element_type=jnp.float32)       # (S, S)
            if causal:
                s = jnp.where(allow, s, -jnp.inf)
            m = jnp.max(s, axis=-1, keepdims=True)
            p = jnp.exp(s - m)
            denom = jnp.sum(p, axis=-1, keepdims=True)
            o_h = lax.dot_general(p.astype(cd), v.astype(cd), _C_LAST_FIRST,
                                  preferred_element_type=jnp.float32)     # (S, dh)
            # normalize as a post-scale of the small (S, dh) output
            o_h = o_h * pl.reciprocal(denom, approx=True)
            # accumulate out-projection per head -> no concat / lane slicing
            attn = attn + lax.dot_general(o_h.astype(cd), wo[h], _C_LAST_FIRST,
                                          preferred_element_type=jnp.float32)
        r1 = xb + attn + bo                                # residual 1 (f32)

        # ---- MLP ----
        h2 = _layer_norm(r1, ln2_g, ln2_b).astype(cd)
        a1 = lax.dot_general(h2, w1, _C_LAST_LAST,
                             preferred_element_type=jnp.float32) + b1     # (S, I)
        a1 = act_fn(a1)                                    # activation in f32
        a2 = lax.dot_general(a1.astype(cd), w2, _C_LAST_LAST,
                             preferred_element_type=jnp.float32) + b2     # (S, E)

        o_ref[b] = (r1 + a2).astype(o_ref.dtype)           # residual 2


def _const_spec(arr):
    zeros = (0,) * arr.ndim
    return pl.BlockSpec(arr.shape, lambda i, _z=zeros: _z)


def _pick_batch_tile(batch, batch_tile):
    bt = max(1, min(batch_tile, batch))
    while batch % bt:
        bt -= 1
    return bt


def clip_layer(x, p, heads, act, *, causal=True, batch_tile=2,
               compute_dtype=jnp.bfloat16):
    """One fused CLIPLayer forward:  x + attn(LN1(x)),  then  + mlp(LN2(.))."""
    B, S, E = x.shape
    assert E % heads == 0
    dh = E // heads
    inter = p["w1"].shape[0]
    Bt = _pick_batch_tile(B, batch_tile)

    # One-time wrapper-side weight re-layout: head-major, no in-kernel transposes.
    # q/k/v: (E_out, E_in) -> (heads, E_in, dh);  out: (E_out, E_in) -> (heads, dh, E_out).
    def head_major_in(w):
        return jnp.transpose(w.reshape(heads, dh, E), (0, 2, 1))

    wo_hm = jnp.transpose(p["wo"].reshape(E, heads, dh), (1, 2, 0))

    args = (
        x,
        p["ln1_g"].reshape(1, E), p["ln1_b"].reshape(1, E),
        head_major_in(p["wq"]), p["bq"].reshape(heads, 1, dh),
        head_major_in(p["wk"]), p["bk"].reshape(heads, 1, dh),
        head_major_in(p["wv"]), p["bv"].reshape(heads, 1, dh),
        wo_hm, p["bo"].reshape(1, E),
        p["ln2_g"].reshape(1, E), p["ln2_b"].reshape(1, E),
        p["w1"], p["b1"].reshape(1, inter),
        p["w2"], p["b2"].reshape(1, E),
    )

    x_spec = pl.BlockSpec((Bt, S, E), lambda i: (i, 0, 0))
    # Constant index_maps: weights are only fetched on the first grid step.
    # TODO(synk): pipeline_mode=pl.Buffered(1) on the weight specs halves their VMEM
    # footprint for E=768-scale models; left at the pipeline default for portability.
    in_specs = [x_spec] + [_const_spec(a) for a in args[1:]]

    kernel = functools.partial(_clip_layer_kernel, heads=heads, act=act,
                               compute_dtype=compute_dtype, causal=causal)

    return pl.pallas_call(
        kernel,
        out_shape=jax.ShapeDtypeStruct((B, S, E), x.dtype),
        grid_spec=pltpu.PrefetchScalarGridSpec(
            num_scalar_prefetch=0,
            grid=(B // Bt,),
            in_specs=in_specs,
            out_specs=x_spec,
        ),
        compiler_params=pltpu.CompilerParams(
            dimension_semantics=("parallel",),
            vmem_limit_bytes=_VMEM_LIMIT),
    )(*args)


# --------------------------------------------------------------------------------------
# Final LayerNorm kernel
# --------------------------------------------------------------------------------------
def _layernorm_kernel(x_ref, g_ref, b_ref, o_ref):
    o_ref[...] = _layer_norm(x_ref[...], g_ref[...], b_ref[...]).astype(o_ref.dtype)


def layer_norm(x, gamma, beta, *, batch_tile=2):
    B, S, E = x.shape
    Bt = _pick_batch_tile(B, batch_tile)
    x_spec = pl.BlockSpec((Bt, S, E), lambda i: (i, 0, 0))
    g2 = gamma.reshape(1, E)
    b2 = beta.reshape(1, E)
    return pl.pallas_call(
        _layernorm_kernel,
        out_shape=jax.ShapeDtypeStruct((B, S, E), x.dtype),
        grid_spec=pltpu.PrefetchScalarGridSpec(
            num_scalar_prefetch=0,
            grid=(B // Bt,),
            in_specs=[x_spec, _const_spec(g2), _const_spec(b2)],
            out_specs=x_spec,
        ),
        compiler_params=pltpu.CompilerParams(
            dimension_semantics=("parallel",),
            vmem_limit_bytes=_VMEM_LIMIT),
    )(x, g2, b2)


# --------------------------------------------------------------------------------------
# Full CLIPTextModel_ forward
# --------------------------------------------------------------------------------------
def clip_text_model(input_tokens, params, config, *, intermediate_output=None,
                    final_layer_norm_intermediate=True, batch_tile=2,
                    compute_dtype=jnp.bfloat16):
    heads = config["num_attention_heads"]
    act = config["hidden_act"]

    # embeddings: data-dependent gather, kept in plain JAX
    x = jnp.take(params["token_embedding"], input_tokens, axis=0)
    x = (x + params["position_embedding"][None, :, :]).astype(jnp.float32)

    layers = params["layers"]
    n = len(layers)
    if intermediate_output is not None and intermediate_output < 0:
        intermediate_output = n + intermediate_output

    intermediate = None
    for i, lp in enumerate(layers):
        x = clip_layer(x, lp, heads, act, causal=True, batch_tile=batch_tile,
                       compute_dtype=compute_dtype)
        if i == intermediate_output:
            intermediate = x

    x = layer_norm(x, params["final_ln_g"], params["final_ln_b"], batch_tile=batch_tile)
    if intermediate is not None and final_layer_norm_intermediate:
        intermediate = layer_norm(intermediate, params["final_ln_g"],
                                  params["final_ln_b"], batch_tile=batch_tile)

    # pooled output: gather at the argmax (EOT) token id -- plain JAX
    eot = jnp.argmax(input_tokens.astype(jnp.int32), axis=-1)
    pooled = x[jnp.arange(x.shape[0]), eot]
    return x, intermediate, pooled


# --------------------------------------------------------------------------------------
# Pure-JAX f32 reference mirroring the PyTorch forward
# --------------------------------------------------------------------------------------
def _reference_model(input_tokens, params, config):
    heads = config["num_attention_heads"]
    act_fn = _ACTIVATIONS[config["hidden_act"]]

    x = jnp.take(params["token_embedding"], input_tokens, axis=0)
    x = (x + params["position_embedding"][None, :, :]).astype(jnp.float32)
    B, S, E = x.shape
    dh = E // heads
    causal = jnp.where(jnp.arange(S)[None, :] <= jnp.arange(S)[:, None], 0.0, -jnp.inf)

    def ln(v, g, b):
        mu = v.mean(-1, keepdims=True)
        vc = v - mu
        var = (vc * vc).mean(-1, keepdims=True)
        return vc * lax.rsqrt(var + 1e-5) * g + b

    def attn(v, lp):
        q = v @ lp["wq"].T + lp["bq"]
        k = v @ lp["wk"].T + lp["bk"]
        w = v @ lp["wv"].T + lp["bv"]
        q, k, w = [t.reshape(B, S, heads, dh).transpose(0, 2, 1, 3) for t in (q, k, w)]
        s = jnp.einsum("bhqd,bhkd->bhqk", q, k) / math.sqrt(dh) + causal
        p = jax.nn.softmax(s, axis=-1)
        o = jnp.einsum("bhqk,bhkd->bhqd", p, w)
        o = o.transpose(0, 2, 1, 3).reshape(B, S, E)
        return o @ lp["wo"].T + lp["bo"]

    def mlp(v, lp):
        a = act_fn(v @ lp["w1"].T + lp["b1"])
        return a @ lp["w2"].T + lp["b2"]

    for lp in params["layers"]:
        x = x + attn(ln(x, lp["ln1_g"], lp["ln1_b"]), lp)
        x = x + mlp(ln(x, lp["ln2_g"], lp["ln2_b"]), lp)
    x = ln(x, params["final_ln_g"], params["final_ln_b"])
    eot = jnp.argmax(input_tokens.astype(jnp.int32), axis=-1)
    pooled = x[jnp.arange(B), eot]
    return x, pooled


if __name__ == "__main__":
    config = {
        "num_hidden_layers": 2,
        "hidden_size": 128,           # small E, but dh = 64 matches real CLIP head size
        "num_attention_heads": 2,
        "intermediate_size": 256,
        "hidden_act": "quick_gelu",
    }
    vocab_size = 384
    num_positions = 77                # CLIP sequence length
    B = 4                             # Bt = 2 rows/step -> 2 parallel grid steps

    E = config["hidden_size"]
    inter = config["intermediate_size"]
    key = jax.random.PRNGKey(0)

    def linear_init(k, out_f, in_f):
        k1, k2 = jax.random.split(k)
        bound = 1.0 / math.sqrt(in_f)
        w = jax.random.uniform(k1, (out_f, in_f), jnp.float32, -bound, bound)
        b = jax.random.uniform(k2, (out_f,), jnp.float32, -bound, bound)
        return w, b

    key, k_tok, k_pos = jax.random.split(key, 3)
    params = {
        "token_embedding": 0.02 * jax.random.normal(k_tok, (vocab_size, E), jnp.float32),
        "position_embedding": 0.01 * jax.random.normal(k_pos, (num_positions, E), jnp.float32),
        "layers": [],
    }
    for _ in range(config["num_hidden_layers"]):
        key, *ks = jax.random.split(key, 11)
        wq, bq = linear_init(ks[0], E, E)
        wk, bk = linear_init(ks[1], E, E)
        wv, bv = linear_init(ks[2], E, E)
        wo, bo = linear_init(ks[3], E, E)
        w1, b1 = linear_init(ks[4], inter, E)
        w2, b2 = linear_init(ks[5], E, inter)
        params["layers"].append({
            "ln1_g": 1.0 + 0.05 * jax.random.normal(ks[6], (E,), jnp.float32),
            "ln1_b": 0.02 * jax.random.normal(ks[7], (E,), jnp.float32),
            "ln2_g": 1.0 + 0.05 * jax.random.normal(ks[8], (E,), jnp.float32),
            "ln2_b": 0.02 * jax.random.normal(ks[9], (E,), jnp.float32),
            "wq": wq, "bq": bq, "wk": wk, "bk": bk, "wv": wv, "bv": bv,
            "wo": wo, "bo": bo, "w1": w1, "b1": b1, "w2": w2, "b2": b2,
        })
    key, k_g, k_b = jax.random.split(key, 3)
    params["final_ln_g"] = 1.0 + 0.05 * jax.random.normal(k_g, (E,), jnp.float32)
    params["final_ln_b"] = 0.02 * jax.random.normal(k_b, (E,), jnp.float32)

    key, k_ids, k_eot = jax.random.split(key, 3)
    tokens = jax.random.randint(k_ids, (B, num_positions), 1, vocab_size - 1, jnp.int32)
    eot_pos = jax.random.randint(k_eot, (B,), num_positions // 2, num_positions, jnp.int32)
    tokens = tokens.at[jnp.arange(B), eot_pos].set(vocab_size - 1)  # unique max id per row

    # bf16 matmul operands (performance path) plus an f32-compute run for a tighter check.
    x_bf16, _, pooled_bf16 = clip_text_model(tokens, params, config,
                                             compute_dtype=jnp.bfloat16)
    x_bf16 = jax.block_until_ready(x_bf16)
    x_f32, _, pooled_f32 = clip_text_model(tokens, params, config,
                                           compute_dtype=jnp.float32)
    x_f32 = jax.block_until_ready(x_f32)

    ref_x, ref_pooled = _reference_model(tokens, params, config)

    assert x_f32.shape == (B, num_positions, E)
    assert jnp.allclose(x_f32, ref_x, atol=2e-2, rtol=2e-2), "f32 kernel mismatch"
    assert jnp.allclose(pooled_f32, ref_pooled, atol=2e-2, rtol=2e-2), "f32 pooled mismatch"
    assert jnp.allclose(x_bf16, ref_x, atol=8e-2, rtol=8e-2), "bf16 kernel mismatch"
    assert jnp.allclose(pooled_bf16, ref_pooled, atol=8e-2, rtol=8e-2), "bf16 pooled mismatch"

    print("KERNEL_OK")
</pallas_src>

<mosaic_0001>
module attributes {stable_mosaic.version = 11 : i64} {
  func.func @_clip_layer_kernel(%arg0: i32, %arg1: memref<2x77x128xf32, #tpu.memory_space<vmem>>, %arg2: memref<1x128xf32, #tpu.memory_space<vmem>>, %arg3: memref<1x128xf32, #tpu.memory_space<vmem>>, %arg4: memref<2x128x64xf32, #tpu.memory_space<vmem>>, %arg5: memref<2x1x64xf32, #tpu.memory_space<vmem>>, %arg6: memref<2x128x64xf32, #tpu.memory_space<vmem>>, %arg7: memref<2x1x64xf32, #tpu.memory_space<vmem>>, %arg8: memref<2x128x64xf32, #tpu.memory_space<vmem>>, %arg9: memref<2x1x64xf32, #tpu.memory_space<vmem>>, %arg10: memref<2x64x128xf32, #tpu.memory_space<vmem>>, %arg11: memref<1x128xf32, #tpu.memory_space<vmem>>, %arg12: memref<1x128xf32, #tpu.memory_space<vmem>>, %arg13: memref<1x128xf32, #tpu.memory_space<vmem>>, %arg14: memref<256x128xf32, #tpu.memory_space<vmem>>, %arg15: memref<1x256xf32, #tpu.memory_space<vmem>>, %arg16: memref<128x256xf32, #tpu.memory_space<vmem>>, %arg17: memref<1x128xf32, #tpu.memory_space<vmem>>, %arg18: memref<2x77x128xf32, #tpu.memory_space<vmem>>) attributes {dimension_semantics = [#tpu.dimension_semantics<parallel>], iteration_bounds = array<i64: 2>, scalar_prefetch = 0 : i64, scratch_operands = 0 : i64, tpu.core_type = #tpu.core_type<tc>, window_params = [{transform_indices = @transform_0, window_bounds = array<i64: 2, 77, 128>}, {pipeline_mode = #tpu.pipeline_mode<synchronous>, transform_indices = @transform_1, window_bounds = array<i64: 1, 128>}, {pipeline_mode = #tpu.pipeline_mode<synchronous>, transform_indices = @transform_2, window_bounds = array<i64: 1, 128>}, {pipeline_mode = #tpu.pipeline_mode<synchronous>, transform_indices = @transform_3, window_bounds = array<i64: 2, 128, 64>}, {pipeline_mode = #tpu.pipeline_mode<synchronous>, transform_indices = @transform_4, window_bounds = array<i64: 2, 1, 64>}, {pipeline_mode = #tpu.pipeline_mode<synchronous>, transform_indices = @transform_5, window_bounds = array<i64: 2, 128, 64>}, {pipeline_mode = #tpu.pipeline_mode<synchronous>, transform_indices = @transform_6, window_bounds = array<i64: 2, 1, 64>}, {pipeline_mode = #tpu.pipeline_mode<synchronous>, transform_indices = @transform_7, window_bounds = array<i64: 2, 128, 64>}, {pipeline_mode = #tpu.pipeline_mode<synchronous>, transform_indices = @transform_8, window_bounds = array<i64: 2, 1, 64>}, {pipeline_mode = #tpu.pipeline_mode<synchronous>, transform_indices = @transform_9, window_bounds = array<i64: 2, 64, 128>}, {pipeline_mode = #tpu.pipeline_mode<synchronous>, transform_indices = @transform_10, window_bounds = array<i64: 1, 128>}, {pipeline_mode = #tpu.pipeline_mode<synchronous>, transform_indices = @transform_11, window_bounds = array<i64: 1, 128>}, {pipeline_mode = #tpu.pipeline_mode<synchronous>, transform_indices = @transform_12, window_bounds = array<i64: 1, 128>}, {pipeline_mode = #tpu.pipeline_mode<synchronous>, transform_indices = @transform_13, window_bounds = array<i64: 256, 128>}, {pipeline_mode = #tpu.pipeline_mode<synchronous>, transform_indices = @transform_14, window_bounds = array<i64: 1, 256>}, {pipeline_mode = #tpu.pipeline_mode<synchronous>, transform_indices = @transform_15, window_bounds = array<i64: 128, 256>}, {pipeline_mode = #tpu.pipeline_mode<synchronous>, transform_indices = @transform_16, window_bounds = array<i64: 1, 128>}, {transform_indices = @transform_17, window_bounds = array<i64: 2, 77, 128>}]} {
    %c0 = arith.constant 0 : index
    %c0_0 = arith.constant 0 : index
    %0 = vector.load %arg2[%c0, %c0_0] : memref<1x128xf32, #tpu.memory_space<vmem>>, vector<1x128xf32>
    %c0_1 = arith.constant 0 : index
    %c0_2 = arith.constant 0 : index
    %1 = vector.load %arg3[%c0_1, %c0_2] : memref<1x128xf32, #tpu.memory_space<vmem>>, vector<1x128xf32>
    %c0_3 = arith.constant 0 : index
    %c0_4 = arith.constant 0 : index
    %2 = vector.load %arg12[%c0_3, %c0_4] : memref<1x128xf32, #tpu.memory_space<vmem>>, vector<1x128xf32>
    %c0_5 = arith.constant 0 : index
    %c0_6 = arith.constant 0 : index
    %3 = vector.load %arg13[%c0_5, %c0_6] : memref<1x128xf32, #tpu.memory_space<vmem>>, vector<1x128xf32>
    %c0_7 = arith.constant 0 : index
    %c0_8 = arith.constant 0 : index
    %c0_9 = arith.constant 0 : index
    %4 = vector.load %arg4[%c0_7, %c0_8, %c0_9] : memref<2x128x64xf32, #tpu.memory_space<vmem>>, vector<2x128x64xf32>
    %5 = arith.truncf %4 : vector<2x128x64xf32> to vector<2x128x64xbf16>
    %c0_10 = arith.constant 0 : index
    %c0_11 = arith.constant 0 : index
    %c0_12 = arith.constant 0 : index
    %6 = vector.load %arg6[%c0_10, %c0_11, %c0_12] : memref<2x128x64xf32, #tpu.memory_space<vmem>>, vector<2x128x64xf32>
    %7 = arith.truncf %6 : vector<2x128x64xf32> to vector<2x128x64xbf16>
    %c0_13 = arith.constant 0 : index
    %c0_14 = arith.constant 0 : index
    %c0_15 = arith.constant 0 : index
    %8 = vector.load %arg8[%c0_13, %c0_14, %c0_15] : memref<2x128x64xf32, #tpu.memory_space<vmem>>, vector<2x128x64xf32>
    %9 = arith.truncf %8 : vector<2x128x64xf32> to vector<2x128x64xbf16>
    %c0_16 = arith.constant 0 : index
    %c0_17 = arith.constant 0 : index
    %c0_18 = arith.constant 0 : index
    %10 = vector.load %arg10[%c0_16, %c0_17, %c0_18] : memref<2x64x128xf32, #tpu.memory_space<vmem>>, vector<2x64x128xf32>
    %11 = arith.truncf %10 : vector<2x64x128xf32> to vector<2x64x128xbf16>
    %c0_19 = arith.constant 0 : index
    %c0_20 = arith.constant 0 : index
    %c0_21 = arith.constant 0 : index
    %12 = vector.load %arg5[%c0_19, %c0_20, %c0_21] : memref<2x1x64xf32, #tpu.memory_space<vmem>>, vector<2x1x64xf32>
    %c0_22 = arith.constant 0 : index
    %c0_23 = arith.constant 0 : index
    %c0_24 = arith.constant 0 : index
    %13 = vector.load %arg7[%c0_22, %c0_23, %c0_24] : memref<2x1x64xf32, #tpu.memory_space<vmem>>, vector<2x1x64xf32>
    %c0_25 = arith.constant 0 : index
    %c0_26 = arith.constant 0 : index
    %c0_27 = arith.constant 0 : index
    %14 = vector.load %arg9[%c0_25, %c0_26, %c0_27] : memref<2x1x64xf32, #tpu.memory_space<vmem>>, vector<2x1x64xf32>
    %c0_28 = arith.constant 0 : index
    %c0_29 = arith.constant 0 : index
    %15 = vector.load %arg11[%c0_28, %c0_29] : memref<1x128xf32, #tpu.memory_space<vmem>>, vector<1x128xf32>
    %c0_30 = arith.constant 0 : index
    %c0_31 = arith.constant 0 : index
    %16 = vector.load %arg14[%c0_30, %c0_31] : memref<256x128xf32, #tpu.memory_space<vmem>>, vector<256x128xf32>
    %17 = arith.truncf %16 : vector<256x128xf32> to vector<256x128xbf16>
    %c0_32 = arith.constant 0 : index
    %c0_33 = arith.constant 0 : index
    %18 = vector.load %arg15[%c0_32, %c0_33] : memref<1x256xf32, #tpu.memory_space<vmem>>, vector<1x256xf32>
    %c0_34 = arith.constant 0 : index
    %c0_35 = arith.constant 0 : index
    %19 = vector.load %arg16[%c0_34, %c0_35] : memref<128x256xf32, #tpu.memory_space<vmem>>, vector<128x256xf32>
    %20 = arith.truncf %19 : vector<128x256xf32> to vector<128x256xbf16>
    %c0_36 = arith.constant 0 : index
    %c0_37 = arith.constant 0 : index
    %21 = vector.load %arg17[%c0_36, %c0_37] : memref<1x128xf32, #tpu.memory_space<vmem>>, vector<1x128xf32>
    %22 = tpu.iota {dimensions = array<i32: 0>} : vector<77x77xi32>
    %23 = tpu.iota {dimensions = array<i32: 1>} : vector<77x77xi32>
    %24 = arith.cmpi sle, %23, %22 : vector<77x77xi32>
    %c0_38 = arith.constant 0 : index
    %c0_39 = arith.constant 0 : index
    %c0_40 = arith.constant 0 : index
    %25 = vector.load %arg1[%c0_38, %c0_39, %c0_40] : memref<2x77x128xf32, #tpu.memory_space<vmem>>, vector<1x77x128xf32>
    %26 = vector.shape_cast %25 : vector<1x77x128xf32> to vector<77x128xf32>
    %cst = arith.constant dense<0.000000e+00> : vector<77xf32>
    %27 = vector.multi_reduction <add>, %26, %cst [1] : vector<77x128xf32> to vector<77xf32>
    %28 = vector.shape_cast %27 : vector<77xf32> to vector<77x1xf32>
    %cst_41 = arith.constant 1.280000e+02 : f32
    %29 = vector.broadcast %cst_41 : f32 to vector<77x1xf32>
    %30 = arith.divf %28, %29 : vector<77x1xf32>
    %31 = vector.broadcast %30 : vector<77x1xf32> to vector<77x128xf32>
    %32 = arith.subf %26, %31 : vector<77x128xf32>
    %33 = arith.mulf %32, %32 : vector<77x128xf32>
    %cst_42 = arith.constant dense<0.000000e+00> : vector<77xf32>
    %34 = vector.multi_reduction <add>, %33, %cst_42 [1] : vector<77x128xf32> to vector<77xf32>
    %35 = vector.shape_cast %34 : vector<77xf32> to vector<77x1xf32>
    %cst_43 = arith.constant 1.280000e+02 : f32
    %36 = vector.broadcast %cst_43 : f32 to vector<77x1xf32>
    %37 = arith.divf %35, %36 : vector<77x1xf32>
    %cst_44 = arith.constant 9.99999974E-6 : f32
    %38 = vector.broadcast %cst_44 : f32 to vector<77x1xf32>
    %39 = arith.addf %37, %38 : vector<77x1xf32>
    %40 = math.rsqrt %39 : vector<77x1xf32>
    %41 = vector.broadcast %40 : vector<77x1xf32> to vector<77x128xf32>
    %42 = arith.mulf %32, %41 : vector<77x128xf32>
    %43 = vector.broadcast %0 : vector<1x128xf32> to vector<77x128xf32>
    %44 = arith.mulf %42, %43 : vector<77x128xf32>
    %45 = vector.broadcast %1 : vector<1x128xf32> to vector<77x128xf32>
    %46 = arith.addf %44, %45 : vector<77x128xf32>
    %47 = arith.truncf %46 : vector<77x128xf32> to vector<77x128xbf16>
    %cst_45 = arith.constant 0.000000e+00 : f32
    %48 = vector.broadcast %cst_45 : f32 to vector<77x128xf32>
    %49 = vector.extract_strided_slice %5 {offsets = [0, 0, 0], sizes = [1, 128, 64], strides = [1, 1, 1]} : vector<2x128x64xbf16> to vector<1x128x64xbf16>
    %50 = vector.shape_cast %49 : vector<1x128x64xbf16> to vector<128x64xbf16>
    %cst_46 = arith.constant dense<0.000000e+00> : vector<77x64xf32>
    %51 = tpu.matmul %47, %50, %cst_46 {dimension_numbers = #tpu.dot_dimension_numbers<[1], [0], [0], [1], [0, 0, 1, 1], [], []>} : vector<77x128xbf16>, vector<128x64xbf16>, vector<77x64xf32> -> vector<77x64xf32>
    %52 = vector.extract_strided_slice %12 {offsets = [0, 0, 0], sizes = [1, 1, 64], strides = [1, 1, 1]} : vector<2x1x64xf32> to vector<1x1x64xf32>
    %53 = vector.shape_cast %52 : vector<1x1x64xf32> to vector<1x64xf32>
    %54 = vector.broadcast %53 : vector<1x64xf32> to vector<77x64xf32>
    %55 = arith.addf %51, %54 : vector<77x64xf32>
    %cst_47 = arith.constant 1.250000e-01 : f32
    %56 = vector.broadcast %cst_47 : f32 to vector<77x64xf32>
    %57 = arith.mulf %55, %56 : vector<77x64xf32>
    %58 = vector.extract_strided_slice %7 {offsets = [0, 0, 0], sizes = [1, 128, 64], strides = [1, 1, 1]} : vector<2x128x64xbf16> to vector<1x128x64xbf16>
    %59 = vector.shape_cast %58 : vector<1x128x64xbf16> to vector<128x64xbf16>
    %cst_48 = arith.constant dense<0.000000e+00> : vector<77x64xf32>
    %60 = tpu.matmul %47, %59, %cst_48 {dimension_numbers = #tpu.dot_dimension_numbers<[1], [0], [0], [1], [0, 0, 1, 1], [], []>} : vector<77x128xbf16>, vector<128x64xbf16>, vector<77x64xf32> -> vector<77x64xf32>
    %61 = vector.extract_strided_slice %13 {offsets = [0, 0, 0], sizes = [1, 1, 64], strides = [1, 1, 1]} : vector<2x1x64xf32> to vector<1x1x64xf32>
    %62 = vector.shape_cast %61 : vector<1x1x64xf32> to vector<1x64xf32>
    %63 = vector.broadcast %62 : vector<1x64xf32> to vector<77x64xf32>
    %64 = arith.addf %60, %63 : vector<77x64xf32>
    %65 = vector.extract_strided_slice %9 {offsets = [0, 0, 0], sizes = [1, 128, 64], strides = [1, 1, 1]} : vector<2x128x64xbf16> to vector<1x128x64xbf16>
    %66 = vector.shape_cast %65 : vector<1x128x64xbf16> to vector<128x64xbf16>
    %cst_49 = arith.constant dense<0.000000e+00> : vector<77x64xf32>
    %67 = tpu.matmul %47, %66, %cst_49 {dimension_numbers = #tpu.dot_dimension_numbers<[1], [0], [0], [1], [0, 0, 1, 1], [], []>} : vector<77x128xbf16>, vector<128x64xbf16>, vector<77x64xf32> -> vector<77x64xf32>
    %68 = vector.extract_strided_slice %14 {offsets = [0, 0, 0], sizes = [1, 1, 64], strides = [1, 1, 1]} : vector<2x1x64xf32> to vector<1x1x64xf32>
    %69 = vector.shape_cast %68 : vector<1x1x64xf32> to vector<1x64xf32>
    %70 = vector.broadcast %69 : vector<1x64xf32> to vector<77x64xf32>
    %71 = arith.addf %67, %70 : vector<77x64xf32>
    %72 = arith.truncf %57 : vector<77x64xf32> to vector<77x64xbf16>
    %73 = arith.truncf %64 : vector<77x64xf32> to vector<77x64xbf16>
    %cst_50 = arith.constant dense<0.000000e+00> : vector<77x77xf32>
    %74 = tpu.matmul %72, %73, %cst_50 {dimension_numbers = #tpu.dot_dimension_numbers<[1], [1], [0], [0], [0, 0, 1, 0], [], []>} : vector<77x64xbf16>, vector<77x64xbf16>, vector<77x77xf32> -> vector<77x77xf32>
    %cst_51 = arith.constant 0xFF800000 : f32
    %75 = vector.broadcast %cst_51 : f32 to vector<77x77xf32>
    %76 = arith.select %24, %74, %75 : vector<77x77xi1>, vector<77x77xf32>
    %cst_52 = arith.constant dense<0xFF800000> : vector<77xf32>
    %77 = vector.multi_reduction <maximumf>, %76, %cst_52 [1] : vector<77x77xf32> to vector<77xf32>
    %78 = vector.shape_cast %77 : vector<77xf32> to vector<77x1xf32>
    %79 = vector.broadcast %78 : vector<77x1xf32> to vector<77x77xf32>
    %80 = arith.subf %76, %79 : vector<77x77xf32>
    %81 = math.exp %80 : vector<77x77xf32>
    %cst_53 = arith.constant dense<0.000000e+00> : vector<77xf32>
    %82 = vector.multi_reduction <add>, %81, %cst_53 [1] : vector<77x77xf32> to vector<77xf32>
    %83 = vector.shape_cast %82 : vector<77xf32> to vector<77x1xf32>
    %84 = arith.truncf %81 : vector<77x77xf32> to vector<77x77xbf16>
    %85 = arith.truncf %71 : vector<77x64xf32> to vector<77x64xbf16>
    %cst_54 = arith.constant dense<0.000000e+00> : vector<77x64xf32>
    %86 = tpu.matmul %84, %85, %cst_54 {dimension_numbers = #tpu.dot_dimension_numbers<[1], [0], [0], [1], [0, 0, 1, 1], [], []>} : vector<77x77xbf16>, vector<77x64xbf16>, vector<77x64xf32> -> vector<77x64xf32>
    %87 = tpu.reciprocal %83 {approx = true} : vector<77x1xf32> -> vector<77x1xf32>
    %88 = vector.broadcast %87 : vector<77x1xf32> to vector<77x64xf32>
    %89 = arith.mulf %86, %88 : vector<77x64xf32>
    %90 = arith.truncf %89 : vector<77x64xf32> to vector<77x64xbf16>
    %91 = vector.extract_strided_slice %11 {offsets = [0, 0, 0], sizes = [1, 64, 128], strides = [1, 1, 1]} : vector<2x64x128xbf16> to vector<1x64x128xbf16>
    %92 = vector.shape_cast %91 : vector<1x64x128xbf16> to vector<64x128xbf16>
    %cst_55 = arith.constant dense<0.000000e+00> : vector<77x128xf32>
    %93 = tpu.matmul %90, %92, %cst_55 {dimension_numbers = #tpu.dot_dimension_numbers<[1], [0], [0], [1], [0, 0, 1, 1], [], []>} : vector<77x64xbf16>, vector<64x128xbf16>, vector<77x128xf32> -> vector<77x128xf32>
    %94 = arith.addf %48, %93 : vector<77x128xf32>
    %95 = vector.extract_strided_slice %5 {offsets = [1, 0, 0], sizes = [1, 128, 64], strides = [1, 1, 1]} : vector<2x128x64xbf16> to vector<1x128x64xbf16>
    %96 = vector.shape_cast %95 : vector<1x128x64xbf16> to vector<128x64xbf16>
    %cst_56 = arith.constant dense<0.000000e+00> : vector<77x64xf32>
    %97 = tpu.matmul %47, %96, %cst_56 {dimension_numbers = #tpu.dot_dimension_numbers<[1], [0], [0], [1], [0, 0, 1, 1], [], []>} : vector<77x128xbf16>, vector<128x64xbf16>, vector<77x64xf32> -> vector<77x64xf32>
    %98 = vector.extract_strided_slice %12 {offsets = [1, 0, 0], sizes = [1, 1, 64], strides = [1, 1, 1]} : vector<2x1x64xf32> to vector<1x1x64xf32>
    %99 = vector.shape_cast %98 : vector<1x1x64xf32> to vector<1x64xf32>
    %100 = vector.broadcast %99 : vector<1x64xf32> to vector<77x64xf32>
    %101 = arith.addf %97, %100 : vector<77x64xf32>
    %cst_57 = arith.constant 1.250000e-01 : f32
    %102 = vector.broadcast %cst_57 : f32 to vector<77x64xf32>
    %103 = arith.mulf %101, %102 : vector<77x64xf32>
    %104 = vector.extract_strided_slice %7 {offsets = [1, 0, 0], sizes = [1, 128, 64], strides = [1, 1, 1]} : vector<2x128x64xbf16> to vector<1x128x64xbf16>
    %105 = vector.shape_cast %104 : vector<1x128x64xbf16> to vector<128x64xbf16>
    %cst_58 = arith.constant dense<0.000000e+00> : vector<77x64xf32>
    %106 = tpu.matmul %47, %105, %cst_58 {dimension_numbers = #tpu.dot_dimension_numbers<[1], [0], [0], [1], [0, 0, 1, 1], [], []>} : vector<77x128xbf16>, vector<128x64xbf16>, vector<77x64xf32> -> vector<77x64xf32>
    %107 = vector.extract_strided_slice %13 {offsets = [1, 0, 0], sizes = [1, 1, 64], strides = [1, 1, 1]} : vector<2x1x64xf32> to vector<1x1x64xf32>
    %108 = vector.shape_cast %107 : vector<1x1x64xf32> to vector<1x64xf32>
    %109 = vector.broadcast %108 : vector<1x64xf32> to vector<77x64xf32>
    %110 = arith.addf %106, %109 : vector<77x64xf32>
    %111 = vector.extract_strided_slice %9 {offsets = [1, 0, 0], sizes = [1, 128, 64], strides = [1, 1, 1]} : vector<2x128x64xbf16> to vector<1x128x64xbf16>
    %112 = vector.shape_cast %111 : vector<1x128x64xbf16> to vector<128x64xbf16>
    %cst_59 = arith.constant dense<0.000000e+00> : vector<77x64xf32>
    %113 = tpu.matmul %47, %112, %cst_59 {dimension_numbers = #tpu.dot_dimension_numbers<[1], [0], [0], [1], [0, 0, 1, 1], [], []>} : vector<77x128xbf16>, vector<128x64xbf16>, vector<77x64xf32> -> vector<77x64xf32>
    %114 = vector.extract_strided_slice %14 {offsets = [1, 0, 0], sizes = [1, 1, 64], strides = [1, 1, 1]} : vector<2x1x64xf32> to vector<1x1x64xf32>
    %115 = vector.shape_cast %114 : vector<1x1x64xf32> to vector<1x64xf32>
    %116 = vector.broadcast %115 : vector<1x64xf32> to vector<77x64xf32>
    %117 = arith.addf %113, %116 : vector<77x64xf32>
    %118 = arith.truncf %103 : vector<77x64xf32> to vector<77x64xbf16>
    %119 = arith.truncf %110 : vector<77x64xf32> to vector<77x64xbf16>
    %cst_60 = arith.constant dense<0.000000e+00> : vector<77x77xf32>
    %120 = tpu.matmul %118, %119, %cst_60 {dimension_numbers = #tpu.dot_dimension_numbers<[1], [1], [0], [0], [0, 0, 1, 0], [], []>} : vector<77x64xbf16>, vector<77x64xbf16>, vector<77x77xf32> -> vector<77x77xf32>
    %cst_61 = arith.constant 0xFF800000 : f32
    %121 = vector.broadcast %cst_61 : f32 to vector<77x77xf32>
    %122 = arith.select %24, %120, %121 : vector<77x77xi1>, vector<77x77xf32>
    %cst_62 = arith.constant dense<0xFF800000> : vector<77xf32>
    %123 = vector.multi_reduction <maximumf>, %122, %cst_62 [1] : vector<77x77xf32> to vector<77xf32>
    %124 = vector.shape_cast %123 : vector<77xf32> to vector<77x1xf32>
    %125 = vector.broadcast %124 : vector<77x1xf32> to vector<77x77xf32>
    %126 = arith.subf %122, %125 : vector<77x77xf32>
    %127 = math.exp %126 : vector<77x77xf32>
    %cst_63 = arith.constant dense<0.000000e+00> : vector<77xf32>
    %128 = vector.multi_reduction <add>, %127, %cst_63 [1] : vector<77x77xf32> to vector<77xf32>
    %129 = vector.shape_cast %128 : vector<77xf32> to vector<77x1xf32>
    %130 = arith.truncf %127 : vector<77x77xf32> to vector<77x77xbf16>
    %131 = arith.truncf %117 : vector<77x64xf32> to vector<77x64xbf16>
    %cst_64 = arith.constant dense<0.000000e+00> : vector<77x64xf32>
    %132 = tpu.matmul %130, %131, %cst_64 {dimension_numbers = #tpu.dot_dimension_numbers<[1], [0], [0], [1], [0, 0, 1, 1], [], []>} : vector<77x77xbf16>, vector<77x64xbf16>, vector<77x64xf32> -> vector<77x64xf32>
    %133 = tpu.reciprocal %129 {approx = true} : vector<77x1xf32> -> vector<77x1xf32>
    %134 = vector.broadcast %133 : vector<77x1xf32> to vector<77x64xf32>
    %135 = arith.mulf %132, %134 : vector<77x64xf32>
    %136 = arith.truncf %135 : vector<77x64xf32> to vector<77x64xbf16>
    %137 = vector.extract_strided_slice %11 {offsets = [1, 0, 0], sizes = [1, 64, 128], strides = [1, 1, 1]} : vector<2x64x128xbf16> to vector<1x64x128xbf16>
    %138 = vector.shape_cast %137 : vector<1x64x128xbf16> to vector<64x128xbf16>
    %cst_65 = arith.constant dense<0.000000e+00> : vector<77x128xf32>
    %139 = tpu.matmul %136, %138, %cst_65 {dimension_numbers = #tpu.dot_dimension_numbers<[1], [0], [0], [1], [0, 0, 1, 1], [], []>} : vector<77x64xbf16>, vector<64x128xbf16>, vector<77x128xf32> -> vector<77x128xf32>
    %140 = arith.addf %94, %139 : vector<77x128xf32>
    %141 = arith.addf %26, %140 : vector<77x128xf32>
    %142 = vector.broadcast %15 : vector<1x128xf32> to vector<77x128xf32>
    %143 = arith.addf %141, %142 : vector<77x128xf32>
    %cst_66 = arith.constant dense<0.000000e+00> : vector<77xf32>
    %144 = vector.multi_reduction <add>, %143, %cst_66 [1] : vector<77x128xf32> to vector<77xf32>
    %145 = vector.shape_cast %144 : vector<77xf32> to vector<77x1xf32>
    %cst_67 = arith.constant 1.280000e+02 : f32
    %146 = vector.broadcast %cst_67 : f32 to vector<77x1xf32>
    %147 = arith.divf %145, %146 : vector<77x1xf32>
    %148 = vector.broadcast %147 : vector<77x1xf32> to vector<77x128xf32>
    %149 = arith.subf %143, %148 : vector<77x128xf32>
    %150 = arith.mulf %149, %149 : vector<77x128xf32>
    %cst_68 = arith.constant dense<0.000000e+00> : vector<77xf32>
    %151 = vector.multi_reduction <add>, %150, %cst_68 [1] : vector<77x128xf32> to vector<77xf32>
    %152 = vector.shape_cast %151 : vector<77xf32> to vector<77x1xf32>
    %cst_69 = arith.constant 1.280000e+02 : f32
    %153 = vector.broadcast %cst_69 : f32 to vector<77x1xf32>
    %154 = arith.divf %152, %153 : vector<77x1xf32>
    %cst_70 = arith.constant 9.99999974E-6 : f32
    %155 = vector.broadcast %cst_70 : f32 to vector<77x1xf32>
    %156 = arith.addf %154, %155 : vector<77x1xf32>
    %157 = math.rsqrt %156 : vector<77x1xf32>
    %158 = vector.broadcast %157 : vector<77x1xf32> to vector<77x128xf32>
    %159 = arith.mulf %149, %158 : vector<77x128xf32>
    %160 = vector.broadcast %2 : vector<1x128xf32> to vector<77x128xf32>
    %161 = arith.mulf %159, %160 : vector<77x128xf32>
    %162 = vector.broadcast %3 : vector<1x128xf32> to vector<77x128xf32>
    %163 = arith.addf %161, %162 : vector<77x128xf32>
    %164 = arith.truncf %163 : vector<77x128xf32> to vector<77x128xbf16>
    %cst_71 = arith.constant dense<0.000000e+00> : vector<77x256xf32>
    %165 = tpu.matmul %164, %17, %cst_71 {dimension_numbers = #tpu.dot_dimension_numbers<[1], [1], [0], [0], [0, 0, 1, 0], [], []>} : vector<77x128xbf16>, vector<256x128xbf16>, vector<77x256xf32> -> vector<77x256xf32>
    %166 = vector.broadcast %18 : vector<1x256xf32> to vector<77x256xf32>
    %167 = arith.addf %165, %166 : vector<77x256xf32>
    %cst_72 = arith.constant -1.702000e+00 : f32
    %168 = vector.broadcast %cst_72 : f32 to vector<77x256xf32>
    %169 = arith.mulf %168, %167 : vector<77x256xf32>
    %170 = math.exp %169 : vector<77x256xf32>
    %cst_73 = arith.constant 1.000000e+00 : f32
    %171 = vector.broadcast %cst_73 : f32 to vector<77x256xf32>
    %172 = arith.addf %171, %170 : vector<77x256xf32>
    %173 = arith.divf %167, %172 : vector<77x256xf32>
    %174 = arith.truncf %173 : vector<77x256xf32> to vector<77x256xbf16>
    %cst_74 = arith.constant dense<0.000000e+00> : vector<77x128xf32>
    %175 = tpu.matmul %174, %20, %cst_74 {dimension_numbers = #tpu.dot_dimension_numbers<[1], [1], [0], [0], [0, 0, 1, 0], [], []>} : vector<77x256xbf16>, vector<128x256xbf16>, vector<77x128xf32> -> vector<77x128xf32>
    %176 = vector.broadcast %21 : vector<1x128xf32> to vector<77x128xf32>
    %177 = arith.addf %175, %176 : vector<77x128xf32>
    %178 = arith.addf %143, %177 : vector<77x128xf32>
    %c0_75 = arith.constant 0 : index
    %c0_76 = arith.constant 0 : index
    %c0_77 = arith.constant 0 : index
    %179 = vector.load %arg18[%c0_75, %c0_76, %c0_77] : memref<2x77x128xf32, #tpu.memory_space<vmem>>, vector<1x77x128xf32>
    %180 = vector.shape_cast %179 : vector<1x77x128xf32> to vector<77x128xf32>
    %181 = vector.shape_cast %178 : vector<77x128xf32> to vector<1x77x128xf32>
    tpu.vector_store %arg18[%c0_75, %c0_76, %c0_77], %181 {strides = array<i32>} : memref<2x77x128xf32, #tpu.memory_space<vmem>>, vector<1x77x128xf32>,
    %c1 = arith.constant 1 : index
    %c0_78 = arith.constant 0 : index
    %c0_79 = arith.constant 0 : index
    %182 = vector.load %arg1[%c1, %c0_78, %c0_79] : memref<2x77x128xf32, #tpu.memory_space<vmem>>, vector<1x77x128xf32>
    %183 = vector.shape_cast %182 : vector<1x77x128xf32> to vector<77x128xf32>
    %cst_80 = arith.constant dense<0.000000e+00> : vector<77xf32>
    %184 = vector.multi_reduction <add>, %183, %cst_80 [1] : vector<77x128xf32> to vector<77xf32>
    %185 = vector.shape_cast %184 : vector<77xf32> to vector<77x1xf32>
    %cst_81 = arith.constant 1.280000e+02 : f32
    %186 = vector.broadcast %cst_81 : f32 to vector<77x1xf32>
    %187 = arith.divf %185, %186 : vector<77x1xf32>
    %188 = vector.broadcast %187 : vector<77x1xf32> to vector<77x128xf32>
    %189 = arith.subf %183, %188 : vector<77x128xf32>
    %190 = arith.mulf %189, %189 : vector<77x128xf32>
    %cst_82 = arith.constant dense<0.000000e+00> : vector<77xf32>
    %191 = vector.multi_reduction <add>, %190, %cst_82 [1] : vector<77x128xf32> to vector<77xf32>
    %192 = vector.shape_cast %191 : vector<77xf32> to vector<77x1xf32>
    %cst_83 = arith.constant 1.280000e+02 : f32
    %193 = vector.broadcast %cst_83 : f32 to vector<77x1xf32>
    %194 = arith.divf %192, %193 : vector<77x1xf32>
    %cst_84 = arith.constant 9.99999974E-6 : f32
    %195 = vector.broadcast %cst_84 : f32 to vector<77x1xf32>
    %196 = arith.addf %194, %195 : vector<77x1xf32>
    %197 = math.rsqrt %196 : vector<77x1xf32>
    %198 = vector.broadcast %197 : vector<77x1xf32> to vector<77x128xf32>
    %199 = arith.mulf %189, %198 : vector<77x128xf32>
    %200 = vector.broadcast %0 : vector<1x128xf32> to vector<77x128xf32>
    %201 = arith.mulf %199, %200 : vector<77x128xf32>
    %202 = vector.broadcast %1 : vector<1x128xf32> to vector<77x128xf32>
    %203 = arith.addf %201, %202 : vector<77x128xf32>
    %204 = arith.truncf %203 : vector<77x128xf32> to vector<77x128xbf16>
    %cst_85 = arith.constant 0.000000e+00 : f32
    %205 = vector.broadcast %cst_85 : f32 to vector<77x128xf32>
    %206 = vector.extract_strided_slice %5 {offsets = [0, 0, 0], sizes = [1, 128, 64], strides = [1, 1, 1]} : vector<2x128x64xbf16> to vector<1x128x64xbf16>
    %207 = vector.shape_cast %206 : vector<1x128x64xbf16> to vector<128x64xbf16>
    %cst_86 = arith.constant dense<0.000000e+00> : vector<77x64xf32>
    %208 = tpu.matmul %204, %207, %cst_86 {dimension_numbers = #tpu.dot_dimension_numbers<[1], [0], [0], [1], [0, 0, 1, 1], [], []>} : vector<77x128xbf16>, vector<128x64xbf16>, vector<77x64xf32> -> vector<77x64xf32>
    %209 = vector.extract_strided_slice %12 {offsets = [0, 0, 0], sizes = [1, 1, 64], strides = [1, 1, 1]} : vector<2x1x64xf32> to vector<1x1x64xf32>
    %210 = vector.shape_cast %209 : vector<1x1x64xf32> to vector<1x64xf32>
    %211 = vector.broadcast %210 : vector<1x64xf32> to vector<77x64xf32>
    %212 = arith.addf %208, %211 : vector<77x64xf32>
    %cst_87 = arith.constant 1.250000e-01 : f32
    %213 = vector.broadcast %cst_87 : f32 to vector<77x64xf32>
    %214 = arith.mulf %212, %213 : vector<77x64xf32>
    %215 = vector.extract_strided_slice %7 {offsets = [0, 0, 0], sizes = [1, 128, 64], strides = [1, 1, 1]} : vector<2x128x64xbf16> to vector<1x128x64xbf16>
    %216 = vector.shape_cast %215 : vector<1x128x64xbf16> to vector<128x64xbf16>
    %cst_88 = arith.constant dense<0.000000e+00> : vector<77x64xf32>
    %217 = tpu.matmul %204, %216, %cst_88 {dimension_numbers = #tpu.dot_dimension_numbers<[1], [0], [0], [1], [0, 0, 1, 1], [], []>} : vector<77x128xbf16>, vector<128x64xbf16>, vector<77x64xf32> -> vector<77x64xf32>
    %218 = vector.extract_strided_slice %13 {offsets = [0, 0, 0], sizes = [1, 1, 64], strides = [1, 1, 1]} : vector<2x1x64xf32> to vector<1x1x64xf32>
    %219 = vector.shape_cast %218 : vector<1x1x64xf32> to vector<1x64xf32>
    %220 = vector.broadcast %219 : vector<1x64xf32> to vector<77x64xf32>
    %221 = arith.addf %217, %220 : vector<77x64xf32>
    %222 = vector.extract_strided_slice %9 {offsets = [0, 0, 0], sizes = [1, 128, 64], strides = [1, 1, 1]} : vector<2x128x64xbf16> to vector<1x128x64xbf16>
    %223 = vector.shape_cast %222 : vector<1x128x64xbf16> to vector<128x64xbf16>
    %cst_89 = arith.constant dense<0.000000e+00> : vector<77x64xf32>
    %224 = tpu.matmul %204, %223, %cst_89 {dimension_numbers = #tpu.dot_dimension_numbers<[1], [0], [0], [1], [0, 0, 1, 1], [], []>} : vector<77x128xbf16>, vector<128x64xbf16>, vector<77x64xf32> -> vector<77x64xf32>
    %225 = vector.extract_strided_slice %14 {offsets = [0, 0, 0], sizes = [1, 1, 64], strides = [1, 1, 1]} : vector<2x1x64xf32> to vector<1x1x64xf32>
    %226 = vector.shape_cast %225 : vector<1x1x64xf32> to vector<1x64xf32>
    %227 = vector.broadcast %226 : vector<1x64xf32> to vector<77x64xf32>
    %228 = arith.addf %224, %227 : vector<77x64xf32>
    %229 = arith.truncf %214 : vector<77x64xf32> to vector<77x64xbf16>
    %230 = arith.truncf %221 : vector<77x64xf32> to vector<77x64xbf16>
    %cst_90 = arith.constant dense<0.000000e+00> : vector<77x77xf32>
    %231 = tpu.matmul %229, %230, %cst_90 {dimension_numbers = #tpu.dot_dimension_numbers<[1], [1], [0], [0], [0, 0, 1, 0], [], []>} : vector<77x64xbf16>, vector<77x64xbf16>, vector<77x77xf32> -> vector<77x77xf32>
    %cst_91 = arith.constant 0xFF800000 : f32
    %232 = vector.broadcast %cst_91 : f32 to vector<77x77xf32>
    %233 = arith.select %24, %231, %232 : vector<77x77xi1>, vector<77x77xf32>
    %cst_92 = arith.constant dense<0xFF800000> : vector<77xf32>
    %234 = vector.multi_reduction <maximumf>, %233, %cst_92 [1] : vector<77x77xf32> to vector<77xf32>
    %235 = vector.shape_cast %234 : vector<77xf32> to vector<77x1xf32>
    %236 = vector.broadcast %235 : vector<77x1xf32> to vector<77x77xf32>
    %237 = arith.subf %233, %236 : vector<77x77xf32>
    %238 = math.exp %237 : vector<77x77xf32>
    %cst_93 = arith.constant dense<0.000000e+00> : vector<77xf32>
    %239 = vector.multi_reduction <add>, %238, %cst_93 [1] : vector<77x77xf32> to vector<77xf32>
    %240 = vector.shape_cast %239 : vector<77xf32> to vector<77x1xf32>
    %241 = arith.truncf %238 : vector<77x77xf32> to vector<77x77xbf16>
    %242 = arith.truncf %228 : vector<77x64xf32> to vector<77x64xbf16>
    %cst_94 = arith.constant dense<0.000000e+00> : vector<77x64xf32>
    %243 = tpu.matmul %241, %242, %cst_94 {dimension_numbers = #tpu.dot_dimension_numbers<[1], [0], [0], [1], [0, 0, 1, 1], [], []>} : vector<77x77xbf16>, vector<77x64xbf16>, vector<77x64xf32> -> vector<77x64xf32>
    %244 = tpu.reciprocal %240 {approx = true} : vector<77x1xf32> -> vector<77x1xf32>
    %245 = vector.broadcast %244 : vector<77x1xf32> to vector<77x64xf32>
    %246 = arith.mulf %243, %245 : vector<77x64xf32>
    %247 = arith.truncf %246 : vector<77x64xf32> to vector<77x64xbf16>
    %248 = vector.extract_strided_slice %11 {offsets = [0, 0, 0], sizes = [1, 64, 128], strides = [1, 1, 1]} : vector<2x64x128xbf16> to vector<1x64x128xbf16>
    %249 = vector.shape_cast %248 : vector<1x64x128xbf16> to vector<64x128xbf16>
    %cst_95 = arith.constant dense<0.000000e+00> : vector<77x128xf32>
    %250 = tpu.matmul %247, %249, %cst_95 {dimension_numbers = #tpu.dot_dimension_numbers<[1], [0], [0], [1], [0, 0, 1, 1], [], []>} : vector<77x64xbf16>, vector<64x128xbf16>, vector<77x128xf32> -> vector<77x128xf32>
    %251 = arith.addf %205, %250 : vector<77x128xf32>
    %252 = vector.extract_strided_slice %5 {offsets = [1, 0, 0], sizes = [1, 128, 64], strides = [1, 1, 1]} : vector<2x128x64xbf16> to vector<1x128x64xbf16>
    %253 = vector.shape_cast %252 : vector<1x128x64xbf16> to vector<128x64xbf16>
    %cst_96 = arith.constant dense<0.000000e+00> : vector<77x64xf32>
    %254 = tpu.matmul %204, %253, %cst_96 {dimension_numbers = #tpu.dot_dimension_numbers<[1], [0], [0], [1], [0, 0, 1, 1], [], []>} : vector<77x128xbf16>, vector<128x64xbf16>, vector<77x64xf32> -> vector<77x64xf32>
    %255 = vector.extract_strided_slice %12 {offsets = [1, 0, 0], sizes = [1, 1, 64], strides = [1, 1, 1]} : vector<2x1x64xf32> to vector<1x1x64xf32>
    %256 = vector.shape_cast %255 : vector<1x1x64xf32> to vector<1x64xf32>
    %257 = vector.broadcast %256 : vector<1x64xf32> to vector<77x64xf32>
    %258 = arith.addf %254, %257 : vector<77x64xf32>
    %cst_97 = arith.constant 1.250000e-01 : f32
    %259 = vector.broadcast %cst_97 : f32 to vector<77x64xf32>
    %260 = arith.mulf %258, %259 : vector<77x64xf32>
    %261 = vector.extract_strided_slice %7 {offsets = [1, 0, 0], sizes = [1, 128, 64], strides = [1, 1, 1]} : vector<2x128x64xbf16> to vector<1x128x64xbf16>
    %262 = vector.shape_cast %261 : vector<1x128x64xbf16> to vector<128x64xbf16>
    %cst_98 = arith.constant dense<0.000000e+00> : vector<77x64xf32>
    %263 = tpu.matmul %204, %262, %cst_98 {dimension_numbers = #tpu.dot_dimension_numbers<[1], [0], [0], [1], [0, 0, 1, 1], [], []>} : vector<77x128xbf16>, vector<128x64xbf16>, vector<77x64xf32> -> vector<77x64xf32>
    %264 = vector.extract_strided_slice %13 {offsets = [1, 0, 0], sizes = [1, 1, 64], strides = [1, 1, 1]} : vector<2x1x64xf32> to vector<1x1x64xf32>
    %265 = vector.shape_cast %264 : vector<1x1x64xf32> to vector<1x64xf32>
    %266 = vector.broadcast %265 : vector<1x64xf32> to vector<77x64xf32>
    %267 = arith.addf %263, %266 : vector<77x64xf32>
    %268 = vector.extract_strided_slice %9 {offsets = [1, 0, 0], sizes = [1, 128, 64], strides = [1, 1, 1]} : vector<2x128x64xbf16> to vector<1x128x64xbf16>
    %269 = vector.shape_cast %268 : vector<1x128x64xbf16> to vector<128x64xbf16>
    %cst_99 = arith.constant dense<0.000000e+00> : vector<77x64xf32>
    %270 = tpu.matmul %204, %269, %cst_99 {dimension_numbers = #tpu.dot_dimension_numbers<[1], [0], [0], [1], [0, 0, 1, 1], [], []>} : vector<77x128xbf16>, vector<128x64xbf16>, vector<77x64xf32> -> vector<77x64xf32>
    %271 = vector.extract_strided_slice %14 {offsets = [1, 0, 0], sizes = [1, 1, 64], strides = [1, 1, 1]} : vector<2x1x64xf32> to vector<1x1x64xf32>
    %272 = vector.shape_cast %271 : vector<1x1x64xf32> to vector<1x64xf32>
    %273 = vector.broadcast %272 : vector<1x64xf32> to vector<77x64xf32>
    %274 = arith.addf %270, %273 : vector<77x64xf32>
    %275 = arith.truncf %260 : vector<77x64xf32> to vector<77x64xbf16>
    %276 = arith.truncf %267 : vector<77x64xf32> to vector<77x64xbf16>
    %cst_100 = arith.constant dense<0.000000e+00> : vector<77x77xf32>
    %277 = tpu.matmul %275, %276, %cst_100 {dimension_numbers = #tpu.dot_dimension_numbers<[1], [1], [0], [0], [0, 0, 1, 0], [], []>} : vector<77x64xbf16>, vector<77x64xbf16>, vector<77x77xf32> -> vector<77x77xf32>
    %cst_101 = arith.constant 0xFF800000 : f32
    %278 = vector.broadcast %cst_101 : f32 to vector<77x77xf32>
    %279 = arith.select %24, %277, %278 : vector<77x77xi1>, vector<77x77xf32>
    %cst_102 = arith.constant dense<0xFF800000> : vector<77xf32>
    %280 = vector.multi_reduction <maximumf>, %279, %cst_102 [1] : vector<77x77xf32> to vector<77xf32>
    %281 = vector.shape_cast %280 : vector<77xf32> to vector<77x1xf32>
    %282 = vector.broadcast %281 : vector<77x1xf32> to vector<77x77xf32>
    %283 = arith.subf %279, %282 : vector<77x77xf32>
    %284 = math.exp %283 : vector<77x77xf32>
    %cst_103 = arith.constant dense<0.000000e+00> : vector<77xf32>
    %285 = vector.multi_reduction <add>, %284, %cst_103 [1] : vector<77x77xf32> to vector<77xf32>
    %286 = vector.shape_cast %285 : vector<77xf32> to vector<77x1xf32>
    %287 = arith.truncf %284 : vector<77x77xf32> to vector<77x77xbf16>
    %288 = arith.truncf %274 : vector<77x64xf32> to vector<77x64xbf16>
    %cst_104 = arith.constant dense<0.000000e+00> : vector<77x64xf32>
    %289 = tpu.matmul %287, %288, %cst_104 {dimension_numbers = #tpu.dot_dimension_numbers<[1], [0], [0], [1], [0, 0, 1, 1], [], []>} : vector<77x77xbf16>, vector<77x64xbf16>, vector<77x64xf32> -> vector<77x64xf32>
    %290 = tpu.reciprocal %286 {approx = true} : vector<77x1xf32> -> vector<77x1xf32>
    %291 = vector.broadcast %290 : vector<77x1xf32> to vector<77x64xf32>
    %292 = arith.mulf %289, %291 : vector<77x64xf32>
    %293 = arith.truncf %292 : vector<77x64xf32> to vector<77x64xbf16>
    %294 = vector.extract_strided_slice %11 {offsets = [1, 0, 0], sizes = [1, 64, 128], strides = [1, 1, 1]} : vector<2x64x128xbf16> to vector<1x64x128xbf16>
    %295 = vector.shape_cast %294 : vector<1x64x128xbf16> to vector<64x128xbf16>
    %cst_105 = arith.constant dense<0.000000e+00> : vector<77x128xf32>
    %296 = tpu.matmul %293, %295, %cst_105 {dimension_numbers = #tpu.dot_dimension_numbers<[1], [0], [0], [1], [0, 0, 1, 1], [], []>} : vector<77x64xbf16>, vector<64x128xbf16>, vector<77x128xf32> -> vector<77x128xf32>
    %297 = arith.addf %251, %296 : vector<77x128xf32>
    %298 = arith.addf %183, %297 : vector<77x128xf32>
    %299 = vector.broadcast %15 : vector<1x128xf32> to vector<77x128xf32>
    %300 = arith.addf %298, %299 : vector<77x128xf32>
    %cst_106 = arith.constant dense<0.000000e+00> : vector<77xf32>
    %301 = vector.multi_reduction <add>, %300, %cst_106 [1] : vector<77x128xf32> to vector<77xf32>
    %302 = vector.shape_cast %301 : vector<77xf32> to vector<77x1xf32>
    %cst_107 = arith.constant 1.280000e+02 : f32
    %303 = vector.broadcast %cst_107 : f32 to vector<77x1xf32>
    %304 = arith.divf %302, %303 : vector<77x1xf32>
    %305 = vector.broadcast %304 : vector<77x1xf32> to vector<77x128xf32>
    %306 = arith.subf %300, %305 : vector<77x128xf32>
    %307 = arith.mulf %306, %306 : vector<77x128xf32>
    %cst_108 = arith.constant dense<0.000000e+00> : vector<77xf32>
    %308 = vector.multi_reduction <add>, %307, %cst_108 [1] : vector<77x128xf32> to vector<77xf32>
    %309 = vector.shape_cast %308 : vector<77xf32> to vector<77x1xf32>
    %cst_109 = arith.constant 1.280000e+02 : f32
    %310 = vector.broadcast %cst_109 : f32 to vector<77x1xf32>
    %311 = arith.divf %309, %310 : vector<77x1xf32>
    %cst_110 = arith.constant 9.99999974E-6 : f32
    %312 = vector.broadcast %cst_110 : f32 to vector<77x1xf32>
    %313 = arith.addf %311, %312 : vector<77x1xf32>
    %314 = math.rsqrt %313 : vector<77x1xf32>
    %315 = vector.broadcast %314 : vector<77x1xf32> to vector<77x128xf32>
    %316 = arith.mulf %306, %315 : vector<77x128xf32>
    %317 = vector.broadcast %2 : vector<1x128xf32> to vector<77x128xf32>
    %318 = arith.mulf %316, %317 : vector<77x128xf32>
    %319 = vector.broadcast %3 : vector<1x128xf32> to vector<77x128xf32>
    %320 = arith.addf %318, %319 : vector<77x128xf32>
    %321 = arith.truncf %320 : vector<77x128xf32> to vector<77x128xbf16>
    %cst_111 = arith.constant dense<0.000000e+00> : vector<77x256xf32>
    %322 = tpu.matmul %321, %17, %cst_111 {dimension_numbers = #tpu.dot_dimension_numbers<[1], [1], [0], [0], [0, 0, 1, 0], [], []>} : vector<77x128xbf16>, vector<256x128xbf16>, vector<77x256xf32> -> vector<77x256xf32>
    %323 = vector.broadcast %18 : vector<1x256xf32> to vector<77x256xf32>
    %324 = arith.addf %322, %323 : vector<77x256xf32>
    %cst_112 = arith.constant -1.702000e+00 : f32
    %325 = vector.broadcast %cst_112 : f32 to vector<77x256xf32>
    %326 = arith.mulf %325, %324 : vector<77x256xf32>
    %327 = math.exp %326 : vector<77x256xf32>
    %cst_113 = arith.constant 1.000000e+00 : f32
    %328 = vector.broadcast %cst_113 : f32 to vector<77x256xf32>
    %329 = arith.addf %328, %327 : vector<77x256xf32>
    %330 = arith.divf %324, %329 : vector<77x256xf32>
    %331 = arith.truncf %330 : vector<77x256xf32> to vector<77x256xbf16>
    %cst_114 = arith.constant dense<0.000000e+00> : vector<77x128xf32>
    %332 = tpu.matmul %331, %20, %cst_114 {dimension_numbers = #tpu.dot_dimension_numbers<[1], [1], [0], [0], [0, 0, 1, 0], [], []>} : vector<77x256xbf16>, vector<128x256xbf16>, vector<77x128xf32> -> vector<77x128xf32>
    %333 = vector.broadcast %21 : vector<1x128xf32> to vector<77x128xf32>
    %334 = arith.addf %332, %333 : vector<77x128xf32>
    %335 = arith.addf %300, %334 : vector<77x128xf32>
    %c1_115 = arith.constant 1 : index
    %c0_116 = arith.constant 0 : index
    %c0_117 = arith.constant 0 : index
    %336 = vector.load %arg18[%c1_115, %c0_116, %c0_117] : memref<2x77x128xf32, #tpu.memory_space<vmem>>, vector<1x77x128xf32>
    %337 = vector.shape_cast %336 : vector<1x77x128xf32> to vector<77x128xf32>
    %338 = vector.shape_cast %335 : vector<77x128xf32> to vector<1x77x128xf32>
    tpu.vector_store %arg18[%c1_115, %c0_116, %c0_117], %338 {strides = array<i32>} : memref<2x77x128xf32, #tpu.memory_space<vmem>>, vector<1x77x128xf32>,
    return
  }
  func.func @transform_0(%arg0: i32) -> (i32, i32, i32) {
    %c0_i32 = arith.constant 0 : i32
    %c0_i32_0 = arith.constant 0 : i32
    %c0_i32_1 = arith.constant 0 : i32
    return %arg0, %c0_i32, %c0_i32_0 : i32, i32, i32
  }
  func.func @transform_1(%arg0: i32) -> (i32, i32) {
    %c0_i32 = arith.constant 0 : i32
    %c0_i32_0 = arith.constant 0 : i32
    %c0_i32_1 = arith.constant 0 : i32
    return %c0_i32, %c0_i32_0 : i32, i32
  }
  func.func @transform_2(%arg0: i32) -> (i32, i32) {
    %c0_i32 = arith.constant 0 : i32
    %c0_i32_0 = arith.constant 0 : i32
    %c0_i32_1 = arith.constant 0 : i32
    return %c0_i32, %c0_i32_0 : i32, i32
  }
  func.func @transform_3(%arg0: i32) -> (i32, i32, i32) {
    %c0_i32 = arith.constant 0 : i32
    %c0_i32_0 = arith.constant 0 : i32
    %c0_i32_1 = arith.constant 0 : i32
    %c0_i32_2 = arith.constant 0 : i32
    return %c0_i32, %c0_i32_0, %c0_i32_1 : i32, i32, i32
  }
  func.func @transform_4(%arg0: i32) -> (i32, i32, i32) {
    %c0_i32 = arith.constant 0 : i32
    %c0_i32_0 = arith.constant 0 : i32
    %c0_i32_1 = arith.constant 0 : i32
    %c0_i32_2 = arith.constant 0 : i32
    return %c0_i32, %c0_i32_0, %c0_i32_1 : i32, i32, i32
  }
  func.func @transform_5(%arg0: i32) -> (i32, i32, i32) {
    %c0_i32 = arith.constant 0 : i32
    %c0_i32_0 = arith.constant 0 : i32
    %c0_i32_1 = arith.constant 0 : i32
    %c0_i32_2 = arith.constant 0 : i32
    return %c0_i32, %c0_i32_0, %c0_i32_1 : i32, i32, i32
  }
  func.func @transform_6(%arg0: i32) -> (i32, i32, i32) {
    %c0_i32 = arith.constant 0 : i32
    %c0_i32_0 = arith.constant 0 : i32
    %c0_i32_1 = arith.constant 0 : i32
    %c0_i32_2 = arith.constant 0 : i32
    return %c0_i32, %c0_i32_0, %c0_i32_1 : i32, i32, i32
  }
  func.func @transform_7(%arg0: i32) -> (i32, i32, i32) {
    %c0_i32 = arith.constant 0 : i32
    %c0_i32_0 = arith.constant 0 : i32
    %c0_i32_1 = arith.constant 0 : i32
    %c0_i32_2 = arith.constant 0 : i32
    return %c0_i32, %c0_i32_0, %c0_i32_1 : i32, i32, i32
  }
  func.func @transform_8(%arg0: i32) -> (i32, i32, i32) {
    %c0_i32 = arith.constant 0 : i32
    %c0_i32_0 = arith.constant 0 : i32
    %c0_i32_1 = arith.constant 0 : i32
    %c0_i32_2 = arith.constant 0 : i32
    return %c0_i32, %c0_i32_0, %c0_i32_1 : i32, i32, i32
  }
  func.func @transform_9(%arg0: i32) -> (i32, i32, i32) {
    %c0_i32 = arith.constant 0 : i32
    %c0_i32_0 = arith.constant 0 : i32
    %c0_i32_1 = arith.constant 0 : i32
    %c0_i32_2 = arith.constant 0 : i32
    return %c0_i32, %c0_i32_0, %c0_i32_1 : i32, i32, i32
  }
  func.func @transform_10(%arg0: i32) -> (i32, i32) {
    %c0_i32 = arith.constant 0 : i32
    %c0_i32_0 = arith.constant 0 : i32
    %c0_i32_1 = arith.constant 0 : i32
    return %c0_i32, %c0_i32_0 : i32, i32
  }
  func.func @transform_11(%arg0: i32) -> (i32, i32) {
    %c0_i32 = arith.constant 0 : i32
    %c0_i32_0 = arith.constant 0 : i32
    %c0_i32_1 = arith.constant 0 : i32
    return %c0_i32, %c0_i32_0 : i32, i32
  }
  func.func @transform_12(%arg0: i32) -> (i32, i32) {
    %c0_i32 = arith.constant 0 : i32
    %c0_i32_0 = arith.constant 0 : i32
    %c0_i32_1 = arith.constant 0 : i32
    return %c0_i32, %c0_i32_0 : i32, i32
  }
  func.func @transform_13(%arg0: i32) -> (i32, i32) {
    %c0_i32 = arith.constant 0 : i32
    %c0_i32_0 = arith.constant 0 : i32
    %c0_i32_1 = arith.constant 0 : i32
    return %c0_i32, %c0_i32_0 : i32, i32
  }
  func.func @transform_14(%arg0: i32) -> (i32, i32) {
    %c0_i32 = arith.constant 0 : i32
    %c0_i32_0 = arith.constant 0 : i32
    %c0_i32_1 = arith.constant 0 : i32
    return %c0_i32, %c0_i32_0 : i32, i32
  }
  func.func @transform_15(%arg0: i32) -> (i32, i32) {
    %c0_i32 = arith.constant 0 : i32
    %c0_i32_0 = arith.constant 0 : i32
    %c0_i32_1 = arith.constant 0 : i32
    return %c0_i32, %c0_i32_0 : i32, i32
  }
  func.func @transform_16(%arg0: i32) -> (i32, i32) {
    %c0_i32 = arith.constant 0 : i32
    %c0_i32_0 = arith.constant 0 : i32
    %c0_i32_1 = arith.constant 0 : i32
    return %c0_i32, %c0_i32_0 : i32, i32
  }
  func.func @transform_17(%arg0: i32) -> (i32, i32, i32) {
    %c0_i32 = arith.constant 0 : i32
    %c0_i32_0 = arith.constant 0 : i32
    %c0_i32_1 = arith.constant 0 : i32
    return %arg0, %c0_i32, %c0_i32_0 : i32, i32, i32
  }
}

</mosaic_0001>

<bundles_post_ra>
// kernel: tpu_custom_call.1
= control target key start
LH: loop header
LB: loop body
LE: loop exit
PB: predicated region body
PF: predicated region fallthrough
CT: control target
= control target key end

     0   :  { %s6610_s24 = smov 0   ;;  %s9622_s0 = inlined_call_operand.vmem [shape: f32[4,77,128], index: 0, kind: input, shape index: {}]   ;;  %s9623_s1 = inlined_call_operand.vmem [shape: f32[1,128], index: 1, kind: input, shape index: {}]   ;;  %s9624_s2 = inlined_call_operand.vmem [shape: f32[1,128], index: 2, kind: input, shape index: {}]   ;;  %s9625_s3 = inlined_call_operand.vmem [shape: f32[2,128,64], index: 3, kind: input, shape index: {}]   ;;  %s9626_s4 = inlined_call_operand.vmem [shape: f32[2,1,64], index: 4, kind: input, shape index: {}]   ;;  %s9627_s5 = inlined_call_operand.vmem [shape: f32[2,128,64], index: 5, kind: input, shape index: {}]   ;;  %s9628_s6 = inlined_call_operand.vmem [shape: f32[2,1,64], index: 6, kind: input, shape index: {}]   ;;  %s9629_s7 = inlined_call_operand.vmem [shape: f32[2,128,64], index: 7, kind: input, shape index: {}]   ;;  %s9630_s8 = inlined_call_operand.vmem [shape: f32[2,1,64], index: 8, kind: input, shape index: {}]   ;;  %s9631_s9 = inlined_call_operand.vmem [shape: f32[2,64,128], index: 9, kind: input, shape index: {}]   ;;  %s9632_s10 = inlined_call_operand.vmem [shape: f32[1,128], index: 10, kind: input, shape index: {}]   ;;  %s9633_s11 = inlined_call_operand.vmem [shape: f32[1,128], index: 11, kind: input, shape index: {}]   ;;  %s9634_s12 = inlined_call_operand.vmem [shape: f32[1,128], index: 12, kind: input, shape index: {}]   ;;  %s9635_s13 = inlined_call_operand.vmem [shape: f32[256,128], index: 13, kind: input, shape index: {}]   ;;  %s9636_s14 = inlined_call_operand.vmem [shape: f32[1,256], index: 14, kind: input, shape index: {}]   ;;  %s9637_s15 = inlined_call_operand.vmem [shape: f32[128,256], index: 15, kind: input, shape index: {}]   ;;  %s9638_s16 = inlined_call_operand.vmem [shape: f32[1,128], index: 16, kind: input, shape index: {}]   ;;  %s9639_s17 = inlined_call_operand.vmem [shape: f32[4,77,128], index: 17, kind: output, shape index: {}]  }
   0x1   :  { %9730 = sst [smem:[#allocation83_spill]] %s9622_s0 }
   0x2   :  { %9731 = sst [smem:[#allocation84_spill]] %s9623_s1 }
   0x3 LB: > { %s4854_s25 = sadd.s32 4294967295, %s6515_s24   ;;  %p4858_p0 = scmp.ge.s32.totalorder %s6515_s24, 1  ;;  %s6515_s24 = sphi %s6610_s24, %s27_s24  }
   0x4   : > { %p489_p1 = scmp.lt.s32.totalorder %s6515_s24, 3 }
   0x6   : > { %p490_p2 = pnand %p4858_p0, %p489_p1 }
   0x8   : > { %493 = sbr.rel (%p490_p2) target bundleno = 5251 (0x1483), region = 88 }
   0xf   : > { %s4859_s26 = sshll.u32 %s4854_s25, 1  ;;  %s9732_s0 = sld [smem:[#allocation83_spill]]  ;;  %vm886_vm0 = vcmask 1044480   ;;  %v562_v11 = vld [vmem:[%s9625_s3] sm:$0xff]  ;;  %v563_v12 = vld [vmem:[%s9625_s3 + $0x8] sm:$0xff]  ;;  %v9641_v14 = vmov 0.0  }
  0x10   : > { %p544_p3 = scmp.lt.s32.totalorder %s4859_s26, 3  ;;  %v610_v13 = vld [vmem:[%s9627_s5] sm:$0xff]  ;;  %5281 = vmatprep.subr.bf16.mxu0 %v9641_v14  ;;  %5317 = vmatprep.subr.bf16.mxu1 %v9641_v14  ;;  %v6656_v15 = vpack.c.bf16 %v563_v12, %v562_v11  ;;  %v611_v16 = vld [vmem:[%s9627_s5 + $0x8] sm:$0xff]  ;;  %v564_v54 = vld [vmem:[%s9625_s3 + $0x10] sm:$0xff]  ;;  %vm6518_vm1 = vmmov 0   ;;  %s9744_s18 = sld [smem:[#allocation84_spill]] }
  0x11   : > { %v6661_v17 = vpack.c.bf16 %v611_v16, %v610_v13  ;;  %v565_v55 = vld [vmem:[%s9625_s3 + $0x18] sm:$0xff]  ;;  %v612_v56 = vld [vmem:[%s9627_s5 + $0x10] sm:$0xff]  ;;  %v570_v13 = vld [vmem:[%s9625_s3 + $0x40] sm:$0xff]  ;;  %5297 = vmatprep.mubr.msk.bf16.mxu0 %vm6518_vm1, %v9641_v14  ;;  %5333 = vmatprep.mubr.msk.bf16.mxu1 %vm6518_vm1, %v9641_v14  ;;  %vm1276_vm2 = vcmask 523264   ;;  %vm1507_vm3 = vcmask 1045504   ;;  %vm1508_vm4 = vcmask 1046528  }
  0x12   : > { %s9912_s26 = smov (!%p544_p3, %s4859_s26), 3  ;;  %5282 = vmatpush3.bf16.msra.mxu0 %v6656_v15  ;;  %v6714_v59 = vpack.c.bf16 %v565_v55, %v564_v54  ;;  %v613_v60 = vld [vmem:[%s9627_s5 + $0x18] sm:$0xff]  ;;  %v571_v16 = vld [vmem:[%s9625_s3 + $0x48] sm:$0xff]  ;;  %vm1390_vm6 = vcmask 629760  }
  0x13   : > { %s6065_s27 = smul.u32 80, %s9912_s26  ;;  %9733 = vst [vmem:[#allocation2_spill] sm:$0xff] %v6661_v17  ;;  %5318 = vmatpush3.bf16.msra.mxu1 %v6661_v17  ;;  %5283 = vmatprep.subr.bf16.mxu0 %v9641_v14  ;;  %v6719_v61 = vpack.c.bf16 %v613_v60, %v612_v56  ;;  %v617_v11 = vld [vmem:[%s9627_s5 + $0x38] sm:$0xff] }
  0x14   : > { %5319 = vmatprep.subr.bf16.mxu1 %v9641_v14 }
  0x15   : > { %s6626_s30 = scalar_lea.vmem %s9732_s0, %s6065_s27  ;;  %9734 = vst [vmem:[#allocation3_spill] sm:$0xff] %v6719_v61  ;;  %s8775_s20 = scalar_lea.vmem %s9639_s17, %s6065_s27 }
  0x16   : > { %v860_v0 = vld [vmem:[%s6626_s30 + $0x10] sm:$0xff]  ;;  %v858_v1 = vld [vmem:[%s6626_s30] sm:$0xff]  ;;  %v861_v2 = vld [vmem:[%s6626_s30 + $0x18] sm:$0xff]  ;;  %5284 = vmatpush3.bf16.msra.mxu0 %v6714_v59 }
  0x17   : > { %872 = vadd.xlane.f32.xlu1 %v860_v0  ;;  %868 = vadd.xlane.f32.xlu0 %v858_v1  ;;  %v859_v3 = vld [vmem:[%s6626_s30 + $0x8] sm:$0xff]  ;;  %v862_v5 = vld [vmem:[%s6626_s30 + $0x20] sm:$0xff]  ;;  %v865_v6 = vld [vmem:[%s6626_s30 + $0x38] sm:$0xff] }
  0x18   : > { %v863_v4 = vld [vmem:[%s6626_s30 + $0x28] sm:$0xff]  ;;  %v864_v7 = vld [vmem:[%s6626_s30 + $0x30] sm:$0xff]  ;;  %v6640_v9 = vld [vmem:[%s6626_s30 + $0x40] sm:$0xff]  ;;  %5320 = vmatpush3.bf16.msra.mxu1 %v6719_v61  ;;  %5285 = vmatprep.subr.bf16.mxu0 %v9641_v14 }
  0x19   : > { %v6637_v8 = vld [vmem:[%s6626_s30 + $0x48] sm:$0x1f]  ;;  %5321 = vmatprep.subr.bf16.mxu1 %v9641_v14 }
  0x1a   : > { %v887_v10 = vsel %vm886_vm0, %v6637_v8, 0.0 }
  0x1b   : > { %874 = vadd.xlane.f32.xlu1 %v861_v2  ;;  %870 = vadd.xlane.f32.xlu0 %v859_v3 }
  0x1f   : > { %878 = vadd.xlane.f32.xlu1 %v863_v4  ;;  %876 = vadd.xlane.f32.xlu0 %v862_v5 }
  0x23   : > { %882 = vadd.xlane.f32.xlu1 %v865_v6  ;;  %880 = vadd.xlane.f32.xlu0 %v864_v7 }
  0x27   : > { %884 = vadd.xlane.f32.xlu1 %v6640_v9  ;;  %888 = vadd.xlane.f32.xlu0 %v887_v10 }
  0xa4   : > { %v873_v18 = vpop.xlane.xlu1 %872  ;;  %v869_v19 = vpop.xlane.xlu0 %868 }
  0xa5   : > { %v893_v20 = vmul.f32 0.0078125, %v873_v18  ;;  %v891_v21 = vmul.f32 0.0078125, %v869_v19  ;;  %v618_v18 = vld [vmem:[%s9627_s5 + $0x40] sm:$0xff]  ;;  %v6779_v19 = vpack.c.bf16 %v571_v16, %v570_v13 }
  0xa6   : > { %v6858_v16 = vld [vmem:[%s9744_s18] ss:$0 sm:$0xff] }
  0xa7   : > { %v6667_v22 = vsub.f32 %v858_v1, %v891_v21  ;;  %v6669_v23 = vsub.f32 %v860_v0, %v893_v20  ;;  %v566_v0 = vld [vmem:[%s9625_s3 + $0x20] sm:$0xff]  ;;  %v567_v1 = vld [vmem:[%s9625_s3 + $0x28] sm:$0xff] }
  0xa8   : > { %v875_v24 = vpop.xlane.xlu1 %874  ;;  %v871_v25 = vpop.xlane.xlu0 %870  ;;  %v619_v20 = vld [vmem:[%s9627_s5 + $0x48] sm:$0xff] }
  0xa9   : > { %v894_v26 = vmul.f32 0.0078125, %v875_v24  ;;  %v892_v27 = vmul.f32 0.0078125, %v871_v25  ;;  %v911_v28 = vmul.f32 %v6667_v22, %v6667_v22  ;;  %v913_v29 = vmul.f32 %v6669_v23, %v6669_v23  ;;  %v572_v24 = vld [vmem:[%s9625_s3 + $0x50] sm:$0xff]  ;;  %v573_v25 = vld [vmem:[%s9625_s3 + $0x58] sm:$0xff] }
  0xaa   : > { %v6784_v21 = vpack.c.bf16 %v619_v20, %v618_v18 }
  0xab   : > { %921 = vadd.xlane.f32.xlu0 %v911_v28  ;;  %v6675_v30 = vsub.f32 %v859_v3, %v892_v27  ;;  %v6677_v31 = vsub.f32 %v861_v2, %v894_v26  ;;  %v614_v2 = vld [vmem:[%s9627_s5 + $0x20] sm:$0xff]  ;;  %v620_v26 = vld [vmem:[%s9627_s5 + $0x50] sm:$0xff]  ;;  %v6799_v27 = vpack.c.bf16 %v573_v25, %v572_v24  ;;  %v621_v28 = vld [vmem:[%s9627_s5 + $0x58] sm:$0xff] }
  0xac   : > { %v879_v32 = vpop.xlane.xlu1 %878  ;;  %v877_v33 = vpop.xlane.xlu0 %876  ;;  %9737 = vst [vmem:[#allocation6_spill] sm:$0xff] %v6784_v21 }
  0xad   : > { %v896_v34 = vmul.f32 0.0078125, %v879_v32  ;;  %v895_v35 = vmul.f32 0.0078125, %v877_v33  ;;  %v912_v36 = vmul.f32 %v6675_v30, %v6675_v30  ;;  %v914_v37 = vmul.f32 %v6677_v31, %v6677_v31  ;;  %9738 = vst [vmem:[#allocation7_spill] sm:$0xff] %v6799_v27  ;;  %v574_v32 = vld [vmem:[%s9625_s3 + $0x60] sm:$0xff]  ;;  %v575_v33 = vld [vmem:[%s9625_s3 + $0x68] sm:$0xff] }
  0xaf   : > { %925 = vadd.xlane.f32.xlu0 %v913_v29  ;;  %923 = vadd.xlane.f32.xlu1 %v912_v36  ;;  %v6683_v38 = vsub.f32 %v862_v5, %v895_v35  ;;  %v6685_v39 = vsub.f32 %v863_v4, %v896_v34  ;;  %v6739_v4 = vpack.c.bf16 %v567_v1, %v566_v0  ;;  %v615_v5 = vld [vmem:[%s9627_s5 + $0x28] sm:$0xff]  ;;  %v622_v34 = vld [vmem:[%s9627_s5 + $0x60] sm:$0xff] }
  0xb0   : > { %v883_v40 = vpop.xlane.xlu1 %882  ;;  %v881_v41 = vpop.xlane.xlu0 %880  ;;  %v6804_v29 = vpack.c.bf16 %v621_v28, %v620_v26  ;;  %v6819_v35 = vpack.c.bf16 %v575_v33, %v574_v32  ;;  %v623_v36 = vld [vmem:[%s9627_s5 + $0x68] sm:$0xff] }
  0xb1   : > { %v898_v42 = vmul.f32 0.0078125, %v883_v40  ;;  %v897_v43 = vmul.f32 0.0078125, %v881_v41  ;;  %v915_v44 = vmul.f32 %v6683_v38, %v6683_v38  ;;  %v916_v45 = vmul.f32 %v6685_v39, %v6685_v39  ;;  %5286 = vmatpush3.bf16.msra.mxu0 %v6739_v4  ;;  %v576_v40 = vld [vmem:[%s9625_s3 + $0x70] sm:$0xff]  ;;  %v577_v41 = vld [vmem:[%s9625_s3 + $0x78] sm:$0xff] }
  0xb2   : > { %5287 = vmatprep.subr.bf16.mxu0 %v9641_v14  ;;  %9739 = vst [vmem:[#allocation8_spill] sm:$0xff] %v6804_v29  ;;  %9740 = vst [vmem:[#allocation9_spill] sm:$0xff] %v6819_v35 }
  0xb3   : > { %927 = vadd.xlane.f32.xlu1 %v914_v37  ;;  %929 = vadd.xlane.f32.xlu0 %v915_v44  ;;  %v6691_v46 = vsub.f32 %v864_v7, %v897_v43  ;;  %v6693_v47 = vsub.f32 %v865_v6, %v898_v42  ;;  %v6744_v6 = vpack.c.bf16 %v615_v5, %v614_v2  ;;  %v568_v7 = vld [vmem:[%s9625_s3 + $0x30] sm:$0xff]  ;;  %v625_v44 = vld [vmem:[%s9627_s5 + $0x78] sm:$0xff] }
  0xb4   : > { %v885_v48 = vpop.xlane.xlu1 %884  ;;  %v889_v49 = vpop.xlane.xlu0 %888  ;;  %v6824_v37 = vpack.c.bf16 %v623_v36, %v622_v34  ;;  %v624_v42 = vld [vmem:[%s9627_s5 + $0x70] sm:$0xff]  ;;  %v6839_v43 = vpack.c.bf16 %v577_v41, %v576_v40  ;;  %v658_v41 = vld [vmem:[%s9629_s7] sm:$0xff] }
  0xb5   : > { %v899_v50 = vmul.f32 0.0078125, %v885_v48  ;;  %v917_v51 = vmul.f32 %v6691_v46, %v6691_v46  ;;  %v900_v52 = vmul.f32 0.0078125, %v889_v49  ;;  %v918_v53 = vmul.f32 %v6693_v47, %v6693_v47  ;;  %9735 = vst [vmem:[#allocation4_spill] sm:$0xff] %v6744_v6  ;;  %5322 = vmatpush3.bf16.msra.mxu1 %v6744_v6 }
  0xb6   : > { %5323 = vmatprep.subr.bf16.mxu1 %v9641_v14  ;;  %9741 = vst [vmem:[#allocation10_spill] sm:$0xff] %v6824_v37  ;;  %9742 = vst [vmem:[#allocation11_spill] sm:$0xff] %v6839_v43 }
  0xb7   : > { %931 = vadd.xlane.f32.xlu1 %v916_v45  ;;  %933 = vadd.xlane.f32.xlu0 %v917_v51  ;;  %v6709_v57 = vsub.f32 %v6637_v8, %v900_v52  ;;  %v6712_v58 = vsub.f32 %v6640_v9, %v899_v50  ;;  %v569_v8 = vld [vmem:[%s9625_s3 + $0x38] sm:$0xff]  ;;  %v616_v9 = vld [vmem:[%s9627_s5 + $0x30] sm:$0xff]  ;;  %v6844_v45 = vpack.c.bf16 %v625_v44, %v624_v42 }
  0xb8   : > { %v6759_v10 = vpack.c.bf16 %v569_v8, %v568_v7  ;;  %v6764_v12 = vpack.c.bf16 %v617_v11, %v616_v9 }
  0xb9   : > { %v919_v62 = vmul.f32 %v6712_v58, %v6712_v58  ;;  %v920_v63 = vmul.f32 %v6709_v57, %v6709_v57  ;;  %9743 = vst [vmem:[#allocation12_spill] sm:$0xff] %v6844_v45 }
  0xba   : > { %9736 = vst [vmem:[#allocation5_spill] sm:$0xff] %v6764_v12  ;;  %5288 = vmatpush3.bf16.msra.mxu0 %v6759_v10  ;;  %5324 = vmatpush3.bf16.msra.mxu1 %v6764_v12 }
  0xbb   : > { %935 = vadd.xlane.f32.xlu1 %v918_v53  ;;  %937 = vadd.xlane.f32.xlu0 %v919_v62  ;;  %v939_v3 = vsel %vm886_vm0, %v920_v63, 0.0 }
  0xbc   : > { %5289 = vmatprep.subr.bf16.mxu0 %v9641_v14  ;;  %5325 = vmatprep.subr.bf16.mxu1 %v9641_v14 }
  0xbe   : > { %5290 = vmatpush3.bf16.msra.mxu0 %v6779_v19  ;;  %5326 = vmatpush3.bf16.msra.mxu1 %v6784_v21 }
  0xbf   : > { %940 = vadd.xlane.f32.xlu1 %v939_v3  ;;  %5291 = vmatprep.subr.bf16.mxu0 %v9641_v14 }
  0xc0   : > { %5327 = vmatprep.subr.bf16.mxu1 %v9641_v14 }
  0xc2   : > { %5292 = vmatpush3.bf16.msra.mxu0 %v6799_v27  ;;  %5328 = vmatpush3.bf16.msra.mxu1 %v6804_v29 }
  0xc3   : > { %5293 = vmatprep.subr.bf16.mxu0 %v9641_v14  ;;  %5329 = vmatprep.subr.bf16.mxu1 %v9641_v14 }
  0xc6   : > { %5294 = vmatpush3.bf16.msra.mxu0 %v6819_v35  ;;  %5330 = vmatpush3.bf16.msra.mxu1 %v6824_v37 }
  0xc7   : > { %5295 = vmatprep.subr.bf16.mxu0 %v9641_v14  ;;  %5331 = vmatprep.subr.bf16.mxu1 %v9641_v14 }
  0xca   : > { %5296 = vmatpush3.bf16.msra.mxu0 %v6839_v43  ;;  %5332 = vmatpush3.bf16.msra.mxu1 %v6844_v45 }
  0xcb   : > { %5353 = vmatprep.subr.bf16.mxu0 %v9641_v14  ;;  %5389 = vmatprep.subr.bf16.mxu1 %v9641_v14 }
 0x138   : > { %v922_v48 = vpop.xlane.xlu0 %921 }
 0x139   : > { %v942_v49 = vmul.f32 0.0078125, %v922_v48 }
 0x13b   : > { %v952_v50 = vadd.f32 1e-05, %v942_v49 }
 0x13c   : > { %v924_v51 = vpop.xlane.xlu1 %923  ;;  %v926_v52 = vpop.xlane.xlu0 %925 }
 0x13d   : > { %6077 = vrsqrt.f32 %v952_v50  ;;  %v943_v53 = vmul.f32 0.0078125, %v924_v51  ;;  %v944_v54 = vmul.f32 0.0078125, %v926_v52 }
 0x13f   : > { %v953_v55 = vadd.f32 1e-05, %v943_v53  ;;  %v954_v56 = vadd.f32 1e-05, %v944_v54 }
 0x140   : > { %v928_v60 = vpop.xlane.xlu1 %927  ;;  %v930_v62 = vpop.xlane.xlu0 %929 }
 0x141   : > { %6079 = vrsqrt.f32 %v953_v55  ;;  %v945_v63 = vmul.f32 0.0078125, %v928_v60  ;;  %v946_v1 = vmul.f32 0.0078125, %v930_v62  ;;  %v660_v60 = vld [vmem:[%s9629_s7 + $0x10] sm:$0xff] }
 0x142   : > { %6081 = vrsqrt.f32 %v954_v56 }
 0x143   : > { %v955_v0 = vadd.f32 1e-05, %v945_v63  ;;  %v956_v7 = vadd.f32 1e-05, %v946_v1 }
 0x144   : > { %v932_v2 = vpop.xlane.xlu1 %931  ;;  %v934_v11 = vpop.xlane.xlu0 %933 }
 0x145   : > { %6083 = vrsqrt.f32 %v955_v0  ;;  %v947_v3 = vmul.f32 0.0078125, %v932_v2  ;;  %v948_v24 = vmul.f32 0.0078125, %v934_v11 }
 0x147   : > { %v6078_v5 = vpop.eup %6077  ;;  %v957_v8 = vadd.f32 1e-05, %v947_v3  ;;  %v958_v40 = vadd.f32 1e-05, %v948_v24 }
 0x148   : > { %v972_v9 = vmul.f32 %v6078_v5, %v6667_v22  ;;  %v936_v13 = vpop.xlane.xlu1 %935  ;;  %v6865_v22 = vld [vmem:[%s9624_s2] ss:$0 sm:$0xff]  ;;  %v938_v50 = vpop.xlane.xlu0 %937 }
 0x149   : > { %6085 = vrsqrt.f32 %v957_v8  ;;  %v949_v18 = vmul.f32 0.0078125, %v936_v13  ;;  %v950_v56 = vmul.f32 0.0078125, %v938_v50  ;;  %v662_v5 = vld [vmem:[%s9629_s7 + $0x20] sm:$0xff] }
 0x14a   : > { %6087 = vrsqrt.f32 %v956_v7  ;;  %v988_v25 = vmul.f32 %v6858_v16, %v972_v9  ;;  %v663_v7 = vld [vmem:[%s9629_s7 + $0x28] sm:$0xff] }
 0x14b   : > { %v6080_v20 = vpop.eup %6079  ;;  %v959_v32 = vadd.f32 1e-05, %v949_v18  ;;  %v960_v3 = vadd.f32 1e-05, %v950_v56  ;;  %v6914_v13 = vpack.c.bf16 %v663_v7, %v662_v5  ;;  %v671_v56 = vld [vmem:[%s9629_s7 + $0x68] sm:$0xff] }
 0x14c   : > { %v973_v26 = vmul.f32 %v6080_v20, %v6675_v30  ;;  %v6082_v28 = vpop.eup %6081  ;;  %v941_v34 = vpop.xlane.xlu1 %940  ;;  %v659_v30 = vld [vmem:[%s9629_s7 + $0x8] sm:$0xff]  ;;  %v1004_v42 = vadd.f32 %v6865_v22, %v988_v25  ;;  %v664_v20 = vld [vmem:[%s9629_s7 + $0x30] sm:$0xff] }
 0x14d   : > { %v974_v48 = vmul.f32 %v6082_v28, %v6669_v23  ;;  %6089 = vrsqrt.f32 %v959_v32  ;;  %v951_v51 = vmul.f32 0.0078125, %v941_v34  ;;  %v6881_v54 = vpack.c.bf16 %v659_v30, %v658_v41  ;;  %v661_v23 = vld [vmem:[%s9629_s7 + $0x18] sm:$0xff]  ;;  %9747 = vst [vmem:[#allocation15_spill] sm:$0xff] %v6914_v13  ;;  %v667_v34 = vld [vmem:[%s9629_s7 + $0x48] sm:$0xff] }
 0x14e   : > { %v989_v33 = vmul.f32 %v6858_v16, %v973_v26  ;;  %6091 = vrsqrt.f32 %v958_v40  ;;  %v6899_v2 = vpack.c.bf16 %v661_v23, %v660_v60 }
 0x14f   : > { %v6084_v36 = vpop.eup %6083  ;;  %9745 = vst [vmem:[#allocation13_spill] sm:$0xff] %v6881_v54  ;;  %v961_v63 = vadd.f32 1e-05, %v951_v51 }
 0x150   : > { %v1005_v44 = vadd.f32 %v6865_v22, %v989_v33  ;;  %v975_v49 = vmul.f32 %v6084_v36, %v6677_v31  ;;  %v990_v31 = vmul.f32 %v6858_v16, %v974_v48  ;;  %9746 = vst [vmem:[#allocation14_spill] sm:$0xff] %v6899_v2  ;;  %v666_v33 = vld [vmem:[%s9629_s7 + $0x40] sm:$0xff]  ;;  %v669_v48 = vld [vmem:[%s9629_s7 + $0x58] sm:$0xff] }
 0x151   : > { %6093 = vrsqrt.f32 %v961_v63  ;;  %v6948_v30 = vpack.c.bf16 %v667_v34, %v666_v33  ;;  %v672_v63 = vld [vmem:[%s9629_s7 + $0x70] sm:$0xff] }
 0x152   : > { %v991_v52 = vmul.f32 %v6858_v16, %v975_v49  ;;  %v6879_v53 = vpack.c.bf16 %v1005_v44, %v1004_v42  ;;  %v1006_v8 = vadd.f32 %v6865_v22, %v990_v31  ;;  %6095 = vrsqrt.f32 %v960_v3  ;;  %v668_v44 = vld [vmem:[%s9629_s7 + $0x50] sm:$0xff] }
 0x153   : > { %v6086_v55 = vpop.eup %6085  ;;  %9749 = vst [vmem:[#allocation17_spill] sm:$0xff] %v6948_v30 }
 0x154   : > { %5298 = vmatmul.mubr.bf16.vlgmr.msra.gmra.mrb[0].mxu0 %v6879_v53  ;;  %5334 = vmatmul.mubr.bf16.vlgmr.msra.gmra.mrb[0].mxu1 %v6879_v53  ;;  %v6088_v62 = vpop.eup %6087  ;;  %v1007_v0 = vadd.f32 %v6865_v22, %v991_v52  ;;  %v977_v1 = vmul.f32 %v6086_v55, %v6685_v39  ;;  %v6967_v52 = vpack.c.bf16 %v669_v48, %v668_v44  ;;  %v670_v55 = vld [vmem:[%s9629_s7 + $0x60] sm:$0xff] }
 0x155   : > { %5301 = vmatprep.mubr.msk.bf16.mxu0 %vm6518_vm1, %v9641_v14  ;;  %5337 = vmatprep.mubr.msk.bf16.mxu1 %vm6518_vm1, %v9641_v14  ;;  %v976_v9 = vmul.f32 %v6088_v62, %v6683_v38  ;;  %v665_v38 = vld [vmem:[%s9629_s7 + $0x38] sm:$0xff]  ;;  %v6982_v62 = vpack.c.bf16 %v671_v56, %v670_v55 }
 0x156   : > { %5354 = vmatpush3.bf16.msra.mxu0 %v6881_v54  ;;  %v993_v39 = vmul.f32 %v6858_v16, %v977_v1  ;;  %v6911_v11 = vpack.c.bf16 %v1007_v0, %v1006_v8  ;;  %v6933_v32 = vpack.c.bf16 %v665_v38, %v664_v20  ;;  %9750 = vst [vmem:[#allocation18_spill] sm:$0xff] %v6967_v52  ;;  %v673_v0 = vld [vmem:[%s9629_s7 + $0x78] sm:$0xff]  ;;  %v7037_v8 = vld [vmem:[%s9628_s6] ss:$0 sm:$0xff] }
 0x157   : > { %5355 = vmatprep.subr.bf16.mxu0 %v9641_v14  ;;  %v6090_v18 = vpop.eup %6089  ;;  %v992_v24 = vmul.f32 %v6858_v16, %v976_v9  ;;  %9751 = vst [vmem:[#allocation19_spill] sm:$0xff] %v6982_v62  ;;  %v7000_v3 = vpack.c.bf16 %v673_v0, %v672_v63 }
 0x158   : > { %v6092_v25 = vpop.eup %6091  ;;  %v1009_v26 = vadd.f32 %v6865_v22, %v993_v39  ;;  %v979_v28 = vmul.f32 %v6090_v18, %v6693_v47  ;;  %9748 = vst [vmem:[#allocation16_spill] sm:$0xff] %v6933_v32 }
 0x159   : > { %v1008_v36 = vadd.f32 %v6865_v22, %v992_v24  ;;  %v978_v40 = vmul.f32 %v6092_v25, %v6691_v46  ;;  %9752 = vst [vmem:[#allocation20_spill] sm:$0xff] %v7000_v3 }
 0x15a   : > { %5356 = vmatpush3.bf16.msra.mxu0 %v6899_v2  ;;  %v995_v47 = vmul.f32 %v6858_v16, %v979_v28 }
 0x15b   : > { %5357 = vmatprep.subr.bf16.mxu0 %v9641_v14  ;;  %v6945_v41 = vpack.c.bf16 %v1009_v26, %v1008_v36  ;;  %v6094_v42 = vpop.eup %6093  ;;  %v994_v46 = vmul.f32 %v6858_v16, %v978_v40 }
 0x15c   : > { %5302 = vmatmul.mubr.bf16.gmra.mrb[4].mxu0 %v6911_v11  ;;  %5338 = vmatmul.mubr.bf16.gmra.mrb[4].mxu1 %v6911_v11  ;;  %v6096_v49 = vpop.eup %6095  ;;  %v1011_v50 = vadd.f32 %v6865_v22, %v995_v47  ;;  %v981_v51 = vmul.f32 %v6094_v42, %v6709_v57 }
 0x15d   : > { %5305 = vmatprep.mubr.msk.bf16.mxu0 %vm6518_vm1, %v9641_v14  ;;  %5341 = vmatprep.mubr.msk.bf16.mxu1 %vm6518_vm1, %v9641_v14  ;;  %v1010_v60 = vadd.f32 %v6865_v22, %v994_v46  ;;  %v980_v23 = vmul.f32 %v6096_v49, %v6712_v58 }
 0x15e   : > { %5358 = vmatpush3.bf16.msra.mxu0 %v6914_v13  ;;  %v997_v57 = vmul.f32 %v6858_v16, %v981_v51 }
 0x15f   : > { %5359 = vmatprep.subr.bf16.mxu0 %v9641_v14  ;;  %v6979_v31 = vpack.c.bf16 %v1011_v50, %v1010_v60  ;;  %v996_v58 = vmul.f32 %v6858_v16, %v980_v23 }
 0x160   : > { %v1013_v1 = vadd.f32 %v6865_v22, %v997_v57 }
 0x161   : > { %v1012_v16 = vadd.f32 %v6865_v22, %v996_v58  ;;  %v7032_v22 = vld [vmem:[%s9626_s4] ss:$0 sm:$0xff] }
 0x162   : > { %5360 = vmatpush3.bf16.msra.mxu0 %v6933_v32 }
 0x163   : > { %5361 = vmatprep.subr.bf16.mxu0 %v9641_v14  ;;  %v7004_v5 = vpack.c.bf16 %v1013_v1, %v1012_v16 }
 0x164   : > { %5306 = vmatmul.mubr.bf16.gmra.mrb[8].mxu0 %v6945_v41  ;;  %5342 = vmatmul.mubr.bf16.gmra.mrb[8].mxu1 %v6945_v41 }
 0x165   : > { %5309 = vmatprep.mubr.msk.bf16.mxu0 %vm6518_vm1, %v9641_v14  ;;  %5345 = vmatprep.mubr.msk.bf16.mxu1 %vm6518_vm1, %v9641_v14 }
 0x166   : > { %5362 = vmatpush3.bf16.msra.mxu0 %v6948_v30 }
 0x167   : > { %5363 = vmatprep.subr.bf16.mxu0 %v9641_v14 }
 0x16a   : > { %5364 = vmatpush3.bf16.msra.mxu0 %v6967_v52 }
 0x16b   : > { %5365 = vmatprep.subr.bf16.mxu0 %v9641_v14 }
 0x16c   : > { %5310 = vmatmul.mubr.bf16.gmra.mrb[12].mxu0 %v6979_v31  ;;  %5346 = vmatmul.mubr.bf16.gmra.mrb[12].mxu1 %v6979_v31 }
 0x16d   : > { %5313 = vmatprep.mubr.msk.bf16.mxu0 %vm6518_vm1, %v9641_v14  ;;  %5349 = vmatprep.mubr.msk.bf16.mxu1 %vm6518_vm1, %v9641_v14 }
 0x16e   : > { %5366 = vmatpush3.bf16.msra.mxu0 %v6982_v62 }
 0x16f   : > { %5367 = vmatprep.subr.bf16.mxu0 %v9641_v14 }
 0x172   : > { %5368 = vmatpush3.bf16.msra.mxu0 %v7000_v3 }
 0x173   : > { %5419 = vmatprep.subr.bf16.mxu0 %v9641_v14 }
 0x174   : > { %5314 = vmatmul.mubr.bf16.gmra.mrb[16].mxu0 %v7004_v5  ;;  %5350 = vmatmul.mubr.bf16.gmra.mrb[16].mxu1 %v7004_v5 }
 0x175   : > { %5369 = vmatprep.mubr.msk.bf16.mxu0 %vm6518_vm1, %v9641_v14  ;;  %5399 = vmatprep.mubr.msk.bf16.mxu1 %vm6518_vm1, %v9641_v14 }
 0x17c   : > { %5370 = vmatmul.mubr.bf16.vlgmr.msra.gmra.mrb[20].mxu0 %v6879_v53 }
 0x17d   : > { %5373 = vmatprep.mubr.msk.bf16.mxu0 %vm6518_vm1, %v9641_v14 }
 0x184   : > { %5374 = vmatmul.mubr.bf16.gmra.mrb[24].mxu0 %v6911_v11 }
 0x185   : > { %5377 = vmatprep.mubr.msk.bf16.mxu0 %vm6518_vm1, %v9641_v14 }
 0x18c   : > { %5378 = vmatmul.mubr.bf16.gmra.mrb[28].mxu0 %v6945_v41 }
 0x18d   : > { %5381 = vmatprep.mubr.msk.bf16.mxu0 %vm6518_vm1, %v9641_v14 }
 0x194   : > { %5382 = vmatmul.mubr.bf16.gmra.mrb[32].mxu0 %v6979_v31 }
 0x195   : > { %5385 = vmatprep.mubr.msk.bf16.mxu0 %vm6518_vm1, %v9641_v14 }
 0x19c   : > { %5386 = vmatmul.mubr.bf16.gmra.mrb[36].mxu0 %v7004_v5 }
 0x19d   : > { %5429 = vmatprep.mubr.msk.bf16.mxu0 %vm6518_vm1, %v9641_v14 }
 0x227   : > { %v1059_v7 = vpop.f32.mrb[0].mxu0  ;;  %v1148_v9 = vpop.f32.mrb[0].mxu1 }
 0x228   : > { %v1060_v39 = vadd.f32 %v7032_v22, %v1059_v7  ;;  %v5299_v18 = vpop.f32.mrb[1].mxu0  ;;  %v5335_v20 = vpop.f32.mrb[1].mxu1  ;;  %v1149_v25 = vadd.f32 %v7037_v8, %v1148_v9 }
 0x229   : > { %v1062_v38 = vpop.f32.mrb[2].mxu0  ;;  %v1151_v24 = vpop.f32.mrb[2].mxu1 }
 0x22a   : > { %v1063_v26 = vadd.f32 %v7032_v22, %v1062_v38  ;;  %v1152_v28 = vadd.f32 %v7037_v8, %v1151_v24  ;;  %v5300_v33 = vpop.f32.mrb[3].mxu0  ;;  %v5336_v34 = vpop.f32.mrb[3].mxu1  ;;  %v7043_v36 = vmul.f32 0.125, %v1060_v39 }
 0x22c   : > { %v7045_v40 = vmul.f32 0.125, %v1063_v26  ;;  %v1271_v47 = vpack.c.bf16 %v1152_v28, %v1149_v25 }
 0x22e   : > { %v1266_v42 = vpack.c.bf16 %v7045_v40, %v7043_v36  ;;  %v1293_v44 = vsel %vm1276_vm2, %v1271_v47, 0  ;;  %v582_v36 = vld [vmem:[%s9625_s3 + $0xa0] sm:$0xff]  ;;  %v583_v40 = vld [vmem:[%s9625_s3 + $0xa8] sm:$0xff] }
 0x22f   : > { %v1067_v48 = vpop.f32.mrb[4].mxu0  ;;  %v1156_v46 = vpop.f32.mrb[4].mxu1  ;;  %5390 = vmatpush3.bf16.xpose.msra.mxu1 %v1293_v44 }
 0x230   : > { %v1068_v49 = vadd.f32 %v7032_v22, %v1067_v48  ;;  %v5303_v50 = vpop.f32.mrb[5].mxu0  ;;  %v5339_v51 = vpop.f32.mrb[5].mxu1  ;;  %5391 = vmatprep.subr.bf16.mxu1 %v9641_v14  ;;  %v1157_v60 = vadd.f32 %v7037_v8, %v1156_v46 }
 0x231   : > { %v1070_v55 = vpop.f32.mrb[6].mxu0  ;;  %v1159_v56 = vpop.f32.mrb[6].mxu1 }
 0x232   : > { %v1071_v23 = vadd.f32 %v7032_v22, %v1070_v55  ;;  %v1160_v57 = vadd.f32 %v7037_v8, %v1159_v56  ;;  %v5304_v63 = vpop.f32.mrb[7].mxu0  ;;  %v5340_v0 = vpop.f32.mrb[7].mxu1  ;;  %v7055_v58 = vmul.f32 0.125, %v1068_v49 }
 0x234   : > { %v7057_v1 = vmul.f32 0.125, %v1071_v23  ;;  %v1272_v16 = vpack.c.bf16 %v1160_v57, %v1157_v60 }
 0x236   : > { %v1267_v7 = vpack.c.bf16 %v7057_v1, %v7055_v58  ;;  %v1296_v9 = vsel %vm1276_vm2, %v1272_v16, 0  ;;  %v586_v58 = vld [vmem:[%s9625_s3 + $0xc0] sm:$0xff]  ;;  %v587_v1 = vld [vmem:[%s9625_s3 + $0xc8] sm:$0xff] }
 0x237   : > { %v1075_v39 = vpop.f32.mrb[8].mxu0  ;;  %v1164_v18 = vpop.f32.mrb[8].mxu1  ;;  %5392 = vmatpush3.bf16.xpose.msra.mxu1 %v1296_v9 }
 0x238   : > { %v1076_v20 = vadd.f32 %v7032_v22, %v1075_v39  ;;  %v5307_v38 = vpop.f32.mrb[9].mxu0  ;;  %v5343_v24 = vpop.f32.mrb[9].mxu1  ;;  %5393 = vmatprep.subr.bf16.mxu1 %v9641_v14  ;;  %v1165_v28 = vadd.f32 %v7037_v8, %v1164_v18 }
 0x239   : > { %v1078_v25 = vpop.f32.mrb[10].mxu0  ;;  %v1167_v26 = vpop.f32.mrb[10].mxu1 }
 0x23a   : > { %v1079_v33 = vadd.f32 %v7032_v22, %v1078_v25  ;;  %v1168_v34 = vadd.f32 %v7037_v8, %v1167_v26  ;;  %v5308_v47 = vpop.f32.mrb[11].mxu0  ;;  %v5344_v44 = vpop.f32.mrb[11].mxu1  ;;  %v7067_v48 = vmul.f32 0.125, %v1076_v20 }
 0x23c   : > { %v7069_v46 = vmul.f32 0.125, %v1079_v33  ;;  %v1273_v49 = vpack.c.bf16 %v1168_v34, %v1165_v28 }
 0x23e   : > { %v1268_v50 = vpack.c.bf16 %v7069_v46, %v7067_v48  ;;  %v1299_v51 = vsel %vm1276_vm2, %v1273_v49, 0  ;;  %v590_v48 = vld [vmem:[%s9625_s3 + $0xe0] sm:$0xff]  ;;  %v591_v46 = vld [vmem:[%s9625_s3 + $0xe8] sm:$0xff] }
 0x23f   : > { %v1083_v55 = vpop.f32.mrb[12].mxu0  ;;  %v1172_v56 = vpop.f32.mrb[12].mxu1  ;;  %5394 = vmatpush3.bf16.xpose.msra.mxu1 %v1299_v51 }
 0x240   : > { %v1084_v60 = vadd.f32 %v7032_v22, %v1083_v55  ;;  %v5311_v23 = vpop.f32.mrb[13].mxu0  ;;  %v5347_v57 = vpop.f32.mrb[13].mxu1  ;;  %5395 = vmatprep.subr.bf16.mxu1 %v9641_v14  ;;  %v1173_v16 = vadd.f32 %v7037_v8, %v1172_v56 }
 0x241   : > { %v1086_v63 = vpop.f32.mrb[14].mxu0  ;;  %v1175_v0 = vpop.f32.mrb[14].mxu1 }
 0x242   : > { %v1087_v9 = vadd.f32 %v7032_v22, %v1086_v63  ;;  %v1176_v39 = vadd.f32 %v7037_v8, %v1175_v0  ;;  %v5312_v18 = vpop.f32.mrb[15].mxu0  ;;  %v5348_v20 = vpop.f32.mrb[15].mxu1  ;;  %v7079_v38 = vmul.f32 0.125, %v1084_v60 }
 0x243   : > { %v7101_v20 = vld [vmem:[%s9630_s8] ss:$0 sm:$0xff] }
 0x244   : > { %v7081_v24 = vmul.f32 0.125, %v1087_v9  ;;  %v1274_v25 = vpack.c.bf16 %v1176_v39, %v1173_v16 }
 0x246   : > { %v1269_v26 = vpack.c.bf16 %v7081_v24, %v7079_v38  ;;  %v1302_v28 = vsel %vm1276_vm2, %v1274_v25, 0 }
 0x247   : > { %v1091_v33 = vpop.f32.mrb[16].mxu0  ;;  %v1180_v34 = vpop.f32.mrb[16].mxu1  ;;  %5396 = vmatpush3.bf16.xpose.msra.mxu1 %v1302_v28  ;;  %v578_v28 = vld [vmem:[%s9625_s3 + $0x80] sm:$0xff] }
 0x248   : > { %v1092_v47 = vadd.f32 %v7032_v22, %v1091_v33  ;;  %v5315_v44 = vpop.f32.mrb[17].mxu0  ;;  %v5351_v49 = vpop.f32.mrb[17].mxu1  ;;  %5397 = vmatprep.subr.bf16.mxu1 %v9641_v14  ;;  %v1181_v56 = vadd.f32 %v7037_v8, %v1180_v34  ;;  %v579_v33 = vld [vmem:[%s9625_s3 + $0x88] sm:$0xff] }
 0x249   : > { %v1094_v51 = vpop.f32.mrb[18].mxu0  ;;  %v1183_v55 = vpop.f32.mrb[18].mxu1 }
 0x24a   : > { %v1095_v60 = vadd.f32 %v7032_v22, %v1094_v51  ;;  %v1184_v23 = vadd.f32 %v7037_v8, %v1183_v55  ;;  %v5316_v57 = vpop.f32.mrb[19].mxu0  ;;  %v5352_v63 = vpop.f32.mrb[19].mxu1  ;;  %v7091_v0 = vmul.f32 0.125, %v1092_v47  ;;  %v7112_v51 = vpack.c.bf16 %v579_v33, %v578_v28  ;;  %v580_v55 = vld [vmem:[%s9625_s3 + $0x90] sm:$0xff]  ;;  %v585_v28 = vld [vmem:[%s9625_s3 + $0xb8] sm:$0xff] }
 0x24c   : > { %v7093_v16 = vmul.f32 0.125, %v1095_v60  ;;  %v1275_v9 = vpack.c.bf16 %v1184_v23, %v1181_v56  ;;  %9753 = vst [vmem:[#allocation21_spill] sm:$0xff] %v7112_v51  ;;  %v581_v56 = vld [vmem:[%s9625_s3 + $0x98] sm:$0xff] }
 0x24d   : > { %v7128_v57 = vpack.c.bf16 %v581_v56, %v580_v55 }
 0x24e   : > { %v1270_v39 = vpack.c.bf16 %v7093_v16, %v7091_v0  ;;  %v1305_v18 = vsel %vm1276_vm2, %v1275_v9, 0  ;;  %v676_v0 = vld [vmem:[%s9629_s7 + $0x90] sm:$0xff]  ;;  %v677_v16 = vld [vmem:[%s9629_s7 + $0x98] sm:$0xff] }
 0x24f   : > { %v1227_v22 = vpop.f32.mrb[20].mxu0  ;;  %5398 = vmatpush3.bf16.xpose.msra.mxu1 %v1305_v18  ;;  %9754 = vst [vmem:[#allocation22_spill] sm:$0xff] %v7128_v57 }
 0x250   : > { %v5371_v8 = vpop.f32.mrb[21].mxu0  ;;  %5449 = vmatprep.subr.bf16.mxu1 %v9641_v14  ;;  %v1228_v34 = vadd.f32 %v7101_v20, %v1227_v22 }
 0x251   : > { %v1230_v25 = vpop.f32.mrb[22].mxu0  ;;  %v7140_v8 = vpack.c.bf16 %v583_v40, %v582_v36 }
 0x252   : > { %v1231_v47 = vadd.f32 %v7101_v20, %v1230_v25  ;;  %v5372_v44 = vpop.f32.mrb[23].mxu0  ;;  %v584_v25 = vld [vmem:[%s9625_s3 + $0xb0] sm:$0xff] }
 0x253   : > { %9755 = vst [vmem:[#allocation23_spill] sm:$0xff] %v7140_v8 }
 0x254   : > { %v1487_v49 = vpack.c.bf16 %v1231_v47, %v1228_v34  ;;  %v7157_v47 = vpack.c.bf16 %v585_v28, %v584_v25  ;;  %v7198_v28 = vpack.c.bf16 %v591_v46, %v590_v48  ;;  %v679_v48 = vld [vmem:[%s9629_s7 + $0xa8] sm:$0xff] }
 0x256   : > { %5400 = vmatmul.mubr.msk.bf16.vlgmr.msra.gmra.mrb[20].mxu1 %vm1276_vm2, %v1266_v42  ;;  %5420 = vmatpush3.bf16.msra.mxu0 %v1487_v49  ;;  %9756 = vst [vmem:[#allocation24_spill] sm:$0xff] %v7157_v47  ;;  %9759 = vst [vmem:[#allocation27_spill] sm:$0xff] %v7198_v28 }
 0x257   : > { %v1235_v60 = vpop.f32.mrb[24].mxu0  ;;  %5403 = vmatprep.mubr.msk.bf16.mxu1 %vm6518_vm1, %v9641_v14  ;;  %5421 = vmatprep.subr.bf16.mxu0 %v9641_v14 }
 0x258   : > { %v5375_v23 = vpop.f32.mrb[25].mxu0  ;;  %5450 = vmatpush3.bf16.msra.mxu1 %v7112_v51  ;;  %v1236_v42 = vadd.f32 %v7101_v20, %v1235_v60  ;;  %v7169_v60 = vpack.c.bf16 %v587_v1, %v586_v58  ;;  %v6519_v1 = vmov 65535  }
 0x259   : > { %v1238_v63 = vpop.f32.mrb[26].mxu0  ;;  %5451 = vmatprep.subr.bf16.mxu1 %v9641_v14  ;;  %v588_v23 = vld [vmem:[%s9625_s3 + $0xd0] sm:$0xff] }
 0x25a   : > { %v1239_v9 = vadd.f32 %v7101_v20, %v1238_v63  ;;  %v5376_v18 = vpop.f32.mrb[27].mxu0  ;;  %9757 = vst [vmem:[#allocation25_spill] sm:$0xff] %v7169_v60  ;;  %v589_v63 = vld [vmem:[%s9625_s3 + $0xd8] sm:$0xff] }
 0x25c   : > { %v1488_v22 = vpack.c.bf16 %v1239_v9, %v1236_v42  ;;  %5452 = vmatpush3.bf16.msra.mxu1 %v7128_v57  ;;  %v7186_v42 = vpack.c.bf16 %v589_v63, %v588_v23 }
 0x25d   : > { %5453 = vmatprep.subr.bf16.mxu1 %v9641_v14 }
 0x25e   : > { %5404 = vmatmul.mubr.msk.bf16.gmra.mrb[24].mxu1 %vm1276_vm2, %v1267_v7  ;;  %5422 = vmatpush3.bf16.msra.mxu0 %v1488_v22  ;;  %9758 = vst [vmem:[#allocation26_spill] sm:$0xff] %v7186_v42 }
 0x25f   : > { %v1243_v33 = vpop.f32.mrb[28].mxu0  ;;  %5407 = vmatprep.mubr.msk.bf16.mxu1 %vm6518_vm1, %v9641_v14  ;;  %5423 = vmatprep.subr.bf16.mxu0 %v9641_v14 }
 0x260   : > { %v5379_v34 = vpop.f32.mrb[29].mxu0  ;;  %5454 = vmatpush3.bf16.msra.mxu1 %v7140_v8  ;;  %v1244_v7 = vadd.f32 %v7101_v20, %v1243_v33  ;;  %v592_v33 = vld [vmem:[%s9625_s3 + $0xf0] sm:$0xff] }
 0x261   : > { %v1246_v44 = vpop.f32.mrb[30].mxu0  ;;  %5455 = vmatprep.subr.bf16.mxu1 %v9641_v14  ;;  %v593_v34 = vld [vmem:[%s9625_s3 + $0xf8] sm:$0xff] }
 0x262   : > { %v1247_v49 = vadd.f32 %v7101_v20, %v1246_v44  ;;  %v5380_v55 = vpop.f32.mrb[31].mxu0 }
 0x264   : > { %v1489_v56 = vpack.c.bf16 %v1247_v49, %v1244_v7  ;;  %5456 = vmatpush3.bf16.msra.mxu1 %v7157_v47  ;;  %v1509_v7 = vsel %vm1507_vm3, 4294967295, %v6519_v1  ;;  %v7215_v49 = vpack.c.bf16 %v593_v34, %v592_v33  ;;  %v683_v33 = vld [vmem:[%s9629_s7 + $0xc8] sm:$0xff]  ;;  %vm1418_vm3 = vcmask 626688  }
 0x265   : > { %5457 = vmatprep.subr.bf16.mxu1 %v9641_v14 }
 0x266   : > { %5408 = vmatmul.mubr.msk.bf16.gmra.mrb[28].mxu1 %vm1276_vm2, %v1268_v50  ;;  %5424 = vmatpush3.bf16.msra.mxu0 %v1489_v56  ;;  %9760 = vst [vmem:[#allocation28_spill] sm:$0xff] %v7215_v49  ;;  %v7220_v56 = vsel %vm1508_vm4, %v1509_v7, 0  ;;  %v686_v7 = vld [vmem:[%s9629_s7 + $0xe0] sm:$0xff] }
 0x267   : > { %v1251_v36 = vpop.f32.mrb[32].mxu0  ;;  %5411 = vmatprep.mubr.msk.bf16.mxu1 %vm6518_vm1, %v9641_v14  ;;  %5425 = vmatprep.subr.bf16.mxu0 %v9641_v14  ;;  %9761 = vst [vmem:[#allocation29_spill] sm:$0xff] %v7220_v56 }
 0x268   : > { %v5383_v40 = vpop.f32.mrb[33].mxu0  ;;  %5458 = vmatpush3.bf16.msra.mxu1 %v7169_v60  ;;  %v1252_v50 = vadd.f32 %v7101_v20, %v1251_v36  ;;  %v675_v36 = vld [vmem:[%s9629_s7 + $0x88] sm:$0xff] }
 0x269   : > { %v1254_v9 = vpop.f32.mrb[34].mxu0  ;;  %5459 = vmatprep.subr.bf16.mxu1 %v9641_v14 }
 0x26a   : > { %v1255_v18 = vadd.f32 %v7101_v20, %v1254_v9  ;;  %v5384_v22 = vpop.f32.mrb[35].mxu0  ;;  %v678_v9 = vld [vmem:[%s9629_s7 + $0xa0] sm:$0xff] }
 0x26b   : > { %v7260_v46 = vpack.c.bf16 %v679_v48, %v678_v9 }
 0x26c   : > { %v1490_v25 = vpack.c.bf16 %v1255_v18, %v1252_v50  ;;  %5460 = vmatpush3.bf16.msra.mxu1 %v7186_v42  ;;  %v680_v50 = vld [vmem:[%s9629_s7 + $0xb0] sm:$0xff]  ;;  %v681_v18 = vld [vmem:[%s9629_s7 + $0xb8] sm:$0xff] }
 0x26d   : > { %5461 = vmatprep.subr.bf16.mxu1 %v9641_v14  ;;  %9764 = vst [vmem:[#allocation32_spill] sm:$0xff] %v7260_v46  ;;  %v7273_v22 = vpack.c.bf16 %v681_v18, %v680_v50 }
 0x26e   : > { %5412 = vmatmul.mubr.msk.bf16.gmra.mrb[32].mxu1 %vm1276_vm2, %v1269_v26  ;;  %5426 = vmatpush3.bf16.msra.mxu0 %v1490_v25  ;;  %v682_v25 = vld [vmem:[%s9629_s7 + $0xc0] sm:$0xff] }
 0x26f   : > { %v1259_v44 = vpop.f32.mrb[36].mxu0  ;;  %5415 = vmatprep.mubr.msk.bf16.mxu1 %vm6518_vm1, %v9641_v14  ;;  %5427 = vmatprep.subr.bf16.mxu0 %v9641_v14  ;;  %9765 = vst [vmem:[#allocation33_spill] sm:$0xff] %v7273_v22  ;;  %v7283_v34 = vpack.c.bf16 %v683_v33, %v682_v25 }
 0x270   : > { %v5387_v58 = vpop.f32.mrb[37].mxu0  ;;  %5462 = vmatpush3.bf16.msra.mxu1 %v7198_v28  ;;  %v1260_v38 = vadd.f32 %v7101_v20, %v1259_v44  ;;  %v684_v44 = vld [vmem:[%s9629_s7 + $0xd0] sm:$0xff] }
 0x271   : > { %v1262_v55 = vpop.f32.mrb[38].mxu0  ;;  %5463 = vmatprep.subr.bf16.mxu1 %v9641_v14  ;;  %9766 = vst [vmem:[#allocation34_spill] sm:$0xff] %v7283_v34  ;;  %v685_v58 = vld [vmem:[%s9629_s7 + $0xd8] sm:$0xff] }
 0x272   : > { %v1263_v24 = vadd.f32 %v7101_v20, %v1262_v55  ;;  %v5388_v26 = vpop.f32.mrb[39].mxu0  ;;  %v674_v20 = vld [vmem:[%s9629_s7 + $0x80] sm:$0xff]  ;;  %v7296_v1 = vpack.c.bf16 %v685_v58, %v684_v44  ;;  %v687_v55 = vld [vmem:[%s9629_s7 + $0xe8] sm:$0xff] }
 0x273   : > { %v7238_v40 = vpack.c.bf16 %v675_v36, %v674_v20  ;;  %v689_v26 = vld [vmem:[%s9629_s7 + $0xf8] sm:$0xff] }
 0x274   : > { %v1491_v23 = vpack.c.bf16 %v1263_v24, %v1260_v38  ;;  %5464 = vmatpush3.bf16.msra.mxu1 %v7215_v49  ;;  %9767 = vst [vmem:[#allocation35_spill] sm:$0xff] %v7296_v1  ;;  %v7306_v38 = vpack.c.bf16 %v687_v55, %v686_v7  ;;  %v688_v24 = vld [vmem:[%s9629_s7 + $0xf0] sm:$0xff] }
 0x275   : > { %5521 = vmatprep.subr.bf16.mxu1 %v9641_v14  ;;  %9762 = vst [vmem:[#allocation30_spill] sm:$0xff] %v7238_v40 }
 0x276   : > { %v1512_v63 = vand.u32 %v7220_v56, %v1491_v23  ;;  %5416 = vmatmul.mubr.msk.bf16.gmra.mrb[36].mxu1 %vm1276_vm2, %v1270_v39  ;;  %v7250_v39 = vpack.c.bf16 %v677_v16, %v676_v0  ;;  %9768 = vst [vmem:[#allocation36_spill] sm:$0xff] %v7306_v38  ;;  %v7319_v23 = vpack.c.bf16 %v689_v26, %v688_v24 }
 0x277   : > { %5465 = vmatprep.mubr.msk.bf16.mxu1 %vm6518_vm1, %v9641_v14 }
 0x278   : > { %5428 = vmatpush3.bf16.msra.mxu0 %v1512_v63  ;;  %9763 = vst [vmem:[#allocation31_spill] sm:$0xff] %v7250_v39  ;;  %9769 = vst [vmem:[#allocation37_spill] sm:$0xff] %v7319_v23  ;;  %v835_v63 = vlaneseq }
 0x279   : > { %5485 = vmatprep.subr.bf16.mxu0 %v9641_v14 }
 0x27a   : > { %v7342_v20 = vshrl.u32 %v835_v63, 7  ;;  %v7344_v36 = vand.u32 127, %v835_v63 }
 0x27c   : > { %v7347_v0 = vadd.s32 8, %v7342_v20  ;;  %vm848_vm5 = vcmp.le.s32.totalorder %v7344_v36, %v7342_v20  ;;  %v7361_v25 = vadd.s32 16, %v7342_v20  ;;  %v7371_v7 = vadd.s32 24, %v7342_v20 }
 0x27e   : > { %5466 = vmatmul.mubr.bf16.vlgmr.msra.gmra.mrb[40].mxu1 %v6879_v53  ;;  %vm849_vm7 = vcmp.le.s32.totalorder %v7344_v36, %v7347_v0  ;;  %vm850_vm8 = vcmp.le.s32.totalorder %v7344_v36, %v7361_v25  ;;  %vm851_vm9 = vcmp.le.s32.totalorder %v7344_v36, %v7371_v7 }
 0x27f   : > { %5469 = vmatprep.mubr.msk.bf16.mxu1 %vm6518_vm1, %v9641_v14  ;;  %5522 = vmatpush3.bf16.msra.mxu1 %v7238_v40 }
 0x280   : > { %5523 = vmatprep.subr.bf16.mxu1 %v9641_v14 }
 0x283   : > { %5524 = vmatpush3.bf16.msra.mxu1 %v7250_v39 }
 0x284   : > { %5525 = vmatprep.subr.bf16.mxu1 %v9641_v14 }
 0x286   : > { %5470 = vmatmul.mubr.bf16.gmra.mrb[44].mxu1 %v6911_v11 }
 0x287   : > { %5473 = vmatprep.mubr.msk.bf16.mxu1 %vm6518_vm1, %v9641_v14  ;;  %5526 = vmatpush3.bf16.msra.mxu1 %v7260_v46 }
 0x288   : > { %5527 = vmatprep.subr.bf16.mxu1 %v9641_v14 }
 0x28b   : > { %5528 = vmatpush3.bf16.msra.mxu1 %v7273_v22 }
 0x28c   : > { %5529 = vmatprep.subr.bf16.mxu1 %v9641_v14 }
 0x28e   : > { %5474 = vmatmul.mubr.bf16.gmra.mrb[48].mxu1 %v6945_v41 }
 0x28f   : > { %5477 = vmatprep.mubr.msk.bf16.mxu1 %vm6518_vm1, %v9641_v14  ;;  %5530 = vmatpush3.bf16.msra.mxu1 %v7283_v34  ;;  %v7433_v34 = vadd.s32 64, %v7342_v20 }
 0x290   : > { %5531 = vmatprep.subr.bf16.mxu1 %v9641_v14 }
 0x291   : > { %vm856_vm14 = vcmp.le.s32.totalorder %v7344_v36, %v7433_v34 }
 0x293   : > { %5532 = vmatpush3.bf16.msra.mxu1 %v7296_v1 }
 0x294   : > { %5533 = vmatprep.subr.bf16.mxu1 %v9641_v14 }
 0x296   : > { %5478 = vmatmul.mubr.bf16.gmra.mrb[52].mxu1 %v6979_v31 }
 0x297   : > { %5481 = vmatprep.mubr.msk.bf16.mxu1 %vm6518_vm1, %v9641_v14  ;;  %5534 = vmatpush3.bf16.msra.mxu1 %v7306_v38 }
 0x298   : > { %5535 = vmatprep.subr.bf16.mxu1 %v9641_v14 }
 0x29b   : > { %5536 = vmatpush3.bf16.msra.mxu1 %v7319_v23 }
 0x29c   : > { %5587 = vmatprep.subr.bf16.mxu1 %v9641_v14 }
 0x29e   : > { %5482 = vmatmul.mubr.bf16.gmra.mrb[56].mxu1 %v7004_v5 }
 0x29f   : > { %5537 = vmatprep.mubr.msk.bf16.mxu1 %vm6518_vm1, %v9641_v14 }
 0x2a6   : > { %5538 = vmatmul.mubr.bf16.vlgmr.msra.gmra.mrb[60].mxu1 %v6879_v53 }
 0x2a7   : > { %5541 = vmatprep.mubr.msk.bf16.mxu1 %vm6518_vm1, %v9641_v14 }
 0x2ae   : > { %5542 = vmatmul.mubr.bf16.gmra.mrb[64].mxu1 %v6911_v11 }
 0x2af   : > { %5545 = vmatprep.mubr.msk.bf16.mxu1 %vm6518_vm1, %v9641_v14 }
 0x2b6   : > { %5546 = vmatmul.mubr.bf16.gmra.mrb[68].mxu1 %v6945_v41 }
 0x2b7   : > { %5549 = vmatprep.mubr.msk.bf16.mxu1 %vm6518_vm1, %v9641_v14 }
 0x2be   : > { %5550 = vmatmul.mubr.bf16.gmra.mrb[72].mxu1 %v6979_v31 }
 0x2bf   : > { %5553 = vmatprep.mubr.msk.bf16.mxu1 %vm6518_vm1, %v9641_v14 }
 0x2c6   : > { %5554 = vmatmul.mubr.bf16.gmra.mrb[76].mxu1 %v7004_v5 }
 0x2c7   : > { %5597 = vmatprep.mubr.msk.bf16.mxu1 %vm6518_vm1, %v9641_v14  ;;  %v7409_v14 = vadd.s32 48, %v7342_v20 }
 0x2c9   : > { %vm854_vm12 = vcmp.le.s32.totalorder %v7344_v36, %v7409_v14 }
 0x329   : > { %v1341_v16 = vpop.f32.mrb[20].mxu1 }
 0x32a   : > { %v5401_v9 = vpop.f32.mrb[21].mxu1  ;;  %v7356_v48 = vsel %vm848_vm5, %v1341_v16, -inf }
 0x32b   : > { %v1344_v50 = vpop.f32.mrb[22].mxu1  ;;  %v1391_v18 = vsel %vm1390_vm6, %v7356_v48, -inf  ;;  %v7385_v9 = vadd.s32 32, %v7342_v20 }
 0x32c   : > { %1392 = vmax.xlane.f32.xlu0 %v1391_v18  ;;  %v5402_v33 = vpop.f32.mrb[23].mxu1  ;;  %v7366_v44 = vsel %vm849_vm7, %v1344_v50, -inf }
 0x32d   : > { %v1394_v58 = vsel %vm1390_vm6, %v7366_v44, -inf  ;;  %vm852_vm10 = vcmp.le.s32.totalorder %v7344_v36, %v7385_v9 }
 0x32e   : > { %1395 = vmax.xlane.f32.xlu1 %v1394_v58  ;;  %v7395_v58 = vadd.s32 40, %v7342_v20 }
 0x330   : > { %vm853_vm11 = vcmp.le.s32.totalorder %v7344_v36, %v7395_v58 }
 0x331   : > { %v1349_v55 = vpop.f32.mrb[24].mxu1 }
 0x332   : > { %v7380_v24 = vsel %vm850_vm8, %v1349_v55, -inf  ;;  %v5405_v26 = vpop.f32.mrb[25].mxu1 }
 0x333   : > { %v1352_v63 = vpop.f32.mrb[26].mxu1  ;;  %v1397_v16 = vsel %vm1390_vm6, %v7380_v24, -inf }
 0x334   : > { %v7390_v50 = vsel %vm851_vm9, %v1352_v63, -inf  ;;  %1398 = vmax.xlane.f32.xlu0 %v1397_v16  ;;  %v5406_v18 = vpop.f32.mrb[27].mxu1 }
 0x335   : > { %v1400_v33 = vsel %vm1390_vm6, %v7390_v50, -inf }
 0x336   : > { %1401 = vmax.xlane.f32.xlu1 %v1400_v33 }
 0x339   : > { %v1357_v55 = vpop.f32.mrb[28].mxu1 }
 0x33a   : > { %v7404_v26 = vsel %vm852_vm10, %v1357_v55, -inf  ;;  %v5409_v63 = vpop.f32.mrb[29].mxu1  ;;  %v7419_v55 = vadd.s32 56, %v7342_v20 }
 0x33b   : > { %v1360_v16 = vpop.f32.mrb[30].mxu1  ;;  %v1403_v18 = vsel %vm1390_vm6, %v7404_v26, -inf }
 0x33c   : > { %v7414_v33 = vsel %vm853_vm11, %v1360_v16, -inf  ;;  %1404 = vmax.xlane.f32.xlu0 %v1403_v18  ;;  %v5410_v23 = vpop.f32.mrb[31].mxu1  ;;  %vm855_vm13 = vcmp.le.s32.totalorder %v7344_v36, %v7419_v55 }
 0x33d   : > { %v1406_v38 = vsel %vm1390_vm6, %v7414_v33, -inf }
 0x33e   : > { %1407 = vmax.xlane.f32.xlu1 %v1406_v38 }
 0x341   : > { %v1365_v63 = vpop.f32.mrb[32].mxu1 }
 0x342   : > { %v7428_v16 = vsel %vm854_vm12, %v1365_v63, -inf  ;;  %v5413_v23 = vpop.f32.mrb[33].mxu1  ;;  %v7443_v63 = vadd.s32 72, %v7342_v20 }
 0x343   : > { %v1368_v18 = vpop.f32.mrb[34].mxu1  ;;  %v1409_v1 = vsel %vm1390_vm6, %v7428_v16, -inf }
 0x344   : > { %v7438_v38 = vsel %vm855_vm13, %v1368_v18, -inf  ;;  %1410 = vmax.xlane.f32.xlu0 %v1409_v1  ;;  %v5414_v22 = vpop.f32.mrb[35].mxu1  ;;  %vm857_vm15 = vcmp.le.s32.totalorder %v7344_v36, %v7443_v63 }
 0x345   : > { %v1412_v46 = vsel %vm1390_vm6, %v7438_v38, -inf }
 0x346   : > { %1413 = vmax.xlane.f32.xlu1 %v1412_v46 }
 0x349   : > { %v1373_v23 = vpop.f32.mrb[36].mxu1 }
 0x34a   : > { %v7452_v18 = vsel %vm856_vm14, %v1373_v23, -inf  ;;  %v5417_v22 = vpop.f32.mrb[37].mxu1  ;;  %v4878_v23 = vld [vmem:[%s9626_s4 + $0x1] ss:$0 sm:$0xff] }
 0x34b   : > { %v1376_v1 = vpop.f32.mrb[38].mxu1  ;;  %v1415_v39 = vsel %vm1390_vm6, %v7452_v18, -inf }
 0x34c   : > { %v7459_v46 = vsel %vm857_vm15, %v1376_v1, -inf  ;;  %1416 = vmax.xlane.f32.xlu0 %v1415_v39  ;;  %v5418_v40 = vpop.f32.mrb[39].mxu1 }
 0x34d   : > { %v1419_v49 = vsel %vm1418_vm3, %v7459_v46, -inf }
 0x34e   : > { %1420 = vmax.xlane.f32.xlu1 %v1419_v49 }
 0x351   : > { %v1652_v22 = vpop.f32.mrb[40].mxu1 }
 0x352   : > { %v1653_v28 = vadd.f32 %v4878_v23, %v1652_v22  ;;  %v5467_v42 = vpop.f32.mrb[41].mxu1 }
 0x353   : > { %v1655_v60 = vpop.f32.mrb[42].mxu1 }
 0x354   : > { %v1656_v47 = vadd.f32 %v4878_v23, %v1655_v60  ;;  %v5468_v8 = vpop.f32.mrb[43].mxu1  ;;  %v7466_v57 = vmul.f32 0.125, %v1653_v28 }
 0x356   : > { %v7468_v1 = vmul.f32 0.125, %v1656_v47 }
 0x359   : > { %v1660_v39 = vpop.f32.mrb[44].mxu1 }
 0x35a   : > { %v1661_v51 = vadd.f32 %v4878_v23, %v1660_v39  ;;  %v5471_v49 = vpop.f32.mrb[45].mxu1 }
 0x35b   : > { %v1663_v45 = vpop.f32.mrb[46].mxu1 }
 0x35c   : > { %v1664_v37 = vadd.f32 %v4878_v23, %v1663_v45  ;;  %v5472_v29 = vpop.f32.mrb[47].mxu1  ;;  %v7472_v21 = vmul.f32 0.125, %v1661_v51 }
 0x35e   : > { %v7474_v22 = vmul.f32 0.125, %v1664_v37 }
 0x361   : > { %v1668_v60 = vpop.f32.mrb[48].mxu1 }
 0x362   : > { %v1669_v42 = vadd.f32 %v4878_v23, %v1668_v60  ;;  %v5475_v47 = vpop.f32.mrb[49].mxu1 }
 0x363   : > { %v1671_v28 = vpop.f32.mrb[50].mxu1 }
 0x364   : > { %v1672_v12 = vadd.f32 %v4878_v23, %v1671_v28  ;;  %v5476_v6 = vpop.f32.mrb[51].mxu1  ;;  %v7478_v40 = vmul.f32 0.125, %v1669_v42 }
 0x366   : > { %v7480_v39 = vmul.f32 0.125, %v1672_v12 }
 0x369   : > { %v1676_v45 = vpop.f32.mrb[52].mxu1 }
 0x36a   : > { %v1677_v51 = vadd.f32 %v4878_v23, %v1676_v45  ;;  %v5479_v37 = vpop.f32.mrb[53].mxu1 }
 0x36b   : > { %v1679_v49 = vpop.f32.mrb[54].mxu1 }
 0x36c   : > { %v1680_v61 = vadd.f32 %v4878_v23, %v1679_v49  ;;  %v5480_v17 = vpop.f32.mrb[55].mxu1  ;;  %v7484_v8 = vmul.f32 0.125, %v1677_v51 }
 0x36e   : > { %v7486_v60 = vmul.f32 0.125, %v1680_v61  ;;  %v4880_v61 = vld [vmem:[%s9630_s8 + $0x1] ss:$0 sm:$0xff] }
 0x371   : > { %v1684_v42 = vpop.f32.mrb[56].mxu1 }
 0x372   : > { %v1685_v47 = vadd.f32 %v4878_v23, %v1684_v42  ;;  %v5483_v12 = vpop.f32.mrb[57].mxu1 }
 0x373   : > { %v1687_v28 = vpop.f32.mrb[58].mxu1 }
 0x374   : > { %v1688_v3 = vadd.f32 %v4878_v23, %v1687_v28  ;;  %v5484_v62 = vpop.f32.mrb[59].mxu1  ;;  %v7490_v29 = vmul.f32 0.125, %v1685_v47  ;;  %v9770_v23 = vmov 0.0  }
 0x376   : > { %v7492_v45 = vmul.f32 0.125, %v1688_v3 }
 0x379   : > { %v1820_v51 = vpop.f32.mrb[60].mxu1 }
 0x37a   : > { %v5539_v37 = vpop.f32.mrb[61].mxu1  ;;  %v1821_v6 = vadd.f32 %v4880_v61, %v1820_v51 }
 0x37b   : > { %v1823_v49 = vpop.f32.mrb[62].mxu1 }
 0x37c   : > { %v1824_v42 = vadd.f32 %v4880_v61, %v1823_v49  ;;  %v5540_v12 = vpop.f32.mrb[63].mxu1 }
 0x37e   : > { %v2077_v52 = vpack.c.bf16 %v1824_v42, %v1821_v6 }
 0x380   : > { %5588 = vmatpush3.bf16.msra.mxu1 %v2077_v52 }
 0x381   : > { %v1828_v62 = vpop.f32.mrb[64].mxu1  ;;  %5589 = vmatprep.subr.bf16.mxu1 %v9770_v23 }
 0x382   : > { %v5543_v3 = vpop.f32.mrb[65].mxu1  ;;  %v1829_v28 = vadd.f32 %v4880_v61, %v1828_v62 }
 0x383   : > { %v1831_v47 = vpop.f32.mrb[66].mxu1 }
 0x384   : > { %v1832_v30 = vadd.f32 %v4880_v61, %v1831_v47  ;;  %v5544_v17 = vpop.f32.mrb[67].mxu1 }
 0x386   : > { %v2078_v32 = vpack.c.bf16 %v1832_v30, %v1829_v28 }
 0x388   : > { %5590 = vmatpush3.bf16.msra.mxu1 %v2078_v32 }
 0x389   : > { %v1836_v13 = vpop.f32.mrb[68].mxu1  ;;  %5591 = vmatprep.subr.bf16.mxu1 %v9770_v23 }
 0x38a   : > { %v5547_v37 = vpop.f32.mrb[69].mxu1  ;;  %v1837_v51 = vadd.f32 %v4880_v61, %v1836_v13 }
 0x38b   : > { %v1839_v2 = vpop.f32.mrb[70].mxu1 }
 0x38c   : > { %v1840_v49 = vadd.f32 %v4880_v61, %v1839_v2  ;;  %v5548_v12 = vpop.f32.mrb[71].mxu1 }
 0x38e   : > { %v2079_v6 = vpack.c.bf16 %v1840_v49, %v1837_v51 }
 0x390   : > { %5592 = vmatpush3.bf16.msra.mxu1 %v2079_v6 }
 0x391   : > { %v1844_v52 = vpop.f32.mrb[72].mxu1  ;;  %5593 = vmatprep.subr.bf16.mxu1 %v9770_v23 }
 0x392   : > { %v5551_v42 = vpop.f32.mrb[73].mxu1  ;;  %v1845_v62 = vadd.f32 %v4880_v61, %v1844_v52 }
 0x393   : > { %v1847_v3 = vpop.f32.mrb[74].mxu1 }
 0x394   : > { %v1848_v47 = vadd.f32 %v4880_v61, %v1847_v3  ;;  %v5552_v17 = vpop.f32.mrb[75].mxu1 }
 0x396   : > { %v2080_v30 = vpack.c.bf16 %v1848_v47, %v1845_v62 }
 0x398   : > { %5594 = vmatpush3.bf16.msra.mxu1 %v2080_v30 }
 0x399   : > { %v1852_v32 = vpop.f32.mrb[76].mxu1  ;;  %5595 = vmatprep.subr.bf16.mxu1 %v9770_v23 }
 0x39a   : > { %v5555_v28 = vpop.f32.mrb[77].mxu1  ;;  %v1853_v13 = vadd.f32 %v4880_v61, %v1852_v32 }
 0x39b   : > { %v1855_v37 = vpop.f32.mrb[78].mxu1 }
 0x39c   : > { %v1856_v2 = vadd.f32 %v4880_v61, %v1855_v37  ;;  %v5556_v12 = vpop.f32.mrb[79].mxu1 }
 0x39e   : > { %v2081_v51 = vpack.c.bf16 %v1856_v2, %v1853_v13 }
 0x3a0   : > { %v2098_v49 = vand.u32 %v2081_v51, %v7220_v56 }
 0x3a2   : > { %5596 = vmatpush3.bf16.msra.mxu1 %v2098_v49 }
 0x3a3   : > { %5645 = vmatprep.subr.bf16.mxu1 %v9770_v23 }
 0x3b9   : > { %v1393_v6 = vpop.xlane.xlu0 %1392 }
 0x3ba   : > { %v1422_v52 = vsub.f32 %v7356_v48, %v1393_v6  ;;  %v626_v48 = vld [vmem:[%s9627_s5 + $0x80] sm:$0xff]  ;;  %v628_v6 = vld [vmem:[%s9627_s5 + $0x90] sm:$0xff] }
 0x3bb   : > { %v1396_v42 = vpop.xlane.xlu1 %1395 }
 0x3bc   : > { %v1432_v3 = vmul.f32 1.442695, %v1422_v52  ;;  %v1423_v62 = vsub.f32 %v7366_v44, %v1396_v42  ;;  %v627_v44 = vld [vmem:[%s9627_s5 + $0x88] sm:$0xff]  ;;  %v629_v52 = vld [vmem:[%s9627_s5 + $0x98] sm:$0xff] }
 0x3bd   : > { %v7520_v51 = vpack.c.bf16 %v627_v44, %v626_v48  ;;  %v632_v44 = vld [vmem:[%s9627_s5 + $0xb0] sm:$0xff] }
 0x3be   : > { %v1434_v47 = vmul.f32 1.442695, %v1423_v62  ;;  %6097 = vpow2.f32 %v1432_v3  ;;  %v7533_v62 = vpack.c.bf16 %v629_v52, %v628_v6  ;;  %v634_v6 = vld [vmem:[%s9627_s5 + $0xc0] sm:$0xff] }
 0x3bf   : > { %9771 = vst [vmem:[#allocation38_spill] sm:$0xff] %v7520_v51 }
 0x3c0   : > { %6099 = vpow2.f32 %v1434_v47  ;;  %9772 = vst [vmem:[#allocation39_spill] sm:$0xff] %v7533_v62  ;;  %v630_v47 = vld [vmem:[%s9627_s5 + $0xa0] sm:$0xff] }
 0x3c1   : > { %v1399_v17 = vpop.xlane.xlu0 %1398 }
 0x3c2   : > { %v1424_v61 = vsub.f32 %v7380_v24, %v1399_v17 }
 0x3c3   : > { %v1402_v30 = vpop.xlane.xlu1 %1401 }
 0x3c4   : > { %v1436_v32 = vmul.f32 1.442695, %v1424_v61  ;;  %v1425_v28 = vsub.f32 %v7390_v50, %v1402_v30 }
 0x3c6   : > { %v1438_v37 = vmul.f32 1.442695, %v1425_v28  ;;  %6101 = vpow2.f32 %v1436_v32 }
 0x3c8   : > { %6103 = vpow2.f32 %v1438_v37  ;;  %v7515_v13 = vpop.eup %6097 }
 0x3c9   : > { %v1405_v2 = vpop.xlane.xlu0 %1404 }
 0x3ca   : > { %v7517_v12 = vpop.eup %6099  ;;  %v1426_v24 = vsub.f32 %v7404_v26, %v1405_v2  ;;  %v633_v2 = vld [vmem:[%s9627_s5 + $0xb8] sm:$0xff] }
 0x3cb   : > { %v1482_v50 = vpack.c.bf16 %v7517_v12, %v7515_v13  ;;  %v1408_v49 = vpop.xlane.xlu1 %1407 }
 0x3cc   : > { %v1440_v42 = vmul.f32 1.442695, %v1426_v24  ;;  %v1427_v3 = vsub.f32 %v7414_v33, %v1408_v49  ;;  %v631_v33 = vld [vmem:[%s9627_s5 + $0xa8] sm:$0xff]  ;;  %v7566_v49 = vpack.c.bf16 %v633_v2, %v632_v44 }
 0x3cd   : > { %5430 = vmatmul.mubr.msk.bf16.vlgmr.msra.gmra.mrb[40].mxu0 %vm1390_vm6, %v1482_v50  ;;  %v7550_v28 = vpack.c.bf16 %v631_v33, %v630_v47 }
 0x3ce   : > { %v1442_v26 = vmul.f32 1.442695, %v1427_v3  ;;  %5486 = vmatpush3.bf16.msra.mxu0 %v7520_v51  ;;  %5433 = vmatprep.mubr.msk.bf16.mxu0 %vm6518_vm1, %v9770_v23  ;;  %6105 = vpow2.f32 %v1440_v42  ;;  %9774 = vst [vmem:[#allocation41_spill] sm:$0xff] %v7566_v49 }
 0x3cf   : > { %5487 = vmatprep.subr.bf16.mxu0 %v9770_v23  ;;  %9773 = vst [vmem:[#allocation40_spill] sm:$0xff] %v7550_v28 }
 0x3d0   : > { %6107 = vpow2.f32 %v1442_v26  ;;  %v7544_v17 = vpop.eup %6101 }
 0x3d1   : > { %v1411_v61 = vpop.xlane.xlu0 %1410 }
 0x3d2   : > { %v7546_v30 = vpop.eup %6103  ;;  %v1428_v32 = vsub.f32 %v7428_v16, %v1411_v61  ;;  %5488 = vmatpush3.bf16.msra.mxu0 %v7533_v62 }
 0x3d3   : > { %v1414_v37 = vpop.xlane.xlu1 %1413  ;;  %v1483_v48 = vpack.c.bf16 %v7546_v30, %v7544_v17  ;;  %5489 = vmatprep.subr.bf16.mxu0 %v9770_v23 }
 0x3d4   : > { %v1444_v24 = vmul.f32 1.442695, %v1428_v32  ;;  %v1429_v16 = vsub.f32 %v7438_v38, %v1414_v37  ;;  %v635_v38 = vld [vmem:[%s9627_s5 + $0xc8] sm:$0xff]  ;;  %v636_v32 = vld [vmem:[%s9627_s5 + $0xd0] sm:$0xff]  ;;  %v637_v37 = vld [vmem:[%s9627_s5 + $0xd8] sm:$0xff] }
 0x3d5   : > { %5434 = vmatmul.mubr.msk.bf16.gmra.mrb[44].mxu0 %vm1390_vm6, %v1483_v48  ;;  %v7581_v47 = vpack.c.bf16 %v635_v38, %v634_v6  ;;  %v7597_v2 = vpack.c.bf16 %v637_v37, %v636_v32 }
 0x3d6   : > { %v1446_v50 = vmul.f32 1.442695, %v1429_v16  ;;  %5490 = vmatpush3.bf16.msra.mxu0 %v7550_v28  ;;  %5437 = vmatprep.mubr.msk.bf16.mxu0 %vm6518_vm1, %v9770_v23  ;;  %6109 = vpow2.f32 %v1444_v24  ;;  %v638_v24 = vld [vmem:[%s9627_s5 + $0xe0] sm:$0xff] }
 0x3d7   : > { %5491 = vmatprep.subr.bf16.mxu0 %v9770_v23  ;;  %9775 = vst [vmem:[#allocation42_spill] sm:$0xff] %v7581_v47  ;;  %9776 = vst [vmem:[#allocation43_spill] sm:$0xff] %v7597_v2 }
 0x3d8   : > { %6111 = vpow2.f32 %v1446_v50  ;;  %v7575_v52 = vpop.eup %6105 }
 0x3d9   : > { %v1417_v42 = vpop.xlane.xlu0 %1416 }
 0x3da   : > { %v7577_v3 = vpop.eup %6107  ;;  %v1430_v26 = vsub.f32 %v7452_v18, %v1417_v42  ;;  %5492 = vmatpush3.bf16.msra.mxu0 %v7566_v49  ;;  %v640_v42 = vld [vmem:[%s9627_s5 + $0xf0] sm:$0xff] }
 0x3db   : > { %v1421_v33 = vpop.xlane.xlu1 %1420  ;;  %v1484_v61 = vpack.c.bf16 %v7577_v3, %v7575_v52  ;;  %5493 = vmatprep.subr.bf16.mxu0 %v9770_v23 }
 0x3dc   : > { %v1448_v48 = vmul.f32 1.442695, %v1430_v26  ;;  %v1431_v18 = vsub.f32 %v7459_v46, %v1421_v33  ;;  %v639_v46 = vld [vmem:[%s9627_s5 + $0xe8] sm:$0xff]  ;;  %v641_v26 = vld [vmem:[%s9627_s5 + $0xf8] sm:$0xff] }
 0x3dd   : > { %5438 = vmatmul.mubr.msk.bf16.gmra.mrb[48].mxu0 %vm1390_vm6, %v1484_v61  ;;  %v7611_v6 = vpack.c.bf16 %v639_v46, %v638_v24  ;;  %v7626_v33 = vpack.c.bf16 %v641_v26, %v640_v42 }
 0x3de   : > { %v1450_v44 = vmul.f32 1.442695, %v1431_v18  ;;  %5494 = vmatpush3.bf16.msra.mxu0 %v7581_v47  ;;  %5441 = vmatprep.mubr.msk.bf16.mxu0 %vm6518_vm1, %v9770_v23  ;;  %6113 = vpow2.f32 %v1448_v48 }
 0x3df   : > { %5495 = vmatprep.subr.bf16.mxu0 %v9770_v23  ;;  %9777 = vst [vmem:[#allocation44_spill] sm:$0xff] %v7611_v6  ;;  %9778 = vst [vmem:[#allocation45_spill] sm:$0xff] %v7626_v33 }
 0x3e0   : > { %6115 = vpow2.f32 %v1450_v44  ;;  %v7606_v16 = vpop.eup %6109 }
 0x3e2   : > { %v7608_v50 = vpop.eup %6111  ;;  %5496 = vmatpush3.bf16.msra.mxu0 %v7597_v2 }
 0x3e3   : > { %v1485_v38 = vpack.c.bf16 %v7608_v50, %v7606_v16  ;;  %5497 = vmatprep.subr.bf16.mxu0 %v9770_v23 }
 0x3e5   : > { %5442 = vmatmul.mubr.msk.bf16.gmra.mrb[52].mxu0 %vm1390_vm6, %v1485_v38 }
 0x3e6   : > { %5445 = vmatprep.mubr.msk.bf16.mxu0 %vm6518_vm1, %v9770_v23  ;;  %5498 = vmatpush3.bf16.msra.mxu0 %v7611_v6 }
 0x3e7   : > { %5499 = vmatprep.subr.bf16.mxu0 %v9770_v23 }
 0x3e8   : > { %v7629_v61 = vpop.eup %6113 }
 0x3ea   : > { %v7631_v32 = vpop.eup %6115  ;;  %5500 = vmatpush3.bf16.msra.mxu0 %v7626_v33 }
 0x3eb   : > { %v1486_v37 = vpack.c.bf16 %v7631_v32, %v7629_v61  ;;  %5557 = vmatprep.subr.bf16.mxu0 %v9770_v23 }
 0x3ed   : > { %5446 = vmatmul.mubr.msk.bf16.gmra.mrb[56].mxu0 %vm1390_vm6, %v1486_v37 }
 0x3ee   : > { %5501 = vmatprep.mubr.msk.bf16.mxu0 %vm6518_vm1, %v9770_v23 }
 0x3f5   : > { %5502 = vmatmul.mubr.bf16.vlgmr.msra.gmra.mrb[60].mxu0 %v6879_v53 }
 0x3f6   : > { %5505 = vmatprep.mubr.msk.bf16.mxu0 %vm6518_vm1, %v9770_v23 }
 0x3fd   : > { %5506 = vmatmul.mubr.bf16.gmra.mrb[64].mxu0 %v6911_v11 }
 0x3fe   : > { %5509 = vmatprep.mubr.msk.bf16.mxu0 %vm6518_vm1, %v9770_v23 }
 0x405   : > { %5510 = vmatmul.mubr.bf16.gmra.mrb[68].mxu0 %v6945_v41 }
 0x406   : > { %5513 = vmatprep.mubr.msk.bf16.mxu0 %vm6518_vm1, %v9770_v23 }
 0x40d   : > { %5514 = vmatmul.mubr.bf16.gmra.mrb[72].mxu0 %v6979_v31 }
 0x40e   : > { %5517 = vmatprep.mubr.msk.bf16.mxu0 %vm6518_vm1, %v9770_v23 }
 0x415   : > { %5518 = vmatmul.mubr.bf16.gmra.mrb[76].mxu0 %v7004_v5 }
 0x416   : > { %5567 = vmatprep.mubr.msk.bf16.mxu0 %vm6518_vm1, %v9770_v23 }
 0x4a0   : > { %v7655_v53 = vpop.f32.mrb[40].mxu0 }
 0x4a1   : > { %v5431_v11 = vpop.f32.mrb[41].mxu0 }
 0x4a2   : > { %v7657_v48 = vpop.f32.mrb[42].mxu0 }
 0x4a3   : > { %v5432_v18 = vpop.f32.mrb[43].mxu0 }
 0x4a8   : > { %v7659_v41 = vpop.f32.mrb[44].mxu0 }
 0x4a9   : > { %v5435_v44 = vpop.f32.mrb[45].mxu0 }
 0x4aa   : > { %v7661_v24 = vpop.f32.mrb[46].mxu0 }
 0x4ab   : > { %v5436_v31 = vpop.f32.mrb[47].mxu0 }
 0x4ac   : > { %v4879_v31 = vld [vmem:[%s9628_s6 + $0x1] ss:$0 sm:$0xff] }
 0x4b0   : > { %v7663_v46 = vpop.f32.mrb[48].mxu0 }
 0x4b1   : > { %v5439_v38 = vpop.f32.mrb[49].mxu0 }
 0x4b2   : > { %v7665_v42 = vpop.f32.mrb[50].mxu0 }
 0x4b3   : > { %v5440_v5 = vpop.f32.mrb[51].mxu0 }
 0x4b8   : > { %v7667_v26 = vpop.f32.mrb[52].mxu0 }
 0x4b9   : > { %v5443_v37 = vpop.f32.mrb[53].mxu0 }
 0x4ba   : > { %v7669_v33 = vpop.f32.mrb[54].mxu0 }
 0x4bb   : > { %v5444_v11 = vpop.f32.mrb[55].mxu0 }
 0x4c0   : > { %v7671_v6 = vpop.f32.mrb[56].mxu0 }
 0x4c1   : > { %v5447_v18 = vpop.f32.mrb[57].mxu0 }
 0x4c2   : > { %v7673_v2 = vpop.f32.mrb[58].mxu0 }
 0x4c3   : > { %v5448_v44 = vpop.f32.mrb[59].mxu0 }
 0x4c8   : > { %v1741_v38 = vpop.f32.mrb[60].mxu0 }
 0x4c9   : > { %v5503_v47 = vpop.f32.mrb[61].mxu0  ;;  %v1742_v5 = vadd.f32 %v4879_v31, %v1741_v38 }
 0x4ca   : > { %v1744_v49 = vpop.f32.mrb[62].mxu0 }
 0x4cb   : > { %v1745_v28 = vadd.f32 %v4879_v31, %v1744_v49  ;;  %v5504_v62 = vpop.f32.mrb[63].mxu0 }
 0x4cd   : > { %v1864_v37 = vpack.c.bf16 %v1745_v28, %v1742_v5 }
 0x4cf   : > { %v1885_v51 = vsel %vm1276_vm2, %v1864_v37, 0 }
 0x4d0   : > { %v1749_v11 = vpop.f32.mrb[64].mxu0  ;;  %5558 = vmatpush3.bf16.xpose.msra.mxu0 %v1885_v51 }
 0x4d1   : > { %v5507_v56 = vpop.f32.mrb[65].mxu0  ;;  %5559 = vmatprep.subr.bf16.mxu0 %v9770_v23  ;;  %v1750_v44 = vadd.f32 %v4879_v31, %v1749_v11 }
 0x4d2   : > { %v1752_v18 = vpop.f32.mrb[66].mxu0 }
 0x4d3   : > { %v1753_v54 = vadd.f32 %v4879_v31, %v1752_v18  ;;  %v5508_v43 = vpop.f32.mrb[67].mxu0 }
 0x4d5   : > { %v1865_v35 = vpack.c.bf16 %v1753_v54, %v1750_v44 }
 0x4d7   : > { %v1888_v27 = vsel %vm1276_vm2, %v1865_v35, 0 }
 0x4d8   : > { %v1757_v47 = vpop.f32.mrb[68].mxu0  ;;  %5560 = vmatpush3.bf16.xpose.msra.mxu0 %v1888_v27 }
 0x4d9   : > { %v5511_v38 = vpop.f32.mrb[69].mxu0  ;;  %5561 = vmatprep.subr.bf16.mxu0 %v9770_v23  ;;  %v1758_v28 = vadd.f32 %v4879_v31, %v1757_v47 }
 0x4da   : > { %v1760_v62 = vpop.f32.mrb[70].mxu0 }
 0x4db   : > { %v1761_v49 = vadd.f32 %v4879_v31, %v1760_v62  ;;  %v5512_v5 = vpop.f32.mrb[71].mxu0 }
 0x4dd   : > { %v1866_v51 = vpack.c.bf16 %v1761_v49, %v1758_v28 }
 0x4df   : > { %v1891_v56 = vsel %vm1276_vm2, %v1866_v51, 0 }
 0x4e0   : > { %v1765_v37 = vpop.f32.mrb[72].mxu0  ;;  %5562 = vmatpush3.bf16.xpose.msra.mxu0 %v1891_v56 }
 0x4e1   : > { %v5515_v11 = vpop.f32.mrb[73].mxu0  ;;  %5563 = vmatprep.subr.bf16.mxu0 %v9770_v23  ;;  %v1766_v54 = vadd.f32 %v4879_v31, %v1765_v37  ;;  %v9779_v37 = vpack.c.bf16 %v7468_v1, %v7466_v57  ;;  %v9782_v57 = vpack.c.bf16 %v7486_v60, %v7484_v8 }
 0x4e2   : > { %v1768_v43 = vpop.f32.mrb[74].mxu0  ;;  %v9780_v11 = vpack.c.bf16 %v7474_v22, %v7472_v21  ;;  %v9783_v21 = vpack.c.bf16 %v7492_v45, %v7490_v29 }
 0x4e3   : > { %v1769_v35 = vadd.f32 %v4879_v31, %v1768_v43  ;;  %v5516_v18 = vpop.f32.mrb[75].mxu0 }
 0x4e5   : > { %v1867_v27 = vpack.c.bf16 %v1769_v35, %v1766_v54 }
 0x4e7   : > { %v1894_v44 = vsel %vm1276_vm2, %v1867_v27, 0 }
 0x4e8   : > { %v1773_v38 = vpop.f32.mrb[76].mxu0  ;;  %5564 = vmatpush3.bf16.xpose.msra.mxu0 %v1894_v44 }
 0x4e9   : > { %v5519_v47 = vpop.f32.mrb[77].mxu0  ;;  %5565 = vmatprep.subr.bf16.mxu0 %v9770_v23  ;;  %v1774_v28 = vadd.f32 %v4879_v31, %v1773_v38 }
 0x4ea   : > { %v1776_v62 = vpop.f32.mrb[78].mxu0 }
 0x4eb   : > { %v1777_v49 = vadd.f32 %v4879_v31, %v1776_v62  ;;  %v5520_v5 = vpop.f32.mrb[79].mxu0  ;;  %v9781_v31 = vpack.c.bf16 %v7480_v39, %v7478_v40 }
 0x4ed   : > { %v1868_v51 = vpack.c.bf16 %v1777_v49, %v1774_v28 }
 0x4ef   : > { %v1897_v56 = vsel %vm1276_vm2, %v1868_v51, 0 }
 0x4f0   : > { %5566 = vmatpush3.bf16.xpose.msra.mxu0 %v1897_v56 }
 0x4f1   : > { %5617 = vmatprep.subr.bf16.mxu0 %v9770_v23 }
 0x4f7   : > { %5568 = vmatmul.mubr.msk.bf16.vlgmr.msra.gmra.mrb[80].mxu0 %vm1276_vm2, %v9779_v37 }
 0x4f8   : > { %5571 = vmatprep.mubr.msk.bf16.mxu0 %vm6518_vm1, %v9770_v23 }
 0x4ff   : > { %5572 = vmatmul.mubr.msk.bf16.gmra.mrb[84].mxu0 %vm1276_vm2, %v9780_v11 }
 0x500   : > { %5575 = vmatprep.mubr.msk.bf16.mxu0 %vm6518_vm1, %v9770_v23 }
 0x507   : > { %5576 = vmatmul.mubr.msk.bf16.gmra.mrb[88].mxu0 %vm1276_vm2, %v9781_v31 }
 0x508   : > { %5579 = vmatprep.mubr.msk.bf16.mxu0 %vm6518_vm1, %v9770_v23 }
 0x50f   : > { %5580 = vmatmul.mubr.msk.bf16.gmra.mrb[92].mxu0 %vm1276_vm2, %v9782_v57 }
 0x510   : > { %5583 = vmatprep.mubr.msk.bf16.mxu0 %vm6518_vm1, %v9770_v23 }
 0x517   : > { %5584 = vmatmul.mubr.msk.bf16.gmra.mrb[96].mxu0 %vm1276_vm2, %v9783_v21 }
 0x518   : > { %5625 = vmatprep.mubr.msk.bf16.mxu0 %vm6518_vm1, %v9770_v23 }
 0x5ca   : > { %v1933_v1 = vpop.f32.mrb[80].mxu0 }
 0x5cb   : > { %v1972_v40 = vsel %vm848_vm5, %v1933_v1, -inf  ;;  %v5569_v22 = vpop.f32.mrb[81].mxu0 }
 0x5cc   : > { %v1936_v8 = vpop.f32.mrb[82].mxu0  ;;  %v1982_v39 = vsel %vm1390_vm6, %v1972_v40, -inf }
 0x5cd   : > { %v1973_v60 = vsel %vm849_vm7, %v1936_v8, -inf  ;;  %1983 = vmax.xlane.f32.xlu0 %v1982_v39  ;;  %v5570_v29 = vpop.f32.mrb[83].mxu0 }
 0x5ce   : > { %v1985_v45 = vsel %vm1390_vm6, %v1973_v60, -inf }
 0x5cf   : > { %1986 = vmax.xlane.f32.xlu1 %v1985_v45 }
 0x5d2   : > { %v1941_v43 = vpop.f32.mrb[84].mxu0 }
 0x5d3   : > { %v1974_v54 = vsel %vm850_vm8, %v1941_v43, -inf  ;;  %v5573_v35 = vpop.f32.mrb[85].mxu0 }
 0x5d4   : > { %v1944_v18 = vpop.f32.mrb[86].mxu0  ;;  %v1988_v27 = vsel %vm1390_vm6, %v1974_v54, -inf }
 0x5d5   : > { %v1975_v44 = vsel %vm851_vm9, %v1944_v18, -inf  ;;  %1989 = vmax.xlane.f32.xlu0 %v1988_v27  ;;  %v5574_v38 = vpop.f32.mrb[87].mxu0 }
 0x5d6   : > { %v1991_v47 = vsel %vm1390_vm6, %v1975_v44, -inf }
 0x5d7   : > { %1992 = vmax.xlane.f32.xlu1 %v1991_v47 }
 0x5da   : > { %v1949_v62 = vpop.f32.mrb[88].mxu0 }
 0x5db   : > { %v1976_v28 = vsel %vm852_vm10, %v1949_v62, -inf  ;;  %v5577_v49 = vpop.f32.mrb[89].mxu0 }
 0x5dc   : > { %v1952_v5 = vpop.f32.mrb[90].mxu0  ;;  %v1994_v51 = vsel %vm1390_vm6, %v1976_v28, -inf  ;;  %v1452_v49 = vsel %vm1390_vm6, %v7515_v13, 0.0 }
 0x5dd   : > { %v7741_v56 = vsel %vm853_vm11, %v1952_v5, -inf  ;;  %1995 = vmax.xlane.f32.xlu0 %v1994_v51  ;;  %v5578_v37 = vpop.f32.mrb[91].mxu0  ;;  %v1455_v5 = vsel %vm1390_vm6, %v7517_v12, 0.0  ;;  %v706_v12 = vld [vmem:[%s9631_s9] sm:$0xff] }
 0x5de   : > { %v1997_v11 = vsel %vm1390_vm6, %v7741_v56, -inf }
 0x5df   : > { %1998 = vmax.xlane.f32.xlu1 %v1997_v11 }
 0x5e2   : > { %v1957_v31 = vpop.f32.mrb[92].mxu0 }
 0x5e3   : > { %v7748_v57 = vsel %vm854_vm12, %v1957_v31, -inf  ;;  %v5581_v21 = vpop.f32.mrb[93].mxu0 }
 0x5e4   : > { %v1960_v1 = vpop.f32.mrb[94].mxu0  ;;  %v2000_v22 = vsel %vm1390_vm6, %v7748_v57, -inf }
 0x5e5   : > { %v7755_v8 = vsel %vm855_vm13, %v1960_v1, -inf  ;;  %2001 = vmax.xlane.f32.xlu0 %v2000_v22  ;;  %v5582_v39 = vpop.f32.mrb[95].mxu0 }
 0x5e6   : > { %v2003_v29 = vsel %vm1390_vm6, %v7755_v8, -inf }
 0x5e7   : > { %2004 = vmax.xlane.f32.xlu1 %v2003_v29 }
 0x5ea   : > { %v1965_v45 = vpop.f32.mrb[96].mxu0 }
 0x5eb   : > { %v7762_v43 = vsel %vm856_vm14, %v1965_v45, -inf  ;;  %v5585_v35 = vpop.f32.mrb[97].mxu0 }
 0x5ec   : > { %v1968_v18 = vpop.f32.mrb[98].mxu0  ;;  %v2006_v27 = vsel %vm1390_vm6, %v7762_v43, -inf }
 0x5ed   : > { %v7769_v38 = vsel %vm857_vm15, %v1968_v18, -inf  ;;  %2007 = vmax.xlane.f32.xlu0 %v2006_v27  ;;  %v5586_v47 = vpop.f32.mrb[99].mxu0 }
 0x5ee   : > { %v2009_v62 = vsel %vm1418_vm3, %v7769_v38, -inf }
 0x5ef   : > { %2010 = vmax.xlane.f32.xlu1 %v2009_v62 }
 0x5f1   : > { %1453 = vadd.xlane.f32.xlu0 %v1452_v49 }
 0x5f3   : > { %1456 = vadd.xlane.f32.xlu1 %v1455_v5 }
 0x65a   : > { %v1984_v51 = vpop.xlane.xlu0 %1983 }
 0x65b   : > { %v2012_v37 = vsub.f32 %v1972_v40, %v1984_v51  ;;  %v707_v40 = vld [vmem:[%s9631_s9 + $0x8] sm:$0xff] }
 0x65c   : > { %v1987_v11 = vpop.xlane.xlu1 %1986  ;;  %v7785_v5 = vpack.c.bf16 %v707_v40, %v706_v12 }
 0x65d   : > { %v2022_v31 = vmul.f32 1.442695, %v2012_v37  ;;  %v2013_v21 = vsub.f32 %v1973_v60, %v1987_v11  ;;  %v708_v11 = vld [vmem:[%s9631_s9 + $0x10] sm:$0xff] }
 0x65e   : > { %9784 = vst [vmem:[#allocation46_spill] sm:$0xff] %v7785_v5 }
 0x65f   : > { %6117 = vpow2.f32 %v2022_v31  ;;  %v2024_v1 = vmul.f32 1.442695, %v2013_v21  ;;  %v709_v31 = vld [vmem:[%s9631_s9 + $0x18] sm:$0xff] }
 0x661   : > { %6119 = vpow2.f32 %v2024_v1  ;;  %v7802_v1 = vpack.c.bf16 %v709_v31, %v708_v11 }
 0x662   : > { %v1990_v22 = vpop.xlane.xlu0 %1989 }
 0x663   : > { %v2014_v39 = vsub.f32 %v1974_v54, %v1990_v22  ;;  %9785 = vst [vmem:[#allocation47_spill] sm:$0xff] %v7802_v1 }
 0x664   : > { %v1993_v29 = vpop.xlane.xlu1 %1992 }
 0x665   : > { %v2026_v45 = vmul.f32 1.442695, %v2014_v39  ;;  %v2015_v35 = vsub.f32 %v1975_v44, %v1993_v29  ;;  %v711_v39 = vld [vmem:[%s9631_s9 + $0x28] sm:$0xff] }
 0x667   : > { %6121 = vpow2.f32 %v2026_v45  ;;  %v2028_v13 = vmul.f32 1.442695, %v2015_v35 }
 0x669   : > { %v6118_v18 = vpop.eup %6117  ;;  %6123 = vpow2.f32 %v2028_v13 }
 0x66a   : > { %v1996_v60 = vpop.xlane.xlu0 %1995  ;;  %v2042_v27 = vsel %vm1390_vm6, %v6118_v18, 0.0 }
 0x66b   : > { %v6120_v47 = vpop.eup %6119  ;;  %v2016_v54 = vsub.f32 %v1976_v28, %v1996_v60  ;;  %2043 = vadd.xlane.f32.xlu0 %v2042_v27  ;;  %v1458_v28 = vsel %vm1390_vm6, %v7544_v17, 0.0  ;;  %v710_v17 = vld [vmem:[%s9631_s9 + $0x20] sm:$0xff] }
 0x66c   : > { %v2072_v62 = vpack.c.bf16 %v6120_v47, %v6118_v18  ;;  %v1999_v44 = vpop.xlane.xlu1 %1998  ;;  %v2045_v49 = vsel %vm1390_vm6, %v6120_v47, 0.0  ;;  %v7815_v40 = vpack.c.bf16 %v711_v39, %v710_v17  ;;  %v712_v47 = vld [vmem:[%s9631_s9 + $0x30] sm:$0xff]  ;;  %v1470_v17 = vsel %vm1390_vm6, %v7606_v16, 0.0 }
 0x66d   : > { %v2030_v51 = vmul.f32 1.442695, %v2016_v54  ;;  %v2017_v37 = vsub.f32 %v7741_v56, %v1999_v44  ;;  %2046 = vadd.xlane.f32.xlu1 %v2045_v49  ;;  %v1461_v56 = vsel %vm1390_vm6, %v7546_v30, 0.0  ;;  %v1464_v54 = vsel %vm1390_vm6, %v7575_v52, 0.0 }
 0x66e   : > { %5598 = vmatmul.mubr.msk.bf16.vlgmr.msra.gmra.mrb[80].mxu1 %vm1390_vm6, %v2072_v62  ;;  %9786 = vst [vmem:[#allocation48_spill] sm:$0xff] %v7815_v40 }
 0x66f   : > { %6125 = vpow2.f32 %v2030_v51  ;;  %v2032_v21 = vmul.f32 1.442695, %v2017_v37  ;;  %1459 = vadd.xlane.f32.xlu0 %v1458_v28  ;;  %5601 = vmatprep.mubr.msk.bf16.mxu1 %vm6518_vm1, %v9770_v23 }
 0x670   : > { %5646 = vmatpush3.bf16.msra.mxu1 %v7785_v5 }
 0x671   : > { %v6122_v22 = vpop.eup %6121  ;;  %6127 = vpow2.f32 %v2032_v21  ;;  %1462 = vadd.xlane.f32.xlu1 %v1461_v56  ;;  %5647 = vmatprep.subr.bf16.mxu1 %v9770_v23 }
 0x672   : > { %v2002_v29 = vpop.xlane.xlu0 %2001  ;;  %v2048_v30 = vsel %vm1390_vm6, %v6122_v22, 0.0 }
 0x673   : > { %v6124_v45 = vpop.eup %6123  ;;  %v2018_v35 = vsub.f32 %v7748_v57, %v2002_v29  ;;  %2049 = vadd.xlane.f32.xlu0 %v2048_v30  ;;  %v713_v57 = vld [vmem:[%s9631_s9 + $0x38] sm:$0xff]  ;;  %v1473_v29 = vsel %vm1390_vm6, %v7608_v50, 0.0  ;;  %v1479_v50 = vsel %vm1418_vm3, %v7631_v32, 0.0  ;;  %v714_v32 = vld [vmem:[%s9631_s9 + $0x40] sm:$0xff] }
 0x674   : > { %v2005_v13 = vpop.xlane.xlu1 %2004  ;;  %v2051_v18 = vsel %vm1390_vm6, %v6124_v45, 0.0  ;;  %v2073_v12 = vpack.c.bf16 %v6124_v45, %v6122_v22  ;;  %5648 = vmatpush3.bf16.msra.mxu1 %v7802_v1  ;;  %v7833_v44 = vpack.c.bf16 %v713_v57, %v712_v47 }
 0x675   : > { %v2034_v60 = vmul.f32 1.442695, %v2018_v35  ;;  %v2019_v27 = vsub.f32 %v7755_v8, %v2005_v13  ;;  %2052 = vadd.xlane.f32.xlu1 %v2051_v18  ;;  %5649 = vmatprep.subr.bf16.mxu1 %v9770_v23  ;;  %v1467_v8 = vsel %vm1390_vm6, %v7577_v3, 0.0  ;;  %v1476_v13 = vsel %vm1390_vm6, %v7629_v61, 0.0 }
 0x676   : > { %5602 = vmatmul.mubr.msk.bf16.gmra.mrb[84].mxu1 %vm1390_vm6, %v2073_v12  ;;  %9787 = vst [vmem:[#allocation49_spill] sm:$0xff] %v7833_v44 }
 0x677   : > { %6129 = vpow2.f32 %v2034_v60  ;;  %v2036_v62 = vmul.f32 1.442695, %v2019_v27  ;;  %1465 = vadd.xlane.f32.xlu0 %v1464_v54  ;;  %5605 = vmatprep.mubr.msk.bf16.mxu1 %vm6518_vm1, %v9770_v23 }
 0x678   : > { %5650 = vmatpush3.bf16.msra.mxu1 %v7815_v40 }
 0x679   : > { %v6126_v49 = vpop.eup %6125  ;;  %6131 = vpow2.f32 %v2036_v62  ;;  %1468 = vadd.xlane.f32.xlu1 %v1467_v8  ;;  %5651 = vmatprep.subr.bf16.mxu1 %v9770_v23 }
 0x67a   : > { %v2008_v51 = vpop.xlane.xlu0 %2007  ;;  %v2054_v52 = vsel %vm1390_vm6, %v6126_v49, 0.0 }
 0x67b   : > { %v6128_v37 = vpop.eup %6127  ;;  %v2020_v11 = vsub.f32 %v7762_v43, %v2008_v51  ;;  %2055 = vadd.xlane.f32.xlu0 %v2054_v52  ;;  %v717_v51 = vld [vmem:[%s9631_s9 + $0x58] sm:$0xff]  ;;  %v718_v52 = vld [vmem:[%s9631_s9 + $0x60] sm:$0xff] }
 0x67c   : > { %v2011_v31 = vpop.xlane.xlu1 %2010  ;;  %v2057_v28 = vsel %vm1390_vm6, %v6128_v37, 0.0  ;;  %v2074_v3 = vpack.c.bf16 %v6128_v37, %v6126_v49  ;;  %5652 = vmatpush3.bf16.msra.mxu1 %v7833_v44  ;;  %v716_v49 = vld [vmem:[%s9631_s9 + $0x50] sm:$0xff] }
 0x67d   : > { %v2038_v21 = vmul.f32 1.442695, %v2020_v11  ;;  %v2021_v56 = vsub.f32 %v7769_v38, %v2011_v31  ;;  %2058 = vadd.xlane.f32.xlu1 %v2057_v28  ;;  %v7886_v37 = vpack.c.bf16 %v717_v51, %v716_v49  ;;  %v719_v11 = vld [vmem:[%s9631_s9 + $0x68] sm:$0xff]  ;;  %v720_v28 = vld [vmem:[%s9631_s9 + $0x70] sm:$0xff] }
 0x67e   : > { %5606 = vmatmul.mubr.msk.bf16.gmra.mrb[88].mxu1 %vm1390_vm6, %v2074_v3  ;;  %v1454_v22 = vpop.xlane.xlu0 %1453  ;;  %v7892_v31 = vpack.c.bf16 %v719_v11, %v718_v52  ;;  %v721_v3 = vld [vmem:[%s9631_s9 + $0x78] sm:$0xff] }
 0x67f   : > { %6133 = vpow2.f32 %v2038_v21  ;;  %v2040_v39 = vmul.f32 1.442695, %v2021_v56  ;;  %1471 = vadd.xlane.f32.xlu0 %v1470_v17  ;;  %5609 = vmatprep.mubr.msk.bf16.mxu1 %vm6518_vm1, %v9770_v23  ;;  %9789 = vst [vmem:[#allocation51_spill] sm:$0xff] %v7886_v37  ;;  %v7902_v21 = vpack.c.bf16 %v721_v3, %v720_v28 }
 0x680   : > { %6135 = vrcp.f32 %v1454_v22  ;;  %v1457_v43 = vpop.xlane.xlu1 %1456  ;;  %9790 = vst [vmem:[#allocation52_spill] sm:$0xff] %v7892_v31 }
 0x681   : > { %v6130_v30 = vpop.eup %6129  ;;  %6137 = vpow2.f32 %v2040_v39  ;;  %1474 = vadd.xlane.f32.xlu1 %v1473_v29  ;;  %9791 = vst [vmem:[#allocation53_spill] sm:$0xff] %v7902_v21 }
 0x682   : > { %6139 = vrcp.f32 %v1457_v43  ;;  %v2060_v38 = vsel %vm1390_vm6, %v6130_v30, 0.0 }
 0x683   : > { %v6132_v45 = vpop.eup %6131  ;;  %2061 = vadd.xlane.f32.xlu0 %v2060_v38 }
 0x684   : > { %v2063_v16 = vsel %vm1390_vm6, %v6132_v45, 0.0  ;;  %v2075_v35 = vpack.c.bf16 %v6132_v45, %v6130_v30 }
 0x685   : > { %2064 = vadd.xlane.f32.xlu1 %v2063_v16 }
 0x686   : > { %5610 = vmatmul.mubr.msk.bf16.gmra.mrb[92].mxu1 %vm1390_vm6, %v2075_v35 }
 0x687   : > { %1477 = vadd.xlane.f32.xlu0 %v1476_v13  ;;  %5613 = vmatprep.mubr.msk.bf16.mxu1 %vm6518_vm1, %v9770_v23 }
 0x689   : > { %v6134_v18 = vpop.eup %6133  ;;  %1480 = vadd.xlane.f32.xlu1 %v1479_v50 }
 0x68a   : > { %v6136_v12 = vpop.eup %6135  ;;  %v2066_v60 = vsel %vm1390_vm6, %v6134_v18, 0.0 }
 0x68b   : > { %v6138_v27 = vpop.eup %6137  ;;  %2067 = vadd.xlane.f32.xlu0 %v2066_v60  ;;  %v1597_v61 = vmul.f32 %v6136_v12, %v7655_v53  ;;  %v715_v53 = vld [vmem:[%s9631_s9 + $0x48] sm:$0xff] }
 0x68c   : > { %v6140_v47 = vpop.eup %6139  ;;  %v2069_v57 = vsel %vm1418_vm3, %v6138_v27, 0.0  ;;  %v2076_v54 = vpack.c.bf16 %v6138_v27, %v6134_v18 }
 0x68d   : > { %v1598_v62 = vmul.f32 %v6140_v47, %v7657_v48  ;;  %2070 = vadd.xlane.f32.xlu1 %v2069_v57  ;;  %v7873_v48 = vpack.c.bf16 %v715_v53, %v714_v32 }
 0x68e   : > { %5614 = vmatmul.mubr.msk.bf16.gmra.mrb[96].mxu1 %vm1390_vm6, %v2076_v54 }
 0x68f   : > { %v1607_v8 = vpack.c.bf16 %v1598_v62, %v1597_v61  ;;  %5653 = vmatprep.mubr.msk.bf16.mxu1 %vm6518_vm1, %v9770_v23  ;;  %9788 = vst [vmem:[#allocation50_spill] sm:$0xff] %v7873_v48  ;;  %5618 = vmatpush3.bf16.msra.mxu0 %v7873_v48 }
 0x690   : > { %5619 = vmatprep.subr.bf16.mxu0 %v9770_v23 }
 0x693   : > { %5620 = vmatpush3.bf16.msra.mxu0 %v7886_v37 }
 0x694   : > { %5621 = vmatprep.subr.bf16.mxu0 %v9770_v23 }
 0x696   : > { %5654 = vmatmul.mubr.msk.bf16.vlgmr.msra.gmra.mrb[100].mxu1 %vm1276_vm2, %v1607_v8 }
 0x697   : > { %5657 = vmatprep.mubr.msk.bf16.mxu1 %vm6518_vm1, %v9770_v23  ;;  %5622 = vmatpush3.bf16.msra.mxu0 %v7892_v31 }
 0x698   : > { %5623 = vmatprep.subr.bf16.mxu0 %v9770_v23 }
 0x69b   : > { %5624 = vmatpush3.bf16.msra.mxu0 %v7902_v21  ;;  %v8236_v21 = vld [vmem:[%s9633_s11] ss:$0 sm:$0xff] }
 0x6f8   : > { %v2044_v56 = vpop.xlane.xlu0 %2043 }
 0x6fa   : > { %v2047_v22 = vpop.xlane.xlu1 %2046 }
 0x6fc   : > { %v1460_v17 = vpop.xlane.xlu0 %1459 }
 0x6fd   : > { %6141 = vrcp.f32 %v1460_v17 }
 0x6fe   : > { %v1463_v39 = vpop.xlane.xlu1 %1462 }
 0x6ff   : > { %6143 = vrcp.f32 %v1463_v39 }
 0x700   : > { %v2050_v43 = vpop.xlane.xlu0 %2049 }
 0x702   : > { %v2053_v29 = vpop.xlane.xlu1 %2052 }
 0x704   : > { %v1466_v30 = vpop.xlane.xlu0 %1465 }
 0x705   : > { %6145 = vrcp.f32 %v1466_v30 }
 0x706   : > { %v1469_v38 = vpop.xlane.xlu1 %1468 }
 0x707   : > { %v6142_v45 = vpop.eup %6141  ;;  %6147 = vrcp.f32 %v1469_v38 }
 0x708   : > { %v2056_v16 = vpop.xlane.xlu0 %2055  ;;  %v1599_v50 = vmul.f32 %v6142_v45, %v7659_v41 }
 0x709   : > { %v6144_v35 = vpop.eup %6143 }
 0x70a   : > { %v2059_v13 = vpop.xlane.xlu1 %2058  ;;  %v1600_v18 = vmul.f32 %v6144_v35, %v7661_v24 }
 0x70c   : > { %v1472_v12 = vpop.xlane.xlu0 %1471  ;;  %v1608_v60 = vpack.c.bf16 %v1600_v18, %v1599_v50 }
 0x70d   : > { %6149 = vrcp.f32 %v1472_v12 }
 0x70e   : > { %5658 = vmatmul.mubr.msk.bf16.gmra.mrb[104].mxu1 %vm1276_vm2, %v1608_v60  ;;  %v1475_v27 = vpop.xlane.xlu1 %1474 }
 0x70f   : > { %v6146_v47 = vpop.eup %6145  ;;  %6151 = vrcp.f32 %v1475_v27  ;;  %5661 = vmatprep.mubr.msk.bf16.mxu1 %vm6518_vm1, %v9770_v23 }
 0x710   : > { %v2062_v57 = vpop.xlane.xlu0 %2061  ;;  %v1601_v62 = vmul.f32 %v6146_v47, %v7663_v46 }
 0x711   : > { %v6148_v54 = vpop.eup %6147 }
 0x712   : > { %v2065_v61 = vpop.xlane.xlu1 %2064  ;;  %v1602_v41 = vmul.f32 %v6148_v54, %v7665_v42 }
 0x714   : > { %v1478_v8 = vpop.xlane.xlu0 %1477  ;;  %v1609_v24 = vpack.c.bf16 %v1602_v41, %v1601_v62 }
 0x715   : > { %6153 = vrcp.f32 %v1478_v8 }
 0x716   : > { %5662 = vmatmul.mubr.msk.bf16.gmra.mrb[108].mxu1 %vm1276_vm2, %v1609_v24  ;;  %v1481_v32 = vpop.xlane.xlu1 %1480 }
 0x717   : > { %v6150_v53 = vpop.eup %6149  ;;  %6155 = vrcp.f32 %v1481_v32  ;;  %5665 = vmatprep.mubr.msk.bf16.mxu1 %vm6518_vm1, %v9770_v23 }
 0x718   : > { %v1603_v51 = vmul.f32 %v6150_v53, %v7667_v26  ;;  %6157 = vrcp.f32 %v2044_v56  ;;  %v2068_v32 = vpop.xlane.xlu0 %2067 }
 0x719   : > { %v6152_v49 = vpop.eup %6151  ;;  %6159 = vrcp.f32 %v2047_v22 }
 0x71a   : > { %v1604_v52 = vmul.f32 %v6152_v49, %v7669_v33  ;;  %6161 = vrcp.f32 %v2050_v43  ;;  %v2071_v53 = vpop.xlane.xlu1 %2070 }
 0x71b   : > { %6163 = vrcp.f32 %v2053_v29 }
 0x71c   : > { %v1610_v11 = vpack.c.bf16 %v1604_v52, %v1603_v51  ;;  %6165 = vrcp.f32 %v2056_v16 }
 0x71d   : > { %6167 = vrcp.f32 %v2059_v13 }
 0x71e   : > { %5666 = vmatmul.mubr.msk.bf16.gmra.mrb[112].mxu1 %vm1276_vm2, %v1610_v11  ;;  %6169 = vrcp.f32 %v2062_v57 }
 0x71f   : > { %v6154_v46 = vpop.eup %6153  ;;  %5669 = vmatprep.mubr.msk.bf16.mxu1 %vm6518_vm1, %v9770_v23  ;;  %6171 = vrcp.f32 %v2065_v61 }
 0x720   : > { %v1605_v28 = vmul.f32 %v6154_v46, %v7671_v6  ;;  %6173 = vrcp.f32 %v2068_v32 }
 0x721   : > { %v6156_v42 = vpop.eup %6155  ;;  %6175 = vrcp.f32 %v2071_v53 }
 0x722   : > { %v1606_v3 = vmul.f32 %v6156_v42, %v7673_v2  ;;  %v6158_v26 = vpop.eup %6157 }
 0x723   : > { %v6160_v30 = vpop.eup %6159 }
 0x724   : > { %v1611_v17 = vpack.c.bf16 %v1606_v3, %v1605_v28  ;;  %v6162_v6 = vpop.eup %6161 }
 0x725   : > { %v6164_v22 = vpop.eup %6163 }
 0x726   : > { %5670 = vmatmul.mubr.msk.bf16.gmra.mrb[116].mxu1 %vm1276_vm2, %v1611_v17  ;;  %v6166_v13 = vpop.eup %6165 }
 0x727   : > { %v6168_v54 = vpop.eup %6167 }
 0x728   : > { %v6170_v61 = vpop.eup %6169 }
 0x729   : > { %v6172_v52 = vpop.eup %6171 }
 0x741   : > { %v2134_v33 = vpop.f32.mrb[80].mxu1 }
 0x742   : > { %v5599_v39 = vpop.f32.mrb[81].mxu1  ;;  %v2183_v45 = vmul.f32 %v6158_v26, %v2134_v33  ;;  %v6174_v33 = vpop.eup %6173 }
 0x743   : > { %v2137_v38 = vpop.f32.mrb[82].mxu1  ;;  %v6176_v39 = vpop.eup %6175 }
 0x744   : > { %v2184_v35 = vmul.f32 %v6160_v30, %v2137_v38  ;;  %v5600_v50 = vpop.f32.mrb[83].mxu1 }
 0x746   : > { %v2193_v18 = vpack.c.bf16 %v2184_v35, %v2183_v45 }
 0x748   : > { %5626 = vmatmul.mubr.msk.bf16.vlgmr.msra.gmra.mrb[100].mxu0 %vm1276_vm2, %v2193_v18 }
 0x749   : > { %v2142_v2 = vpop.f32.mrb[84].mxu1  ;;  %5629 = vmatprep.mubr.msk.bf16.mxu0 %vm6518_vm1, %v9770_v23 }
 0x74a   : > { %v5603_v56 = vpop.f32.mrb[85].mxu1  ;;  %v2185_v29 = vmul.f32 %v6162_v6, %v2142_v2 }
 0x74b   : > { %v2145_v43 = vpop.f32.mrb[86].mxu1 }
 0x74c   : > { %v2186_v12 = vmul.f32 %v6164_v22, %v2145_v43  ;;  %v5604_v60 = vpop.f32.mrb[87].mxu1 }
 0x74e   : > { %v2194_v27 = vpack.c.bf16 %v2186_v12, %v2185_v29 }
 0x750   : > { %5630 = vmatmul.mubr.msk.bf16.gmra.mrb[104].mxu0 %vm1276_vm2, %v2194_v27 }
 0x751   : > { %v2150_v16 = vpop.f32.mrb[88].mxu1  ;;  %5633 = vmatprep.mubr.msk.bf16.mxu0 %vm6518_vm1, %v9770_v23 }
 0x752   : > { %v5607_v47 = vpop.f32.mrb[89].mxu1  ;;  %v2187_v41 = vmul.f32 %v6166_v13, %v2150_v16 }
 0x753   : > { %v2153_v62 = vpop.f32.mrb[90].mxu1 }
 0x754   : > { %v2188_v8 = vmul.f32 %v6168_v54, %v2153_v62  ;;  %v5608_v24 = vpop.f32.mrb[91].mxu1 }
 0x756   : > { %v2195_v49 = vpack.c.bf16 %v2188_v8, %v2187_v41 }
 0x758   : > { %5634 = vmatmul.mubr.msk.bf16.gmra.mrb[108].mxu0 %vm1276_vm2, %v2195_v49 }
 0x759   : > { %v2158_v57 = vpop.f32.mrb[92].mxu1  ;;  %5637 = vmatprep.mubr.msk.bf16.mxu0 %vm6518_vm1, %v9770_v23 }
 0x75a   : > { %v5611_v51 = vpop.f32.mrb[93].mxu1  ;;  %v2189_v46 = vmul.f32 %v6170_v61, %v2158_v57 }
 0x75b   : > { %v2161_v11 = vpop.f32.mrb[94].mxu1 }
 0x75c   : > { %v2190_v42 = vmul.f32 %v6172_v52, %v2161_v11  ;;  %v5612_v28 = vpop.f32.mrb[95].mxu1  ;;  %v7942_v52 = vld [vmem:[%s9632_s10] ss:$0 sm:$0xff] }
 0x75d   : > { %v6477_v11 = vld [vmem:[%s6626_s30] sm:$0xff] }
 0x75e   : > { %v2196_v3 = vpack.c.bf16 %v2190_v42, %v2189_v46 }
 0x760   : > { %5638 = vmatmul.mubr.msk.bf16.gmra.mrb[112].mxu0 %vm1276_vm2, %v2196_v3  ;;  %v6478_v3 = vld [vmem:[%s6626_s30 + $0x8] sm:$0xff] }
 0x761   : > { %v2166_v17 = vpop.f32.mrb[96].mxu1  ;;  %5641 = vmatprep.mubr.msk.bf16.mxu0 %vm6518_vm1, %v9770_v23 }
 0x762   : > { %v5615_v26 = vpop.f32.mrb[97].mxu1  ;;  %v2191_v38 = vmul.f32 %v6174_v33, %v2166_v17 }
 0x763   : > { %v2169_v30 = vpop.f32.mrb[98].mxu1 }
 0x764   : > { %v2192_v45 = vmul.f32 %v6176_v39, %v2169_v30  ;;  %v5616_v35 = vpop.f32.mrb[99].mxu1 }
 0x765   : > { %v6479_v35 = vld [vmem:[%s6626_s30 + $0x10] sm:$0xff] }
 0x766   : > { %v2197_v50 = vpack.c.bf16 %v2192_v45, %v2191_v38 }
 0x768   : > { %5642 = vmatmul.mubr.msk.bf16.gmra.mrb[116].mxu0 %vm1276_vm2, %v2197_v50 }
 0x769   : > { %v2335_v18 = vpop.f32.mrb[100].mxu1 }
 0x76a   : > { %v5655_v2 = vpop.f32.mrb[101].mxu1 }
 0x76b   : > { %v2338_v6 = vpop.f32.mrb[102].mxu1 }
 0x76c   : > { %v5656_v56 = vpop.f32.mrb[103].mxu1 }
 0x7e1   : > { %v2343_v22 = vpop.f32.mrb[104].mxu1 }
 0x7e2   : > { %v5659_v43 = vpop.f32.mrb[105].mxu1 }
 0x7e3   : > { %v2346_v29 = vpop.f32.mrb[106].mxu1 }
 0x7e4   : > { %v5660_v12 = vpop.f32.mrb[107].mxu1 }
 0x7e9   : > { %v2351_v60 = vpop.f32.mrb[108].mxu1 }
 0x7ea   : > { %v5663_v27 = vpop.f32.mrb[109].mxu1 }
 0x7eb   : > { %v2354_v16 = vpop.f32.mrb[110].mxu1 }
 0x7ec   : > { %v5664_v13 = vpop.f32.mrb[111].mxu1 }
 0x7f1   : > { %v2359_v47 = vpop.f32.mrb[112].mxu1 }
 0x7f2   : > { %v5667_v54 = vpop.f32.mrb[113].mxu1 }
 0x7f3   : > { %v2362_v62 = vpop.f32.mrb[114].mxu1 }
 0x7f4   : > { %v5668_v41 = vpop.f32.mrb[115].mxu1 }
 0x7f9   : > { %v2367_v8 = vpop.f32.mrb[116].mxu1 }
 0x7fa   : > { %v5671_v24 = vpop.f32.mrb[117].mxu1 }
 0x7fb   : > { %v7937_v32 = vpop.f32.mrb[118].mxu1 }
 0x7fc   : > { %v5672_v53 = vpop.f32.mrb[119].mxu1 }
 0x81b   : > { %v2247_v49 = vpop.f32.mrb[100].mxu0 }
 0x81c   : > { %v2336_v57 = vadd.f32 %v2335_v18, %v2247_v49  ;;  %v5627_v61 = vpop.f32.mrb[101].mxu0  ;;  %v6482_v49 = vld [vmem:[%s6626_s30 + $0x28] sm:$0xff] }
 0x81d   : > { %v2250_v51 = vpop.f32.mrb[102].mxu0 }
 0x81e   : > { %v2374_v46 = vadd.f32 %v6477_v11, %v2336_v57  ;;  %v2339_v42 = vadd.f32 %v2338_v6, %v2250_v51  ;;  %v5628_v28 = vpop.f32.mrb[103].mxu0  ;;  %v6480_v6 = vld [vmem:[%s6626_s30 + $0x18] sm:$0xff] }
 0x820   : > { %v2375_v17 = vadd.f32 %v6478_v3, %v2339_v42  ;;  %v7947_v33 = vadd.f32 %v7942_v52, %v2374_v46 }
 0x822   : > { %2400 = vadd.xlane.f32.xlu0 %v7947_v33  ;;  %v7951_v26 = vadd.f32 %v7942_v52, %v2375_v17 }
 0x823   : > { %v2255_v39 = vpop.f32.mrb[104].mxu0 }
 0x824   : > { %v2344_v30 = vadd.f32 %v2343_v22, %v2255_v39  ;;  %2402 = vadd.xlane.f32.xlu1 %v7951_v26  ;;  %v5631_v38 = vpop.f32.mrb[105].mxu0  ;;  %v6484_v39 = vld [vmem:[%s6626_s30 + $0x38] sm:$0xff] }
 0x825   : > { %v2258_v45 = vpop.f32.mrb[106].mxu0 }
 0x826   : > { %v2376_v50 = vadd.f32 %v6479_v35, %v2344_v30  ;;  %v2347_v18 = vadd.f32 %v2346_v29, %v2258_v45  ;;  %v5632_v2 = vpop.f32.mrb[107].mxu0  ;;  %v6481_v29 = vld [vmem:[%s6626_s30 + $0x20] sm:$0xff] }
 0x827   : > { %v6485_v2 = vld [vmem:[%s6626_s30 + $0x40] sm:$0xff] }
 0x828   : > { %v2377_v56 = vadd.f32 %v6480_v6, %v2347_v18  ;;  %v7957_v43 = vadd.f32 %v7942_v52, %v2376_v50 }
 0x82a   : > { %2404 = vadd.xlane.f32.xlu0 %v7957_v43  ;;  %v7961_v12 = vadd.f32 %v7942_v52, %v2377_v56 }
 0x82b   : > { %v2263_v22 = vpop.f32.mrb[108].mxu0 }
 0x82c   : > { %v2352_v27 = vadd.f32 %v2351_v60, %v2263_v22  ;;  %2406 = vadd.xlane.f32.xlu1 %v7961_v12  ;;  %v5635_v13 = vpop.f32.mrb[109].mxu0  ;;  %v6486_v22 = vld [vmem:[%s6626_s30 + $0x48] sm:$0x1f] }
 0x82d   : > { %v2266_v54 = vpop.f32.mrb[110].mxu0 }
 0x82e   : > { %v2378_v41 = vadd.f32 %v6481_v29, %v2352_v27  ;;  %v2355_v24 = vadd.f32 %v2354_v16, %v2266_v54  ;;  %v5636_v53 = vpop.f32.mrb[111].mxu0  ;;  %v6483_v16 = vld [vmem:[%s6626_s30 + $0x30] sm:$0xff]  ;;  %v753_v29 = vld [vmem:[%s9635_s13 + $0x80] sm:$0xff] }
 0x82f   : > { %v755_v53 = vld [vmem:[%s9635_s13 + $0x90] sm:$0xff] }
 0x830   : > { %v2379_v57 = vadd.f32 %v6482_v49, %v2355_v24  ;;  %v7967_v61 = vadd.f32 %v7942_v52, %v2378_v41  ;;  %v737_v41 = vld [vmem:[%s9635_s13] sm:$0xff]  ;;  %v738_v24 = vld [vmem:[%s9635_s13 + $0x8] sm:$0xff]  ;;  %v756_v49 = vld [vmem:[%s9635_s13 + $0x98] sm:$0xff] }
 0x832   : > { %2408 = vadd.xlane.f32.xlu0 %v7967_v61  ;;  %v7971_v51 = vadd.f32 %v7942_v52, %v2379_v57  ;;  %v8016_v57 = vpack.c.bf16 %v738_v24, %v737_v41 }
 0x833   : > { %v2271_v60 = vpop.f32.mrb[112].mxu0 }
 0x834   : > { %v2360_v11 = vadd.f32 %v2359_v47, %v2271_v60  ;;  %2410 = vadd.xlane.f32.xlu1 %v7971_v51  ;;  %v5639_v46 = vpop.f32.mrb[113].mxu0  ;;  %9793 = vst [vmem:[#allocation55_spill] sm:$0xff] %v8016_v57  ;;  %v8018_v60 = vpack.c.bf16 %v756_v49, %v755_v53 }
 0x835   : > { %v2274_v42 = vpop.f32.mrb[114].mxu0  ;;  %v740_v46 = vld [vmem:[%s9635_s13 + $0x18] sm:$0xff] }
 0x836   : > { %v2380_v28 = vadd.f32 %v6483_v16, %v2360_v11  ;;  %v2363_v3 = vadd.f32 %v2362_v62, %v2274_v42  ;;  %v5640_v17 = vpop.f32.mrb[115].mxu0  ;;  %9794 = vst [vmem:[#allocation56_spill] sm:$0xff] %v8018_v60  ;;  %v739_v11 = vld [vmem:[%s9635_s13 + $0x10] sm:$0xff]  ;;  %v757_v42 = vld [vmem:[%s9635_s13 + $0xa0] sm:$0xff]  ;;  %v758_v16 = vld [vmem:[%s9635_s13 + $0xa8] sm:$0xff] }
 0x837   : > { %v741_v17 = vld [vmem:[%s9635_s13 + $0x20] sm:$0xff] }
 0x838   : > { %v2381_v30 = vadd.f32 %v6484_v39, %v2363_v3  ;;  %v7977_v38 = vadd.f32 %v7942_v52, %v2380_v28  ;;  %v8035_v28 = vpack.c.bf16 %v740_v46, %v739_v11  ;;  %v8037_v3 = vpack.c.bf16 %v758_v16, %v757_v42  ;;  %v742_v39 = vld [vmem:[%s9635_s13 + $0x28] sm:$0xff] }
 0x83a   : > { %2412 = vadd.xlane.f32.xlu0 %v7977_v38  ;;  %v7981_v45 = vadd.f32 %v7942_v52, %v2381_v30  ;;  %9795 = vst [vmem:[#allocation57_spill] sm:$0xff] %v8035_v28  ;;  %9796 = vst [vmem:[#allocation58_spill] sm:$0xff] %v8037_v3  ;;  %v759_v30 = vld [vmem:[%s9635_s13 + $0xb0] sm:$0xff] }
 0x83b   : > { %v2279_v47 = vpop.f32.mrb[116].mxu0 }
 0x83c   : > { %v2368_v35 = vadd.f32 %v2367_v8, %v2279_v47  ;;  %2414 = vadd.xlane.f32.xlu1 %v7981_v45  ;;  %v5643_v50 = vpop.f32.mrb[117].mxu0  ;;  %v760_v47 = vld [vmem:[%s9635_s13 + $0xb8] sm:$0xff] }
 0x83d   : > { %v2282_v18 = vpop.f32.mrb[118].mxu0  ;;  %v8055_v50 = vpack.c.bf16 %v760_v47, %v759_v30 }
 0x83e   : > { %v2382_v62 = vadd.f32 %v6485_v2, %v2368_v35  ;;  %v2371_v6 = vadd.f32 %v7937_v32, %v2282_v18  ;;  %v5644_v56 = vpop.f32.mrb[119].mxu0  ;;  %v754_v32 = vld [vmem:[%s9635_s13 + $0x88] sm:$0xff]  ;;  %v8053_v35 = vpack.c.bf16 %v742_v39, %v741_v17  ;;  %v743_v18 = vld [vmem:[%s9635_s13 + $0x30] sm:$0xff]  ;;  %v744_v2 = vld [vmem:[%s9635_s13 + $0x38] sm:$0xff] }
 0x83f   : > { %9798 = vst [vmem:[#allocation60_spill] sm:$0xff] %v8055_v50  ;;  %v8071_v56 = vpack.c.bf16 %v744_v2, %v743_v18 }
 0x840   : > { %v2383_v27 = vadd.f32 %v6486_v22, %v2371_v6  ;;  %v7988_v13 = vadd.f32 %v7942_v52, %v2382_v62  ;;  %9797 = vst [vmem:[#allocation59_spill] sm:$0xff] %v8053_v35  ;;  %v761_v62 = vld [vmem:[%s9635_s13 + $0xc0] sm:$0xff]  ;;  %v762_v6 = vld [vmem:[%s9635_s13 + $0xc8] sm:$0xff] }
 0x841   : > { %9799 = vst [vmem:[#allocation61_spill] sm:$0xff] %v8071_v56  ;;  %v8073_v22 = vpack.c.bf16 %v762_v6, %v761_v62 }
 0x842   : > { %v7991_v54 = vadd.f32 %v7942_v52, %v2383_v27  ;;  %2416 = vadd.xlane.f32.xlu1 %v7988_v13  ;;  %v8005_v52 = vpack.c.bf16 %v754_v32, %v753_v29  ;;  %v745_v27 = vld [vmem:[%s9635_s13 + $0x40] sm:$0xff] }
 0x843   : > { %9800 = vst [vmem:[#allocation62_spill] sm:$0xff] %v8073_v22 }
 0x844   : > { %v2418_v8 = vsel %vm886_vm0, %v7991_v54, 0.0  ;;  %9792 = vst [vmem:[#allocation54_spill] sm:$0xff] %v8005_v52  ;;  %5093 = vmatprep.subr.bf16.mxu0 %v8005_v52 }
 0x845   : > { %2419 = vadd.xlane.f32.xlu0 %v2418_v8  ;;  %5094 = vmatpush3.bf16.xpose.msra.mxu0 %v8016_v57  ;;  %v746_v8 = vld [vmem:[%s9635_s13 + $0x48] sm:$0xff] }
 0x846   : > { %5095 = vmatprep.subr.bf16.mxu0 %v8018_v60  ;;  %v8083_v29 = vpack.c.bf16 %v746_v8, %v745_v27 }
 0x848   : > { %9801 = vst [vmem:[#allocation63_spill] sm:$0xff] %v8083_v29 }
 0x84d   : > { %5096 = vmatpush3.bf16.xpose.msra.mxu0 %v8035_v28 }
 0x84e   : > { %5097 = vmatprep.subr.bf16.mxu0 %v8037_v3 }
 0x855   : > { %5098 = vmatpush3.bf16.xpose.msra.mxu0 %v8053_v35 }
 0x856   : > { %5099 = vmatprep.subr.bf16.mxu0 %v8055_v50 }
 0x85d   : > { %5100 = vmatpush3.bf16.xpose.msra.mxu0 %v8071_v56 }
 0x85e   : > { %5101 = vmatprep.subr.bf16.mxu0 %v8073_v22  ;;  %v8230_v22 = vld [vmem:[%s6626_s30 + $0x90] sm:$0xff] }
 0x865   : > { %5102 = vmatpush3.bf16.xpose.msra.mxu0 %v8083_v29 }
 0x8af   : > { %v2401_v32 = vpop.xlane.xlu0 %2400 }
 0x8b0   : > { %v2421_v41 = vmul.f32 0.0078125, %v2401_v32 }
 0x8b1   : > { %v2403_v24 = vpop.xlane.xlu1 %2402 }
 0x8b2   : > { %v2422_v53 = vmul.f32 0.0078125, %v2403_v24  ;;  %v8087_v49 = vsub.f32 %v7947_v33, %v2421_v41 }
 0x8b4   : > { %v2441_v11 = vmul.f32 %v8087_v49, %v8087_v49  ;;  %v8092_v46 = vsub.f32 %v7951_v26, %v2422_v53 }
 0x8b6   : > { %2451 = vadd.xlane.f32.xlu0 %v2441_v11  ;;  %v2442_v42 = vmul.f32 %v8092_v46, %v8092_v46  ;;  %v763_v11 = vld [vmem:[%s9635_s13 + $0xd0] sm:$0xff] }
 0x8b7   : > { %v2405_v16 = vpop.xlane.xlu0 %2404 }
 0x8b8   : > { %v2423_v17 = vmul.f32 0.0078125, %v2405_v16  ;;  %2453 = vadd.xlane.f32.xlu1 %v2442_v42  ;;  %v764_v42 = vld [vmem:[%s9635_s13 + $0xd8] sm:$0xff] }
 0x8b9   : > { %v2407_v39 = vpop.xlane.xlu1 %2406  ;;  %v8120_v16 = vpack.c.bf16 %v764_v42, %v763_v11  ;;  %v765_v42 = vld [vmem:[%s9635_s13 + $0xe0] sm:$0xff] }
 0x8ba   : > { %v8097_v30 = vsub.f32 %v7957_v43, %v2423_v17  ;;  %v2424_v47 = vmul.f32 0.0078125, %v2407_v39  ;;  %v747_v17 = vld [vmem:[%s9635_s13 + $0x50] sm:$0xff]  ;;  %v748_v39 = vld [vmem:[%s9635_s13 + $0x58] sm:$0xff] }
 0x8bb   : > { %9802 = vst [vmem:[#allocation64_spill] sm:$0xff] %v8120_v16  ;;  %5103 = vmatprep.subr.bf16.mxu0 %v8120_v16 }
 0x8bc   : > { %v8100_v18 = vsub.f32 %v7961_v12, %v2424_v47  ;;  %v2443_v2 = vmul.f32 %v8097_v30, %v8097_v30 }
 0x8be   : > { %2455 = vadd.xlane.f32.xlu0 %v2443_v2  ;;  %v2444_v62 = vmul.f32 %v8100_v18, %v8100_v18  ;;  %v8130_v2 = vpack.c.bf16 %v748_v39, %v747_v17  ;;  %v766_v17 = vld [vmem:[%s9635_s13 + $0xe8] sm:$0xff] }
 0x8bf   : > { %v2409_v6 = vpop.xlane.xlu0 %2408  ;;  %v8148_v39 = vpack.c.bf16 %v766_v17, %v765_v42 }
 0x8c0   : > { %v2425_v27 = vmul.f32 0.0078125, %v2409_v6  ;;  %2457 = vadd.xlane.f32.xlu1 %v2444_v62  ;;  %9803 = vst [vmem:[#allocation65_spill] sm:$0xff] %v8130_v2  ;;  %5104 = vmatpush3.bf16.xpose.msra.mxu0 %v8130_v2 }
 0x8c1   : > { %v2411_v8 = vpop.xlane.xlu1 %2410  ;;  %9804 = vst [vmem:[#allocation66_spill] sm:$0xff] %v8148_v39  ;;  %5105 = vmatprep.subr.bf16.mxu0 %v8148_v39  ;;  %v8187_v39 = vld [vmem:[%s6626_s30 + $0x50] sm:$0xff] }
 0x8c2   : > { %v8107_v32 = vsub.f32 %v7967_v61, %v2425_v27  ;;  %v2426_v41 = vmul.f32 0.0078125, %v2411_v8 }
 0x8c4   : > { %v8110_v24 = vsub.f32 %v7971_v51, %v2426_v41  ;;  %v2445_v53 = vmul.f32 %v8107_v32, %v8107_v32 }
 0x8c6   : > { %2459 = vadd.xlane.f32.xlu0 %v2445_v53  ;;  %v2446_v47 = vmul.f32 %v8110_v24, %v8110_v24 }
 0x8c7   : > { %v2413_v62 = vpop.xlane.xlu0 %2412 }
 0x8c8   : > { %v2427_v6 = vmul.f32 0.0078125, %v2413_v62  ;;  %2461 = vadd.xlane.f32.xlu1 %v2446_v47  ;;  %v749_v47 = vld [vmem:[%s9635_s13 + $0x60] sm:$0xff]  ;;  %v750_v62 = vld [vmem:[%s9635_s13 + $0x68] sm:$0xff] }
 0x8c9   : > { %v2415_v27 = vpop.xlane.xlu1 %2414 }
 0x8ca   : > { %v8135_v8 = vsub.f32 %v7977_v38, %v2427_v6  ;;  %v2428_v41 = vmul.f32 0.0078125, %v2415_v27  ;;  %v8158_v27 = vpack.c.bf16 %v750_v62, %v749_v47  ;;  %v767_v47 = vld [vmem:[%s9635_s13 + $0xf0] sm:$0xff]  ;;  %v768_v62 = vld [vmem:[%s9635_s13 + $0xf8] sm:$0xff] }
 0x8cc   : > { %v8138_v11 = vsub.f32 %v7981_v45, %v2428_v41  ;;  %v2447_v53 = vmul.f32 %v8135_v8, %v8135_v8  ;;  %9805 = vst [vmem:[#allocation67_spill] sm:$0xff] %v8158_v27  ;;  %5106 = vmatpush3.bf16.xpose.msra.mxu0 %v8158_v27 }
 0x8ce   : > { %2463 = vadd.xlane.f32.xlu0 %v2447_v53  ;;  %v2448_v6 = vmul.f32 %v8138_v11, %v8138_v11 }
 0x8cf   : > { %v2417_v41 = vpop.xlane.xlu1 %2416 }
 0x8d0   : > { %v2429_v42 = vmul.f32 0.0078125, %v2417_v41  ;;  %2465 = vadd.xlane.f32.xlu1 %v2448_v6  ;;  %v8176_v41 = vpack.c.bf16 %v768_v62, %v767_v47  ;;  %v8200_v62 = vld [vmem:[%s6626_s30 + $0x58] sm:$0xff] }
 0x8d2   : > { %v8163_v17 = vsub.f32 %v7988_v13, %v2429_v42  ;;  %v2420_v2 = vpop.xlane.xlu0 %2419  ;;  %9806 = vst [vmem:[#allocation68_spill] sm:$0xff] %v8176_v41  ;;  %v752_v42 = vld [vmem:[%s9635_s13 + $0x78] sm:$0xff]  ;;  %5107 = vmatprep.subr.bf16.mxu0 %v8176_v41  ;;  %v8224_v41 = vld [vmem:[%s6626_s30 + $0x88] sm:$0xff] }
 0x8d3   : > { %v2430_v16 = vmul.f32 0.0078125, %v2420_v2  ;;  %v751_v2 = vld [vmem:[%s9635_s13 + $0x70] sm:$0xff] }
 0x8d4   : > { %v2449_v53 = vmul.f32 %v8163_v17, %v8163_v17  ;;  %v8184_v27 = vpack.c.bf16 %v752_v42, %v751_v2  ;;  %v8205_v2 = vld [vmem:[%s6626_s30 + $0x70] sm:$0xff]  ;;  %v8208_v42 = vld [vmem:[%s6626_s30 + $0x68] sm:$0xff] }
 0x8d5   : > { %v8174_v6 = vsub.f32 %v7991_v54, %v2430_v16 }
 0x8d6   : > { %2467 = vadd.xlane.f32.xlu0 %v2449_v53  ;;  %9807 = vst [vmem:[#allocation69_spill] sm:$0xff] %v8184_v27  ;;  %5108 = vmatpush3.bf16.xpose.msra.mxu0 %v8184_v27  ;;  %v8197_v53 = vld [vmem:[%s6626_s30 + $0x60] sm:$0xff]  ;;  %v8219_v27 = vld [vmem:[%s6626_s30 + $0x98] sm:$0x1f] }
 0x8d7   : > { %v2450_v16 = vmul.f32 %v8174_v6, %v8174_v6  ;;  %5673 = vmatprep.subr.bf16.mxu0 %v9770_v23  ;;  %v2901_v29 = vsel %vm886_vm0, %v8219_v27, 0.0 }
 0x8d9   : > { %v2469_v47 = vsel %vm886_vm0, %v2450_v16, 0.0  ;;  %v8213_v16 = vld [vmem:[%s6626_s30 + $0x80] sm:$0xff] }
 0x8da   : > { %2883 = vadd.xlane.f32.xlu0 %v8187_v39  ;;  %2470 = vadd.xlane.f32.xlu1 %v2469_v47  ;;  %v8216_v47 = vld [vmem:[%s6626_s30 + $0x78] sm:$0xff] }
 0x8de   : > { %2887 = vadd.xlane.f32.xlu0 %v8197_v53  ;;  %2885 = vadd.xlane.f32.xlu1 %v8200_v62 }
 0x8e2   : > { %2891 = vadd.xlane.f32.xlu0 %v8205_v2  ;;  %2889 = vadd.xlane.f32.xlu1 %v8208_v42 }
 0x8e6   : > { %2895 = vadd.xlane.f32.xlu0 %v8213_v16  ;;  %2893 = vadd.xlane.f32.xlu1 %v8216_v47 }
 0x8ea   : > { %2897 = vadd.xlane.f32.xlu1 %v8224_v41  ;;  %2902 = vadd.xlane.f32.xlu0 %v2901_v29 }
 0x8ee   : > { %2899 = vadd.xlane.f32.xlu1 %v8230_v22 }
 0x943   : > { %v2452_v56 = vpop.xlane.xlu0 %2451 }
 0x944   : > { %v2472_v50 = vmul.f32 0.0078125, %v2452_v56 }
 0x945   : > { %v2454_v35 = vpop.xlane.xlu1 %2453 }
 0x946   : > { %v2482_v3 = vadd.f32 1e-05, %v2472_v50  ;;  %v2473_v28 = vmul.f32 0.0078125, %v2454_v35 }
 0x948   : > { %6177 = vrsqrt.f32 %v2482_v3  ;;  %v2483_v60 = vadd.f32 1e-05, %v2473_v28 }
 0x94a   : > { %6179 = vrsqrt.f32 %v2483_v60 }
 0x94b   : > { %v2456_v57 = vpop.xlane.xlu0 %2455 }
 0x94c   : > { %v2474_v44 = vmul.f32 0.0078125, %v2456_v57 }
 0x94d   : > { %v2458_v40 = vpop.xlane.xlu1 %2457 }
 0x94e   : > { %v2484_v1 = vadd.f32 1e-05, %v2474_v44  ;;  %v2475_v5 = vmul.f32 0.0078125, %v2458_v40 }
 0x950   : > { %6181 = vrsqrt.f32 %v2484_v1  ;;  %v2485_v52 = vadd.f32 1e-05, %v2475_v5  ;;  %v8244_v5 = vld [vmem:[%s9634_s12] ss:$0 sm:$0xff] }
 0x952   : > { %v6178_v29 = vpop.eup %6177  ;;  %6183 = vrsqrt.f32 %v2485_v52 }
 0x953   : > { %v2460_v56 = vpop.xlane.xlu0 %2459  ;;  %v2502_v35 = vmul.f32 %v6178_v29, %v8087_v49 }
 0x954   : > { %v6180_v3 = vpop.eup %6179  ;;  %v2476_v28 = vmul.f32 0.0078125, %v2460_v56 }
 0x955   : > { %v2462_v60 = vpop.xlane.xlu1 %2461  ;;  %v2503_v57 = vmul.f32 %v6180_v3, %v8092_v46  ;;  %v2518_v44 = vmul.f32 %v8236_v21, %v2502_v35 }
 0x956   : > { %v2486_v40 = vadd.f32 1e-05, %v2476_v28  ;;  %v2477_v1 = vmul.f32 0.0078125, %v2462_v60 }
 0x957   : > { %v2519_v52 = vmul.f32 %v8236_v21, %v2503_v57  ;;  %v2534_v49 = vadd.f32 %v8244_v5, %v2518_v44 }
 0x958   : > { %6185 = vrsqrt.f32 %v2486_v40  ;;  %v2487_v50 = vadd.f32 1e-05, %v2477_v1 }
 0x959   : > { %v2535_v29 = vadd.f32 %v8244_v5, %v2519_v52 }
 0x95a   : > { %v6182_v56 = vpop.eup %6181  ;;  %6187 = vrsqrt.f32 %v2487_v50 }
 0x95b   : > { %v2464_v46 = vpop.xlane.xlu0 %2463  ;;  %v2544_v3 = vpack.c.bf16 %v2535_v29, %v2534_v49  ;;  %v2504_v35 = vmul.f32 %v6182_v56, %v8097_v30 }
 0x95c   : > { %v6184_v28 = vpop.eup %6183  ;;  %v2478_v60 = vmul.f32 0.0078125, %v2464_v46 }
 0x95d   : > { %v2466_v31 = vpop.xlane.xlu1 %2465  ;;  %5109 = vmatprep.mubr.bf16.mxu0 %v2544_v3  ;;  %v2505_v37 = vmul.f32 %v6184_v28, %v8100_v18  ;;  %v2520_v57 = vmul.f32 %v8236_v21, %v2504_v35 }
 0x95e   : > { %v2488_v40 = vadd.f32 1e-05, %v2478_v60  ;;  %v2479_v1 = vmul.f32 0.0078125, %v2466_v31  ;;  %5110 = vmatmul.mubr.bf16.vlgmr.msra.gmra.mrb[120].mxu0 %v2544_v3 }
 0x95f   : > { %v2521_v44 = vmul.f32 %v8236_v21, %v2505_v37  ;;  %5674 = vmatpush3.bf16.msra.mxu0 %v6656_v15  ;;  %v2536_v30 = vadd.f32 %v8244_v5, %v2520_v57 }
 0x960   : > { %6189 = vrsqrt.f32 %v2488_v40  ;;  %v2489_v52 = vadd.f32 1e-05, %v2479_v1  ;;  %5675 = vmatprep.subr.bf16.mxu0 %v9770_v23 }
 0x961   : > { %v2537_v50 = vadd.f32 %v8244_v5, %v2521_v44 }
 0x962   : > { %v6186_v49 = vpop.eup %6185  ;;  %6191 = vrsqrt.f32 %v2489_v52 }
 0x963   : > { %v2468_v18 = vpop.xlane.xlu0 %2467  ;;  %v2545_v29 = vpack.c.bf16 %v2537_v50, %v2536_v30  ;;  %v2506_v56 = vmul.f32 %v6186_v49, %v8107_v32  ;;  %5676 = vmatpush3.bf16.msra.mxu0 %v6714_v59 }
 0x964   : > { %v6188_v31 = vpop.eup %6187  ;;  %v2480_v37 = vmul.f32 0.0078125, %v2468_v18  ;;  %5677 = vmatprep.subr.bf16.mxu0 %v9770_v23 }
 0x965   : > { %5111 = vmatprep.mubr.bf16.mxu0 %v2545_v29  ;;  %v2507_v15 = vmul.f32 %v6188_v31, %v8110_v24  ;;  %v2522_v46 = vmul.f32 %v8236_v21, %v2506_v56 }
 0x966   : > { %v2490_v3 = vadd.f32 1e-05, %v2480_v37  ;;  %5112 = vmatmul.mubr.bf16.gmra.mrb[124].mxu0 %v2545_v29 }
 0x967   : > { %v2471_v35 = vpop.xlane.xlu1 %2470  ;;  %v2884_v28 = vpop.xlane.xlu0 %2883  ;;  %v2523_v60 = vmul.f32 %v8236_v21, %v2507_v15  ;;  %5678 = vmatpush3.bf16.msra.mxu0 %v6739_v4  ;;  %v2538_v57 = vadd.f32 %v8244_v5, %v2522_v46 }
 0x968   : > { %6193 = vrsqrt.f32 %v2490_v3  ;;  %v2481_v32 = vmul.f32 0.0078125, %v2471_v35  ;;  %v2904_v59 = vmul.f32 0.0078125, %v2884_v28  ;;  %5679 = vmatprep.subr.bf16.mxu0 %v9770_v23 }
 0x969   : > { %v2539_v40 = vadd.f32 %v8244_v5, %v2523_v60 }
 0x96a   : > { %v6190_v24 = vpop.eup %6189  ;;  %v2491_v1 = vadd.f32 1e-05, %v2481_v32  ;;  %v8268_v44 = vsub.f32 %v8187_v39, %v2904_v59 }
 0x96b   : > { %v2886_v52 = vpop.xlane.xlu1 %2885  ;;  %v2888_v30 = vpop.xlane.xlu0 %2887  ;;  %v2546_v50 = vpack.c.bf16 %v2539_v40, %v2538_v57  ;;  %v2508_v49 = vmul.f32 %v6190_v24, %v8135_v8  ;;  %5680 = vmatpush3.bf16.msra.mxu0 %v6759_v10 }
 0x96c   : > { %v6192_v4 = vpop.eup %6191  ;;  %6195 = vrsqrt.f32 %v2491_v1  ;;  %v2905_v18 = vmul.f32 0.0078125, %v2886_v52  ;;  %v2906_v29 = vmul.f32 0.0078125, %v2888_v30  ;;  %v2924_v56 = vmul.f32 %v8268_v44, %v8268_v44  ;;  %5681 = vmatprep.subr.bf16.mxu0 %v9770_v23  ;;  %v9808_v1 = vld [vmem:[#allocation7_spill] sm:$0xff] }
 0x96d   : > { %5113 = vmatprep.mubr.bf16.mxu0 %v2546_v50  ;;  %v2509_v39 = vmul.f32 %v6192_v4, %v8138_v11  ;;  %v2524_v31 = vmul.f32 %v8236_v21, %v2508_v49 }
 0x96e   : > { %v8278_v37 = vsub.f32 %v8200_v62, %v2905_v18  ;;  %v8281_v8 = vsub.f32 %v8197_v53, %v2906_v29  ;;  %5114 = vmatmul.mubr.bf16.gmra.mrb[128].mxu0 %v2546_v50  ;;  %2934 = vadd.xlane.f32.xlu0 %v2924_v56 }
 0x96f   : > { %v2890_v10 = vpop.xlane.xlu1 %2889  ;;  %v2892_v15 = vpop.xlane.xlu0 %2891  ;;  %v2525_v46 = vmul.f32 %v8236_v21, %v2509_v39  ;;  %5682 = vmatpush3.bf16.msra.mxu0 %v6779_v19  ;;  %v2540_v53 = vadd.f32 %v8244_v5, %v2524_v31  ;;  %v9809_v39 = vld [vmem:[#allocation9_spill] sm:$0xff] }
 0x970   : > { %v2907_v3 = vmul.f32 0.0078125, %v2890_v10  ;;  %v2908_v35 = vmul.f32 0.0078125, %v2892_v15  ;;  %v2925_v11 = vmul.f32 %v8278_v37, %v8278_v37  ;;  %v2926_v62 = vmul.f32 %v8281_v8, %v8281_v8  ;;  %5683 = vmatprep.subr.bf16.mxu0 %v9770_v23 }
 0x971   : > { %v2541_v28 = vadd.f32 %v8244_v5, %v2525_v46 }
 0x972   : > { %v6194_v60 = vpop.eup %6193  ;;  %v8293_v32 = vsub.f32 %v8208_v42, %v2907_v3  ;;  %v8296_v19 = vsub.f32 %v8205_v2, %v2908_v35  ;;  %2936 = vadd.xlane.f32.xlu1 %v2925_v11  ;;  %2938 = vadd.xlane.f32.xlu0 %v2926_v62  ;;  %v9810_v62 = vld [vmem:[#allocation11_spill] sm:$0xff] }
 0x973   : > { %v2894_v59 = vpop.xlane.xlu1 %2893  ;;  %v2896_v57 = vpop.xlane.xlu0 %2895  ;;  %v2547_v40 = vpack.c.bf16 %v2541_v28, %v2540_v53  ;;  %v2510_v24 = vmul.f32 %v6194_v60, %v8163_v17  ;;  %5684 = vmatpush3.bf16.msra.mxu0 %v9808_v1 }
 0x974   : > { %v2909_v52 = vmul.f32 0.0078125, %v2894_v59  ;;  %v2910_v30 = vmul.f32 0.0078125, %v2896_v57  ;;  %v2927_v50 = vmul.f32 %v8293_v32, %v8293_v32  ;;  %v2928_v42 = vmul.f32 %v8296_v19, %v8296_v19  ;;  %5685 = vmatprep.subr.bf16.mxu0 %v9770_v23  ;;  %v787_v59 = vld [vmem:[%s9637_s15 + $0x8] sm:$0xff] }
 0x975   : > { %5115 = vmatprep.mubr.bf16.mxu0 %v2547_v40  ;;  %v2526_v56 = vmul.f32 %v8236_v21, %v2510_v24  ;;  %v788_v24 = vld [vmem:[%s9637_s15 + $0x10] sm:$0xff] }
 0x976   : > { %v6196_v2 = vpop.eup %6195  ;;  %v8306_v49 = vsub.f32 %v8216_v47, %v2909_v52  ;;  %v8309_v4 = vsub.f32 %v8213_v16, %v2910_v30  ;;  %2940 = vadd.xlane.f32.xlu1 %v2927_v50  ;;  %5116 = vmatmul.mubr.bf16.gmra.mrb[132].mxu0 %v2547_v40  ;;  %v786_v40 = vld [vmem:[%s9637_s15] sm:$0xff]  ;;  %v791_v52 = vld [vmem:[%s9637_s15 + $0x28] sm:$0xff]  ;;  %v793_v30 = vld [vmem:[%s9637_s15 + $0x38] sm:$0xff] }
 0x977   : > { %2942 = vadd.xlane.f32.xlu0 %v2928_v42  ;;  %v2898_v17 = vpop.xlane.xlu1 %2897  ;;  %v2903_v18 = vpop.xlane.xlu0 %2902  ;;  %v2511_v29 = vmul.f32 %v6196_v2, %v8174_v6  ;;  %5686 = vmatpush3.bf16.msra.mxu0 %v9809_v39  ;;  %v2542_v35 = vadd.f32 %v8244_v5, %v2526_v56  ;;  %v8356_v1 = vpack.c.bf16 %v788_v24, %v786_v40  ;;  %v790_v42 = vld [vmem:[%s9637_s15 + $0x20] sm:$0xff]  ;;  %v792_v2 = vld [vmem:[%s9637_s15 + $0x30] sm:$0xff] }
 0x978   : > { %v2911_v31 = vmul.f32 0.0078125, %v2898_v17  ;;  %v2929_v10 = vmul.f32 %v8306_v49, %v8306_v49  ;;  %v2930_v47 = vmul.f32 %v8309_v4, %v8309_v4  ;;  %v2913_v16 = vmul.f32 0.0078125, %v2903_v18  ;;  %5687 = vmatprep.subr.bf16.mxu0 %v9770_v23  ;;  %v795_v18 = vld [vmem:[%s9637_s15 + $0x48] sm:$0xff]  ;;  %v794_v39 = vld [vmem:[%s9637_s15 + $0x40] sm:$0xff]  ;;  %v808_v24 = vld [vmem:[%s9637_s15 + $0xb0] sm:$0xff] }
 0x979   : > { %v2527_v15 = vmul.f32 %v8236_v21, %v2511_v29  ;;  %9812 = vst [vmem:[#allocation9_spill] sm:$0xff] %v8356_v1  ;;  %v8366_v50 = vpack.c.bf16 %v793_v30, %v791_v52  ;;  %v8374_v17 = vpack.c.bf16 %v792_v2, %v790_v42  ;;  %v797_v29 = vld [vmem:[%s9637_s15 + $0x58] sm:$0xff]  ;;  %v806_v40 = vld [vmem:[%s9637_s15 + $0xa0] sm:$0xff]  ;;  %v811_v30 = vld [vmem:[%s9637_s15 + $0xc8] sm:$0xff] }
 0x97a   : > { %v8321_v46 = vsub.f32 %v8224_v41, %v2911_v31  ;;  %2944 = vadd.xlane.f32.xlu1 %v2929_v10  ;;  %v8324_v6 = vsub.f32 %v8219_v27, %v2913_v16  ;;  %v8384_v56 = vpack.c.bf16 %v797_v29, %v795_v18  ;;  %v796_v31 = vld [vmem:[%s9637_s15 + $0x50] sm:$0xff]  ;;  %v801_v16 = vld [vmem:[%s9637_s15 + $0x78] sm:$0xff]  ;;  %v8446_v52 = vpack.c.bf16 %v808_v24, %v806_v40  ;;  %v810_v18 = vld [vmem:[%s9637_s15 + $0xc0] sm:$0xff] }
 0x97b   : > { %2946 = vadd.xlane.f32.xlu0 %v2930_v47  ;;  %v2900_v3 = vpop.xlane.xlu1 %2899  ;;  %v2543_v11 = vadd.f32 %v8244_v5, %v2527_v15  ;;  %5688 = vmatpush3.bf16.msra.mxu0 %v9810_v62  ;;  %9813 = vst [vmem:[#allocation11_spill] sm:$0xff] %v8366_v50  ;;  %9814 = vst [vmem:[#allocation70_spill] sm:$0xff] %v8374_v17  ;;  %v8392_v10 = vpack.c.bf16 %v796_v31, %v794_v39  ;;  %v799_v47 = vld [vmem:[%s9637_s15 + $0x68] sm:$0xff]  ;;  %v813_v42 = vld [vmem:[%s9637_s15 + $0xd8] sm:$0xff] }
 0x97c   : > { %v2912_v53 = vmul.f32 0.0078125, %v2900_v3  ;;  %v2931_v28 = vmul.f32 %v8321_v46, %v8321_v46  ;;  %v2933_v21 = vmul.f32 %v8324_v6, %v8324_v6  ;;  %5745 = vmatprep.subr.bf16.mxu0 %v9770_v23  ;;  %9815 = vst [vmem:[#allocation71_spill] sm:$0xff] %v8384_v56  ;;  %v8402_v15 = vpack.c.bf16 %v801_v16, %v799_v47  ;;  %v798_v3 = vld [vmem:[%s9637_s15 + $0x60] sm:$0xff]  ;;  %v803_v62 = vld [vmem:[%s9637_s15 + $0x88] sm:$0xff]  ;;  %v812_v29 = vld [vmem:[%s9637_s15 + $0xd0] sm:$0xff] }
 0x97d   : > { %v2548_v41 = vpack.c.bf16 %v2543_v11, %v2542_v35  ;;  %9816 = vst [vmem:[#allocation72_spill] sm:$0xff] %v8392_v10  ;;  %v800_v35 = vld [vmem:[%s9637_s15 + $0x70] sm:$0xff]  ;;  %9822 = vst [vmem:[#allocation78_spill] sm:$0xff] %v8446_v52  ;;  %v8456_v2 = vpack.c.bf16 %v813_v42, %v811_v30  ;;  %v8464_v39 = vpack.c.bf16 %v812_v29, %v810_v18  ;;  %v815_v31 = vld [vmem:[%s9637_s15 + $0xe8] sm:$0xff] }
 0x97e   : > { %v8335_v27 = vsub.f32 %v8230_v22, %v2912_v53  ;;  %2948 = vadd.xlane.f32.xlu1 %v2931_v28  ;;  %v2952_v60 = vsel %vm886_vm0, %v2933_v21, 0.0  ;;  %v789_v22 = vld [vmem:[%s9637_s15 + $0x18] sm:$0xff]  ;;  %9817 = vst [vmem:[#allocation73_spill] sm:$0xff] %v8402_v15  ;;  %v8410_v11 = vpack.c.bf16 %v800_v35, %v798_v3  ;;  %v802_v21 = vld [vmem:[%s9637_s15 + $0x80] sm:$0xff]  ;;  %v816_v35 = vld [vmem:[%s9637_s15 + $0xf0] sm:$0xff] }
 0x97f   : > { %5117 = vmatprep.mubr.bf16.mxu0 %v2548_v41  ;;  %v8348_v57 = vpack.c.bf16 %v789_v22, %v787_v59  ;;  %v805_v53 = vld [vmem:[%s9637_s15 + $0x98] sm:$0xff]  ;;  %9823 = vst [vmem:[#allocation79_spill] sm:$0xff] %v8456_v2  ;;  %9824 = vst [vmem:[#allocation80_spill] sm:$0xff] %v8464_v39  ;;  %v814_v3 = vld [vmem:[%s9637_s15 + $0xe0] sm:$0xff] }
 0x980   : > { %5118 = vmatmul.mubr.bf16.gmra.mrb[136].mxu0 %v2548_v41  ;;  %v2932_v5 = vmul.f32 %v8335_v27, %v8335_v27  ;;  %9818 = vst [vmem:[#allocation74_spill] sm:$0xff] %v8410_v11  ;;  %v8420_v28 = vpack.c.bf16 %v805_v53, %v803_v62  ;;  %v804_v41 = vld [vmem:[%s9637_s15 + $0x90] sm:$0xff]  ;;  %v809_v59 = vld [vmem:[%s9637_s15 + $0xb8] sm:$0xff]  ;;  %v8482_v62 = vpack.c.bf16 %v816_v35, %v814_v3 }
 0x981   : > { %5689 = vmatprep.mubr.msk.bf16.mxu0 %vm6518_vm1, %v9770_v23  ;;  %9811 = vst [vmem:[#allocation7_spill] sm:$0xff] %v8348_v57  ;;  %2779 = vmatprep.subr.bf16.mxu1 %v8348_v57  ;;  %v817_v47 = vld [vmem:[%s9637_s15 + $0xf8] sm:$0xff] }
 0x982   : > { %2950 = vadd.xlane.f32.xlu0 %v2932_v5  ;;  %2953 = vadd.xlane.f32.xlu1 %v2952_v60  ;;  %9819 = vst [vmem:[#allocation75_spill] sm:$0xff] %v8420_v28  ;;  %v8428_v60 = vpack.c.bf16 %v804_v41, %v802_v21  ;;  %v807_v5 = vld [vmem:[%s9637_s15 + $0xa8] sm:$0xff]  ;;  %v8474_v16 = vpack.c.bf16 %v817_v47, %v815_v31  ;;  %9826 = vst [vmem:[#allocation82_spill] sm:$0xff] %v8482_v62 }
 0x983   : > { %2780 = vmatpush1.bf16.xpose.msra.mxu1 %v8356_v1  ;;  %v8438_v22 = vpack.c.bf16 %v809_v59, %v807_v5 }
 0x984   : > { %2781 = vmatprep.subr.bf16.mxu1 %v8366_v50  ;;  %9820 = vst [vmem:[#allocation76_spill] sm:$0xff] %v8428_v60  ;;  %9825 = vst [vmem:[#allocation81_spill] sm:$0xff] %v8474_v16 }
 0x985   : > { %9821 = vst [vmem:[#allocation77_spill] sm:$0xff] %v8438_v22 }
 0x98b   : > { %2782 = vmatpush1.bf16.xpose.msra.mxu1 %v8374_v17 }
 0x98c   : > { %2783 = vmatprep.subr.bf16.mxu1 %v8384_v56 }
 0x993   : > { %2784 = vmatpush1.bf16.xpose.msra.mxu1 %v8392_v10 }
 0x994   : > { %2785 = vmatprep.subr.bf16.mxu1 %v8402_v15 }
 0x99b   : > { %2786 = vmatpush1.bf16.xpose.msra.mxu1 %v8410_v11 }
 0x99c   : > { %2787 = vmatprep.subr.bf16.mxu1 %v8420_v28 }
 0x9a3   : > { %2788 = vmatpush1.bf16.xpose.msra.mxu1 %v8428_v60 }
 0x9a4   : > { %2789 = vmatprep.subr.bf16.mxu1 %v8438_v22 }
 0x9ab   : > { %2790 = vmatpush1.bf16.xpose.msra.mxu1 %v8446_v52 }
 0x9ac   : > { %2791 = vmatprep.subr.bf16.mxu1 %v8456_v2 }
 0x9b3   : > { %2792 = vmatpush1.bf16.xpose.msra.mxu1 %v8464_v39 }
 0x9b4   : > { %2793 = vmatprep.subr.bf16.mxu1 %v8474_v16 }
 0x9bb   : > { %2794 = vmatpush1.bf16.xpose.msra.mxu1 %v8482_v62 }
 0x9bc   : > { %5709 = vmatprep.subr.bf16.mxu1 %v9770_v23 }
 0x9fb   : > { %v2935_v53 = vpop.xlane.xlu0 %2934 }
 0x9fc   : > { %v2955_v21 = vmul.f32 0.0078125, %v2935_v53 }
 0x9fe   : > { %v2965_v41 = vadd.f32 1e-05, %v2955_v21 }
 0x9ff   : > { %v2937_v5 = vpop.xlane.xlu1 %2936  ;;  %v2939_v59 = vpop.xlane.xlu0 %2938 }
 0xa00   : > { %6197 = vrsqrt.f32 %v2965_v41  ;;  %v2956_v40 = vmul.f32 0.0078125, %v2937_v5  ;;  %v2957_v24 = vmul.f32 0.0078125, %v2939_v59 }
 0xa02   : > { %v2966_v30 = vadd.f32 1e-05, %v2956_v40  ;;  %v2967_v42 = vadd.f32 1e-05, %v2957_v24  ;;  %v8491_v24 = vld [vmem:[%s9744_s18] ss:$0 sm:$0xff] }
 0xa03   : > { %v2941_v18 = vpop.xlane.xlu1 %2940 }
 0xa04   : > { %6199 = vrsqrt.f32 %v2966_v30  ;;  %v2958_v29 = vmul.f32 0.0078125, %v2941_v18  ;;  %v2943_v31 = vpop.xlane.xlu0 %2942 }
 0xa05   : > { %6201 = vrsqrt.f32 %v2967_v42  ;;  %v2959_v3 = vmul.f32 0.0078125, %v2943_v31 }
 0xa06   : > { %v2968_v47 = vadd.f32 1e-05, %v2958_v29 }
 0xa07   : > { %v2945_v35 = vpop.xlane.xlu1 %2944  ;;  %v2969_v53 = vadd.f32 1e-05, %v2959_v3  ;;  %v8499_v3 = vld [vmem:[%s9624_s2] ss:$0 sm:$0xff] }
 0xa08   : > { %6203 = vrsqrt.f32 %v2968_v47  ;;  %v2960_v62 = vmul.f32 0.0078125, %v2945_v35  ;;  %v2947_v41 = vpop.xlane.xlu0 %2946 }
 0xa09   : > { %v2961_v42 = vmul.f32 0.0078125, %v2947_v41 }
 0xa0a   : > { %v6198_v16 = vpop.eup %6197  ;;  %v2970_v21 = vadd.f32 1e-05, %v2960_v62 }
 0xa0b   : > { %v2985_v39 = vmul.f32 %v6198_v16, %v8268_v44  ;;  %v2949_v5 = vpop.xlane.xlu1 %2948 }
 0xa0c   : > { %6205 = vrsqrt.f32 %v2970_v21  ;;  %v2962_v59 = vmul.f32 0.0078125, %v2949_v5  ;;  %v2971_v21 = vadd.f32 1e-05, %v2961_v42 }
 0xa0d   : > { %v2995_v30 = vmul.f32 %v8491_v24, %v2985_v39  ;;  %6207 = vrsqrt.f32 %v2969_v53 }
 0xa0e   : > { %v6200_v40 = vpop.eup %6199  ;;  %v2972_v62 = vadd.f32 1e-05, %v2962_v59 }
 0xa0f   : > { %v2986_v18 = vmul.f32 %v6200_v40, %v8278_v37  ;;  %v6202_v29 = vpop.eup %6201  ;;  %v2954_v31 = vpop.xlane.xlu1 %2953  ;;  %v3005_v35 = vadd.f32 %v8499_v3, %v2995_v30 }
 0xa10   : > { %v2951_v16 = vpop.xlane.xlu0 %2950  ;;  %v2987_v53 = vmul.f32 %v6202_v29, %v8281_v8  ;;  %v2964_v41 = vmul.f32 0.0078125, %v2954_v31  ;;  %6209 = vrsqrt.f32 %v2972_v62  ;;  %v9827_v8 = vld [vmem:[#allocation13_spill] sm:$0xff] }
 0xa11   : > { %v2996_v44 = vmul.f32 %v8491_v24, %v2986_v18  ;;  %v2963_v5 = vmul.f32 0.0078125, %v2951_v16  ;;  %6211 = vrsqrt.f32 %v2971_v21 }
 0xa12   : > { %v6204_v47 = vpop.eup %6203  ;;  %v2997_v2 = vmul.f32 %v8491_v24, %v2987_v53  ;;  %v2974_v52 = vadd.f32 1e-05, %v2964_v41 }
 0xa13   : > { %v3006_v39 = vadd.f32 %v8499_v3, %v2996_v44  ;;  %v2988_v37 = vmul.f32 %v6204_v47, %v8293_v32  ;;  %v2973_v42 = vadd.f32 1e-05, %v2963_v5  ;;  %v9828_v44 = vld [vmem:[#allocation14_spill] sm:$0xff] }
 0xa14   : > { %v3007_v62 = vadd.f32 %v8499_v3, %v2997_v2  ;;  %6213 = vrsqrt.f32 %v2974_v52 }
 0xa15   : > { %v2998_v59 = vmul.f32 %v8491_v24, %v2988_v37  ;;  %v8506_v40 = vpack.c.bf16 %v3006_v39, %v3005_v35  ;;  %6215 = vrsqrt.f32 %v2973_v42  ;;  %v9830_v37 = vld [vmem:[#allocation16_spill] sm:$0xff] }
 0xa16   : > { %v6206_v18 = vpop.eup %6205 }
 0xa17   : > { %5690 = vmatmul.mubr.bf16.vlgmr.msra.gmra.mrb[140].mxu0 %v8506_v40  ;;  %v6208_v30 = vpop.eup %6207  ;;  %v3008_v32 = vadd.f32 %v8499_v3, %v2998_v59  ;;  %v2990_v29 = vmul.f32 %v6206_v18, %v8306_v49 }
 0xa18   : > { %5693 = vmatprep.mubr.msk.bf16.mxu0 %vm6518_vm1, %v9770_v23  ;;  %5746 = vmatpush3.bf16.msra.mxu0 %v9827_v8  ;;  %v2989_v31 = vmul.f32 %v6208_v30, %v8296_v19  ;;  %v9829_v19 = vld [vmem:[#allocation15_spill] sm:$0xff] }
 0xa19   : > { %5747 = vmatprep.subr.bf16.mxu0 %v9770_v23  ;;  %v3000_v16 = vmul.f32 %v8491_v24, %v2990_v29  ;;  %v8520_v47 = vpack.c.bf16 %v3008_v32, %v3007_v62  ;;  %v2552_v32 = vsub.s32 0, %v7342_v20  ;;  %v785_v29 = vld [vmem:[%s9636_s14] sm:$0x3]  ;;  %v2556_v62 = vsub.s32 1, %v7342_v20 }
 0xa1a   : > { %v6210_v35 = vpop.eup %6209  ;;  %v2999_v21 = vmul.f32 %v8491_v24, %v2989_v31 }
 0xa1b   : > { %v6212_v49 = vpop.eup %6211  ;;  %v3010_v52 = vadd.f32 %v8499_v3, %v3000_v16  ;;  %v2992_v2 = vmul.f32 %v6210_v35, %v8321_v46  ;;  %v9831_v46 = vld [vmem:[#allocation17_spill] sm:$0xff] }
 0xa1c   : > { %5748 = vmatpush3.bf16.msra.mxu0 %v9828_v44  ;;  %v3009_v39 = vadd.f32 %v8499_v3, %v2999_v21  ;;  %v2991_v53 = vmul.f32 %v6212_v49, %v8309_v4  ;;  %v9832_v44 = vld [vmem:[#allocation18_spill] sm:$0xff]  ;;  %v8561_v21 = vrot.slane %v785_v29, %v2556_v62  ;;  %v9834_v49 = vld [vmem:[#allocation19_spill] sm:$0xff] }
 0xa1d   : > { %5749 = vmatprep.subr.bf16.mxu0 %v9770_v23  ;;  %v3002_v5 = vmul.f32 %v8491_v24, %v2992_v2 }
 0xa1e   : > { %v6214_v41 = vpop.eup %6213  ;;  %v8535_v59 = vpack.c.bf16 %v3010_v52, %v3009_v39  ;;  %v3001_v30 = vmul.f32 %v8491_v24, %v2991_v53  ;;  %9833 = vst [vmem:[#allocation13_spill] sm:$0xff] %v8561_v21 }
 0xa1f   : > { %5694 = vmatmul.mubr.bf16.gmra.mrb[144].mxu0 %v8520_v47  ;;  %v6216_v18 = vpop.eup %6215  ;;  %v3012_v4 = vadd.f32 %v8499_v3, %v3002_v5  ;;  %v2994_v42 = vmul.f32 %v6214_v41, %v8324_v6 }
 0xa20   : > { %5697 = vmatprep.mubr.msk.bf16.mxu0 %vm6518_vm1, %v9770_v23  ;;  %5750 = vmatpush3.bf16.msra.mxu0 %v9829_v19  ;;  %v2993_v8 = vmul.f32 %v6216_v18, %v8335_v27  ;;  %v3011_v31 = vadd.f32 %v8499_v3, %v3001_v30  ;;  %v8559_v27 = vrot.slane %v785_v29, %v2552_v32  ;;  %v9835_v30 = vld [vmem:[#allocation20_spill] sm:$0xff] }
 0xa21   : > { %5751 = vmatprep.subr.bf16.mxu0 %v9770_v23  ;;  %v3004_v16 = vmul.f32 %v8491_v24, %v2994_v42 }
 0xa22   : > { %v3003_v6 = vmul.f32 %v8491_v24, %v2993_v8  ;;  %v8556_v35 = vpack.c.bf16 %v3012_v4, %v3011_v31 }
 0xa23   : > { %v3014_v19 = vadd.f32 %v8499_v3, %v3004_v16 }
 0xa24   : > { %5752 = vmatpush3.bf16.msra.mxu0 %v9830_v37  ;;  %v3013_v52 = vadd.f32 %v8499_v3, %v3003_v6 }
 0xa25   : > { %5753 = vmatprep.subr.bf16.mxu0 %v9770_v23 }
 0xa26   : > { %v8585_v4 = vpack.c.bf16 %v3014_v19, %v3013_v52 }
 0xa27   : > { %5698 = vmatmul.mubr.bf16.gmra.mrb[148].mxu0 %v8535_v59 }
 0xa28   : > { %5701 = vmatprep.mubr.msk.bf16.mxu0 %vm6518_vm1, %v9770_v23  ;;  %5754 = vmatpush3.bf16.msra.mxu0 %v9831_v46 }
 0xa29   : > { %5755 = vmatprep.subr.bf16.mxu0 %v9770_v23 }
 0xa2c   : > { %5756 = vmatpush3.bf16.msra.mxu0 %v9832_v44 }
 0xa2d   : > { %5757 = vmatprep.subr.bf16.mxu0 %v9770_v23 }
 0xa2f   : > { %5702 = vmatmul.mubr.bf16.gmra.mrb[152].mxu0 %v8556_v35 }
 0xa30   : > { %5705 = vmatprep.mubr.msk.bf16.mxu0 %vm6518_vm1, %v9770_v23  ;;  %5758 = vmatpush3.bf16.msra.mxu0 %v9834_v49 }
 0xa31   : > { %v2594_v24 = vpop.f32.mrb[120].mxu0  ;;  %5759 = vmatprep.subr.bf16.mxu0 %v9770_v23 }
 0xa32   : > { %v8571_v2 = vadd.f32 %v2594_v24, %v8559_v27  ;;  %v2596_v39 = vpop.f32.mrb[121].mxu0 }
 0xa33   : > { %v8574_v53 = vadd.f32 %v2596_v39, %v8561_v21  ;;  %v2598_v37 = vpop.f32.mrb[122].mxu0 }
 0xa34   : > { %v2643_v41 = vmul.f32 -1.702, %v8571_v2  ;;  %v8578_v5 = vadd.f32 %v2598_v37, %v8559_v27  ;;  %v2600_v18 = vpop.f32.mrb[123].mxu0  ;;  %5760 = vmatpush3.bf16.msra.mxu0 %v9835_v30 }
 0xa35   : > { %v2644_v3 = vmul.f32 -1.702, %v8574_v53  ;;  %v8583_v46 = vadd.f32 %v2600_v18, %v8561_v21  ;;  %5811 = vmatprep.subr.bf16.mxu0 %v9770_v23 }
 0xa36   : > { %v2663_v42 = vmul.f32 1.442695, %v2643_v41  ;;  %v2645_v8 = vmul.f32 -1.702, %v8578_v5 }
 0xa37   : > { %v2665_v32 = vmul.f32 1.442695, %v2644_v3  ;;  %v2646_v29 = vmul.f32 -1.702, %v8583_v46  ;;  %5706 = vmatmul.mubr.bf16.gmra.mrb[156].mxu0 %v8585_v4 }
 0xa38   : > { %6217 = vpow2.f32 %v2663_v42  ;;  %v2667_v62 = vmul.f32 1.442695, %v2645_v8  ;;  %5761 = vmatprep.mubr.msk.bf16.mxu0 %vm6518_vm1, %v9770_v23 }
 0xa39   : > { %6219 = vpow2.f32 %v2665_v32  ;;  %v2669_v31 = vmul.f32 1.442695, %v2646_v29  ;;  %v2604_v44 = vpop.f32.mrb[124].mxu0 }
 0xa3a   : > { %6221 = vpow2.f32 %v2667_v62  ;;  %v8594_v16 = vadd.f32 %v2604_v44, %v8559_v27  ;;  %v2606_v6 = vpop.f32.mrb[125].mxu0 }
 0xa3b   : > { %6223 = vpow2.f32 %v2669_v31  ;;  %v8597_v49 = vadd.f32 %v2606_v6, %v8561_v21  ;;  %v2608_v19 = vpop.f32.mrb[126].mxu0 }
 0xa3c   : > { %v2647_v52 = vmul.f32 -1.702, %v8594_v16  ;;  %v8601_v24 = vadd.f32 %v2608_v19, %v8559_v27  ;;  %v2610_v39 = vpop.f32.mrb[127].mxu0 }
 0xa3d   : > { %v2648_v37 = vmul.f32 -1.702, %v8597_v49  ;;  %v8605_v41 = vadd.f32 %v2610_v39, %v8561_v21 }
 0xa3e   : > { %v2671_v18 = vmul.f32 1.442695, %v2647_v52  ;;  %v2649_v30 = vmul.f32 -1.702, %v8601_v24 }
 0xa3f   : > { %v2673_v3 = vmul.f32 1.442695, %v2648_v37  ;;  %v2650_v42 = vmul.f32 -1.702, %v8605_v41  ;;  %5762 = vmatmul.mubr.bf16.vlgmr.msra.gmra.mrb[160].mxu0 %v8506_v40 }
 0xa40   : > { %6225 = vpow2.f32 %v2671_v18  ;;  %v2675_v8 = vmul.f32 1.442695, %v2649_v30  ;;  %5765 = vmatprep.mubr.msk.bf16.mxu0 %vm6518_vm1, %v9770_v23 }
 0xa41   : > { %6227 = vpow2.f32 %v2673_v3  ;;  %v2677_v32 = vmul.f32 1.442695, %v2650_v42  ;;  %v2614_v29 = vpop.f32.mrb[128].mxu0 }
 0xa42   : > { %v6218_v62 = vpop.eup %6217  ;;  %6229 = vpow2.f32 %v2675_v8  ;;  %v8613_v31 = vadd.f32 %v2614_v29, %v8559_v27  ;;  %v2616_v44 = vpop.f32.mrb[129].mxu0 }
 0xa43   : > { %v6220_v6 = vpop.eup %6219  ;;  %v2703_v19 = vadd.f32 1.0, %v6218_v62  ;;  %6231 = vpow2.f32 %v2677_v32  ;;  %v8616_v52 = vadd.f32 %v2616_v44, %v8561_v21  ;;  %v2618_v39 = vpop.f32.mrb[130].mxu0 }
 0xa44   : > { %v6222_v37 = vpop.eup %6221  ;;  %v2704_v18 = vadd.f32 1.0, %v6220_v6  ;;  %v2651_v30 = vmul.f32 -1.702, %v8613_v31  ;;  %v8620_v3 = vadd.f32 %v2618_v39, %v8559_v27  ;;  %v2620_v42 = vpop.f32.mrb[131].mxu0 }
 0xa45   : > { %v6224_v8 = vpop.eup %6223  ;;  %6233 = vrcp.f32 %v2703_v19  ;;  %v2705_v29 = vadd.f32 1.0, %v6222_v37  ;;  %v2652_v22 = vmul.f32 -1.702, %v8616_v52  ;;  %v8624_v62 = vadd.f32 %v2620_v42, %v8561_v21 }
 0xa46   : > { %6235 = vrcp.f32 %v2704_v18  ;;  %v2706_v32 = vadd.f32 1.0, %v6224_v8  ;;  %v2679_v44 = vmul.f32 1.442695, %v2651_v30  ;;  %v2653_v60 = vmul.f32 -1.702, %v8620_v3 }
 0xa47   : > { %6237 = vrcp.f32 %v2705_v29  ;;  %v2681_v6 = vmul.f32 1.442695, %v2652_v22  ;;  %v2654_v28 = vmul.f32 -1.702, %v8624_v62  ;;  %5766 = vmatmul.mubr.bf16.gmra.mrb[164].mxu0 %v8520_v47 }
 0xa48   : > { %6239 = vrcp.f32 %v2706_v32  ;;  %v2683_v39 = vmul.f32 1.442695, %v2653_v60  ;;  %5769 = vmatprep.mubr.msk.bf16.mxu0 %vm6518_vm1, %v9770_v23 }
 0xa49   : > { %6241 = vpow2.f32 %v2679_v44  ;;  %v2685_v19 = vmul.f32 1.442695, %v2654_v28  ;;  %v2624_v37 = vpop.f32.mrb[132].mxu0 }
 0xa4a   : > { %v6226_v42 = vpop.eup %6225  ;;  %6243 = vpow2.f32 %v2681_v6  ;;  %v8632_v18 = vadd.f32 %v2624_v37, %v8559_v27  ;;  %v2626_v30 = vpop.f32.mrb[133].mxu0 }
 0xa4b   : > { %v6228_v8 = vpop.eup %6227  ;;  %v2707_v22 = vadd.f32 1.0, %v6226_v42  ;;  %6245 = vpow2.f32 %v2683_v39  ;;  %v8635_v29 = vadd.f32 %v2626_v30, %v8561_v21  ;;  %v2628_v32 = vpop.f32.mrb[134].mxu0 }
 0xa4c   : > { %v6230_v60 = vpop.eup %6229  ;;  %v2708_v11 = vadd.f32 1.0, %v6228_v8  ;;  %6247 = vpow2.f32 %v2685_v19  ;;  %v2655_v44 = vmul.f32 -1.702, %v8632_v18  ;;  %v8639_v28 = vadd.f32 %v2628_v32, %v8559_v27  ;;  %v2630_v6 = vpop.f32.mrb[135].mxu0 }
 0xa4d   : > { %v6232_v15 = vpop.eup %6231  ;;  %6249 = vrcp.f32 %v2707_v22  ;;  %v2709_v37 = vadd.f32 1.0, %v6230_v60  ;;  %v2656_v10 = vmul.f32 -1.702, %v8635_v29  ;;  %v8643_v39 = vadd.f32 %v2630_v6, %v8561_v21 }
 0xa4e   : > { %6251 = vrcp.f32 %v2708_v11  ;;  %v2710_v42 = vadd.f32 1.0, %v6232_v15  ;;  %v2687_v30 = vmul.f32 1.442695, %v2655_v44  ;;  %v2657_v8 = vmul.f32 -1.702, %v8639_v28 }
 0xa4f   : > { %v6234_v19 = vpop.eup %6233  ;;  %6253 = vrcp.f32 %v2709_v37  ;;  %v2689_v56 = vmul.f32 1.442695, %v2656_v10  ;;  %v2658_v32 = vmul.f32 -1.702, %v8643_v39  ;;  %5770 = vmatmul.mubr.bf16.gmra.mrb[168].mxu0 %v8535_v59 }
 0xa50   : > { %v6236_v17 = vpop.eup %6235  ;;  %6255 = vrcp.f32 %v2710_v42  ;;  %v2691_v22 = vmul.f32 1.442695, %v2657_v8  ;;  %5773 = vmatprep.mubr.msk.bf16.mxu0 %vm6518_vm1, %v9770_v23  ;;  %v2724_v44 = vmul.f32 %v6234_v19, %v8571_v2 }
 0xa51   : > { %v6238_v60 = vpop.eup %6237  ;;  %6257 = vpow2.f32 %v2687_v30  ;;  %v2693_v11 = vmul.f32 1.442695, %v2658_v32  ;;  %v2726_v37 = vmul.f32 %v6236_v17, %v8574_v53 }
 0xa52   : > { %v6240_v15 = vpop.eup %6239  ;;  %v2728_v6 = vmul.f32 %v6238_v60, %v8578_v5  ;;  %6259 = vpow2.f32 %v2689_v56 }
 0xa53   : > { %v6242_v10 = vpop.eup %6241  ;;  %v2730_v50 = vmul.f32 %v6240_v15, %v8583_v46  ;;  %6261 = vpow2.f32 %v2691_v22  ;;  %v2634_v42 = vpop.f32.mrb[136].mxu0 }
 0xa54   : > { %v6244_v8 = vpop.eup %6243  ;;  %v2763_v1 = vpack.c.bf16 %v2728_v6, %v2724_v44  ;;  %v2711_v57 = vadd.f32 1.0, %v6242_v10  ;;  %6263 = vpow2.f32 %v2693_v11  ;;  %v8655_v30 = vadd.f32 %v2634_v42, %v8559_v27  ;;  %v2636_v32 = vpop.f32.mrb[137].mxu0 }
 0xa55   : > { %v6246_v48 = vpop.eup %6245  ;;  %v2712_v2 = vadd.f32 1.0, %v6244_v8  ;;  %v8658_v5 = vadd.f32 %v2636_v32, %v8561_v21  ;;  %v2638_v56 = vpop.f32.mrb[138].mxu0  ;;  %v2764_v19 = vpack.c.bf16 %v2730_v50, %v2726_v37  ;;  %v9836_v8 = vld [vmem:[#allocation2_spill] sm:$0xff] }
 0xa56   : > { %v6248_v17 = vpop.eup %6247  ;;  %6265 = vrcp.f32 %v2711_v57  ;;  %v2713_v53 = vadd.f32 1.0, %v6246_v48  ;;  %v2659_v46 = vmul.f32 -1.702, %v8655_v30  ;;  %v8662_v22 = vadd.f32 %v2638_v56, %v8559_v27  ;;  %v2640_v60 = vpop.f32.mrb[139].mxu0 }
 0xa57   : > { %v6250_v11 = vpop.eup %6249  ;;  %6267 = vrcp.f32 %v2712_v2  ;;  %v2714_v15 = vadd.f32 1.0, %v6248_v17  ;;  %v2660_v44 = vmul.f32 -1.702, %v8658_v5  ;;  %v8666_v6 = vadd.f32 %v2640_v60, %v8561_v21  ;;  %2811 = vmatprep.mubr.bf16.mxu1 %v2764_v19  ;;  %5774 = vmatmul.mubr.bf16.gmra.mrb[172].mxu0 %v8556_v35 }
 0xa58   : > { %v6252_v50 = vpop.eup %6251  ;;  %6269 = vrcp.f32 %v2713_v53  ;;  %v2695_v48 = vmul.f32 1.442695, %v2659_v46  ;;  %v2661_v57 = vmul.f32 -1.702, %v8662_v22  ;;  %2812 = vmatmul.mubr.bf16.vlgmr.msra.gmra.mrb[120].mxu1 %v2763_v1  ;;  %5777 = vmatprep.mubr.msk.bf16.mxu0 %vm6518_vm1, %v9770_v23  ;;  %v2732_v2 = vmul.f32 %v6250_v11, %v8594_v16 }
 0xa59   : > { %v6254_v10 = vpop.eup %6253  ;;  %6271 = vrcp.f32 %v2714_v15  ;;  %v2697_v37 = vmul.f32 1.442695, %v2660_v44  ;;  %v2662_v42 = vmul.f32 -1.702, %v8666_v6  ;;  %5710 = vmatpush3.bf16.msra.mxu1 %v9836_v8  ;;  %v2734_v17 = vmul.f32 %v6252_v50, %v8597_v49 }
 0xa5a   : > { %v6256_v32 = vpop.eup %6255  ;;  %v2736_v56 = vmul.f32 %v6254_v10, %v8601_v24  ;;  %6273 = vpow2.f32 %v2695_v48  ;;  %v2699_v19 = vmul.f32 1.442695, %v2661_v57  ;;  %5711 = vmatprep.subr.bf16.mxu1 %v9770_v23  ;;  %v9837_v24 = vld [vmem:[#allocation3_spill] sm:$0xff]  ;;  %v9838_v57 = vld [vmem:[#allocation4_spill] sm:$0xff] }
 0xa5b   : > { %v6258_v1 = vpop.eup %6257  ;;  %v2738_v53 = vmul.f32 %v6256_v32, %v8605_v41  ;;  %6275 = vpow2.f32 %v2697_v37  ;;  %v2701_v46 = vmul.f32 1.442695, %v2662_v42 }
 0xa5c   : > { %v6260_v60 = vpop.eup %6259  ;;  %v2715_v15 = vadd.f32 1.0, %v6258_v1  ;;  %6277 = vpow2.f32 %v2699_v19  ;;  %v2765_v44 = vpack.c.bf16 %v2736_v56, %v2732_v2 }
 0xa5d   : > { %v6262_v8 = vpop.eup %6261  ;;  %v2716_v21 = vadd.f32 1.0, %v6260_v60  ;;  %6279 = vpow2.f32 %v2701_v46  ;;  %v2766_v16 = vpack.c.bf16 %v2738_v53, %v2734_v17  ;;  %5712 = vmatpush3.bf16.msra.mxu1 %v9837_v24  ;;  %v9839_v53 = vld [vmem:[#allocation5_spill] sm:$0xff] }
 0xa5e   : > { %v6264_v11 = vpop.eup %6263  ;;  %6281 = vrcp.f32 %v2715_v15  ;;  %v2717_v48 = vadd.f32 1.0, %v6262_v8  ;;  %5713 = vmatprep.subr.bf16.mxu1 %v9770_v23 }
 0xa5f   : > { %6283 = vrcp.f32 %v2716_v21  ;;  %v2718_v49 = vadd.f32 1.0, %v6264_v11  ;;  %2819 = vmatprep.mubr.bf16.mxu1 %v2766_v16  ;;  %5778 = vmatmul.mubr.bf16.gmra.mrb[176].mxu0 %v8585_v4  ;;  %v9840_v16 = vld [vmem:[#allocation6_spill] sm:$0xff] }
 0xa60   : > { %v6266_v41 = vpop.eup %6265  ;;  %6285 = vrcp.f32 %v2717_v48  ;;  %2820 = vmatmul.mubr.bf16.gmra.mrb[124].mxu1 %v2765_v44  ;;  %5821 = vmatprep.mubr.msk.bf16.mxu0 %vm6518_vm1, %v9770_v23 }
 0xa61   : > { %v6268_v50 = vpop.eup %6267  ;;  %6287 = vrcp.f32 %v2718_v49  ;;  %5714 = vmatpush3.bf16.msra.mxu1 %v9838_v57  ;;  %v2740_v21 = vmul.f32 %v6266_v41, %v8613_v31 }
 0xa62   : > { %v6270_v10 = vpop.eup %6269  ;;  %5715 = vmatprep.subr.bf16.mxu1 %v9770_v23  ;;  %v2742_v2 = vmul.f32 %v6268_v50, %v8616_v52 }
 0xa63   : > { %v6272_v37 = vpop.eup %6271  ;;  %v2744_v42 = vmul.f32 %v6270_v10, %v8620_v3  ;;  %v9841_v10 = vld [vmem:[#allocation8_spill] sm:$0xff] }
 0xa64   : > { %v6274_v32 = vpop.eup %6273  ;;  %v2746_v56 = vmul.f32 %v6272_v37, %v8624_v62 }
 0xa65   : > { %v6276_v19 = vpop.eup %6275  ;;  %v2719_v1 = vadd.f32 1.0, %v6274_v32  ;;  %v2767_v17 = vpack.c.bf16 %v2744_v42, %v2740_v21  ;;  %5716 = vmatpush3.bf16.msra.mxu1 %v9839_v53  ;;  %v9842_v42 = vld [vmem:[#allocation10_spill] sm:$0xff] }
 0xa66   : > { %v6278_v46 = vpop.eup %6277  ;;  %v2720_v60 = vadd.f32 1.0, %v6276_v19  ;;  %v2768_v15 = vpack.c.bf16 %v2746_v56, %v2742_v2  ;;  %5717 = vmatprep.subr.bf16.mxu1 %v9770_v23  ;;  %v9843_v19 = vld [vmem:[#allocation12_spill] sm:$0xff] }
 0xa67   : > { %v6280_v44 = vpop.eup %6279  ;;  %6289 = vrcp.f32 %v2719_v1  ;;  %v2721_v31 = vadd.f32 1.0, %v6278_v46 }
 0xa68   : > { %v6282_v8 = vpop.eup %6281  ;;  %6291 = vrcp.f32 %v2720_v60  ;;  %v2722_v3 = vadd.f32 1.0, %v6280_v44  ;;  %2827 = vmatprep.mubr.bf16.mxu1 %v2768_v15 }
 0xa69   : > { %v6284_v52 = vpop.eup %6283  ;;  %6293 = vrcp.f32 %v2721_v31  ;;  %2828 = vmatmul.mubr.bf16.gmra.mrb[128].mxu1 %v2767_v17  ;;  %v2748_v11 = vmul.f32 %v6282_v8, %v8632_v18 }
 0xa6a   : > { %v6286_v62 = vpop.eup %6285  ;;  %6295 = vrcp.f32 %v2722_v3  ;;  %5718 = vmatpush3.bf16.msra.mxu1 %v9840_v16  ;;  %v2750_v49 = vmul.f32 %v6284_v52, %v8635_v29 }
 0xa6b   : > { %v6288_v24 = vpop.eup %6287  ;;  %v2752_v48 = vmul.f32 %v6286_v62, %v8639_v28  ;;  %5719 = vmatprep.subr.bf16.mxu1 %v9770_v23 }
 0xa6c   : > { %v2754_v41 = vmul.f32 %v6288_v24, %v8643_v39 }
 0xa6d   : > { %v2769_v50 = vpack.c.bf16 %v2752_v48, %v2748_v11 }
 0xa6e   : > { %v2770_v57 = vpack.c.bf16 %v2754_v41, %v2750_v49  ;;  %5720 = vmatpush3.bf16.msra.mxu1 %v9841_v10 }
 0xa6f   : > { %5721 = vmatprep.subr.bf16.mxu1 %v9770_v23 }
 0xa70   : > { %2835 = vmatprep.mubr.bf16.mxu1 %v2770_v57 }
 0xa71   : > { %v6290_v37 = vpop.eup %6289  ;;  %2836 = vmatmul.mubr.bf16.gmra.mrb[132].mxu1 %v2769_v50 }
 0xa72   : > { %v6292_v21 = vpop.eup %6291  ;;  %5722 = vmatpush3.bf16.msra.mxu1 %v9842_v42  ;;  %v2756_v29 = vmul.f32 %v6290_v37, %v8655_v30 }
 0xa73   : > { %v6294_v18 = vpop.eup %6293  ;;  %5723 = vmatprep.subr.bf16.mxu1 %v9770_v23  ;;  %v2758_v32 = vmul.f32 %v6292_v21, %v8658_v5  ;;  %v6489_v5 = vld [vmem:[%s9626_s4] ss:$0 sm:$0xff] }
 0xa74   : > { %v6296_v28 = vpop.eup %6295  ;;  %v2760_v39 = vmul.f32 %v6294_v18, %v8662_v22 }
 0xa75   : > { %v2762_v2 = vmul.f32 %v6296_v28, %v8666_v6 }
 0xa76   : > { %v2771_v56 = vpack.c.bf16 %v2760_v39, %v2756_v29  ;;  %5724 = vmatpush3.bf16.msra.mxu1 %v9843_v19 }
 0xa77   : > { %v2772_v1 = vpack.c.bf16 %v2762_v2, %v2758_v32  ;;  %5781 = vmatprep.subr.bf16.mxu1 %v9770_v23 }
 0xa79   : > { %2843 = vmatprep.mubr.bf16.mxu1 %v2772_v1 }
 0xa7a   : > { %2844 = vmatmul.mubr.bf16.gmra.mrb[136].mxu1 %v2771_v56 }
 0xa7b   : > { %5725 = vmatprep.mubr.msk.bf16.mxu1 %vm6518_vm1, %v9770_v23 }
 0xa82   : > { %5726 = vmatmul.mubr.bf16.vlgmr.msra.gmra.mrb[140].mxu1 %v8506_v40 }
 0xa83   : > { %5729 = vmatprep.mubr.msk.bf16.mxu1 %vm6518_vm1, %v9770_v23 }
 0xa8a   : > { %5730 = vmatmul.mubr.bf16.gmra.mrb[144].mxu1 %v8520_v47 }
 0xa8b   : > { %5733 = vmatprep.mubr.msk.bf16.mxu1 %vm6518_vm1, %v9770_v23 }
 0xa92   : > { %5734 = vmatmul.mubr.bf16.gmra.mrb[148].mxu1 %v8535_v59 }
 0xa93   : > { %5737 = vmatprep.mubr.msk.bf16.mxu1 %vm6518_vm1, %v9770_v23 }
 0xa9a   : > { %5738 = vmatmul.mubr.bf16.gmra.mrb[152].mxu1 %v8556_v35 }
 0xa9b   : > { %5741 = vmatprep.mubr.msk.bf16.mxu1 %vm6518_vm1, %v9770_v23 }
 0xaa2   : > { %5742 = vmatmul.mubr.bf16.gmra.mrb[156].mxu1 %v8585_v4 }
 0xaa3   : > { %5791 = vmatprep.mubr.msk.bf16.mxu1 %vm6518_vm1, %v9770_v23 }
 0xaea   : > { %v3054_v30 = vpop.f32.mrb[140].mxu0 }
 0xaeb   : > { %v3055_v22 = vadd.f32 %v6489_v5, %v3054_v30  ;;  %v5691_v6 = vpop.f32.mrb[141].mxu0 }
 0xaec   : > { %v3057_v17 = vpop.f32.mrb[142].mxu0 }
 0xaed   : > { %v3058_v53 = vadd.f32 %v6489_v5, %v3057_v17  ;;  %v5692_v46 = vpop.f32.mrb[143].mxu0  ;;  %v8728_v60 = vmul.f32 0.125, %v3055_v22 }
 0xaef   : > { %v8730_v15 = vmul.f32 0.125, %v3058_v53 }
 0xaf1   : > { %v3249_v44 = vpack.c.bf16 %v8730_v15, %v8728_v60  ;;  %v9847_v60 = vld [vmem:[#allocation23_spill] sm:$0xff]  ;;  %v9848_v15 = vld [vmem:[#allocation24_spill] sm:$0xff] }
 0xaf2   : > { %v3062_v31 = vpop.f32.mrb[144].mxu0 }
 0xaf3   : > { %v3063_v8 = vadd.f32 %v6489_v5, %v3062_v31  ;;  %v5695_v3 = vpop.f32.mrb[145].mxu0 }
 0xaf4   : > { %v3065_v52 = vpop.f32.mrb[146].mxu0 }
 0xaf5   : > { %v3066_v62 = vadd.f32 %v6489_v5, %v3065_v52  ;;  %v5696_v16 = vpop.f32.mrb[147].mxu0  ;;  %v8734_v24 = vmul.f32 0.125, %v3063_v8 }
 0xaf7   : > { %v8736_v11 = vmul.f32 0.125, %v3066_v62 }
 0xaf9   : > { %v3250_v48 = vpack.c.bf16 %v8736_v11, %v8734_v24  ;;  %v9850_v24 = vld [vmem:[#allocation26_spill] sm:$0xff]  ;;  %v9851_v11 = vld [vmem:[#allocation27_spill] sm:$0xff] }
 0xafa   : > { %v3070_v49 = vpop.f32.mrb[148].mxu0 }
 0xafb   : > { %v3071_v41 = vadd.f32 %v6489_v5, %v3070_v49  ;;  %v5699_v50 = vpop.f32.mrb[149].mxu0 }
 0xafc   : > { %v3073_v57 = vpop.f32.mrb[150].mxu0 }
 0xafd   : > { %v3074_v10 = vadd.f32 %v6489_v5, %v3073_v57  ;;  %v5700_v37 = vpop.f32.mrb[151].mxu0  ;;  %v8740_v21 = vmul.f32 0.125, %v3071_v41  ;;  %v6490_v41 = vld [vmem:[%s9630_s8] ss:$0 sm:$0xff] }
 0xaff   : > { %v8742_v42 = vmul.f32 0.125, %v3074_v10 }
 0xb01   : > { %v3251_v18 = vpack.c.bf16 %v8742_v42, %v8740_v21  ;;  %v9853_v21 = vld [vmem:[#allocation30_spill] sm:$0xff]  ;;  %v9854_v42 = vld [vmem:[#allocation31_spill] sm:$0xff] }
 0xb02   : > { %v3078_v28 = vpop.f32.mrb[152].mxu0 }
 0xb03   : > { %v3079_v29 = vadd.f32 %v6489_v5, %v3078_v28  ;;  %v5703_v39 = vpop.f32.mrb[153].mxu0 }
 0xb04   : > { %v3081_v32 = vpop.f32.mrb[154].mxu0 }
 0xb05   : > { %v3082_v2 = vadd.f32 %v6489_v5, %v3081_v32  ;;  %v5704_v56 = vpop.f32.mrb[155].mxu0  ;;  %v8746_v19 = vmul.f32 0.125, %v3079_v29 }
 0xb07   : > { %v8748_v1 = vmul.f32 0.125, %v3082_v2 }
 0xb09   : > { %v3252_v30 = vpack.c.bf16 %v8748_v1, %v8746_v19  ;;  %v9856_v19 = vld [vmem:[#allocation33_spill] sm:$0xff]  ;;  %v9857_v1 = vld [vmem:[#allocation34_spill] sm:$0xff] }
 0xb0a   : > { %v3086_v22 = vpop.f32.mrb[156].mxu0 }
 0xb0b   : > { %v3087_v6 = vadd.f32 %v6489_v5, %v3086_v22  ;;  %v5707_v17 = vpop.f32.mrb[157].mxu0 }
 0xb0c   : > { %v3089_v53 = vpop.f32.mrb[158].mxu0 }
 0xb0d   : > { %v3090_v46 = vadd.f32 %v6489_v5, %v3089_v53  ;;  %v5708_v31 = vpop.f32.mrb[159].mxu0  ;;  %v8752_v8 = vmul.f32 0.125, %v3087_v6 }
 0xb0f   : > { %v8754_v3 = vmul.f32 0.125, %v3090_v46 }
 0xb11   : > { %v3253_v52 = vpack.c.bf16 %v8754_v3, %v8752_v8  ;;  %v9859_v8 = vld [vmem:[#allocation36_spill] sm:$0xff]  ;;  %v9860_v3 = vld [vmem:[#allocation37_spill] sm:$0xff] }
 0xb12   : > { %v3210_v62 = vpop.f32.mrb[160].mxu0 }
 0xb13   : > { %v5763_v16 = vpop.f32.mrb[161].mxu0  ;;  %v3211_v50 = vadd.f32 %v6490_v41, %v3210_v62 }
 0xb14   : > { %v3213_v49 = vpop.f32.mrb[162].mxu0  ;;  %v8766_v16 = vld [vmem:[%s9638_s16] ss:$0 sm:$0xff] }
 0xb15   : > { %v3214_v57 = vadd.f32 %v6490_v41, %v3213_v49  ;;  %v5764_v10 = vpop.f32.mrb[163].mxu0 }
 0xb17   : > { %v3467_v37 = vpack.c.bf16 %v3214_v57, %v3211_v50 }
 0xb19   : > { %5812 = vmatpush3.bf16.msra.mxu0 %v3467_v37 }
 0xb1a   : > { %v3218_v5 = vpop.f32.mrb[164].mxu0  ;;  %5813 = vmatprep.subr.bf16.mxu0 %v9770_v23 }
 0xb1b   : > { %v5767_v28 = vpop.f32.mrb[165].mxu0  ;;  %v3219_v39 = vadd.f32 %v6490_v41, %v3218_v5 }
 0xb1c   : > { %v3221_v29 = vpop.f32.mrb[166].mxu0 }
 0xb1d   : > { %v3222_v32 = vadd.f32 %v6490_v41, %v3221_v29  ;;  %v5768_v2 = vpop.f32.mrb[167].mxu0 }
 0xb1f   : > { %v3468_v56 = vpack.c.bf16 %v3222_v32, %v3219_v39 }
 0xb21   : > { %5814 = vmatpush3.bf16.msra.mxu0 %v3468_v56 }
 0xb22   : > { %v3226_v22 = vpop.f32.mrb[168].mxu0  ;;  %5815 = vmatprep.subr.bf16.mxu0 %v9770_v23 }
 0xb23   : > { %v5771_v6 = vpop.f32.mrb[169].mxu0  ;;  %v3227_v53 = vadd.f32 %v6490_v41, %v3226_v22 }
 0xb24   : > { %v3229_v17 = vpop.f32.mrb[170].mxu0 }
 0xb25   : > { %v3230_v46 = vadd.f32 %v6490_v41, %v3229_v17  ;;  %v5772_v31 = vpop.f32.mrb[171].mxu0 }
 0xb27   : > { %v3469_v62 = vpack.c.bf16 %v3230_v46, %v3227_v53 }
 0xb29   : > { %5816 = vmatpush3.bf16.msra.mxu0 %v3469_v62 }
 0xb2a   : > { %v3234_v49 = vpop.f32.mrb[172].mxu0  ;;  %5817 = vmatprep.subr.bf16.mxu0 %v9770_v23 }
 0xb2b   : > { %v2813_v50 = vpop.f32.mrb[120].mxu1  ;;  %v5775_v57 = vpop.f32.mrb[173].mxu0  ;;  %v3235_v28 = vadd.f32 %v6490_v41, %v3234_v49 }
 0xb2c   : > { %v2814_v10 = vadd.f32 %v8766_v16, %v2813_v50  ;;  %v2815_v37 = vpop.f32.mrb[121].mxu1  ;;  %v3237_v5 = vpop.f32.mrb[174].mxu0 }
 0xb2d   : > { %v3238_v29 = vadd.f32 %v6490_v41, %v3237_v5  ;;  %v2816_v39 = vpop.f32.mrb[122].mxu1  ;;  %v5776_v32 = vpop.f32.mrb[175].mxu0 }
 0xb2e   : > { %v2852_v2 = vadd.f32 %v2814_v10, %v7947_v33  ;;  %v2817_v56 = vadd.f32 %v8766_v16, %v2816_v39  ;;  %v2818_v22 = vpop.f32.mrb[123].mxu1  ;;  %v9844_v32 = vld [vmem:[#allocation29_spill] sm:$0xff] }
 0xb2f   : > { %v3470_v6 = vpack.c.bf16 %v3238_v29, %v3235_v28 }
 0xb30   : > { %2862 = vst [vmem:[%s8775_s20] sm:$0xff] %v2852_v2  ;;  %v2853_v17 = vadd.f32 %v2817_v56, %v7951_v26 }
 0xb31   : > { %5818 = vmatpush3.bf16.msra.mxu0 %v3470_v6 }
 0xb32   : > { %2863 = vst [vmem:[%s8775_s20 + $0x8] sm:$0xff] %v2853_v17  ;;  %v3242_v53 = vpop.f32.mrb[176].mxu0  ;;  %5819 = vmatprep.subr.bf16.mxu0 %v9770_v23 }
 0xb33   : > { %v2821_v46 = vpop.f32.mrb[124].mxu1  ;;  %v5779_v31 = vpop.f32.mrb[177].mxu0  ;;  %v3243_v50 = vadd.f32 %v6490_v41, %v3242_v53 }
 0xb34   : > { %v2822_v62 = vadd.f32 %v8766_v16, %v2821_v46  ;;  %v2823_v49 = vpop.f32.mrb[125].mxu1  ;;  %v3245_v33 = vpop.f32.mrb[178].mxu0 }
 0xb35   : > { %v3246_v57 = vadd.f32 %v6490_v41, %v3245_v33  ;;  %v2824_v10 = vpop.f32.mrb[126].mxu1  ;;  %v5780_v37 = vpop.f32.mrb[179].mxu0 }
 0xb36   : > { %v2854_v5 = vadd.f32 %v2822_v62, %v7957_v43  ;;  %v2825_v26 = vadd.f32 %v8766_v16, %v2824_v10  ;;  %v2826_v28 = vpop.f32.mrb[127].mxu1 }
 0xb37   : > { %v3471_v29 = vpack.c.bf16 %v3246_v57, %v3243_v50 }
 0xb38   : > { %2864 = vst [vmem:[%s8775_s20 + $0x10] sm:$0xff] %v2854_v5  ;;  %v2855_v39 = vadd.f32 %v2825_v26, %v7961_v12 }
 0xb39   : > { %v3488_v2 = vand.u32 %v3471_v29, %v9844_v32 }
 0xb3a   : > { %2865 = vst [vmem:[%s8775_s20 + $0x18] sm:$0xff] %v2855_v39 }
 0xb3b   : > { %5820 = vmatpush3.bf16.msra.mxu0 %v3488_v2 }
 0xb3c   : > { %v2829_v56 = vpop.f32.mrb[128].mxu1  ;;  %5877 = vmatprep.subr.bf16.mxu0 %v9770_v23 }
 0xb3d   : > { %v2830_v41 = vadd.f32 %v8766_v16, %v2829_v56  ;;  %v2831_v43 = vpop.f32.mrb[129].mxu1 }
 0xb3e   : > { %v2832_v22 = vpop.f32.mrb[130].mxu1 }
 0xb3f   : > { %v2856_v6 = vadd.f32 %v2830_v41, %v7967_v61  ;;  %v2833_v17 = vadd.f32 %v8766_v16, %v2832_v22  ;;  %v2834_v53 = vpop.f32.mrb[131].mxu1 }
 0xb41   : > { %2866 = vst [vmem:[%s8775_s20 + $0x20] sm:$0xff] %v2856_v6  ;;  %v2857_v12 = vadd.f32 %v2833_v17, %v7971_v51 }
 0xb43   : > { %2867 = vst [vmem:[%s8775_s20 + $0x28] sm:$0xff] %v2857_v12 }
 0xb44   : > { %v2837_v46 = vpop.f32.mrb[132].mxu1 }
 0xb45   : > { %v2838_v31 = vadd.f32 %v8766_v16, %v2837_v46  ;;  %v2839_v62 = vpop.f32.mrb[133].mxu1 }
 0xb46   : > { %v2840_v49 = vpop.f32.mrb[134].mxu1 }
 0xb47   : > { %v2858_v33 = vadd.f32 %v2838_v31, %v7977_v38  ;;  %v2841_v50 = vadd.f32 %v8766_v16, %v2840_v49  ;;  %v2842_v57 = vpop.f32.mrb[135].mxu1 }
 0xb49   : > { %2868 = vst [vmem:[%s8775_s20 + $0x30] sm:$0xff] %v2858_v33  ;;  %v2859_v61 = vadd.f32 %v2841_v50, %v7981_v45  ;;  %v6491_v45 = vld [vmem:[%s9628_s6] ss:$0 sm:$0xff] }
 0xb4b   : > { %2869 = vst [vmem:[%s8775_s20 + $0x38] sm:$0xff] %v2859_v61 }
 0xb4d   : > { %v2845_v10 = vpop.f32.mrb[136].mxu1 }
 0xb4e   : > { %v2846_v51 = vadd.f32 %v8766_v16, %v2845_v10  ;;  %v2847_v37 = vpop.f32.mrb[137].mxu1 }
 0xb4f   : > { %v2848_v5 = vpop.f32.mrb[138].mxu1 }
 0xb50   : > { %v2860_v26 = vadd.f32 %v2846_v51, %v7988_v13  ;;  %v2849_v28 = vadd.f32 %v8766_v16, %v2848_v5  ;;  %v2850_v29 = vpop.f32.mrb[139].mxu1 }
 0xb52   : > { %2870 = vst [vmem:[%s8775_s20 + $0x40] sm:$0xff] %v2860_v26  ;;  %v2861_v38 = vadd.f32 %v2849_v28, %v7991_v54 }
 0xb54   : > { %2871 = vst [vmem:[%s8775_s20 + $0x48] sm:$0x1f] %v2861_v38 }
 0xb55   : > { %v3137_v39 = vpop.f32.mrb[140].mxu1 }
 0xb56   : > { %v5727_v2 = vpop.f32.mrb[141].mxu1  ;;  %v3138_v41 = vadd.f32 %v6491_v45, %v3137_v39 }
 0xb57   : > { %v3140_v56 = vpop.f32.mrb[142].mxu1 }
 0xb58   : > { %v3141_v43 = vadd.f32 %v6491_v45, %v3140_v56  ;;  %v5728_v22 = vpop.f32.mrb[143].mxu1 }
 0xb5a   : > { %v3254_v6 = vpack.c.bf16 %v3141_v43, %v3138_v41 }
 0xb5c   : > { %v3275_v13 = vsel %vm1276_vm2, %v3254_v6, 0 }
 0xb5d   : > { %v3145_v17 = vpop.f32.mrb[144].mxu1  ;;  %5782 = vmatpush3.bf16.xpose.msra.mxu1 %v3275_v13 }
 0xb5e   : > { %v5731_v16 = vpop.f32.mrb[145].mxu1  ;;  %5783 = vmatprep.subr.bf16.mxu1 %v9770_v23  ;;  %v3146_v53 = vadd.f32 %v6491_v45, %v3145_v17 }
 0xb5f   : > { %v3148_v54 = vpop.f32.mrb[146].mxu1 }
 0xb60   : > { %v3149_v12 = vadd.f32 %v6491_v45, %v3148_v54  ;;  %v5732_v46 = vpop.f32.mrb[147].mxu1 }
 0xb62   : > { %v3255_v31 = vpack.c.bf16 %v3149_v12, %v3146_v53  ;;  %v9845_v53 = vld [vmem:[#allocation21_spill] sm:$0xff] }
 0xb64   : > { %v3278_v62 = vsel %vm1276_vm2, %v3255_v31, 0 }
 0xb65   : > { %v3153_v49 = vpop.f32.mrb[148].mxu1  ;;  %5784 = vmatpush3.bf16.xpose.msra.mxu1 %v3278_v62 }
 0xb66   : > { %v5735_v33 = vpop.f32.mrb[149].mxu1  ;;  %5785 = vmatprep.subr.bf16.mxu1 %v9770_v23  ;;  %v3154_v57 = vadd.f32 %v6491_v45, %v3153_v49 }
 0xb67   : > { %v3156_v50 = vpop.f32.mrb[150].mxu1 }
 0xb68   : > { %v3157_v61 = vadd.f32 %v6491_v45, %v3156_v50  ;;  %v5736_v10 = vpop.f32.mrb[151].mxu1 }
 0xb6a   : > { %v3256_v51 = vpack.c.bf16 %v3157_v61, %v3154_v57 }
 0xb6c   : > { %v3281_v37 = vsel %vm1276_vm2, %v3256_v51, 0 }
 0xb6d   : > { %v3161_v5 = vpop.f32.mrb[152].mxu1  ;;  %5786 = vmatpush3.bf16.xpose.msra.mxu1 %v3281_v37 }
 0xb6e   : > { %v5739_v26 = vpop.f32.mrb[153].mxu1  ;;  %5787 = vmatprep.subr.bf16.mxu1 %v9770_v23  ;;  %v3162_v29 = vadd.f32 %v6491_v45, %v3161_v5 }
 0xb6f   : > { %v3164_v28 = vpop.f32.mrb[154].mxu1 }
 0xb70   : > { %v3165_v38 = vadd.f32 %v6491_v45, %v3164_v28  ;;  %v5740_v39 = vpop.f32.mrb[155].mxu1 }
 0xb72   : > { %v3257_v2 = vpack.c.bf16 %v3165_v38, %v3162_v29 }
 0xb74   : > { %v3284_v56 = vsel %vm1276_vm2, %v3257_v2, 0 }
 0xb75   : > { %v3169_v41 = vpop.f32.mrb[156].mxu1  ;;  %5788 = vmatpush3.bf16.xpose.msra.mxu1 %v3284_v56 }
 0xb76   : > { %v5743_v43 = vpop.f32.mrb[157].mxu1  ;;  %5789 = vmatprep.subr.bf16.mxu1 %v9770_v23  ;;  %v3170_v6 = vadd.f32 %v6491_v45, %v3169_v41 }
 0xb77   : > { %v3172_v22 = vpop.f32.mrb[158].mxu1 }
 0xb78   : > { %v3173_v13 = vadd.f32 %v6491_v45, %v3172_v22  ;;  %v5744_v17 = vpop.f32.mrb[159].mxu1  ;;  %v9846_v45 = vld [vmem:[#allocation22_spill] sm:$0xff] }
 0xb7a   : > { %v3258_v16 = vpack.c.bf16 %v3173_v13, %v3170_v6 }
 0xb7c   : > { %v3287_v54 = vsel %vm1276_vm2, %v3258_v16, 0 }
 0xb7d   : > { %5790 = vmatpush3.bf16.xpose.msra.mxu1 %v3287_v54 }
 0xb7e   : > { %5841 = vmatprep.subr.bf16.mxu1 %v9770_v23 }
 0xb84   : > { %5792 = vmatmul.mubr.msk.bf16.vlgmr.msra.gmra.mrb[160].mxu1 %vm1276_vm2, %v3249_v44  ;;  %v9849_v44 = vld [vmem:[#allocation25_spill] sm:$0xff] }
 0xb85   : > { %5795 = vmatprep.mubr.msk.bf16.mxu1 %vm6518_vm1, %v9770_v23  ;;  %5842 = vmatpush3.bf16.msra.mxu1 %v9845_v53 }
 0xb86   : > { %5843 = vmatprep.subr.bf16.mxu1 %v9770_v23 }
 0xb89   : > { %5844 = vmatpush3.bf16.msra.mxu1 %v9846_v45 }
 0xb8a   : > { %5845 = vmatprep.subr.bf16.mxu1 %v9770_v23 }
 0xb8c   : > { %5796 = vmatmul.mubr.msk.bf16.gmra.mrb[164].mxu1 %vm1276_vm2, %v3250_v48  ;;  %v9852_v48 = vld [vmem:[#allocation28_spill] sm:$0xff] }
 0xb8d   : > { %5799 = vmatprep.mubr.msk.bf16.mxu1 %vm6518_vm1, %v9770_v23  ;;  %5846 = vmatpush3.bf16.msra.mxu1 %v9847_v60 }
 0xb8e   : > { %5847 = vmatprep.subr.bf16.mxu1 %v9770_v23 }
 0xb91   : > { %5848 = vmatpush3.bf16.msra.mxu1 %v9848_v15 }
 0xb92   : > { %5849 = vmatprep.subr.bf16.mxu1 %v9770_v23 }
 0xb94   : > { %5800 = vmatmul.mubr.msk.bf16.gmra.mrb[168].mxu1 %vm1276_vm2, %v3251_v18  ;;  %v9855_v18 = vld [vmem:[#allocation32_spill] sm:$0xff] }
 0xb95   : > { %5803 = vmatprep.mubr.msk.bf16.mxu1 %vm6518_vm1, %v9770_v23  ;;  %5850 = vmatpush3.bf16.msra.mxu1 %v9849_v44 }
 0xb96   : > { %5851 = vmatprep.subr.bf16.mxu1 %v9770_v23 }
 0xb99   : > { %5852 = vmatpush3.bf16.msra.mxu1 %v9850_v24 }
 0xb9a   : > { %5853 = vmatprep.subr.bf16.mxu1 %v9770_v23 }
 0xb9c   : > { %5804 = vmatmul.mubr.msk.bf16.gmra.mrb[172].mxu1 %vm1276_vm2, %v3252_v30  ;;  %v9858_v30 = vld [vmem:[#allocation35_spill] sm:$0xff] }
 0xb9d   : > { %5807 = vmatprep.mubr.msk.bf16.mxu1 %vm6518_vm1, %v9770_v23  ;;  %5854 = vmatpush3.bf16.msra.mxu1 %v9851_v11 }
 0xb9e   : > { %5855 = vmatprep.subr.bf16.mxu1 %v9770_v23 }
 0xba1   : > { %5856 = vmatpush3.bf16.msra.mxu1 %v9852_v48 }
 0xba2   : > { %5913 = vmatprep.subr.bf16.mxu1 %v9770_v23 }
 0xba4   : > { %5808 = vmatmul.mubr.msk.bf16.gmra.mrb[176].mxu1 %vm1276_vm2, %v3253_v52 }
 0xba5   : > { %5857 = vmatprep.mubr.msk.bf16.mxu1 %vm6518_vm1, %v9770_v23 }
 0xbac   : > { %5858 = vmatmul.mubr.bf16.vlgmr.msra.gmra.mrb[180].mxu1 %v8506_v40 }
 0xbad   : > { %5861 = vmatprep.mubr.msk.bf16.mxu1 %vm6518_vm1, %v9770_v23  ;;  %5914 = vmatpush3.bf16.msra.mxu1 %v9853_v21 }
 0xbae   : > { %5915 = vmatprep.subr.bf16.mxu1 %v9770_v23 }
 0xbb1   : > { %5916 = vmatpush3.bf16.msra.mxu1 %v9854_v42 }
 0xbb2   : > { %5917 = vmatprep.subr.bf16.mxu1 %v9770_v23 }
 0xbb4   : > { %5862 = vmatmul.mubr.bf16.gmra.mrb[184].mxu1 %v8520_v47 }
 0xbb5   : > { %5865 = vmatprep.mubr.msk.bf16.mxu1 %vm6518_vm1, %v9770_v23  ;;  %5918 = vmatpush3.bf16.msra.mxu1 %v9855_v18 }
 0xbb6   : > { %5919 = vmatprep.subr.bf16.mxu1 %v9770_v23 }
 0xbb9   : > { %5920 = vmatpush3.bf16.msra.mxu1 %v9856_v19 }
 0xbba   : > { %5921 = vmatprep.subr.bf16.mxu1 %v9770_v23 }
 0xbbc   : > { %5866 = vmatmul.mubr.bf16.gmra.mrb[188].mxu1 %v8535_v59 }
 0xbbd   : > { %5869 = vmatprep.mubr.msk.bf16.mxu1 %vm6518_vm1, %v9770_v23  ;;  %5922 = vmatpush3.bf16.msra.mxu1 %v9857_v1  ;;  %v6492_v1 = vld [vmem:[%s9626_s4 + $0x1] ss:$0 sm:$0xff] }
 0xbbe   : > { %5923 = vmatprep.subr.bf16.mxu1 %v9770_v23 }
 0xbc1   : > { %5924 = vmatpush3.bf16.msra.mxu1 %v9858_v30 }
 0xbc2   : > { %5925 = vmatprep.subr.bf16.mxu1 %v9770_v23 }
 0xbc4   : > { %5870 = vmatmul.mubr.bf16.gmra.mrb[192].mxu1 %v8556_v35 }
 0xbc5   : > { %5873 = vmatprep.mubr.msk.bf16.mxu1 %vm6518_vm1, %v9770_v23  ;;  %5926 = vmatpush3.bf16.msra.mxu1 %v9859_v8 }
 0xbc6   : > { %5927 = vmatprep.subr.bf16.mxu1 %v9770_v23 }
 0xbc9   : > { %5928 = vmatpush3.bf16.msra.mxu1 %v9860_v3 }
 0xbca   : > { %5979 = vmatprep.subr.bf16.mxu1 %v9770_v23 }
 0xbcc   : > { %5874 = vmatmul.mubr.bf16.gmra.mrb[196].mxu1 %v8585_v4 }
 0xbcd   : > { %5929 = vmatprep.mubr.msk.bf16.mxu1 %vm6518_vm1, %v9770_v23 }
 0xbd4   : > { %5930 = vmatmul.mubr.bf16.vlgmr.msra.gmra.mrb[200].mxu1 %v8506_v40 }
 0xbd5   : > { %5933 = vmatprep.mubr.msk.bf16.mxu1 %vm6518_vm1, %v9770_v23 }
 0xbdc   : > { %5934 = vmatmul.mubr.bf16.gmra.mrb[204].mxu1 %v8520_v47 }
 0xbdd   : > { %5937 = vmatprep.mubr.msk.bf16.mxu1 %vm6518_vm1, %v9770_v23 }
 0xbe4   : > { %5938 = vmatmul.mubr.bf16.gmra.mrb[208].mxu1 %v8535_v59 }
 0xbe5   : > { %5941 = vmatprep.mubr.msk.bf16.mxu1 %vm6518_vm1, %v9770_v23 }
 0xbec   : > { %5942 = vmatmul.mubr.bf16.gmra.mrb[212].mxu1 %v8556_v35 }
 0xbed   : > { %5945 = vmatprep.mubr.msk.bf16.mxu1 %vm6518_vm1, %v9770_v23 }
 0xbf4   : > { %5946 = vmatmul.mubr.bf16.gmra.mrb[216].mxu1 %v8585_v4 }
 0xbf5   : > { %5989 = vmatprep.mubr.msk.bf16.mxu1 %vm6518_vm1, %v9770_v23 }
 0xc57   : > { %v3323_v52 = vpop.f32.mrb[160].mxu1 }
 0xc58   : > { %v8917_v12 = vsel %vm848_vm5, %v3323_v52, -inf  ;;  %v5793_v46 = vpop.f32.mrb[161].mxu1 }
 0xc59   : > { %v3372_v31 = vsel %vm1390_vm6, %v8917_v12, -inf  ;;  %v3326_v62 = vpop.f32.mrb[162].mxu1 }
 0xc5a   : > { %v8924_v49 = vsel %vm849_vm7, %v3326_v62, -inf  ;;  %3373 = vmax.xlane.f32.xlu0 %v3372_v31  ;;  %v5794_v33 = vpop.f32.mrb[163].mxu1 }
 0xc5b   : > { %v3375_v50 = vsel %vm1390_vm6, %v8924_v49, -inf }
 0xc5c   : > { %3376 = vmax.xlane.f32.xlu1 %v3375_v50 }
 0xc5f   : > { %v3331_v57 = vpop.f32.mrb[164].mxu1 }
 0xc60   : > { %v8931_v61 = vsel %vm850_vm8, %v3331_v57, -inf  ;;  %v5797_v10 = vpop.f32.mrb[165].mxu1 }
 0xc61   : > { %v3378_v51 = vsel %vm1390_vm6, %v8931_v61, -inf  ;;  %v3334_v37 = vpop.f32.mrb[166].mxu1 }
 0xc62   : > { %v8938_v5 = vsel %vm851_vm9, %v3334_v37, -inf  ;;  %3379 = vmax.xlane.f32.xlu0 %v3378_v51  ;;  %v5798_v26 = vpop.f32.mrb[167].mxu1 }
 0xc63   : > { %v3381_v28 = vsel %vm1390_vm6, %v8938_v5, -inf }
 0xc64   : > { %3382 = vmax.xlane.f32.xlu1 %v3381_v28 }
 0xc67   : > { %v3339_v29 = vpop.f32.mrb[168].mxu1 }
 0xc68   : > { %v8945_v38 = vsel %vm852_vm10, %v3339_v29, -inf  ;;  %v5801_v39 = vpop.f32.mrb[169].mxu1 }
 0xc69   : > { %v3384_v2 = vsel %vm1390_vm6, %v8945_v38, -inf  ;;  %v3342_v56 = vpop.f32.mrb[170].mxu1 }
 0xc6a   : > { %v8952_v41 = vsel %vm853_vm11, %v3342_v56, -inf  ;;  %3385 = vmax.xlane.f32.xlu0 %v3384_v2  ;;  %v5802_v43 = vpop.f32.mrb[171].mxu1 }
 0xc6b   : > { %v3387_v22 = vsel %vm1390_vm6, %v8952_v41, -inf }
 0xc6c   : > { %3388 = vmax.xlane.f32.xlu1 %v3387_v22 }
 0xc6f   : > { %v3347_v6 = vpop.f32.mrb[172].mxu1 }
 0xc70   : > { %v8959_v13 = vsel %vm854_vm12, %v3347_v6, -inf  ;;  %v5805_v17 = vpop.f32.mrb[173].mxu1 }
 0xc71   : > { %v3390_v16 = vsel %vm1390_vm6, %v8959_v13, -inf  ;;  %v3350_v54 = vpop.f32.mrb[174].mxu1 }
 0xc72   : > { %v8966_v53 = vsel %vm855_vm13, %v3350_v54, -inf  ;;  %3391 = vmax.xlane.f32.xlu0 %v3390_v16  ;;  %v5806_v45 = vpop.f32.mrb[175].mxu1 }
 0xc73   : > { %v3393_v60 = vsel %vm1390_vm6, %v8966_v53, -inf }
 0xc74   : > { %3394 = vmax.xlane.f32.xlu1 %v3393_v60 }
 0xc77   : > { %v3355_v15 = vpop.f32.mrb[176].mxu1 }
 0xc78   : > { %v8973_v44 = vsel %vm856_vm14, %v3355_v15, -inf  ;;  %v5809_v24 = vpop.f32.mrb[177].mxu1 }
 0xc79   : > { %v3396_v11 = vsel %vm1390_vm6, %v8973_v44, -inf  ;;  %v3358_v48 = vpop.f32.mrb[178].mxu1 }
 0xc7a   : > { %v8980_v21 = vsel %vm857_vm15, %v3358_v48, -inf  ;;  %3397 = vmax.xlane.f32.xlu0 %v3396_v11  ;;  %v5810_v42 = vpop.f32.mrb[179].mxu1 }
 0xc7b   : > { %v3399_v18 = vsel %vm1418_vm3, %v8980_v21, -inf }
 0xc7c   : > { %3400 = vmax.xlane.f32.xlu1 %v3399_v18 }
 0xc7f   : > { %v3622_v19 = vpop.f32.mrb[180].mxu1 }
 0xc80   : > { %v3623_v30 = vadd.f32 %v6492_v1, %v3622_v19  ;;  %v5859_v8 = vpop.f32.mrb[181].mxu1 }
 0xc81   : > { %v3625_v3 = vpop.f32.mrb[182].mxu1 }
 0xc82   : > { %v3626_v52 = vadd.f32 %v6492_v1, %v3625_v3  ;;  %v5860_v46 = vpop.f32.mrb[183].mxu1  ;;  %v8987_v31 = vmul.f32 0.125, %v3623_v30 }
 0xc84   : > { %v8989_v62 = vmul.f32 0.125, %v3626_v52 }
 0xc86   : > { %v3817_v33 = vpack.c.bf16 %v8989_v62, %v8987_v31  ;;  %v9871_v31 = vld [vmem:[#allocation52_spill] sm:$0xff]  ;;  %v9872_v62 = vld [vmem:[#allocation53_spill] sm:$0xff] }
 0xc87   : > { %v3630_v50 = vpop.f32.mrb[184].mxu1 }
 0xc88   : > { %v3631_v57 = vadd.f32 %v6492_v1, %v3630_v50  ;;  %v5863_v10 = vpop.f32.mrb[185].mxu1 }
 0xc89   : > { %v3633_v51 = vpop.f32.mrb[186].mxu1 }
 0xc8a   : > { %v3634_v37 = vadd.f32 %v6492_v1, %v3633_v51  ;;  %v5864_v26 = vpop.f32.mrb[187].mxu1  ;;  %v8993_v28 = vmul.f32 0.125, %v3631_v57 }
 0xc8c   : > { %v8995_v29 = vmul.f32 0.125, %v3634_v37 }
 0xc8e   : > { %v3818_v39 = vpack.c.bf16 %v8995_v29, %v8993_v28 }
 0xc8f   : > { %v3638_v2 = vpop.f32.mrb[188].mxu1 }
 0xc90   : > { %v3639_v56 = vadd.f32 %v6492_v1, %v3638_v2  ;;  %v5867_v43 = vpop.f32.mrb[189].mxu1 }
 0xc91   : > { %v3641_v22 = vpop.f32.mrb[190].mxu1  ;;  %v6493_v43 = vld [vmem:[%s9630_s8 + $0x1] ss:$0 sm:$0xff] }
 0xc92   : > { %v3642_v6 = vadd.f32 %v6492_v1, %v3641_v22  ;;  %v5868_v17 = vpop.f32.mrb[191].mxu1  ;;  %v8999_v16 = vmul.f32 0.125, %v3639_v56 }
 0xc94   : > { %v9001_v54 = vmul.f32 0.125, %v3642_v6 }
 0xc96   : > { %v3819_v45 = vpack.c.bf16 %v9001_v54, %v8999_v16 }
 0xc97   : > { %v3646_v60 = vpop.f32.mrb[192].mxu1 }
 0xc98   : > { %v3647_v15 = vadd.f32 %v6492_v1, %v3646_v60  ;;  %v5871_v24 = vpop.f32.mrb[193].mxu1 }
 0xc99   : > { %v3649_v11 = vpop.f32.mrb[194].mxu1 }
 0xc9a   : > { %v3650_v48 = vadd.f32 %v6492_v1, %v3649_v11  ;;  %v5872_v42 = vpop.f32.mrb[195].mxu1  ;;  %v9005_v18 = vmul.f32 0.125, %v3647_v15 }
 0xc9c   : > { %v9007_v19 = vmul.f32 0.125, %v3650_v48 }
 0xc9e   : > { %v3820_v30 = vpack.c.bf16 %v9007_v19, %v9005_v18 }
 0xc9f   : > { %v3654_v8 = vpop.f32.mrb[196].mxu1 }
 0xca0   : > { %v3655_v3 = vadd.f32 %v6492_v1, %v3654_v8  ;;  %v5875_v52 = vpop.f32.mrb[197].mxu1 }
 0xca1   : > { %v3657_v46 = vpop.f32.mrb[198].mxu1 }
 0xca2   : > { %v3658_v50 = vadd.f32 %v6492_v1, %v3657_v46  ;;  %v5876_v57 = vpop.f32.mrb[199].mxu1  ;;  %v9011_v10 = vmul.f32 0.125, %v3655_v3 }
 0xca4   : > { %v9013_v51 = vmul.f32 0.125, %v3658_v50 }
 0xca6   : > { %v9874_v28 = vpack.c.bf16 %v9013_v51, %v9011_v10 }
 0xca7   : > { %v3778_v26 = vpop.f32.mrb[200].mxu1 }
 0xca8   : > { %v5931_v2 = vpop.f32.mrb[201].mxu1  ;;  %v3779_v22 = vadd.f32 %v6493_v43, %v3778_v26 }
 0xca9   : > { %v3781_v56 = vpop.f32.mrb[202].mxu1 }
 0xcaa   : > { %v3782_v6 = vadd.f32 %v6493_v43, %v3781_v56  ;;  %v5932_v17 = vpop.f32.mrb[203].mxu1 }
 0xcac   : > { %v4035_v60 = vpack.c.bf16 %v3782_v6, %v3779_v22 }
 0xcae   : > { %5980 = vmatpush3.bf16.msra.mxu1 %v4035_v60 }
 0xcaf   : > { %v3786_v1 = vpop.f32.mrb[204].mxu1  ;;  %5981 = vmatprep.subr.bf16.mxu1 %v9770_v23 }
 0xcb0   : > { %v5935_v15 = vpop.f32.mrb[205].mxu1  ;;  %v3787_v11 = vadd.f32 %v6493_v43, %v3786_v1 }
 0xcb1   : > { %v3789_v24 = vpop.f32.mrb[206].mxu1 }
 0xcb2   : > { %v3790_v48 = vadd.f32 %v6493_v43, %v3789_v24  ;;  %v5936_v42 = vpop.f32.mrb[207].mxu1 }
 0xcb4   : > { %v4036_v8 = vpack.c.bf16 %v3790_v48, %v3787_v11 }
 0xcb6   : > { %5982 = vmatpush3.bf16.msra.mxu1 %v4036_v8 }
 0xcb7   : > { %v3794_v3 = vpop.f32.mrb[208].mxu1  ;;  %5983 = vmatprep.subr.bf16.mxu1 %v9770_v23 }
 0xcb8   : > { %v5939_v52 = vpop.f32.mrb[209].mxu1  ;;  %v3795_v50 = vadd.f32 %v6493_v43, %v3794_v3 }
 0xcb9   : > { %v3797_v46 = vpop.f32.mrb[210].mxu1 }
 0xcba   : > { %v3798_v57 = vadd.f32 %v6493_v43, %v3797_v46  ;;  %v5940_v26 = vpop.f32.mrb[211].mxu1 }
 0xcbc   : > { %v4037_v2 = vpack.c.bf16 %v3798_v57, %v3795_v50 }
 0xcbe   : > { %5984 = vmatpush3.bf16.msra.mxu1 %v4037_v2 }
 0xcbf   : > { %v3802_v56 = vpop.f32.mrb[212].mxu1  ;;  %5985 = vmatprep.subr.bf16.mxu1 %v9770_v23 }
 0xcc0   : > { %v5943_v22 = vpop.f32.mrb[213].mxu1  ;;  %v3803_v17 = vadd.f32 %v6493_v43, %v3802_v56 }
 0xcc1   : > { %v3805_v6 = vpop.f32.mrb[214].mxu1 }
 0xcc2   : > { %v3806_v60 = vadd.f32 %v6493_v43, %v3805_v6  ;;  %v5944_v1 = vpop.f32.mrb[215].mxu1 }
 0xcc4   : > { %v4038_v15 = vpack.c.bf16 %v3806_v60, %v3803_v17 }
 0xcc6   : > { %5986 = vmatpush3.bf16.msra.mxu1 %v4038_v15 }
 0xcc7   : > { %v3810_v24 = vpop.f32.mrb[216].mxu1  ;;  %5987 = vmatprep.subr.bf16.mxu1 %v9770_v23 }
 0xcc8   : > { %v5947_v11 = vpop.f32.mrb[217].mxu1  ;;  %v3811_v42 = vadd.f32 %v6493_v43, %v3810_v24 }
 0xcc9   : > { %v3813_v48 = vpop.f32.mrb[218].mxu1 }
 0xcca   : > { %v3814_v8 = vadd.f32 %v6493_v43, %v3813_v48  ;;  %v5948_v3 = vpop.f32.mrb[219].mxu1 }
 0xccc   : > { %v4039_v52 = vpack.c.bf16 %v3814_v8, %v3811_v42  ;;  %v9861_v8 = vld [vmem:[#allocation38_spill] sm:$0xff] }
 0xcce   : > { %v4056_v46 = vand.u32 %v4039_v52, %v9844_v32 }
 0xcd0   : > { %5988 = vmatpush3.bf16.msra.mxu1 %v4056_v46 }
 0xcd1   : > { %6037 = vmatprep.subr.bf16.mxu1 %v9770_v23 }
 0xce7   : > { %v3374_v50 = vpop.xlane.xlu0 %3373 }
 0xce8   : > { %v3402_v57 = vsub.f32 %v8917_v12, %v3374_v50 }
 0xce9   : > { %v3377_v26 = vpop.xlane.xlu1 %3376 }
 0xcea   : > { %v3412_v2 = vmul.f32 1.442695, %v3402_v57  ;;  %v3403_v56 = vsub.f32 %v8924_v49, %v3377_v26 }
 0xcec   : > { %v3414_v22 = vmul.f32 1.442695, %v3403_v56  ;;  %6297 = vpow2.f32 %v3412_v2 }
 0xcee   : > { %6299 = vpow2.f32 %v3414_v22  ;;  %v9863_v22 = vld [vmem:[#allocation40_spill] sm:$0xff] }
 0xcef   : > { %v3380_v6 = vpop.xlane.xlu0 %3379 }
 0xcf0   : > { %v3404_v43 = vsub.f32 %v8931_v61, %v3380_v6 }
 0xcf1   : > { %v3383_v17 = vpop.xlane.xlu1 %3382 }
 0xcf2   : > { %v3416_v60 = vmul.f32 1.442695, %v3404_v43  ;;  %v3405_v32 = vsub.f32 %v8938_v5, %v3383_v17 }
 0xcf4   : > { %v3418_v1 = vmul.f32 1.442695, %v3405_v32  ;;  %6301 = vpow2.f32 %v3416_v60 }
 0xcf6   : > { %6303 = vpow2.f32 %v3418_v1  ;;  %v9030_v15 = vpop.eup %6297 }
 0xcf7   : > { %v3386_v12 = vpop.xlane.xlu0 %3385  ;;  %v3432_v34 = vsel %vm1390_vm6, %v9030_v15, 0.0 }
 0xcf8   : > { %v9032_v24 = vpop.eup %6299  ;;  %v3406_v49 = vsub.f32 %v8945_v38, %v3386_v12 }
 0xcf9   : > { %v3462_v11 = vpack.c.bf16 %v9032_v24, %v9030_v15  ;;  %v3389_v48 = vpop.xlane.xlu1 %3388 }
 0xcfa   : > { %v3420_v42 = vmul.f32 1.442695, %v3406_v49  ;;  %v3407_v61 = vsub.f32 %v8952_v41, %v3389_v48  ;;  %v9862_v41 = vld [vmem:[#allocation39_spill] sm:$0xff] }
 0xcfb   : > { %5822 = vmatmul.mubr.msk.bf16.vlgmr.msra.gmra.mrb[180].mxu0 %vm1390_vm6, %v3462_v11  ;;  %v9865_v11 = vld [vmem:[#allocation42_spill] sm:$0xff] }
 0xcfc   : > { %v3422_v5 = vmul.f32 1.442695, %v3407_v61  ;;  %5878 = vmatpush3.bf16.msra.mxu0 %v9861_v8  ;;  %5825 = vmatprep.mubr.msk.bf16.mxu0 %vm6518_vm1, %v9770_v23  ;;  %6305 = vpow2.f32 %v3420_v42  ;;  %v9866_v42 = vld [vmem:[#allocation43_spill] sm:$0xff]  ;;  %v9867_v61 = vld [vmem:[#allocation44_spill] sm:$0xff] }
 0xcfd   : > { %5879 = vmatprep.subr.bf16.mxu0 %v9770_v23 }
 0xcfe   : > { %6307 = vpow2.f32 %v3422_v5  ;;  %v9043_v38 = vpop.eup %6301 }
 0xcff   : > { %v3392_v3 = vpop.xlane.xlu0 %3391 }
 0xd00   : > { %v9045_v52 = vpop.eup %6303  ;;  %v3408_v46 = vsub.f32 %v8959_v13, %v3392_v3  ;;  %5880 = vmatpush3.bf16.msra.mxu0 %v9862_v41  ;;  %v9868_v3 = vld [vmem:[#allocation45_spill] sm:$0xff] }
 0xd01   : > { %v3395_v50 = vpop.xlane.xlu1 %3394  ;;  %v3463_v57 = vpack.c.bf16 %v9045_v52, %v9043_v38  ;;  %5881 = vmatprep.subr.bf16.mxu0 %v9770_v23 }
 0xd02   : > { %v3424_v26 = vmul.f32 1.442695, %v3408_v46  ;;  %v3409_v2 = vsub.f32 %v8966_v53, %v3395_v50  ;;  %v9864_v53 = vld [vmem:[#allocation41_spill] sm:$0xff] }
 0xd03   : > { %5826 = vmatmul.mubr.msk.bf16.gmra.mrb[184].mxu0 %vm1390_vm6, %v3463_v57 }
 0xd04   : > { %v3426_v56 = vmul.f32 1.442695, %v3409_v2  ;;  %5882 = vmatpush3.bf16.msra.mxu0 %v9863_v22  ;;  %5829 = vmatprep.mubr.msk.bf16.mxu0 %vm6518_vm1, %v9770_v23  ;;  %6309 = vpow2.f32 %v3424_v26 }
 0xd05   : > { %5883 = vmatprep.subr.bf16.mxu0 %v9770_v23 }
 0xd06   : > { %6311 = vpow2.f32 %v3426_v56  ;;  %v9058_v13 = vpop.eup %6305 }
 0xd07   : > { %v3398_v6 = vpop.xlane.xlu0 %3397 }
 0xd08   : > { %v9060_v43 = vpop.eup %6307  ;;  %v3410_v17 = vsub.f32 %v8973_v44, %v3398_v6  ;;  %5884 = vmatpush3.bf16.msra.mxu0 %v9864_v53 }
 0xd09   : > { %v3401_v60 = vpop.xlane.xlu1 %3400  ;;  %v3464_v32 = vpack.c.bf16 %v9060_v43, %v9058_v13  ;;  %5885 = vmatprep.subr.bf16.mxu0 %v9770_v23 }
 0xd0a   : > { %v3428_v1 = vmul.f32 1.442695, %v3410_v17  ;;  %v3411_v12 = vsub.f32 %v8980_v21, %v3401_v60 }
 0xd0b   : > { %5830 = vmatmul.mubr.msk.bf16.gmra.mrb[188].mxu0 %vm1390_vm6, %v3464_v32 }
 0xd0c   : > { %v3430_v49 = vmul.f32 1.442695, %v3411_v12  ;;  %5886 = vmatpush3.bf16.msra.mxu0 %v9865_v11  ;;  %5833 = vmatprep.mubr.msk.bf16.mxu0 %vm6518_vm1, %v9770_v23  ;;  %6313 = vpow2.f32 %v3428_v1 }
 0xd0d   : > { %5887 = vmatprep.subr.bf16.mxu0 %v9770_v23 }
 0xd0e   : > { %6315 = vpow2.f32 %v3430_v49  ;;  %v9073_v44 = vpop.eup %6309 }
 0xd10   : > { %v9075_v48 = vpop.eup %6311  ;;  %5888 = vmatpush3.bf16.msra.mxu0 %v9866_v42 }
 0xd11   : > { %v3465_v21 = vpack.c.bf16 %v9075_v48, %v9073_v44  ;;  %5889 = vmatprep.subr.bf16.mxu0 %v9770_v23 }
 0xd13   : > { %5834 = vmatmul.mubr.msk.bf16.gmra.mrb[192].mxu0 %vm1390_vm6, %v3465_v21 }
 0xd14   : > { %5837 = vmatprep.mubr.msk.bf16.mxu0 %vm6518_vm1, %v9770_v23  ;;  %5890 = vmatpush3.bf16.msra.mxu0 %v9867_v61  ;;  %v6494_v61 = vld [vmem:[%s9628_s6 + $0x1] ss:$0 sm:$0xff] }
 0xd15   : > { %5891 = vmatprep.subr.bf16.mxu0 %v9770_v23 }
 0xd16   : > { %v9086_v5 = vpop.eup %6313 }
 0xd18   : > { %v9088_v8 = vpop.eup %6315  ;;  %5892 = vmatpush3.bf16.msra.mxu0 %v9868_v3 }
 0xd19   : > { %v3466_v46 = vpack.c.bf16 %v9088_v8, %v9086_v5  ;;  %5949 = vmatprep.subr.bf16.mxu0 %v9770_v23 }
 0xd1b   : > { %5838 = vmatmul.mubr.msk.bf16.gmra.mrb[196].mxu0 %vm1390_vm6, %v3466_v46 }
 0xd1c   : > { %5893 = vmatprep.mubr.msk.bf16.mxu0 %vm6518_vm1, %v9770_v23 }
 0xd23   : > { %5894 = vmatmul.mubr.bf16.vlgmr.msra.gmra.mrb[200].mxu0 %v8506_v40 }
 0xd24   : > { %5897 = vmatprep.mubr.msk.bf16.mxu0 %vm6518_vm1, %v9770_v23 }
 0xd2b   : > { %5898 = vmatmul.mubr.bf16.gmra.mrb[204].mxu0 %v8520_v47 }
 0xd2c   : > { %5901 = vmatprep.mubr.msk.bf16.mxu0 %vm6518_vm1, %v9770_v23 }
 0xd33   : > { %5902 = vmatmul.mubr.bf16.gmra.mrb[208].mxu0 %v8535_v59 }
 0xd34   : > { %5905 = vmatprep.mubr.msk.bf16.mxu0 %vm6518_vm1, %v9770_v23 }
 0xd3b   : > { %5906 = vmatmul.mubr.bf16.gmra.mrb[212].mxu0 %v8556_v35 }
 0xd3c   : > { %5909 = vmatprep.mubr.msk.bf16.mxu0 %vm6518_vm1, %v9770_v23 }
 0xd43   : > { %5910 = vmatmul.mubr.bf16.gmra.mrb[216].mxu0 %v8585_v4 }
 0xd44   : > { %5959 = vmatprep.mubr.msk.bf16.mxu0 %vm6518_vm1, %v9770_v23 }
 0xdce   : > { %v9112_v40 = vpop.f32.mrb[180].mxu0 }
 0xdcf   : > { %v5823_v47 = vpop.f32.mrb[181].mxu0 }
 0xdd0   : > { %v9114_v41 = vpop.f32.mrb[182].mxu0 }
 0xdd1   : > { %v5824_v50 = vpop.f32.mrb[183].mxu0 }
 0xdd6   : > { %v9116_v59 = vpop.f32.mrb[184].mxu0 }
 0xdd7   : > { %v5827_v57 = vpop.f32.mrb[185].mxu0 }
 0xdd8   : > { %v9118_v26 = vpop.f32.mrb[186].mxu0 }
 0xdd9   : > { %v5828_v35 = vpop.f32.mrb[187].mxu0 }
 0xdde   : > { %v9120_v2 = vpop.f32.mrb[188].mxu0 }
 0xddf   : > { %v5831_v56 = vpop.f32.mrb[189].mxu0 }
 0xde0   : > { %v9122_v22 = vpop.f32.mrb[190].mxu0 }
 0xde1   : > { %v5832_v4 = vpop.f32.mrb[191].mxu0 }
 0xde6   : > { %v9124_v6 = vpop.f32.mrb[192].mxu0 }
 0xde7   : > { %v5835_v17 = vpop.f32.mrb[193].mxu0 }
 0xde8   : > { %v9126_v53 = vpop.f32.mrb[194].mxu0 }
 0xde9   : > { %v5836_v60 = vpop.f32.mrb[195].mxu0 }
 0xdee   : > { %v9128_v32 = vpop.f32.mrb[196].mxu0 }
 0xdef   : > { %v5839_v1 = vpop.f32.mrb[197].mxu0 }
 0xdf0   : > { %v9130_v12 = vpop.f32.mrb[198].mxu0 }
 0xdf1   : > { %v5840_v49 = vpop.f32.mrb[199].mxu0 }
 0xdf6   : > { %v3705_v11 = vpop.f32.mrb[200].mxu0 }
 0xdf7   : > { %v5895_v42 = vpop.f32.mrb[201].mxu0  ;;  %v3706_v3 = vadd.f32 %v6494_v61, %v3705_v11 }
 0xdf8   : > { %v3708_v21 = vpop.f32.mrb[202].mxu0 }
 0xdf9   : > { %v3709_v46 = vadd.f32 %v6494_v61, %v3708_v21  ;;  %v5896_v47 = vpop.f32.mrb[203].mxu0 }
 0xdfb   : > { %v3822_v50 = vpack.c.bf16 %v3709_v46, %v3706_v3 }
 0xdfd   : > { %v3843_v57 = vsel %vm1276_vm2, %v3822_v50, 0 }
 0xdfe   : > { %v3713_v35 = vpop.f32.mrb[204].mxu0  ;;  %5950 = vmatpush3.bf16.xpose.msra.mxu0 %v3843_v57 }
 0xdff   : > { %v5899_v56 = vpop.f32.mrb[205].mxu0  ;;  %5951 = vmatprep.subr.bf16.mxu0 %v9770_v23  ;;  %v3714_v17 = vadd.f32 %v6494_v61, %v3713_v35 }
 0xe00   : > { %v3716_v4 = vpop.f32.mrb[206].mxu0 }
 0xe01   : > { %v3717_v60 = vadd.f32 %v6494_v61, %v3716_v4  ;;  %v5900_v1 = vpop.f32.mrb[207].mxu0 }
 0xe03   : > { %v3823_v49 = vpack.c.bf16 %v3717_v60, %v3714_v17 }
 0xe05   : > { %v3846_v42 = vsel %vm1276_vm2, %v3823_v49, 0 }
 0xe06   : > { %v3721_v37 = vpop.f32.mrb[208].mxu0  ;;  %5952 = vmatpush3.bf16.xpose.msra.mxu0 %v3846_v42 }
 0xe07   : > { %v5903_v11 = vpop.f32.mrb[209].mxu0  ;;  %5953 = vmatprep.subr.bf16.mxu0 %v9770_v23  ;;  %v3722_v3 = vadd.f32 %v6494_v61, %v3721_v37 }
 0xe08   : > { %v3724_v21 = vpop.f32.mrb[210].mxu0 }
 0xe09   : > { %v3725_v46 = vadd.f32 %v6494_v61, %v3724_v21  ;;  %v5904_v47 = vpop.f32.mrb[211].mxu0 }
 0xe0b   : > { %v3824_v50 = vpack.c.bf16 %v3725_v46, %v3722_v3 }
 0xe0d   : > { %v3849_v57 = vsel %vm1276_vm2, %v3824_v50, 0 }
 0xe0e   : > { %v3729_v56 = vpop.f32.mrb[212].mxu0  ;;  %5954 = vmatpush3.bf16.xpose.msra.mxu0 %v3849_v57 }
 0xe0f   : > { %v5907_v35 = vpop.f32.mrb[213].mxu0  ;;  %5955 = vmatprep.subr.bf16.mxu0 %v9770_v23  ;;  %v3730_v17 = vadd.f32 %v6494_v61, %v3729_v56  ;;  %v9869_v56 = vld [vmem:[#allocation50_spill] sm:$0xff] }
 0xe10   : > { %v3732_v4 = vpop.f32.mrb[214].mxu0 }
 0xe11   : > { %v3733_v60 = vadd.f32 %v6494_v61, %v3732_v4  ;;  %v5908_v1 = vpop.f32.mrb[215].mxu0 }
 0xe13   : > { %v3825_v49 = vpack.c.bf16 %v3733_v60, %v3730_v17 }
 0xe15   : > { %v3852_v42 = vsel %vm1276_vm2, %v3825_v49, 0 }
 0xe16   : > { %v3737_v11 = vpop.f32.mrb[216].mxu0  ;;  %5956 = vmatpush3.bf16.xpose.msra.mxu0 %v3852_v42 }
 0xe17   : > { %v5911_v37 = vpop.f32.mrb[217].mxu0  ;;  %5957 = vmatprep.subr.bf16.mxu0 %v9770_v23  ;;  %v3738_v3 = vadd.f32 %v6494_v61, %v3737_v11 }
 0xe18   : > { %v3740_v21 = vpop.f32.mrb[218].mxu0 }
 0xe19   : > { %v3741_v46 = vadd.f32 %v6494_v61, %v3740_v21  ;;  %v5912_v47 = vpop.f32.mrb[219].mxu0  ;;  %v9870_v61 = vld [vmem:[#allocation51_spill] sm:$0xff] }
 0xe1b   : > { %v3826_v50 = vpack.c.bf16 %v3741_v46, %v3738_v3 }
 0xe1d   : > { %v3855_v57 = vsel %vm1276_vm2, %v3826_v50, 0 }
 0xe1e   : > { %5958 = vmatpush3.bf16.xpose.msra.mxu0 %v3855_v57 }
 0xe1f   : > { %6009 = vmatprep.subr.bf16.mxu0 %v9770_v23 }
 0xe25   : > { %5960 = vmatmul.mubr.msk.bf16.vlgmr.msra.gmra.mrb[220].mxu0 %vm1276_vm2, %v3817_v33  ;;  %v9873_v33 = vld [vmem:[#allocation54_spill] sm:$0xff] }
 0xe26   : > { %5963 = vmatprep.mubr.msk.bf16.mxu0 %vm6518_vm1, %v9770_v23  ;;  %6010 = vmatpush3.bf16.msra.mxu0 %v9869_v56 }
 0xe27   : > { %6011 = vmatprep.subr.bf16.mxu0 %v9770_v23 }
 0xe2a   : > { %6012 = vmatpush3.bf16.msra.mxu0 %v9870_v61 }
 0xe2b   : > { %6013 = vmatprep.subr.bf16.mxu0 %v9770_v23 }
 0xe2d   : > { %5964 = vmatmul.mubr.msk.bf16.gmra.mrb[224].mxu0 %vm1276_vm2, %v3818_v39 }
 0xe2e   : > { %5967 = vmatprep.mubr.msk.bf16.mxu0 %vm6518_vm1, %v9770_v23  ;;  %6014 = vmatpush3.bf16.msra.mxu0 %v9871_v31 }
 0xe2f   : > { %6015 = vmatprep.subr.bf16.mxu0 %v9770_v23 }
 0xe32   : > { %6016 = vmatpush3.bf16.msra.mxu0 %v9872_v62 }
 0xe33   : > { %5255 = vmatprep.subr.bf16.mxu0 %v9873_v33 }
 0xe35   : > { %5968 = vmatmul.mubr.msk.bf16.gmra.mrb[228].mxu0 %vm1276_vm2, %v3819_v45 }
 0xe36   : > { %5971 = vmatprep.mubr.msk.bf16.mxu0 %vm6518_vm1, %v9770_v23 }
 0xe3d   : > { %5972 = vmatmul.mubr.msk.bf16.gmra.mrb[232].mxu0 %vm1276_vm2, %v3820_v30 }
 0xe3e   : > { %5975 = vmatprep.mubr.msk.bf16.mxu0 %vm6518_vm1, %v9770_v23 }
 0xe45   : > { %5976 = vmatmul.mubr.msk.bf16.gmra.mrb[236].mxu0 %vm1276_vm2, %v9874_v28 }
 0xe46   : > { %6017 = vmatprep.mubr.msk.bf16.mxu0 %vm6518_vm1, %v9770_v23 }
 0xef8   : > { %v3891_v29 = vpop.f32.mrb[220].mxu0 }
 0xef9   : > { %v3930_v39 = vsel %vm848_vm5, %v3891_v29, -inf  ;;  %v5961_v16 = vpop.f32.mrb[221].mxu0 }
 0xefa   : > { %v3940_v54 = vsel %vm1390_vm6, %v3930_v39, -inf  ;;  %v3894_v45 = vpop.f32.mrb[222].mxu0  ;;  %v3435_v16 = vsel %vm1390_vm6, %v9032_v24, 0.0 }
 0xefb   : > { %v3931_v18 = vsel %vm849_vm7, %v3894_v45, -inf  ;;  %3941 = vmax.xlane.f32.xlu0 %v3940_v54  ;;  %v5962_v19 = vpop.f32.mrb[223].mxu0 }
 0xefc   : > { %v3943_v30 = vsel %vm1390_vm6, %v3931_v18, -inf }
 0xefd   : > { %3944 = vmax.xlane.f32.xlu1 %v3943_v30 }
 0xf00   : > { %v3899_v10 = vpop.f32.mrb[224].mxu0 }
 0xf01   : > { %v3932_v51 = vsel %vm850_vm8, %v3899_v10, -inf  ;;  %v5965_v20 = vpop.f32.mrb[225].mxu0 }
 0xf02   : > { %v3946_v35 = vsel %vm1390_vm6, %v3932_v51, -inf  ;;  %v3902_v4 = vpop.f32.mrb[226].mxu0 }
 0xf03   : > { %v3933_v17 = vsel %vm851_vm9, %v3902_v4, -inf  ;;  %3947 = vmax.xlane.f32.xlu0 %v3946_v35  ;;  %v5966_v0 = vpop.f32.mrb[227].mxu0 }
 0xf04   : > { %v3949_v60 = vsel %vm1390_vm6, %v3933_v17, -inf }
 0xf05   : > { %3950 = vmax.xlane.f32.xlu1 %v3949_v60 }
 0xf08   : > { %v3907_v1 = vpop.f32.mrb[228].mxu0 }
 0xf09   : > { %v3934_v49 = vsel %vm852_vm10, %v3907_v1, -inf  ;;  %v5969_v25 = vpop.f32.mrb[229].mxu0 }
 0xf0a   : > { %v3952_v42 = vsel %vm1390_vm6, %v3934_v49, -inf  ;;  %v3910_v11 = vpop.f32.mrb[230].mxu0 }
 0xf0b   : > { %v3935_v37 = vsel %vm853_vm11, %v3910_v11, -inf  ;;  %3953 = vmax.xlane.f32.xlu0 %v3952_v42  ;;  %v5970_v7 = vpop.f32.mrb[231].mxu0 }
 0xf0c   : > { %v3955_v21 = vsel %vm1390_vm6, %v3935_v37, -inf }
 0xf0d   : > { %3956 = vmax.xlane.f32.xlu1 %v3955_v21 }
 0xf10   : > { %v3915_v3 = vpop.f32.mrb[232].mxu0 }
 0xf11   : > { %v9210_v46 = vsel %vm854_vm12, %v3915_v3, -inf  ;;  %v5973_v9 = vpop.f32.mrb[233].mxu0  ;;  %v9875_v3 = vld [vmem:[#allocation46_spill] sm:$0xff] }
 0xf12   : > { %v3958_v47 = vsel %vm1390_vm6, %v9210_v46, -inf  ;;  %v3918_v50 = vpop.f32.mrb[234].mxu0 }
 0xf13   : > { %v9217_v58 = vsel %vm855_vm13, %v3918_v50, -inf  ;;  %3959 = vmax.xlane.f32.xlu0 %v3958_v47  ;;  %v5974_v57 = vpop.f32.mrb[235].mxu0 }
 0xf14   : > { %v3961_v56 = vsel %vm1390_vm6, %v9217_v58, -inf }
 0xf15   : > { %3962 = vmax.xlane.f32.xlu1 %v3961_v56 }
 0xf18   : > { %v3923_v61 = vpop.f32.mrb[236].mxu0 }
 0xf19   : > { %v9224_v14 = vsel %vm856_vm14, %v3923_v61, -inf  ;;  %v5977_v31 = vpop.f32.mrb[237].mxu0 }
 0xf1a   : > { %v3964_v62 = vsel %vm1390_vm6, %v9224_v14, -inf  ;;  %v3926_v33 = vpop.f32.mrb[238].mxu0  ;;  %v9876_v31 = vld [vmem:[#allocation47_spill] sm:$0xff] }
 0xf1b   : > { %v9231_v55 = vsel %vm857_vm15, %v3926_v33, -inf  ;;  %3965 = vmax.xlane.f32.xlu0 %v3964_v62  ;;  %v5978_v28 = vpop.f32.mrb[239].mxu0  ;;  %v3444_v33 = vsel %vm1390_vm6, %v9058_v13, 0.0 }
 0xf1c   : > { %v3967_v29 = vsel %vm1418_vm3, %v9231_v55, -inf  ;;  %v3447_v28 = vsel %vm1390_vm6, %v9060_v43, 0.0 }
 0xf1d   : > { %3968 = vmax.xlane.f32.xlu1 %v3967_v29  ;;  %v9877_v29 = vld [vmem:[#allocation48_spill] sm:$0xff] }
 0xf1f   : > { %3433 = vadd.xlane.f32.xlu0 %v3432_v34 }
 0xf21   : > { %3436 = vadd.xlane.f32.xlu1 %v3435_v16 }
 0xf88   : > { %v3942_v54 = vpop.xlane.xlu0 %3941 }
 0xf89   : > { %v3970_v45 = vsub.f32 %v3930_v39, %v3942_v54 }
 0xf8a   : > { %v3945_v19 = vpop.xlane.xlu1 %3944 }
 0xf8b   : > { %v3980_v36 = vmul.f32 1.442695, %v3970_v45  ;;  %v3971_v63 = vsub.f32 %v3931_v18, %v3945_v19 }
 0xf8d   : > { %6317 = vpow2.f32 %v3980_v36  ;;  %v3982_v30 = vmul.f32 1.442695, %v3971_v63  ;;  %v9878_v63 = vld [vmem:[#allocation49_spill] sm:$0xff] }
 0xf8f   : > { %6319 = vpow2.f32 %v3982_v30 }
 0xf90   : > { %v3948_v10 = vpop.xlane.xlu0 %3947 }
 0xf91   : > { %v3972_v20 = vsub.f32 %v3932_v51, %v3948_v10  ;;  %v3438_v51 = vsel %vm1390_vm6, %v9043_v38, 0.0  ;;  %v9879_v10 = vld [vmem:[#allocation7_spill] sm:$0xff] }
 0xf92   : > { %v3951_v35 = vpop.xlane.xlu1 %3950 }
 0xf93   : > { %v3984_v4 = vmul.f32 1.442695, %v3972_v20  ;;  %v3973_v0 = vsub.f32 %v3933_v17, %v3951_v35  ;;  %v3450_v35 = vsel %vm1390_vm6, %v9073_v44, 0.0 }
 0xf95   : > { %6321 = vpow2.f32 %v3984_v4  ;;  %v3986_v15 = vmul.f32 1.442695, %v3973_v0 }
 0xf97   : > { %v6318_v60 = vpop.eup %6317  ;;  %6323 = vpow2.f32 %v3986_v15 }
 0xf98   : > { %v3954_v1 = vpop.xlane.xlu0 %3953  ;;  %v4000_v24 = vsel %vm1390_vm6, %v6318_v60, 0.0 }
 0xf99   : > { %v6320_v25 = vpop.eup %6319  ;;  %v3974_v39 = vsub.f32 %v3934_v49, %v3954_v1  ;;  %4001 = vadd.xlane.f32.xlu0 %v4000_v24  ;;  %v3441_v49 = vsel %vm1390_vm6, %v9045_v52, 0.0  ;;  %v3456_v24 = vsel %vm1390_vm6, %v9086_v5, 0.0 }
 0xf9a   : > { %v4030_v42 = vpack.c.bf16 %v6320_v25, %v6318_v60  ;;  %v3957_v18 = vpop.xlane.xlu1 %3956  ;;  %v4003_v11 = vsel %vm1390_vm6, %v6320_v25, 0.0 }
 0xf9b   : > { %v3988_v7 = vmul.f32 1.442695, %v3974_v39  ;;  %v3975_v21 = vsub.f32 %v3935_v37, %v3957_v18  ;;  %4004 = vadd.xlane.f32.xlu1 %v4003_v11 }
 0xf9c   : > { %5990 = vmatmul.mubr.msk.bf16.vlgmr.msra.gmra.mrb[220].mxu1 %vm1390_vm6, %v4030_v42 }
 0xf9d   : > { %6325 = vpow2.f32 %v3988_v7  ;;  %v3990_v17 = vmul.f32 1.442695, %v3975_v21  ;;  %3439 = vadd.xlane.f32.xlu0 %v3438_v51  ;;  %5993 = vmatprep.mubr.msk.bf16.mxu1 %vm6518_vm1, %v9770_v23 }
 0xf9e   : > { %6038 = vmatpush3.bf16.msra.mxu1 %v9875_v3  ;;  %v9882_v3 = vld [vmem:[#allocation70_spill] sm:$0xff] }
 0xf9f   : > { %v6322_v9 = vpop.eup %6321  ;;  %6327 = vpow2.f32 %v3990_v17  ;;  %3442 = vadd.xlane.f32.xlu1 %v3441_v49  ;;  %6039 = vmatprep.subr.bf16.mxu1 %v9770_v23  ;;  %v9881_v49 = vld [vmem:[#allocation11_spill] sm:$0xff] }
 0xfa0   : > { %v3960_v37 = vpop.xlane.xlu0 %3959  ;;  %v4006_v47 = vsel %vm1390_vm6, %v6322_v9, 0.0 }
 0xfa1   : > { %v6324_v38 = vpop.eup %6323  ;;  %v3976_v50 = vsub.f32 %v9210_v46, %v3960_v37  ;;  %4007 = vadd.xlane.f32.xlu0 %v4006_v47  ;;  %v9886_v37 = vld [vmem:[#allocation74_spill] sm:$0xff]  ;;  %v9887_v47 = vld [vmem:[#allocation75_spill] sm:$0xff] }
 0xfa2   : > { %v3963_v57 = vpop.xlane.xlu1 %3962  ;;  %v4009_v56 = vsel %vm1390_vm6, %v6324_v38, 0.0  ;;  %v4031_v61 = vpack.c.bf16 %v6324_v38, %v6322_v9  ;;  %6040 = vmatpush3.bf16.msra.mxu1 %v9876_v31  ;;  %v9885_v9 = vld [vmem:[#allocation73_spill] sm:$0xff]  ;;  %v9888_v38 = vld [vmem:[#allocation76_spill] sm:$0xff] }
 0xfa3   : > { %v3992_v52 = vmul.f32 1.442695, %v3976_v50  ;;  %v3977_v62 = vsub.f32 %v9217_v58, %v3963_v57  ;;  %4010 = vadd.xlane.f32.xlu1 %v4009_v56  ;;  %6041 = vmatprep.subr.bf16.mxu1 %v9770_v23  ;;  %v9889_v50 = vld [vmem:[#allocation77_spill] sm:$0xff]  ;;  %v9890_v57 = vld [vmem:[#allocation78_spill] sm:$0xff]  ;;  %v9891_v56 = vld [vmem:[#allocation79_spill] sm:$0xff] }
 0xfa4   : > { %5994 = vmatmul.mubr.msk.bf16.gmra.mrb[224].mxu1 %vm1390_vm6, %v4031_v61  ;;  %v9892_v61 = vld [vmem:[#allocation80_spill] sm:$0xff]  ;;  %v9893_v31 = vld [vmem:[#allocation81_spill] sm:$0xff] }
 0xfa5   : > { %6329 = vpow2.f32 %v3992_v52  ;;  %v3994_v46 = vmul.f32 1.442695, %v3977_v62  ;;  %3445 = vadd.xlane.f32.xlu0 %v3444_v33  ;;  %5997 = vmatprep.mubr.msk.bf16.mxu1 %vm6518_vm1, %v9770_v23  ;;  %v9894_v52 = vld [vmem:[#allocation82_spill] sm:$0xff] }
 0xfa6   : > { %6042 = vmatpush3.bf16.msra.mxu1 %v9877_v29 }
 0xfa7   : > { %v6326_v58 = vpop.eup %6325  ;;  %6331 = vpow2.f32 %v3994_v46  ;;  %3448 = vadd.xlane.f32.xlu1 %v3447_v28  ;;  %6043 = vmatprep.subr.bf16.mxu1 %v9770_v23 }
 0xfa8   : > { %v3966_v34 = vpop.xlane.xlu0 %3965  ;;  %v4012_v16 = vsel %vm1390_vm6, %v6326_v58, 0.0 }
 0xfa9   : > { %v6328_v13 = vpop.eup %6327  ;;  %v3978_v54 = vsub.f32 %v9224_v14, %v3966_v34  ;;  %4013 = vadd.xlane.f32.xlu0 %v4012_v16 }
 0xfaa   : > { %v3969_v45 = vpop.xlane.xlu1 %3968  ;;  %v4015_v19 = vsel %vm1390_vm6, %v6328_v13, 0.0  ;;  %v4032_v36 = vpack.c.bf16 %v6328_v13, %v6326_v58  ;;  %6044 = vmatpush3.bf16.msra.mxu1 %v9878_v63 }
 0xfab   : > { %v3996_v43 = vmul.f32 1.442695, %v3978_v54  ;;  %v3979_v30 = vsub.f32 %v9231_v55, %v3969_v45  ;;  %4016 = vadd.xlane.f32.xlu1 %v4015_v19  ;;  %4702 = vmatprep.subr.bf16.mxu1 %v9879_v10  ;;  %v3453_v55 = vsel %vm1390_vm6, %v9075_v48, 0.0  ;;  %v3459_v48 = vsel %vm1418_vm3, %v9088_v8, 0.0  ;;  %v9880_v8 = vld [vmem:[#allocation9_spill] sm:$0xff] }
 0xfac   : > { %v3434_v20 = vpop.xlane.xlu0 %3433  ;;  %5998 = vmatmul.mubr.msk.bf16.gmra.mrb[228].mxu1 %vm1390_vm6, %v4032_v36 }
 0xfad   : > { %6333 = vpow2.f32 %v3996_v43  ;;  %v3998_v14 = vmul.f32 1.442695, %v3979_v30  ;;  %3451 = vadd.xlane.f32.xlu0 %v3450_v35  ;;  %6001 = vmatprep.mubr.msk.bf16.mxu1 %vm6518_vm1, %v9770_v23 }
 0xfae   : > { %6335 = vrcp.f32 %v3434_v20  ;;  %v3437_v4 = vpop.xlane.xlu1 %3436 }
 0xfaf   : > { %v6330_v0 = vpop.eup %6329  ;;  %6337 = vpow2.f32 %v3998_v14  ;;  %3454 = vadd.xlane.f32.xlu1 %v3453_v55 }
 0xfb0   : > { %6339 = vrcp.f32 %v3437_v4  ;;  %v4018_v15 = vsel %vm1390_vm6, %v6330_v0, 0.0 }
 0xfb1   : > { %v6332_v60 = vpop.eup %6331  ;;  %4019 = vadd.xlane.f32.xlu0 %v4018_v15 }
 0xfb2   : > { %v4021_v44 = vsel %vm1390_vm6, %v6332_v60, 0.0  ;;  %v4033_v1 = vpack.c.bf16 %v6332_v60, %v6330_v0 }
 0xfb3   : > { %4022 = vadd.xlane.f32.xlu1 %v4021_v44 }
 0xfb4   : > { %6002 = vmatmul.mubr.msk.bf16.gmra.mrb[232].mxu1 %vm1390_vm6, %v4033_v1 }
 0xfb5   : > { %3457 = vadd.xlane.f32.xlu0 %v3456_v24  ;;  %6005 = vmatprep.mubr.msk.bf16.mxu1 %vm6518_vm1, %v9770_v23 }
 0xfb7   : > { %v6334_v25 = vpop.eup %6333  ;;  %3460 = vadd.xlane.f32.xlu1 %v3459_v48 }
 0xfb8   : > { %v6336_v39 = vpop.eup %6335  ;;  %v4024_v42 = vsel %vm1390_vm6, %v6334_v25, 0.0 }
 0xfb9   : > { %v6338_v18 = vpop.eup %6337  ;;  %4025 = vadd.xlane.f32.xlu0 %v4024_v42  ;;  %v3573_v5 = vmul.f32 %v6336_v39, %v9112_v40  ;;  %v9883_v40 = vld [vmem:[#allocation71_spill] sm:$0xff] }
 0xfba   : > { %v6340_v11 = vpop.eup %6339  ;;  %v4027_v7 = vsel %vm1418_vm3, %v6338_v18, 0.0  ;;  %v4034_v21 = vpack.c.bf16 %v6338_v18, %v6334_v25 }
 0xfbb   : > { %v3574_v51 = vmul.f32 %v6340_v11, %v9114_v41  ;;  %4028 = vadd.xlane.f32.xlu1 %v4027_v7  ;;  %v9884_v41 = vld [vmem:[#allocation72_spill] sm:$0xff] }
 0xfbc   : > { %6006 = vmatmul.mubr.msk.bf16.gmra.mrb[236].mxu1 %vm1390_vm6, %v4034_v21 }
 0xfbd   : > { %v3583_v17 = vpack.c.bf16 %v3574_v51, %v3573_v5  ;;  %6045 = vmatprep.mubr.msk.bf16.mxu1 %vm6518_vm1, %v9770_v23 }
 0xfc4   : > { %6046 = vmatmul.mubr.msk.bf16.vlgmr.msra.gmra.mrb[240].mxu1 %vm1276_vm2, %v3583_v17 }
 0xfc5   : > { %6049 = vmatprep.mubr.msk.bf16.mxu1 %vm6518_vm1, %v9770_v23  ;;  %4703 = vmatpush1.bf16.xpose.msra.mxu1 %v9880_v8 }
 0xfc6   : > { %4704 = vmatprep.subr.bf16.mxu1 %v9881_v49 }
 0xfcd   : > { %4705 = vmatpush1.bf16.xpose.msra.mxu1 %v9882_v3  ;;  %v9896_v3 = vld [vmem:[#allocation56_spill] sm:$0xff] }
 0xfce   : > { %4706 = vmatprep.subr.bf16.mxu1 %v9883_v40 }
 0xfd5   : > { %4707 = vmatpush1.bf16.xpose.msra.mxu1 %v9884_v41 }
 0xfd6   : > { %4708 = vmatprep.subr.bf16.mxu1 %v9885_v9 }
 0xfdd   : > { %4709 = vmatpush1.bf16.xpose.msra.mxu1 %v9886_v37 }
 0xfde   : > { %4710 = vmatprep.subr.bf16.mxu1 %v9887_v47 }
 0xfe5   : > { %4711 = vmatpush1.bf16.xpose.msra.mxu1 %v9888_v38 }
 0xfe6   : > { %4712 = vmatprep.subr.bf16.mxu1 %v9889_v50 }
 0xfed   : > { %4713 = vmatpush1.bf16.xpose.msra.mxu1 %v9890_v57  ;;  %v9897_v57 = vld [vmem:[#allocation57_spill] sm:$0xff] }
 0xfee   : > { %4714 = vmatprep.subr.bf16.mxu1 %v9891_v56 }
 0xff5   : > { %4715 = vmatpush1.bf16.xpose.msra.mxu1 %v9892_v61 }
 0xff6   : > { %4716 = vmatprep.subr.bf16.mxu1 %v9893_v31  ;;  %v9898_v31 = vld [vmem:[#allocation58_spill] sm:$0xff] }
 0xffd   : > { %4717 = vmatpush1.bf16.xpose.msra.mxu1 %v9894_v52 }
0x1026   : > { %v4002_v62 = vpop.xlane.xlu0 %4001 }
0x1028   : > { %v4005_v33 = vpop.xlane.xlu1 %4004 }
0x102a   : > { %v3440_v46 = vpop.xlane.xlu0 %3439 }
0x102b   : > { %6341 = vrcp.f32 %v3440_v46 }
0x102c   : > { %v3443_v28 = vpop.xlane.xlu1 %3442 }
0x102d   : > { %6343 = vrcp.f32 %v3443_v28 }
0x102e   : > { %v4008_v29 = vpop.xlane.xlu0 %4007 }
0x1030   : > { %v4011_v58 = vpop.xlane.xlu1 %4010 }
0x1032   : > { %v3446_v34 = vpop.xlane.xlu0 %3445 }
0x1033   : > { %6345 = vrcp.f32 %v3446_v34 }
0x1034   : > { %v3449_v16 = vpop.xlane.xlu1 %3448 }
0x1035   : > { %v6342_v13 = vpop.eup %6341  ;;  %6347 = vrcp.f32 %v3449_v16 }
0x1036   : > { %v4014_v54 = vpop.xlane.xlu0 %4013  ;;  %v3575_v36 = vmul.f32 %v6342_v13, %v9116_v59  ;;  %v9899_v13 = vld [vmem:[#allocation59_spill] sm:$0xff] }
0x1037   : > { %v6344_v45 = vpop.eup %6343 }
0x1038   : > { %v4017_v19 = vpop.xlane.xlu1 %4016  ;;  %v3576_v63 = vmul.f32 %v6344_v45, %v9118_v26 }
0x103a   : > { %v3452_v43 = vpop.xlane.xlu0 %3451  ;;  %v3584_v30 = vpack.c.bf16 %v3576_v63, %v3575_v36 }
0x103b   : > { %6349 = vrcp.f32 %v3452_v43 }
0x103c   : > { %v3455_v10 = vpop.xlane.xlu1 %3454  ;;  %6050 = vmatmul.mubr.msk.bf16.gmra.mrb[244].mxu1 %vm1276_vm2, %v3584_v30 }
0x103d   : > { %v6346_v20 = vpop.eup %6345  ;;  %6351 = vrcp.f32 %v3455_v10  ;;  %6053 = vmatprep.mubr.msk.bf16.mxu1 %vm6518_vm1, %v9770_v23 }
0x103e   : > { %v4020_v35 = vpop.xlane.xlu0 %4019  ;;  %v3577_v55 = vmul.f32 %v6346_v20, %v9120_v2 }
0x103f   : > { %v6348_v14 = vpop.eup %6347 }
0x1040   : > { %v4023_v4 = vpop.xlane.xlu1 %4022  ;;  %v3578_v59 = vmul.f32 %v6348_v14, %v9122_v22  ;;  %v9901_v14 = vld [vmem:[#allocation61_spill] sm:$0xff] }
0x1042   : > { %v3458_v0 = vpop.xlane.xlu0 %3457  ;;  %v3585_v26 = vpack.c.bf16 %v3578_v59, %v3577_v55  ;;  %v9902_v59 = vld [vmem:[#allocation62_spill] sm:$0xff] }
0x1043   : > { %6353 = vrcp.f32 %v3458_v0 }
0x1044   : > { %v3461_v15 = vpop.xlane.xlu1 %3460  ;;  %6054 = vmatmul.mubr.msk.bf16.gmra.mrb[248].mxu1 %vm1276_vm2, %v3585_v26 }
0x1045   : > { %v6350_v60 = vpop.eup %6349  ;;  %6355 = vrcp.f32 %v3461_v15  ;;  %6057 = vmatprep.mubr.msk.bf16.mxu1 %vm6518_vm1, %v9770_v23 }
0x1046   : > { %v3579_v1 = vmul.f32 %v6350_v60, %v9124_v6  ;;  %6357 = vrcp.f32 %v4002_v62 }
0x1047   : > { %v6352_v44 = vpop.eup %6351  ;;  %6359 = vrcp.f32 %v4005_v33 }
0x1048   : > { %v3580_v24 = vmul.f32 %v6352_v44, %v9126_v53  ;;  %6361 = vrcp.f32 %v4008_v29  ;;  %v4026_v29 = vpop.xlane.xlu0 %4025 }
0x1049   : > { %6363 = vrcp.f32 %v4011_v58  ;;  %v4029_v58 = vpop.xlane.xlu1 %4028 }
0x104a   : > { %v3586_v48 = vpack.c.bf16 %v3580_v24, %v3579_v1  ;;  %6365 = vrcp.f32 %v4014_v54 }
0x104b   : > { %6367 = vrcp.f32 %v4017_v19  ;;  %v9900_v19 = vld [vmem:[#allocation60_spill] sm:$0xff] }
0x104c   : > { %6058 = vmatmul.mubr.msk.bf16.gmra.mrb[252].mxu1 %vm1276_vm2, %v3586_v48  ;;  %6369 = vrcp.f32 %v4020_v35  ;;  %v9903_v48 = vld [vmem:[#allocation63_spill] sm:$0xff] }
0x104d   : > { %v6354_v2 = vpop.eup %6353  ;;  %6061 = vmatprep.mubr.msk.bf16.mxu1 %vm6518_vm1, %v9770_v23  ;;  %6371 = vrcp.f32 %v4023_v4 }
0x104e   : > { %v3581_v25 = vmul.f32 %v6354_v2, %v9128_v32  ;;  %6373 = vrcp.f32 %v4026_v29 }
0x104f   : > { %v6356_v22 = vpop.eup %6355  ;;  %6375 = vrcp.f32 %v4029_v58 }
0x1050   : > { %v3582_v39 = vmul.f32 %v6356_v22, %v9130_v12  ;;  %v6358_v53 = vpop.eup %6357  ;;  %v9895_v12 = vld [vmem:[#allocation55_spill] sm:$0xff]  ;;  %v9904_v22 = vld [vmem:[#allocation64_spill] sm:$0xff] }
0x1051   : > { %v6360_v11 = vpop.eup %6359 }
0x1052   : > { %v3587_v42 = vpack.c.bf16 %v3582_v39, %v3581_v25  ;;  %v6362_v8 = vpop.eup %6361  ;;  %v9905_v39 = vld [vmem:[#allocation65_spill] sm:$0xff] }
0x1053   : > { %v6364_v40 = vpop.eup %6363 }
0x1054   : > { %6062 = vmatmul.mubr.msk.bf16.gmra.mrb[0].mxu1 %vm1276_vm2, %v3587_v42  ;;  %v6366_v56 = vpop.eup %6365  ;;  %v9906_v42 = vld [vmem:[#allocation66_spill] sm:$0xff] }
0x1055   : > { %v6368_v52 = vpop.eup %6367 }
0x1056   : > { %v6370_v54 = vpop.eup %6369 }
0x1057   : > { %v6372_v36 = vpop.eup %6371 }
0x1058   : > { %v6374_v4 = vpop.eup %6373 }
0x1059   : > { %v6376_v0 = vpop.eup %6375 }
0x106f   : > { %v4092_v6 = vpop.f32.mrb[220].mxu1 }
0x1070   : > { %v5991_v18 = vpop.f32.mrb[221].mxu1  ;;  %v4141_v21 = vmul.f32 %v6358_v53, %v4092_v6  ;;  %v9907_v6 = vld [vmem:[#allocation67_spill] sm:$0xff]  ;;  %v9908_v53 = vld [vmem:[#allocation68_spill] sm:$0xff] }
0x1071   : > { %v4095_v7 = vpop.f32.mrb[222].mxu1  ;;  %v9909_v18 = vld [vmem:[#allocation69_spill] sm:$0xff] }
0x1072   : > { %v4142_v5 = vmul.f32 %v6360_v11, %v4095_v7  ;;  %v5992_v51 = vpop.f32.mrb[223].mxu1 }
0x1074   : > { %v4151_v17 = vpack.c.bf16 %v4142_v5, %v4141_v21 }
0x1076   : > { %6018 = vmatmul.mubr.msk.bf16.vlgmr.msra.gmra.mrb[240].mxu0 %vm1276_vm2, %v4151_v17 }
0x1077   : > { %v4100_v32 = vpop.f32.mrb[224].mxu1  ;;  %6021 = vmatprep.mubr.msk.bf16.mxu0 %vm6518_vm1, %v9770_v23  ;;  %5256 = vmatpush3.bf16.xpose.msra.mxu0 %v9895_v12 }
0x1078   : > { %v5995_v49 = vpop.f32.mrb[225].mxu1  ;;  %5257 = vmatprep.subr.bf16.mxu0 %v9896_v3  ;;  %v4143_v9 = vmul.f32 %v6362_v8, %v4100_v32 }
0x1079   : > { %v4103_v41 = vpop.f32.mrb[226].mxu1 }
0x107a   : > { %v4144_v37 = vmul.f32 %v6364_v40, %v4103_v41  ;;  %v5996_v47 = vpop.f32.mrb[227].mxu1 }
0x107c   : > { %v4152_v38 = vpack.c.bf16 %v4144_v37, %v4143_v9 }
0x107e   : > { %6022 = vmatmul.mubr.msk.bf16.gmra.mrb[244].mxu0 %vm1276_vm2, %v4152_v38 }
0x107f   : > { %v4108_v50 = vpop.f32.mrb[228].mxu1  ;;  %6025 = vmatprep.mubr.msk.bf16.mxu0 %vm6518_vm1, %v9770_v23  ;;  %5258 = vmatpush3.bf16.xpose.msra.mxu0 %v9897_v57 }
0x1080   : > { %v5999_v61 = vpop.f32.mrb[229].mxu1  ;;  %5259 = vmatprep.subr.bf16.mxu0 %v9898_v31  ;;  %v4145_v33 = vmul.f32 %v6366_v56, %v4108_v50 }
0x1081   : > { %v4111_v62 = vpop.f32.mrb[230].mxu1  ;;  %v6495_v61 = vld [vmem:[%s6626_s30 + $0x50] sm:$0xff] }
0x1082   : > { %v4146_v46 = vmul.f32 %v6368_v52, %v4111_v62  ;;  %v6000_v28 = vpop.f32.mrb[231].mxu1 }
0x1083   : > { %v6497_v28 = vld [vmem:[%s9632_s10] ss:$0 sm:$0xff] }
0x1084   : > { %v4153_v34 = vpack.c.bf16 %v4146_v46, %v4145_v33  ;;  %v6496_v33 = vld [vmem:[%s6626_s30 + $0x58] sm:$0xff] }
0x1086   : > { %6026 = vmatmul.mubr.msk.bf16.gmra.mrb[248].mxu0 %vm1276_vm2, %v4153_v34 }
0x1087   : > { %v4116_v16 = vpop.f32.mrb[232].mxu1  ;;  %6029 = vmatprep.mubr.msk.bf16.mxu0 %vm6518_vm1, %v9770_v23  ;;  %5260 = vmatpush3.bf16.xpose.msra.mxu0 %v9899_v13 }
0x1088   : > { %v6003_v45 = vpop.f32.mrb[233].mxu1  ;;  %5261 = vmatprep.subr.bf16.mxu0 %v9900_v19  ;;  %v4147_v43 = vmul.f32 %v6370_v54, %v4116_v16 }
0x1089   : > { %v4119_v63 = vpop.f32.mrb[234].mxu1  ;;  %v6498_v45 = vld [vmem:[%s6626_s30 + $0x60] sm:$0xff] }
0x108a   : > { %v4148_v30 = vmul.f32 %v6372_v36, %v4119_v63  ;;  %v6004_v10 = vpop.f32.mrb[235].mxu1 }
0x108c   : > { %v4154_v20 = vpack.c.bf16 %v4148_v30, %v4147_v43  ;;  %v6499_v43 = vld [vmem:[%s6626_s30 + $0x68] sm:$0xff] }
0x108e   : > { %6030 = vmatmul.mubr.msk.bf16.gmra.mrb[252].mxu0 %vm1276_vm2, %v4154_v20 }
0x108f   : > { %v4124_v35 = vpop.f32.mrb[236].mxu1  ;;  %6033 = vmatprep.mubr.msk.bf16.mxu0 %vm6518_vm1, %v9770_v23  ;;  %5262 = vmatpush3.bf16.xpose.msra.mxu0 %v9901_v14 }
0x1090   : > { %v6007_v55 = vpop.f32.mrb[237].mxu1  ;;  %5263 = vmatprep.subr.bf16.mxu0 %v9902_v59  ;;  %v4149_v15 = vmul.f32 %v6374_v4, %v4124_v35  ;;  %v6500_v59 = vld [vmem:[%s6626_s30 + $0x70] sm:$0xff] }
0x1091   : > { %v4127_v26 = vpop.f32.mrb[238].mxu1 }
0x1092   : > { %v4150_v60 = vmul.f32 %v6376_v0, %v4127_v26  ;;  %v6008_v44 = vpop.f32.mrb[239].mxu1 }
0x1094   : > { %v4155_v1 = vpack.c.bf16 %v4150_v60, %v4149_v15  ;;  %v6501_v60 = vld [vmem:[%s6626_s30 + $0x78] sm:$0xff] }
0x1096   : > { %6034 = vmatmul.mubr.msk.bf16.gmra.mrb[0].mxu0 %vm1276_vm2, %v4155_v1 }
0x1097   : > { %v4293_v24 = vpop.f32.mrb[240].mxu1  ;;  %5264 = vmatpush3.bf16.xpose.msra.mxu0 %v9903_v48 }
0x1098   : > { %v6047_v2 = vpop.f32.mrb[241].mxu1  ;;  %5265 = vmatprep.subr.bf16.mxu0 %v9904_v22 }
0x1099   : > { %v4296_v23 = vpop.f32.mrb[242].mxu1 }
0x109a   : > { %v6048_v25 = vpop.f32.mrb[243].mxu1 }
0x109b   : > { %v6502_v25 = vld [vmem:[%s6626_s30 + $0x80] sm:$0xff] }
0x109f   : > { %5266 = vmatpush3.bf16.xpose.msra.mxu0 %v9905_v39 }
0x10a0   : > { %5267 = vmatprep.subr.bf16.mxu0 %v9906_v42 }
0x10a7   : > { %5268 = vmatpush3.bf16.xpose.msra.mxu0 %v9907_v6 }
0x10a8   : > { %5269 = vmatprep.subr.bf16.mxu0 %v9908_v53  ;;  %v6503_v53 = vld [vmem:[%s6626_s30 + $0x88] sm:$0xff] }
0x10af   : > { %5270 = vmatpush3.bf16.xpose.msra.mxu0 %v9909_v18 }
0x110f   : > { %v4301_v11 = vpop.f32.mrb[244].mxu1 }
0x1110   : > { %v6051_v7 = vpop.f32.mrb[245].mxu1 }
0x1111   : > { %v4304_v21 = vpop.f32.mrb[246].mxu1 }
0x1112   : > { %v6052_v5 = vpop.f32.mrb[247].mxu1 }
0x1117   : > { %v4309_v51 = vpop.f32.mrb[248].mxu1 }
0x1118   : > { %v6055_v17 = vpop.f32.mrb[249].mxu1 }
0x1119   : > { %v4312_v32 = vpop.f32.mrb[250].mxu1 }
0x111a   : > { %v6056_v12 = vpop.f32.mrb[251].mxu1 }
0x111f   : > { %v4317_v8 = vpop.f32.mrb[252].mxu1 }
0x1120   : > { %v6059_v49 = vpop.f32.mrb[253].mxu1 }
0x1121   : > { %v4320_v3 = vpop.f32.mrb[254].mxu1 }
0x1122   : > { %v6060_v40 = vpop.f32.mrb[255].mxu1 }
0x1127   : > { %v4325_v41 = vpop.f32.mrb[0].mxu1 }
0x1128   : > { %v6063_v9 = vpop.f32.mrb[1].mxu1 }
0x1129   : > { %v9358_v37 = vpop.f32.mrb[2].mxu1 }
0x112a   : > { %v6064_v47 = vpop.f32.mrb[3].mxu1 }
0x1149   : > { %v4205_v38 = vpop.f32.mrb[240].mxu0 }
0x114a   : > { %v4294_v50 = vadd.f32 %v4293_v24, %v4205_v38  ;;  %v6019_v57 = vpop.f32.mrb[241].mxu0 }
0x114b   : > { %v4208_v56 = vpop.f32.mrb[242].mxu0 }
0x114c   : > { %v4332_v31 = vadd.f32 %v6495_v61, %v4294_v50  ;;  %v4297_v52 = vadd.f32 %v4296_v23, %v4208_v56  ;;  %v6020_v62 = vpop.f32.mrb[243].mxu0 }
0x114e   : > { %v4333_v46 = vadd.f32 %v6496_v33, %v4297_v52  ;;  %v9365_v29 = vadd.f32 %v6497_v28, %v4332_v31 }
0x1150   : > { %4352 = vadd.xlane.f32.xlu0 %v9365_v29  ;;  %v9368_v58 = vadd.f32 %v6497_v28, %v4333_v46 }
0x1151   : > { %v4213_v34 = vpop.f32.mrb[244].mxu0 }
0x1152   : > { %v4302_v16 = vadd.f32 %v4301_v11, %v4213_v34  ;;  %v6023_v13 = vpop.f32.mrb[245].mxu0  ;;  %4354 = vadd.xlane.f32.xlu1 %v9368_v58 }
0x1153   : > { %v4216_v54 = vpop.f32.mrb[246].mxu0 }
0x1154   : > { %v4334_v19 = vadd.f32 %v6498_v45, %v4302_v16  ;;  %v4305_v36 = vadd.f32 %v4304_v21, %v4216_v54  ;;  %v6024_v63 = vpop.f32.mrb[247].mxu0 }
0x1156   : > { %v4335_v30 = vadd.f32 %v6499_v43, %v4305_v36  ;;  %v9373_v10 = vadd.f32 %v6497_v28, %v4334_v19 }
0x1158   : > { %4356 = vadd.xlane.f32.xlu0 %v9373_v10  ;;  %v9376_v20 = vadd.f32 %v6497_v28, %v4335_v30 }
0x1159   : > { %v4221_v35 = vpop.f32.mrb[248].mxu0 }
0x115a   : > { %v4310_v14 = vadd.f32 %v4309_v51, %v4221_v35  ;;  %v6027_v4 = vpop.f32.mrb[249].mxu0  ;;  %4358 = vadd.xlane.f32.xlu1 %v9376_v20 }
0x115b   : > { %v4224_v55 = vpop.f32.mrb[250].mxu0 }
0x115c   : > { %v4336_v0 = vadd.f32 %v6500_v59, %v4310_v14  ;;  %v4313_v26 = vadd.f32 %v4312_v32, %v4224_v55  ;;  %v6028_v15 = vpop.f32.mrb[251].mxu0  ;;  %v6504_v32 = vld [vmem:[%s6626_s30 + $0x90] sm:$0xff] }
0x115e   : > { %v4337_v44 = vadd.f32 %v6501_v60, %v4313_v26  ;;  %v9381_v1 = vadd.f32 %v6497_v28, %v4336_v0 }
0x1160   : > { %4360 = vadd.xlane.f32.xlu0 %v9381_v1  ;;  %v9384_v24 = vadd.f32 %v6497_v28, %v4337_v44 }
0x1161   : > { %v4229_v48 = vpop.f32.mrb[252].mxu0 }
0x1162   : > { %v4318_v2 = vadd.f32 %v4317_v8, %v4229_v48  ;;  %v6031_v22 = vpop.f32.mrb[253].mxu0  ;;  %4362 = vadd.xlane.f32.xlu1 %v9384_v24 }
0x1163   : > { %v4232_v23 = vpop.f32.mrb[254].mxu0 }
0x1164   : > { %v4338_v39 = vadd.f32 %v6502_v25, %v4318_v2  ;;  %v4321_v42 = vadd.f32 %v4320_v3, %v4232_v23  ;;  %v6032_v6 = vpop.f32.mrb[255].mxu0  ;;  %v6505_v3 = vld [vmem:[%s6626_s30 + $0x98] sm:$0x1f] }
0x1166   : > { %v4339_v18 = vadd.f32 %v6503_v53, %v4321_v42  ;;  %v9389_v11 = vadd.f32 %v6497_v28, %v4338_v39 }
0x1168   : > { %4364 = vadd.xlane.f32.xlu0 %v9389_v11  ;;  %v9392_v7 = vadd.f32 %v6497_v28, %v4339_v18 }
0x1169   : > { %v4237_v21 = vpop.f32.mrb[0].mxu0 }
0x116a   : > { %v4326_v5 = vadd.f32 %v4325_v41, %v4237_v21  ;;  %v6035_v51 = vpop.f32.mrb[1].mxu0  ;;  %4366 = vadd.xlane.f32.xlu1 %v9392_v7 }
0x116b   : > { %v4240_v17 = vpop.f32.mrb[2].mxu0 }
0x116c   : > { %v4340_v12 = vadd.f32 %v6504_v32, %v4326_v5  ;;  %v4329_v8 = vadd.f32 %v9358_v37, %v4240_v17  ;;  %v6036_v49 = vpop.f32.mrb[3].mxu0 }
0x116e   : > { %v4341_v40 = vadd.f32 %v6505_v3, %v4329_v8  ;;  %v9398_v9 = vadd.f32 %v6497_v28, %v4340_v12 }
0x1170   : > { %v9400_v47 = vadd.f32 %v6497_v28, %v4341_v40  ;;  %4368 = vadd.xlane.f32.xlu1 %v9398_v9 }
0x1172   : > { %v4370_v41 = vsel %vm886_vm0, %v9400_v47, 0.0 }
0x1173   : > { %4371 = vadd.xlane.f32.xlu0 %v4370_v41 }
0x11dd   : > { %v4353_v38 = vpop.xlane.xlu0 %4352 }
0x11de   : > { %v4373_v50 = vmul.f32 0.0078125, %v4353_v38 }
0x11df   : > { %v4355_v57 = vpop.xlane.xlu1 %4354 }
0x11e0   : > { %v9406_v56 = vsub.f32 %v9365_v29, %v4373_v50  ;;  %v4374_v37 = vmul.f32 0.0078125, %v4355_v57 }
0x11e2   : > { %v9409_v61 = vsub.f32 %v9368_v58, %v4374_v37  ;;  %v4393_v31 = vmul.f32 %v9406_v56, %v9406_v56 }
0x11e4   : > { %4403 = vadd.xlane.f32.xlu0 %v4393_v31  ;;  %v4394_v52 = vmul.f32 %v9409_v61, %v9409_v61 }
0x11e5   : > { %v4357_v62 = vpop.xlane.xlu0 %4356 }
0x11e6   : > { %v4375_v33 = vmul.f32 0.0078125, %v4357_v62  ;;  %4405 = vadd.xlane.f32.xlu1 %v4394_v52 }
0x11e7   : > { %v4359_v46 = vpop.xlane.xlu1 %4358 }
0x11e8   : > { %v9416_v28 = vsub.f32 %v9373_v10, %v4375_v33  ;;  %v4376_v34 = vmul.f32 0.0078125, %v4359_v46  ;;  %v9461_v33 = vld [vmem:[%s9633_s11] ss:$0 sm:$0xff] }
0x11ea   : > { %v9419_v16 = vsub.f32 %v9376_v20, %v4376_v34  ;;  %v4395_v13 = vmul.f32 %v9416_v28, %v9416_v28 }
0x11ec   : > { %4407 = vadd.xlane.f32.xlu0 %v4395_v13  ;;  %v4396_v54 = vmul.f32 %v9419_v16, %v9419_v16 }
0x11ed   : > { %v4361_v45 = vpop.xlane.xlu0 %4360 }
0x11ee   : > { %v4377_v19 = vmul.f32 0.0078125, %v4361_v45  ;;  %4409 = vadd.xlane.f32.xlu1 %v4396_v54 }
0x11ef   : > { %v4363_v36 = vpop.xlane.xlu1 %4362 }
0x11f0   : > { %v9426_v63 = vsub.f32 %v9381_v1, %v4377_v19  ;;  %v4378_v43 = vmul.f32 0.0078125, %v4363_v36 }
0x11f2   : > { %v9429_v30 = vsub.f32 %v9384_v24, %v4378_v43  ;;  %v4397_v35 = vmul.f32 %v9426_v63, %v9426_v63 }
0x11f4   : > { %4411 = vadd.xlane.f32.xlu0 %v4397_v35  ;;  %v4398_v14 = vmul.f32 %v9429_v30, %v9429_v30 }
0x11f5   : > { %v4365_v4 = vpop.xlane.xlu0 %4364 }
0x11f6   : > { %v4379_v55 = vmul.f32 0.0078125, %v4365_v4  ;;  %4413 = vadd.xlane.f32.xlu1 %v4398_v14 }
0x11f7   : > { %v4367_v59 = vpop.xlane.xlu1 %4366 }
0x11f8   : > { %v9436_v0 = vsub.f32 %v9389_v11, %v4379_v55  ;;  %v4380_v26 = vmul.f32 0.0078125, %v4367_v59 }
0x11fa   : > { %v9439_v15 = vsub.f32 %v9392_v7, %v4380_v26  ;;  %v4399_v60 = vmul.f32 %v9436_v0, %v9436_v0 }
0x11fc   : > { %4415 = vadd.xlane.f32.xlu0 %v4399_v60  ;;  %v4400_v44 = vmul.f32 %v9439_v15, %v9439_v15 }
0x11fd   : > { %v4369_v48 = vpop.xlane.xlu1 %4368 }
0x11fe   : > { %v4381_v2 = vmul.f32 0.0078125, %v4369_v48  ;;  %4417 = vadd.xlane.f32.xlu1 %v4400_v44 }
0x1200   : > { %v9446_v22 = vsub.f32 %v9398_v9, %v4381_v2  ;;  %v4372_v23 = vpop.xlane.xlu0 %4371 }
0x1201   : > { %v4382_v25 = vmul.f32 0.0078125, %v4372_v23 }
0x1202   : > { %v4401_v39 = vmul.f32 %v9446_v22, %v9446_v22 }
0x1203   : > { %v9451_v42 = vsub.f32 %v9400_v47, %v4382_v25 }
0x1204   : > { %4419 = vadd.xlane.f32.xlu0 %v4401_v39 }
0x1205   : > { %v4402_v6 = vmul.f32 %v9451_v42, %v9451_v42 }
0x1207   : > { %v4421_v53 = vsel %vm886_vm0, %v4402_v6, 0.0 }
0x1208   : > { %4422 = vadd.xlane.f32.xlu1 %v4421_v53 }
0x1271   : > { %v4404_v18 = vpop.xlane.xlu0 %4403 }
0x1272   : > { %v4424_v21 = vmul.f32 0.0078125, %v4404_v18 }
0x1273   : > { %v4406_v5 = vpop.xlane.xlu1 %4405 }
0x1274   : > { %v4434_v51 = vadd.f32 1e-05, %v4424_v21  ;;  %v4425_v17 = vmul.f32 0.0078125, %v4406_v5 }
0x1276   : > { %6377 = vrsqrt.f32 %v4434_v51  ;;  %v4435_v32 = vadd.f32 1e-05, %v4425_v17 }
0x1278   : > { %6379 = vrsqrt.f32 %v4435_v32 }
0x1279   : > { %v4408_v12 = vpop.xlane.xlu0 %4407 }
0x127a   : > { %v4426_v8 = vmul.f32 0.0078125, %v4408_v12 }
0x127b   : > { %v4410_v49 = vpop.xlane.xlu1 %4409 }
0x127c   : > { %v4436_v3 = vadd.f32 1e-05, %v4426_v8  ;;  %v4427_v40 = vmul.f32 0.0078125, %v4410_v49 }
0x127e   : > { %6381 = vrsqrt.f32 %v4436_v3  ;;  %v4437_v41 = vadd.f32 1e-05, %v4427_v40 }
0x1280   : > { %v6378_v38 = vpop.eup %6377  ;;  %6383 = vrsqrt.f32 %v4437_v41 }
0x1281   : > { %v4412_v50 = vpop.xlane.xlu0 %4411  ;;  %v4454_v57 = vmul.f32 %v6378_v38, %v9406_v56  ;;  %v9468_v56 = vld [vmem:[%s9634_s12] ss:$0 sm:$0xff] }
0x1282   : > { %v6380_v37 = vpop.eup %6379  ;;  %v4428_v31 = vmul.f32 0.0078125, %v4412_v50 }
0x1283   : > { %v4414_v52 = vpop.xlane.xlu1 %4413  ;;  %v4455_v62 = vmul.f32 %v6380_v37, %v9409_v61  ;;  %v4464_v46 = vmul.f32 %v9461_v33, %v4454_v57 }
0x1284   : > { %v4438_v34 = vadd.f32 1e-05, %v4428_v31  ;;  %v4429_v13 = vmul.f32 0.0078125, %v4414_v52 }
0x1285   : > { %v4465_v54 = vmul.f32 %v9461_v33, %v4455_v62  ;;  %v4474_v61 = vadd.f32 %v9468_v56, %v4464_v46 }
0x1286   : > { %6385 = vrsqrt.f32 %v4438_v34  ;;  %v4439_v45 = vadd.f32 1e-05, %v4429_v13 }
0x1287   : > { %v4475_v19 = vadd.f32 %v9468_v56, %v4465_v54 }
0x1288   : > { %v6382_v36 = vpop.eup %6381  ;;  %6387 = vrsqrt.f32 %v4439_v45 }
0x1289   : > { %v4416_v43 = vpop.xlane.xlu0 %4415  ;;  %v4484_v35 = vpack.c.bf16 %v4475_v19, %v4474_v61  ;;  %v4456_v14 = vmul.f32 %v6382_v36, %v9416_v28 }
0x128a   : > { %v6384_v4 = vpop.eup %6383  ;;  %v4430_v55 = vmul.f32 0.0078125, %v4416_v43 }
0x128b   : > { %v4418_v59 = vpop.xlane.xlu1 %4417  ;;  %5271 = vmatprep.mubr.bf16.mxu0 %v4484_v35  ;;  %v4457_v26 = vmul.f32 %v6384_v4, %v9419_v16  ;;  %v4466_v60 = vmul.f32 %v9461_v33, %v4456_v14 }
0x128c   : > { %v4440_v44 = vadd.f32 1e-05, %v4430_v55  ;;  %v4431_v48 = vmul.f32 0.0078125, %v4418_v59  ;;  %5272 = vmatmul.mubr.bf16.vlgmr.msra.gmra.mrb[4].mxu0 %v4484_v35  ;;  %v9910_v35 = vld [vmem:[#allocation13_spill] sm:$0xff] }
0x128d   : > { %v4467_v2 = vmul.f32 %v9461_v33, %v4457_v26  ;;  %v4476_v25 = vadd.f32 %v9468_v56, %v4466_v60 }
0x128e   : > { %6389 = vrsqrt.f32 %v4440_v44  ;;  %v4441_v23 = vadd.f32 1e-05, %v4431_v48 }
0x128f   : > { %v4477_v39 = vadd.f32 %v9468_v56, %v4467_v2 }
0x1290   : > { %v6386_v28 = vpop.eup %6385  ;;  %6391 = vrsqrt.f32 %v4441_v23 }
0x1291   : > { %v4420_v6 = vpop.xlane.xlu0 %4419  ;;  %v4485_v53 = vpack.c.bf16 %v4477_v39, %v4476_v25  ;;  %v4458_v18 = vmul.f32 %v6386_v28, %v9426_v63 }
0x1292   : > { %v6388_v16 = vpop.eup %6387  ;;  %v4432_v21 = vmul.f32 0.0078125, %v4420_v6 }
0x1293   : > { %5273 = vmatprep.mubr.bf16.mxu0 %v4485_v53  ;;  %v4459_v5 = vmul.f32 %v6388_v16, %v9429_v30  ;;  %v4468_v51 = vmul.f32 %v9461_v33, %v4458_v18 }
0x1294   : > { %v4442_v17 = vadd.f32 1e-05, %v4432_v21  ;;  %5274 = vmatmul.mubr.bf16.gmra.mrb[8].mxu0 %v4485_v53 }
0x1295   : > { %v4423_v32 = vpop.xlane.xlu1 %4422  ;;  %v4469_v12 = vmul.f32 %v9461_v33, %v4459_v5  ;;  %v4478_v49 = vadd.f32 %v9468_v56, %v4468_v51 }
0x1296   : > { %6393 = vrsqrt.f32 %v4442_v17  ;;  %v4433_v8 = vmul.f32 0.0078125, %v4423_v32 }
0x1297   : > { %v4479_v3 = vadd.f32 %v9468_v56, %v4469_v12 }
0x1298   : > { %v6390_v40 = vpop.eup %6389  ;;  %v4443_v63 = vadd.f32 1e-05, %v4433_v8 }
0x1299   : > { %v4486_v41 = vpack.c.bf16 %v4479_v3, %v4478_v49  ;;  %v4460_v38 = vmul.f32 %v6390_v40, %v9436_v0 }
0x129a   : > { %v6392_v50 = vpop.eup %6391  ;;  %6395 = vrsqrt.f32 %v4443_v63 }
0x129b   : > { %5275 = vmatprep.mubr.bf16.mxu0 %v4486_v41  ;;  %v4461_v30 = vmul.f32 %v6392_v50, %v9439_v15  ;;  %v4470_v57 = vmul.f32 %v9461_v33, %v4460_v38 }
0x129c   : > { %5276 = vmatmul.mubr.bf16.gmra.mrb[12].mxu0 %v4486_v41 }
0x129d   : > { %v4471_v37 = vmul.f32 %v9461_v33, %v4461_v30  ;;  %v4480_v31 = vadd.f32 %v9468_v56, %v4470_v57 }
0x129f   : > { %v4481_v52 = vadd.f32 %v9468_v56, %v4471_v37 }
0x12a0   : > { %v6394_v62 = vpop.eup %6393 }
0x12a1   : > { %v4487_v46 = vpack.c.bf16 %v4481_v52, %v4480_v31  ;;  %v4462_v34 = vmul.f32 %v6394_v62, %v9446_v22 }
0x12a3   : > { %5277 = vmatprep.mubr.bf16.mxu0 %v4487_v46  ;;  %v4472_v15 = vmul.f32 %v9461_v33, %v4462_v34 }
0x12a4   : > { %v6396_v0 = vpop.eup %6395  ;;  %5278 = vmatmul.mubr.bf16.gmra.mrb[16].mxu0 %v4487_v46 }
0x12a5   : > { %v4463_v13 = vmul.f32 %v6396_v0, %v9451_v42  ;;  %v4482_v45 = vadd.f32 %v9468_v56, %v4472_v15 }
0x12a7   : > { %v4473_v54 = vmul.f32 %v9461_v33, %v4463_v13 }
0x12a9   : > { %v4483_v61 = vadd.f32 %v9468_v56, %v4473_v54 }
0x12ab   : > { %v4488_v19 = vpack.c.bf16 %v4483_v61, %v4482_v45 }
0x12ad   : > { %5279 = vmatprep.mubr.bf16.mxu0 %v4488_v19 }
0x12ae   : > { %5280 = vmatmul.mubr.bf16.gmra.mrb[20].mxu0 %v4488_v19 }
0x135f   : > { %v4523_v36 = vpop.f32.mrb[4].mxu0 }
0x1360   : > { %v9497_v43 = vadd.f32 %v4523_v36, %v8559_v27  ;;  %v4525_v22 = vpop.f32.mrb[5].mxu0 }
0x1361   : > { %v9500_v14 = vadd.f32 %v4525_v22, %v9910_v35  ;;  %v4527_v42 = vpop.f32.mrb[6].mxu0 }
0x1362   : > { %v4572_v4 = vmul.f32 -1.702, %v9497_v43  ;;  %v9504_v33 = vadd.f32 %v4527_v42, %v8559_v27  ;;  %v4529_v55 = vpop.f32.mrb[7].mxu0 }
0x1363   : > { %v4573_v56 = vmul.f32 -1.702, %v9500_v14  ;;  %v9508_v59 = vadd.f32 %v4529_v55, %v9910_v35 }
0x1364   : > { %v4592_v26 = vmul.f32 1.442695, %v4572_v4  ;;  %v4574_v60 = vmul.f32 -1.702, %v9504_v33 }
0x1365   : > { %v4594_v44 = vmul.f32 1.442695, %v4573_v56  ;;  %v4575_v48 = vmul.f32 -1.702, %v9508_v59 }
0x1366   : > { %6397 = vpow2.f32 %v4592_v26  ;;  %v4596_v2 = vmul.f32 1.442695, %v4574_v60 }
0x1367   : > { %6399 = vpow2.f32 %v4594_v44  ;;  %v4598_v23 = vmul.f32 1.442695, %v4575_v48  ;;  %v4533_v25 = vpop.f32.mrb[8].mxu0 }
0x1368   : > { %6401 = vpow2.f32 %v4596_v2  ;;  %v9513_v39 = vadd.f32 %v4533_v25, %v8559_v27  ;;  %v4535_v28 = vpop.f32.mrb[9].mxu0 }
0x1369   : > { %6403 = vpow2.f32 %v4598_v23  ;;  %v9516_v6 = vadd.f32 %v4535_v28, %v9910_v35  ;;  %v4537_v53 = vpop.f32.mrb[10].mxu0 }
0x136a   : > { %v4576_v18 = vmul.f32 -1.702, %v9513_v39  ;;  %v9520_v16 = vadd.f32 %v4537_v53, %v8559_v27  ;;  %v4539_v21 = vpop.f32.mrb[11].mxu0 }
0x136b   : > { %v4577_v5 = vmul.f32 -1.702, %v9516_v6  ;;  %v9524_v51 = vadd.f32 %v4539_v21, %v9910_v35 }
0x136c   : > { %v4600_v17 = vmul.f32 1.442695, %v4576_v18  ;;  %v4578_v32 = vmul.f32 -1.702, %v9520_v16 }
0x136d   : > { %v4602_v12 = vmul.f32 1.442695, %v4577_v5  ;;  %v4579_v8 = vmul.f32 -1.702, %v9524_v51 }
0x136e   : > { %6405 = vpow2.f32 %v4600_v17  ;;  %v4604_v49 = vmul.f32 1.442695, %v4578_v32 }
0x136f   : > { %6407 = vpow2.f32 %v4602_v12  ;;  %v4606_v3 = vmul.f32 1.442695, %v4579_v8  ;;  %v4543_v40 = vpop.f32.mrb[12].mxu0 }
0x1370   : > { %v6398_v63 = vpop.eup %6397  ;;  %6409 = vpow2.f32 %v4604_v49  ;;  %v9529_v41 = vadd.f32 %v4543_v40, %v8559_v27  ;;  %v4545_v38 = vpop.f32.mrb[13].mxu0 }
0x1371   : > { %v6400_v50 = vpop.eup %6399  ;;  %v4632_v30 = vadd.f32 1.0, %v6398_v63  ;;  %6411 = vpow2.f32 %v4606_v3  ;;  %v9532_v57 = vadd.f32 %v4545_v38, %v9910_v35  ;;  %v4547_v37 = vpop.f32.mrb[14].mxu0 }
0x1372   : > { %v6402_v31 = vpop.eup %6401  ;;  %v4633_v52 = vadd.f32 1.0, %v6400_v50  ;;  %v4580_v62 = vmul.f32 -1.702, %v9529_v41  ;;  %v9536_v46 = vadd.f32 %v4547_v37, %v8559_v27  ;;  %v4549_v34 = vpop.f32.mrb[15].mxu0 }
0x1373   : > { %v6404_v0 = vpop.eup %6403  ;;  %6413 = vrcp.f32 %v4632_v30  ;;  %v4634_v13 = vadd.f32 1.0, %v6402_v31  ;;  %v4581_v15 = vmul.f32 -1.702, %v9532_v57  ;;  %v9540_v54 = vadd.f32 %v4549_v34, %v9910_v35 }
0x1374   : > { %6415 = vrcp.f32 %v4633_v52  ;;  %v4635_v45 = vadd.f32 1.0, %v6404_v0  ;;  %v4608_v61 = vmul.f32 1.442695, %v4580_v62  ;;  %v4582_v19 = vmul.f32 -1.702, %v9536_v46 }
0x1375   : > { %6417 = vrcp.f32 %v4634_v13  ;;  %v4610_v36 = vmul.f32 1.442695, %v4581_v15  ;;  %v4583_v22 = vmul.f32 -1.702, %v9540_v54 }
0x1376   : > { %6419 = vrcp.f32 %v4635_v45  ;;  %v4612_v42 = vmul.f32 1.442695, %v4582_v19 }
0x1377   : > { %6421 = vpow2.f32 %v4608_v61  ;;  %v4614_v4 = vmul.f32 1.442695, %v4583_v22  ;;  %v4553_v55 = vpop.f32.mrb[16].mxu0 }
0x1378   : > { %v6406_v56 = vpop.eup %6405  ;;  %6423 = vpow2.f32 %v4610_v36  ;;  %v9545_v26 = vadd.f32 %v4553_v55, %v8559_v27  ;;  %v4555_v60 = vpop.f32.mrb[17].mxu0 }
0x1379   : > { %v6408_v44 = vpop.eup %6407  ;;  %v4636_v48 = vadd.f32 1.0, %v6406_v56  ;;  %6425 = vpow2.f32 %v4612_v42  ;;  %v9548_v2 = vadd.f32 %v4555_v60, %v9910_v35  ;;  %v4557_v23 = vpop.f32.mrb[18].mxu0 }
0x137a   : > { %v6410_v25 = vpop.eup %6409  ;;  %v4637_v28 = vadd.f32 1.0, %v6408_v44  ;;  %6427 = vpow2.f32 %v4614_v4  ;;  %v4584_v53 = vmul.f32 -1.702, %v9545_v26  ;;  %v9552_v18 = vadd.f32 %v4557_v23, %v8559_v27  ;;  %v4559_v21 = vpop.f32.mrb[19].mxu0 }
0x137b   : > { %v6412_v5 = vpop.eup %6411  ;;  %6429 = vrcp.f32 %v4636_v48  ;;  %v4638_v17 = vadd.f32 1.0, %v6410_v25  ;;  %v4585_v32 = vmul.f32 -1.702, %v9548_v2  ;;  %v9556_v12 = vadd.f32 %v4559_v21, %v9910_v35 }
0x137c   : > { %6431 = vrcp.f32 %v4637_v28  ;;  %v4639_v8 = vadd.f32 1.0, %v6412_v5  ;;  %v4616_v49 = vmul.f32 1.442695, %v4584_v53  ;;  %v4586_v3 = vmul.f32 -1.702, %v9552_v18 }
0x137d   : > { %v6414_v40 = vpop.eup %6413  ;;  %6433 = vrcp.f32 %v4638_v17  ;;  %v4618_v63 = vmul.f32 1.442695, %v4585_v32  ;;  %v4587_v38 = vmul.f32 -1.702, %v9556_v12 }
0x137e   : > { %v6416_v50 = vpop.eup %6415  ;;  %6435 = vrcp.f32 %v4639_v8  ;;  %v4620_v30 = vmul.f32 1.442695, %v4586_v3  ;;  %v4653_v62 = vmul.f32 %v6414_v40, %v9497_v43 }
0x137f   : > { %v6418_v37 = vpop.eup %6417  ;;  %6437 = vpow2.f32 %v4616_v49  ;;  %v4622_v31 = vmul.f32 1.442695, %v4587_v38  ;;  %v4655_v13 = vmul.f32 %v6416_v50, %v9500_v14 }
0x1380   : > { %v6420_v52 = vpop.eup %6419  ;;  %v4657_v34 = vmul.f32 %v6418_v37, %v9504_v33  ;;  %6439 = vpow2.f32 %v4618_v63 }
0x1381   : > { %v6422_v0 = vpop.eup %6421  ;;  %v4659_v15 = vmul.f32 %v6420_v52, %v9508_v59  ;;  %6441 = vpow2.f32 %v4620_v30  ;;  %v4563_v45 = vpop.f32.mrb[20].mxu0 }
0x1382   : > { %v6424_v61 = vpop.eup %6423  ;;  %v4692_v19 = vpack.c.bf16 %v4657_v34, %v4653_v62  ;;  %v4640_v36 = vadd.f32 1.0, %v6422_v0  ;;  %6443 = vpow2.f32 %v4622_v31  ;;  %v9565_v22 = vadd.f32 %v4563_v45, %v8559_v27  ;;  %v4565_v42 = vpop.f32.mrb[21].mxu0 }
0x1383   : > { %v6426_v4 = vpop.eup %6425  ;;  %v4641_v43 = vadd.f32 1.0, %v6424_v61  ;;  %v9568_v33 = vadd.f32 %v4565_v42, %v9910_v35  ;;  %v4567_v55 = vpop.f32.mrb[22].mxu0  ;;  %v4693_v56 = vpack.c.bf16 %v4659_v15, %v4655_v13 }
0x1384   : > { %v6428_v14 = vpop.eup %6427  ;;  %6445 = vrcp.f32 %v4640_v36  ;;  %v4642_v59 = vadd.f32 1.0, %v6426_v4  ;;  %v4588_v60 = vmul.f32 -1.702, %v9565_v22  ;;  %v9572_v44 = vadd.f32 %v4567_v55, %v8559_v27  ;;  %v4569_v48 = vpop.f32.mrb[23].mxu0 }
0x1385   : > { %v6430_v23 = vpop.eup %6429  ;;  %6447 = vrcp.f32 %v4641_v43  ;;  %v4643_v25 = vadd.f32 1.0, %v6428_v14  ;;  %v4589_v28 = vmul.f32 -1.702, %v9568_v33  ;;  %v9576_v53 = vadd.f32 %v4569_v48, %v9910_v35  ;;  %4734 = vmatprep.mubr.bf16.mxu1 %v4693_v56 }
0x1386   : > { %v6432_v21 = vpop.eup %6431  ;;  %6449 = vrcp.f32 %v4642_v59  ;;  %v4624_v5 = vmul.f32 1.442695, %v4588_v60  ;;  %v4590_v17 = vmul.f32 -1.702, %v9572_v44  ;;  %4735 = vmatmul.mubr.bf16.vlgmr.msra.gmra.mrb[4].mxu1 %v4692_v19  ;;  %v4661_v3 = vmul.f32 %v6430_v23, %v9513_v39 }
0x1387   : > { %v6434_v32 = vpop.eup %6433  ;;  %6451 = vrcp.f32 %v4643_v25  ;;  %v4626_v27 = vmul.f32 1.442695, %v4589_v28  ;;  %v4591_v8 = vmul.f32 -1.702, %v9576_v53  ;;  %v4663_v38 = vmul.f32 %v6432_v21, %v9516_v6 }
0x1388   : > { %v6436_v49 = vpop.eup %6435  ;;  %v4665_v40 = vmul.f32 %v6434_v32, %v9520_v16  ;;  %6453 = vpow2.f32 %v4624_v5  ;;  %v4628_v35 = vmul.f32 1.442695, %v4590_v17 }
0x1389   : > { %v6438_v63 = vpop.eup %6437  ;;  %v4667_v50 = vmul.f32 %v6436_v49, %v9524_v51  ;;  %6455 = vpow2.f32 %v4626_v27  ;;  %v4630_v30 = vmul.f32 1.442695, %v4591_v8 }
0x138a   : > { %v6440_v37 = vpop.eup %6439  ;;  %v4694_v31 = vpack.c.bf16 %v4665_v40, %v4661_v3  ;;  %v4644_v52 = vadd.f32 1.0, %v6438_v63  ;;  %6457 = vpow2.f32 %v4628_v35 }
0x138b   : > { %v6442_v62 = vpop.eup %6441  ;;  %v4645_v34 = vadd.f32 1.0, %v6440_v37  ;;  %6459 = vpow2.f32 %v4630_v30  ;;  %v4695_v0 = vpack.c.bf16 %v4667_v50, %v4663_v38  ;;  %v6508_v50 = vld [vmem:[%s9638_s16] ss:$0 sm:$0xff] }
0x138c   : > { %v6444_v39 = vpop.eup %6443  ;;  %6461 = vrcp.f32 %v4644_v52  ;;  %v4646_v16 = vadd.f32 1.0, %v6442_v62 }
0x138d   : > { %6463 = vrcp.f32 %v4645_v34  ;;  %v4647_v13 = vadd.f32 1.0, %v6444_v39  ;;  %4742 = vmatprep.mubr.bf16.mxu1 %v4695_v0 }
0x138e   : > { %v6446_v15 = vpop.eup %6445  ;;  %6465 = vrcp.f32 %v4646_v16  ;;  %4743 = vmatmul.mubr.bf16.gmra.mrb[8].mxu1 %v4694_v31 }
0x138f   : > { %v6448_v6 = vpop.eup %6447  ;;  %6467 = vrcp.f32 %v4647_v13  ;;  %v4669_v61 = vmul.f32 %v6446_v15, %v9529_v41 }
0x1390   : > { %v6450_v51 = vpop.eup %6449  ;;  %v4671_v42 = vmul.f32 %v6448_v6, %v9532_v57 }
0x1391   : > { %v6452_v45 = vpop.eup %6451  ;;  %v4673_v19 = vmul.f32 %v6450_v51, %v9536_v46 }
0x1392   : > { %v6454_v36 = vpop.eup %6453  ;;  %v4675_v4 = vmul.f32 %v6452_v45, %v9540_v54 }
0x1393   : > { %v6456_v43 = vpop.eup %6455  ;;  %v4696_v55 = vpack.c.bf16 %v4673_v19, %v4669_v61  ;;  %v4648_v56 = vadd.f32 1.0, %v6454_v36 }
0x1394   : > { %v6458_v14 = vpop.eup %6457  ;;  %v4649_v59 = vadd.f32 1.0, %v6456_v43  ;;  %v4697_v60 = vpack.c.bf16 %v4675_v4, %v4671_v42 }
0x1395   : > { %v6460_v48 = vpop.eup %6459  ;;  %6469 = vrcp.f32 %v4648_v56  ;;  %v4650_v23 = vadd.f32 1.0, %v6458_v14 }
0x1396   : > { %v6462_v25 = vpop.eup %6461  ;;  %6471 = vrcp.f32 %v4649_v59  ;;  %v4651_v28 = vadd.f32 1.0, %v6460_v48  ;;  %4750 = vmatprep.mubr.bf16.mxu1 %v4697_v60 }
0x1397   : > { %v6464_v41 = vpop.eup %6463  ;;  %6473 = vrcp.f32 %v4650_v23  ;;  %4751 = vmatmul.mubr.bf16.gmra.mrb[12].mxu1 %v4696_v55  ;;  %v4677_v54 = vmul.f32 %v6462_v25, %v9545_v26 }
0x1398   : > { %v6466_v46 = vpop.eup %6465  ;;  %6475 = vrcp.f32 %v4651_v28  ;;  %v4679_v5 = vmul.f32 %v6464_v41, %v9548_v2 }
0x1399   : > { %v6468_v57 = vpop.eup %6467  ;;  %v4681_v21 = vmul.f32 %v6466_v46, %v9552_v18 }
0x139a   : > { %v4683_v17 = vmul.f32 %v6468_v57, %v9556_v12 }
0x139b   : > { %v4698_v32 = vpack.c.bf16 %v4681_v21, %v4677_v54 }
0x139c   : > { %v4699_v27 = vpack.c.bf16 %v4683_v17, %v4679_v5 }
0x139e   : > { %4758 = vmatprep.mubr.bf16.mxu1 %v4699_v27 }
0x139f   : > { %v6470_v8 = vpop.eup %6469  ;;  %4759 = vmatmul.mubr.bf16.gmra.mrb[16].mxu1 %v4698_v32 }
0x13a0   : > { %v6472_v49 = vpop.eup %6471  ;;  %v4685_v35 = vmul.f32 %v6470_v8, %v9565_v22 }
0x13a1   : > { %v6474_v3 = vpop.eup %6473  ;;  %v4687_v26 = vmul.f32 %v6472_v49, %v9568_v33 }
0x13a2   : > { %v6476_v40 = vpop.eup %6475  ;;  %v4689_v63 = vmul.f32 %v6474_v3, %v9572_v44 }
0x13a3   : > { %v4691_v2 = vmul.f32 %v6476_v40, %v9576_v53 }
0x13a4   : > { %v4700_v18 = vpack.c.bf16 %v4689_v63, %v4685_v35 }
0x13a5   : > { %v4701_v12 = vpack.c.bf16 %v4691_v2, %v4687_v26 }
0x13a7   : > { %4766 = vmatprep.mubr.bf16.mxu1 %v4701_v12 }
0x13a8   : > { %4767 = vmatmul.mubr.bf16.gmra.mrb[20].mxu1 %v4700_v18 }
0x1459   : > { %v4736_v38 = vpop.f32.mrb[4].mxu1 }
0x145a   : > { %v4737_v30 = vadd.f32 %v6508_v50, %v4736_v38  ;;  %v4738_v22 = vpop.f32.mrb[5].mxu1 }
0x145b   : > { %v4739_v37 = vpop.f32.mrb[6].mxu1 }
0x145c   : > { %v4775_v44 = vadd.f32 %v4737_v30, %v9365_v29  ;;  %v4740_v33 = vadd.f32 %v6508_v50, %v4739_v37  ;;  %v4741_v31 = vpop.f32.mrb[7].mxu1 }
0x145e   : > { %4945 = vst [vmem:[%s8775_s20 + $0x50] sm:$0xff] %v4775_v44  ;;  %v4776_v53 = vadd.f32 %v4740_v33, %v9368_v58 }
0x1460   : > { %4946 = vst [vmem:[%s8775_s20 + $0x58] sm:$0xff] %v4776_v53 }
0x1461   : > { %v4744_v52 = vpop.f32.mrb[8].mxu1 }
0x1462   : > { %v4745_v62 = vadd.f32 %v6508_v50, %v4744_v52  ;;  %v4746_v34 = vpop.f32.mrb[9].mxu1 }
0x1463   : > { %v4747_v0 = vpop.f32.mrb[10].mxu1 }
0x1464   : > { %v4777_v39 = vadd.f32 %v4745_v62, %v9373_v10  ;;  %v4748_v16 = vadd.f32 %v6508_v50, %v4747_v0  ;;  %v4749_v13 = vpop.f32.mrb[11].mxu1 }
0x1466   : > { %4947 = vst [vmem:[%s8775_s20 + $0x60] sm:$0xff] %v4777_v39  ;;  %v4778_v15 = vadd.f32 %v4748_v16, %v9376_v20 }
0x1468   : > { %4948 = vst [vmem:[%s8775_s20 + $0x68] sm:$0xff] %v4778_v15 }
0x146a   : > { %v4752_v29 = vpop.f32.mrb[12].mxu1 }
0x146b   : > { %v4753_v6 = vadd.f32 %v6508_v50, %v4752_v29  ;;  %v4754_v51 = vpop.f32.mrb[13].mxu1 }
0x146c   : > { %v4755_v58 = vpop.f32.mrb[14].mxu1 }
0x146d   : > { %v4779_v45 = vadd.f32 %v4753_v6, %v9381_v1  ;;  %v4756_v61 = vadd.f32 %v6508_v50, %v4755_v58  ;;  %v4757_v19 = vpop.f32.mrb[15].mxu1 }
0x146f   : > { %4949 = vst [vmem:[%s8775_s20 + $0x70] sm:$0xff] %v4779_v45  ;;  %v4780_v36 = vadd.f32 %v4756_v61, %v9384_v24 }
0x1471   : > { %4950 = vst [vmem:[%s8775_s20 + $0x78] sm:$0xff] %v4780_v36 }
0x1472   : > { %v4760_v10 = vpop.f32.mrb[16].mxu1 }
0x1473   : > { %v4761_v42 = vadd.f32 %v6508_v50, %v4760_v10  ;;  %v4762_v4 = vpop.f32.mrb[17].mxu1 }
0x1474   : > { %v4763_v20 = vpop.f32.mrb[18].mxu1 }
0x1475   : > { %v4781_v43 = vadd.f32 %v4761_v42, %v9389_v11  ;;  %v4764_v55 = vadd.f32 %v6508_v50, %v4763_v20  ;;  %v4765_v56 = vpop.f32.mrb[19].mxu1 }
0x1477   : > { %4951 = vst [vmem:[%s8775_s20 + $0x80] sm:$0xff] %v4781_v43  ;;  %v4782_v14 = vadd.f32 %v4764_v55, %v9392_v7 }
0x1479   : > { %4952 = vst [vmem:[%s8775_s20 + $0x88] sm:$0xff] %v4782_v14 }
0x147b   : > { %v4768_v1 = vpop.f32.mrb[20].mxu1 }
0x147c   : > { %v4769_v59 = vadd.f32 %v6508_v50, %v4768_v1  ;;  %v4770_v60 = vpop.f32.mrb[21].mxu1 }
0x147d   : > { %v4771_v48 = vpop.f32.mrb[22].mxu1 }
0x147e   : > { %v4783_v24 = vadd.f32 %v4769_v59, %v9398_v9  ;;  %v4772_v23 = vadd.f32 %v6508_v50, %v4771_v48  ;;  %v4773_v25 = vpop.f32.mrb[23].mxu1 }
0x1480   : > { %4953 = vst [vmem:[%s8775_s20 + $0x90] sm:$0xff] %v4783_v24  ;;  %v4784_v28 = vadd.f32 %v4772_v23, %v9400_v47 }
0x1482   : > { %4954 = vst [vmem:[%s8775_s20 + $0x98] sm:$0x1f] %v4784_v28 }
0x1483 PF: > { %s27_s24 = sadd.s32 1, %s6515_s24  }
0x1484   : > { %p24_p4 = scmp.ge.s32.totalorder %s27_s24, 4  }
0x1486   :  { %26 = sbr.rel (!%p24_p4) target bundleno = 3 (0x3), region = 120 }

</bundles_post_ra>
